<compile_context>
chip_gen: v5e
topology: v5e:2x2
jax: 0.10.0
libtpu: 0.0.40
codegen_flags: <defaults>
</compile_context>

<pallas_src>
import functools
import math

import jax
import jax.numpy as jnp
from jax.experimental import pallas as pl
from jax.experimental.pallas import tpu as pltpu

EPS = 1e-5                      # torch LayerNorm default eps
_INV_SQRT2 = 0.7071067811865476

NN_DIMS = (((1,), (0,)), ((), ()))   # standard matmul
NT_DIMS = (((1,), (1,)), ((), ()))   # rhs-transposed matmul (contract minor dims)


def _exact_gelu(x):
    # matches torch nn.GELU() default (approximate='none')
    return 0.5 * x * (1.0 + jax.lax.erf(x * _INV_SQRT2))


def _layer_norm_cm(a, g, b):
    """LayerNorm over channels of a channel-major (C, N) block (per-token stats)."""
    mean = jnp.mean(a, axis=0, keepdims=True)
    var = jnp.mean((a - mean) ** 2, axis=0, keepdims=True)
    return (a - mean) * jax.lax.rsqrt(var + EPS) * g + b


def _self_attention_kernel(x_ref, ln1_g_ref, ln1_b_ref, w_in_ref, b_in_ref,
                           w_out_ref, b_out_ref, ln2_g_ref, ln2_b_ref,
                           w1_ref, b1_ref, w2_ref, b2_ref, out_ref,
                           *, channels, num_heads):
    C = channels
    d = C // num_heads
    scale = 1.0 / math.sqrt(d)
    f32 = jnp.float32

    x = x_ref[0].astype(f32)                                         # (C, N) tokens-on-lanes

    # ---- LayerNorm #1 (per token, over channels) ----
    x_ln = _layer_norm_cm(x, ln1_g_ref[...].astype(f32), ln1_b_ref[...].astype(f32))

    # ---- fused QKV projection: single MXU matmul, lane-dense (3C, N) output ----
    qkv = jnp.dot(w_in_ref[...].astype(f32), x_ln, preferred_element_type=f32)
    qkv = qkv + b_in_ref[...].astype(f32)                            # (3C, N)

    # Q to token-major once (single small transpose); K/V stay channel-major.
    q_tok = (qkv[0:C, :] * scale).T                                  # (N, C)

    # ---- multi-head attention; (N, N) scores/probs are lane-dense ----
    head_outs = []
    for h in range(num_heads):
        q_h = q_tok[:, h * d:(h + 1) * d]                            # (N, d)
        k_h = qkv[C + h * d:C + (h + 1) * d, :]                      # (d, N)
        v_h = qkv[2 * C + h * d:2 * C + (h + 1) * d, :]              # (d, N)

        s = jax.lax.dot_general(q_h, k_h, NN_DIMS,
                                preferred_element_type=f32)          # (N, N)
        s = s - jnp.max(s, axis=-1, keepdims=True)
        e = jnp.exp(s)
        p = e / jnp.sum(e, axis=-1, keepdims=True)

        # o_h[c, i] = sum_j v_h[c, j] * p[i, j]  -> keeps output channel-major
        head_outs.append(jax.lax.dot_general(v_h, p, NT_DIMS,
                                             preferred_element_type=f32))   # (d, N)
    attn = jnp.concatenate(head_outs, axis=0)                        # (C, N)

    # ---- output projection + residual with un-normalized x ----
    attn_val = jnp.dot(w_out_ref[...].astype(f32), attn, preferred_element_type=f32)
    attn_val = attn_val + b_out_ref[...].astype(f32) + x             # (C, N)

    # ---- feed-forward: LN -> Linear -> GELU -> Linear, plus residual ----
    y = _layer_norm_cm(attn_val, ln2_g_ref[...].astype(f32), ln2_b_ref[...].astype(f32))
    h1 = jnp.dot(w1_ref[...].astype(f32), y, preferred_element_type=f32)
    h1 = _exact_gelu(h1 + b1_ref[...].astype(f32))
    h2 = jnp.dot(w2_ref[...].astype(f32), h1, preferred_element_type=f32)
    h2 = h2 + b2_ref[...].astype(f32)

    out_ref[0] = (h2 + attn_val).astype(out_ref.dtype)               # lane-dense (C, N) store


def self_attention(x_nchw, params, num_heads=4):
    """Pallas SelfAttention. x_nchw: (B, C, H, W) with H == W. Returns (B, C, H, W)."""
    (ln1_g, ln1_b, w_in, b_in, w_out, b_out,
     ln2_g, ln2_b, w1, b1, w2, b2) = params
    B, C, H, W = x_nchw.shape
    assert C % num_heads == 0
    N = H * W

    x = x_nchw.reshape(B, C, N)                  # NCHW flattened; no transpose needed
    col = lambda v: v.reshape(-1, 1)             # biases / affine params as column vectors

    kernel = functools.partial(_self_attention_kernel, channels=C, num_heads=num_heads)
    rep = lambda b: (0, 0)                       # replicated (weight) blocks

    out = pl.pallas_call(
        kernel,
        out_shape=jax.ShapeDtypeStruct((B, C, N), x.dtype),
        grid_spec=pltpu.PrefetchScalarGridSpec(
            num_scalar_prefetch=0,
            grid=(B,),
            in_specs=[
                pl.BlockSpec((1, C, N), lambda b: (b, 0, 0)),   # x
                pl.BlockSpec((C, 1), rep),                      # ln1 gamma
                pl.BlockSpec((C, 1), rep),                      # ln1 beta
                pl.BlockSpec((3 * C, C), rep),                  # in_proj weight (3C, C)
                pl.BlockSpec((3 * C, 1), rep),                  # in_proj bias
                pl.BlockSpec((C, C), rep),                      # out_proj weight
                pl.BlockSpec((C, 1), rep),                      # out_proj bias
                pl.BlockSpec((C, 1), rep),                      # ln2 gamma
                pl.BlockSpec((C, 1), rep),                      # ln2 beta
                pl.BlockSpec((C, C), rep),                      # ff linear1 weight
                pl.BlockSpec((C, 1), rep),                      # ff linear1 bias
                pl.BlockSpec((C, C), rep),                      # ff linear2 weight
                pl.BlockSpec((C, 1), rep),                      # ff linear2 bias
            ],
            out_specs=pl.BlockSpec((1, C, N), lambda b: (b, 0, 0)),
        ),
        compiler_params=pltpu.CompilerParams(dimension_semantics=("parallel",)),
    )(x, col(ln1_g), col(ln1_b), w_in, col(b_in), w_out, col(b_out),
      col(ln2_g), col(ln2_b), w1, col(b1), w2, col(b2))

    return out.reshape(B, C, H, W)


def self_attention_ref(x_nchw, params, num_heads=4):
    """Plain-JAX reference matching the PyTorch module (for validation)."""
    (ln1_g, ln1_b, w_in, b_in, w_out, b_out,
     ln2_g, ln2_b, w1, b1, w2, b2) = params
    B, C, H, W = x_nchw.shape
    N = H * W
    d = C // num_heads
    x = x_nchw.reshape(B, C, N).swapaxes(1, 2).astype(jnp.float32)   # (B, N, C)

    def ln(a, g, b):
        m = jnp.mean(a, axis=-1, keepdims=True)
        v = jnp.mean((a - m) ** 2, axis=-1, keepdims=True)
        return (a - m) * jax.lax.rsqrt(v + EPS) * g + b

    x_ln = ln(x, ln1_g, ln1_b)
    qkv = x_ln @ w_in.T + b_in                                       # (B, N, 3C)
    q, k, v = qkv[..., :C], qkv[..., C:2 * C], qkv[..., 2 * C:]

    def heads(t):
        return t.reshape(B, N, num_heads, d).transpose(0, 2, 1, 3)   # (B, h, N, d)

    q = heads(q) * (1.0 / math.sqrt(d))
    k, v = heads(k), heads(v)
    s = jnp.einsum('bhqd,bhkd->bhqk', q, k)
    p = jax.nn.softmax(s, axis=-1)
    o = jnp.einsum('bhqk,bhkd->bhqd', p, v).transpose(0, 2, 1, 3).reshape(B, N, C)
    attn_val = o @ w_out.T + b_out + x
    y = ln(attn_val, ln2_g, ln2_b)
    ff = _exact_gelu(y @ w1.T + b1) @ w2.T + b2
    out = ff + attn_val
    return out.swapaxes(1, 2).reshape(B, C, H, W)


def make_params(key, channels):
    C = channels
    ks = jax.random.split(key, 10)
    ln1_g = 1.0 + 0.1 * jax.random.normal(ks[0], (C,), jnp.float32)
    ln1_b = 0.05 * jax.random.normal(ks[1], (C,), jnp.float32)
    w_in = 0.2 * jax.random.normal(ks[2], (3 * C, C), jnp.float32)   # packed Wq/Wk/Wv
    b_in = 0.05 * jax.random.normal(ks[3], (3 * C,), jnp.float32)
    w_out = 0.2 * jax.random.normal(ks[4], (C, C), jnp.float32)
    b_out = 0.05 * jax.random.normal(ks[5], (C,), jnp.float32)
    ln2_g = 1.0 + 0.1 * jax.random.normal(ks[6], (C,), jnp.float32)
    ln2_b = 0.05 * jax.random.normal(ks[7], (C,), jnp.float32)
    w1 = 0.2 * jax.random.normal(ks[8], (C, C), jnp.float32)
    b1 = jnp.zeros((C,), jnp.float32)
    w2 = 0.2 * jax.random.normal(ks[9], (C, C), jnp.float32)
    b2 = jnp.zeros((C,), jnp.float32)
    return (ln1_g, ln1_b, w_in, b_in, w_out, b_out, ln2_g, ln2_b, w1, b1, w2, b2)


if __name__ == "__main__":
    key = jax.random.PRNGKey(0)
    kx, kp = jax.random.split(key)

    # batch=2, channels=32 (4 heads -> head_dim 8), spatial 16x16 -> 256 tokens
    B, C, H, W = 2, 32, 16, 16
    x = jax.random.normal(kx, (B, C, H, W), jnp.float32)
    params = make_params(kp, C)

    y = jax.block_until_ready(self_attention(x, params))
    y_ref = jax.block_until_ready(self_attention_ref(x, params))

    assert y.shape == (B, C, H, W)
    assert jnp.allclose(y, y_ref, atol=2e-3, rtol=2e-3), float(jnp.max(jnp.abs(y - y_ref)))

    print("KERNEL_OK")
</pallas_src>

<mosaic_0001>
module attributes {stable_mosaic.version = 11 : i64} {
  func.func @_self_attention_kernel(%arg0: i32, %arg1: memref<1x32x256xf32, #tpu.memory_space<vmem>>, %arg2: memref<32x1xf32, #tpu.memory_space<vmem>>, %arg3: memref<32x1xf32, #tpu.memory_space<vmem>>, %arg4: memref<96x32xf32, #tpu.memory_space<vmem>>, %arg5: memref<96x1xf32, #tpu.memory_space<vmem>>, %arg6: memref<32x32xf32, #tpu.memory_space<vmem>>, %arg7: memref<32x1xf32, #tpu.memory_space<vmem>>, %arg8: memref<32x1xf32, #tpu.memory_space<vmem>>, %arg9: memref<32x1xf32, #tpu.memory_space<vmem>>, %arg10: memref<32x32xf32, #tpu.memory_space<vmem>>, %arg11: memref<32x1xf32, #tpu.memory_space<vmem>>, %arg12: memref<32x32xf32, #tpu.memory_space<vmem>>, %arg13: memref<32x1xf32, #tpu.memory_space<vmem>>, %arg14: memref<1x32x256xf32, #tpu.memory_space<vmem>>) attributes {dimension_semantics = [#tpu.dimension_semantics<parallel>], iteration_bounds = array<i64: 2>, scalar_prefetch = 0 : i64, scratch_operands = 0 : i64, tpu.core_type = #tpu.core_type<tc>, window_params = [{transform_indices = @transform_0, window_bounds = array<i64: 1, 32, 256>}, {pipeline_mode = #tpu.pipeline_mode<synchronous>, transform_indices = @transform_1, window_bounds = array<i64: 32, 1>}, {pipeline_mode = #tpu.pipeline_mode<synchronous>, transform_indices = @transform_2, window_bounds = array<i64: 32, 1>}, {pipeline_mode = #tpu.pipeline_mode<synchronous>, transform_indices = @transform_3, window_bounds = array<i64: 96, 32>}, {pipeline_mode = #tpu.pipeline_mode<synchronous>, transform_indices = @transform_4, window_bounds = array<i64: 96, 1>}, {pipeline_mode = #tpu.pipeline_mode<synchronous>, transform_indices = @transform_5, window_bounds = array<i64: 32, 32>}, {pipeline_mode = #tpu.pipeline_mode<synchronous>, transform_indices = @transform_6, window_bounds = array<i64: 32, 1>}, {pipeline_mode = #tpu.pipeline_mode<synchronous>, transform_indices = @transform_7, window_bounds = array<i64: 32, 1>}, {pipeline_mode = #tpu.pipeline_mode<synchronous>, transform_indices = @transform_8, window_bounds = array<i64: 32, 1>}, {pipeline_mode = #tpu.pipeline_mode<synchronous>, transform_indices = @transform_9, window_bounds = array<i64: 32, 32>}, {pipeline_mode = #tpu.pipeline_mode<synchronous>, transform_indices = @transform_10, window_bounds = array<i64: 32, 1>}, {pipeline_mode = #tpu.pipeline_mode<synchronous>, transform_indices = @transform_11, window_bounds = array<i64: 32, 32>}, {pipeline_mode = #tpu.pipeline_mode<synchronous>, transform_indices = @transform_12, window_bounds = array<i64: 32, 1>}, {transform_indices = @transform_13, window_bounds = array<i64: 1, 32, 256>}]} {
    %c0 = arith.constant 0 : index
    %c0_0 = arith.constant 0 : index
    %c0_1 = arith.constant 0 : index
    %0 = vector.load %arg1[%c0, %c0_0, %c0_1] : memref<1x32x256xf32, #tpu.memory_space<vmem>>, vector<1x32x256xf32>
    %1 = vector.shape_cast %0 : vector<1x32x256xf32> to vector<32x256xf32>
    %c0_2 = arith.constant 0 : index
    %c0_3 = arith.constant 0 : index
    %2 = vector.load %arg2[%c0_2, %c0_3] : memref<32x1xf32, #tpu.memory_space<vmem>>, vector<32x1xf32>
    %c0_4 = arith.constant 0 : index
    %c0_5 = arith.constant 0 : index
    %3 = vector.load %arg3[%c0_4, %c0_5] : memref<32x1xf32, #tpu.memory_space<vmem>>, vector<32x1xf32>
    %cst = arith.constant dense<0.000000e+00> : vector<256xf32>
    %4 = vector.multi_reduction <add>, %1, %cst [0] : vector<32x256xf32> to vector<256xf32>
    %5 = vector.shape_cast %4 : vector<256xf32> to vector<1x256xf32>
    %cst_6 = arith.constant 3.200000e+01 : f32
    %6 = vector.broadcast %cst_6 : f32 to vector<1x256xf32>
    %7 = arith.divf %5, %6 : vector<1x256xf32>
    %8 = vector.broadcast %7 : vector<1x256xf32> to vector<32x256xf32>
    %9 = arith.subf %1, %8 : vector<32x256xf32>
    %10 = arith.mulf %9, %9 : vector<32x256xf32>
    %cst_7 = arith.constant dense<0.000000e+00> : vector<256xf32>
    %11 = vector.multi_reduction <add>, %10, %cst_7 [0] : vector<32x256xf32> to vector<256xf32>
    %12 = vector.shape_cast %11 : vector<256xf32> to vector<1x256xf32>
    %cst_8 = arith.constant 3.200000e+01 : f32
    %13 = vector.broadcast %cst_8 : f32 to vector<1x256xf32>
    %14 = arith.divf %12, %13 : vector<1x256xf32>
    %15 = vector.broadcast %7 : vector<1x256xf32> to vector<32x256xf32>
    %16 = arith.subf %1, %15 : vector<32x256xf32>
    %cst_9 = arith.constant 9.99999974E-6 : f32
    %17 = vector.broadcast %cst_9 : f32 to vector<1x256xf32>
    %18 = arith.addf %14, %17 : vector<1x256xf32>
    %19 = math.rsqrt %18 : vector<1x256xf32>
    %20 = vector.broadcast %19 : vector<1x256xf32> to vector<32x256xf32>
    %21 = arith.mulf %16, %20 : vector<32x256xf32>
    %22 = vector.broadcast %2 : vector<32x1xf32> to vector<32x256xf32>
    %23 = arith.mulf %21, %22 : vector<32x256xf32>
    %24 = vector.broadcast %3 : vector<32x1xf32> to vector<32x256xf32>
    %25 = arith.addf %23, %24 : vector<32x256xf32>
    %c0_10 = arith.constant 0 : index
    %c0_11 = arith.constant 0 : index
    %26 = vector.load %arg4[%c0_10, %c0_11] : memref<96x32xf32, #tpu.memory_space<vmem>>, vector<96x32xf32>
    %cst_12 = arith.constant dense<0.000000e+00> : vector<96x256xf32>
    %27 = tpu.matmul %26, %25, %cst_12 {dimension_numbers = #tpu.dot_dimension_numbers<[1], [0], [0], [1], [0, 0, 1, 1], [], []>} : vector<96x32xf32>, vector<32x256xf32>, vector<96x256xf32> -> vector<96x256xf32>
    %c0_13 = arith.constant 0 : index
    %c0_14 = arith.constant 0 : index
    %28 = vector.load %arg5[%c0_13, %c0_14] : memref<96x1xf32, #tpu.memory_space<vmem>>, vector<96x1xf32>
    %29 = vector.broadcast %28 : vector<96x1xf32> to vector<96x256xf32>
    %30 = arith.addf %27, %29 : vector<96x256xf32>
    %31 = vector.extract_strided_slice %30 {offsets = [0, 0], sizes = [32, 256], strides = [1, 1]} : vector<96x256xf32> to vector<32x256xf32>
    %cst_15 = arith.constant 0.353553385 : f32
    %32 = vector.broadcast %cst_15 : f32 to vector<32x256xf32>
    %33 = arith.mulf %31, %32 : vector<32x256xf32>
    %34 = tpu.transpose %33, [1, 0] : vector<32x256xf32> -> vector<256x32xf32>
    %35 = vector.extract_strided_slice %34 {offsets = [0, 0], sizes = [256, 8], strides = [1, 1]} : vector<256x32xf32> to vector<256x8xf32>
    %36 = vector.extract_strided_slice %30 {offsets = [32, 0], sizes = [8, 256], strides = [1, 1]} : vector<96x256xf32> to vector<8x256xf32>
    %37 = vector.extract_strided_slice %30 {offsets = [64, 0], sizes = [8, 256], strides = [1, 1]} : vector<96x256xf32> to vector<8x256xf32>
    %cst_16 = arith.constant dense<0.000000e+00> : vector<256x256xf32>
    %38 = tpu.matmul %35, %36, %cst_16 {dimension_numbers = #tpu.dot_dimension_numbers<[1], [0], [0], [1], [0, 0, 1, 1], [], []>} : vector<256x8xf32>, vector<8x256xf32>, vector<256x256xf32> -> vector<256x256xf32>
    %cst_17 = arith.constant dense<0xFF800000> : vector<256xf32>
    %39 = vector.multi_reduction <maximumf>, %38, %cst_17 [1] : vector<256x256xf32> to vector<256xf32>
    %40 = vector.shape_cast %39 : vector<256xf32> to vector<256x1xf32>
    %41 = vector.broadcast %40 : vector<256x1xf32> to vector<256x256xf32>
    %42 = arith.subf %38, %41 : vector<256x256xf32>
    %43 = math.exp %42 : vector<256x256xf32>
    %cst_18 = arith.constant dense<0.000000e+00> : vector<256xf32>
    %44 = vector.multi_reduction <add>, %43, %cst_18 [1] : vector<256x256xf32> to vector<256xf32>
    %45 = vector.shape_cast %44 : vector<256xf32> to vector<256x1xf32>
    %46 = vector.broadcast %45 : vector<256x1xf32> to vector<256x256xf32>
    %47 = arith.divf %43, %46 : vector<256x256xf32>
    %cst_19 = arith.constant dense<0.000000e+00> : vector<8x256xf32>
    %48 = tpu.matmul %37, %47, %cst_19 {dimension_numbers = #tpu.dot_dimension_numbers<[1], [1], [0], [0], [0, 0, 1, 0], [], []>} : vector<8x256xf32>, vector<256x256xf32>, vector<8x256xf32> -> vector<8x256xf32>
    %49 = vector.extract_strided_slice %34 {offsets = [0, 8], sizes = [256, 8], strides = [1, 1]} : vector<256x32xf32> to vector<256x8xf32>
    %50 = vector.extract_strided_slice %30 {offsets = [40, 0], sizes = [8, 256], strides = [1, 1]} : vector<96x256xf32> to vector<8x256xf32>
    %51 = vector.extract_strided_slice %30 {offsets = [72, 0], sizes = [8, 256], strides = [1, 1]} : vector<96x256xf32> to vector<8x256xf32>
    %cst_20 = arith.constant dense<0.000000e+00> : vector<256x256xf32>
    %52 = tpu.matmul %49, %50, %cst_20 {dimension_numbers = #tpu.dot_dimension_numbers<[1], [0], [0], [1], [0, 0, 1, 1], [], []>} : vector<256x8xf32>, vector<8x256xf32>, vector<256x256xf32> -> vector<256x256xf32>
    %cst_21 = arith.constant dense<0xFF800000> : vector<256xf32>
    %53 = vector.multi_reduction <maximumf>, %52, %cst_21 [1] : vector<256x256xf32> to vector<256xf32>
    %54 = vector.shape_cast %53 : vector<256xf32> to vector<256x1xf32>
    %55 = vector.broadcast %54 : vector<256x1xf32> to vector<256x256xf32>
    %56 = arith.subf %52, %55 : vector<256x256xf32>
    %57 = math.exp %56 : vector<256x256xf32>
    %cst_22 = arith.constant dense<0.000000e+00> : vector<256xf32>
    %58 = vector.multi_reduction <add>, %57, %cst_22 [1] : vector<256x256xf32> to vector<256xf32>
    %59 = vector.shape_cast %58 : vector<256xf32> to vector<256x1xf32>
    %60 = vector.broadcast %59 : vector<256x1xf32> to vector<256x256xf32>
    %61 = arith.divf %57, %60 : vector<256x256xf32>
    %cst_23 = arith.constant dense<0.000000e+00> : vector<8x256xf32>
    %62 = tpu.matmul %51, %61, %cst_23 {dimension_numbers = #tpu.dot_dimension_numbers<[1], [1], [0], [0], [0, 0, 1, 0], [], []>} : vector<8x256xf32>, vector<256x256xf32>, vector<8x256xf32> -> vector<8x256xf32>
    %63 = vector.extract_strided_slice %34 {offsets = [0, 16], sizes = [256, 8], strides = [1, 1]} : vector<256x32xf32> to vector<256x8xf32>
    %64 = vector.extract_strided_slice %30 {offsets = [48, 0], sizes = [8, 256], strides = [1, 1]} : vector<96x256xf32> to vector<8x256xf32>
    %65 = vector.extract_strided_slice %30 {offsets = [80, 0], sizes = [8, 256], strides = [1, 1]} : vector<96x256xf32> to vector<8x256xf32>
    %cst_24 = arith.constant dense<0.000000e+00> : vector<256x256xf32>
    %66 = tpu.matmul %63, %64, %cst_24 {dimension_numbers = #tpu.dot_dimension_numbers<[1], [0], [0], [1], [0, 0, 1, 1], [], []>} : vector<256x8xf32>, vector<8x256xf32>, vector<256x256xf32> -> vector<256x256xf32>
    %cst_25 = arith.constant dense<0xFF800000> : vector<256xf32>
    %67 = vector.multi_reduction <maximumf>, %66, %cst_25 [1] : vector<256x256xf32> to vector<256xf32>
    %68 = vector.shape_cast %67 : vector<256xf32> to vector<256x1xf32>
    %69 = vector.broadcast %68 : vector<256x1xf32> to vector<256x256xf32>
    %70 = arith.subf %66, %69 : vector<256x256xf32>
    %71 = math.exp %70 : vector<256x256xf32>
    %cst_26 = arith.constant dense<0.000000e+00> : vector<256xf32>
    %72 = vector.multi_reduction <add>, %71, %cst_26 [1] : vector<256x256xf32> to vector<256xf32>
    %73 = vector.shape_cast %72 : vector<256xf32> to vector<256x1xf32>
    %74 = vector.broadcast %73 : vector<256x1xf32> to vector<256x256xf32>
    %75 = arith.divf %71, %74 : vector<256x256xf32>
    %cst_27 = arith.constant dense<0.000000e+00> : vector<8x256xf32>
    %76 = tpu.matmul %65, %75, %cst_27 {dimension_numbers = #tpu.dot_dimension_numbers<[1], [1], [0], [0], [0, 0, 1, 0], [], []>} : vector<8x256xf32>, vector<256x256xf32>, vector<8x256xf32> -> vector<8x256xf32>
    %77 = vector.extract_strided_slice %34 {offsets = [0, 24], sizes = [256, 8], strides = [1, 1]} : vector<256x32xf32> to vector<256x8xf32>
    %78 = vector.extract_strided_slice %30 {offsets = [56, 0], sizes = [8, 256], strides = [1, 1]} : vector<96x256xf32> to vector<8x256xf32>
    %79 = vector.extract_strided_slice %30 {offsets = [88, 0], sizes = [8, 256], strides = [1, 1]} : vector<96x256xf32> to vector<8x256xf32>
    %cst_28 = arith.constant dense<0.000000e+00> : vector<256x256xf32>
    %80 = tpu.matmul %77, %78, %cst_28 {dimension_numbers = #tpu.dot_dimension_numbers<[1], [0], [0], [1], [0, 0, 1, 1], [], []>} : vector<256x8xf32>, vector<8x256xf32>, vector<256x256xf32> -> vector<256x256xf32>
    %cst_29 = arith.constant dense<0xFF800000> : vector<256xf32>
    %81 = vector.multi_reduction <maximumf>, %80, %cst_29 [1] : vector<256x256xf32> to vector<256xf32>
    %82 = vector.shape_cast %81 : vector<256xf32> to vector<256x1xf32>
    %83 = vector.broadcast %82 : vector<256x1xf32> to vector<256x256xf32>
    %84 = arith.subf %80, %83 : vector<256x256xf32>
    %85 = math.exp %84 : vector<256x256xf32>
    %cst_30 = arith.constant dense<0.000000e+00> : vector<256xf32>
    %86 = vector.multi_reduction <add>, %85, %cst_30 [1] : vector<256x256xf32> to vector<256xf32>
    %87 = vector.shape_cast %86 : vector<256xf32> to vector<256x1xf32>
    %88 = vector.broadcast %87 : vector<256x1xf32> to vector<256x256xf32>
    %89 = arith.divf %85, %88 : vector<256x256xf32>
    %cst_31 = arith.constant dense<0.000000e+00> : vector<8x256xf32>
    %90 = tpu.matmul %79, %89, %cst_31 {dimension_numbers = #tpu.dot_dimension_numbers<[1], [1], [0], [0], [0, 0, 1, 0], [], []>} : vector<8x256xf32>, vector<256x256xf32>, vector<8x256xf32> -> vector<8x256xf32>
    %91 = tpu.concatenate %48, %62, %76, %90 in 0 : vector<8x256xf32>, vector<8x256xf32>, vector<8x256xf32>, vector<8x256xf32> -> vector<32x256xf32>
    %c0_32 = arith.constant 0 : index
    %c0_33 = arith.constant 0 : index
    %92 = vector.load %arg6[%c0_32, %c0_33] : memref<32x32xf32, #tpu.memory_space<vmem>>, vector<32x32xf32>
    %cst_34 = arith.constant dense<0.000000e+00> : vector<32x256xf32>
    %93 = tpu.matmul %92, %91, %cst_34 {dimension_numbers = #tpu.dot_dimension_numbers<[1], [0], [0], [1], [0, 0, 1, 1], [], []>} : vector<32x32xf32>, vector<32x256xf32>, vector<32x256xf32> -> vector<32x256xf32>
    %c0_35 = arith.constant 0 : index
    %c0_36 = arith.constant 0 : index
    %94 = vector.load %arg7[%c0_35, %c0_36] : memref<32x1xf32, #tpu.memory_space<vmem>>, vector<32x1xf32>
    %95 = vector.broadcast %94 : vector<32x1xf32> to vector<32x256xf32>
    %96 = arith.addf %93, %95 : vector<32x256xf32>
    %97 = arith.addf %96, %1 : vector<32x256xf32>
    %c0_37 = arith.constant 0 : index
    %c0_38 = arith.constant 0 : index
    %98 = vector.load %arg8[%c0_37, %c0_38] : memref<32x1xf32, #tpu.memory_space<vmem>>, vector<32x1xf32>
    %c0_39 = arith.constant 0 : index
    %c0_40 = arith.constant 0 : index
    %99 = vector.load %arg9[%c0_39, %c0_40] : memref<32x1xf32, #tpu.memory_space<vmem>>, vector<32x1xf32>
    %cst_41 = arith.constant dense<0.000000e+00> : vector<256xf32>
    %100 = vector.multi_reduction <add>, %97, %cst_41 [0] : vector<32x256xf32> to vector<256xf32>
    %101 = vector.shape_cast %100 : vector<256xf32> to vector<1x256xf32>
    %cst_42 = arith.constant 3.200000e+01 : f32
    %102 = vector.broadcast %cst_42 : f32 to vector<1x256xf32>
    %103 = arith.divf %101, %102 : vector<1x256xf32>
    %104 = vector.broadcast %103 : vector<1x256xf32> to vector<32x256xf32>
    %105 = arith.subf %97, %104 : vector<32x256xf32>
    %106 = arith.mulf %105, %105 : vector<32x256xf32>
    %cst_43 = arith.constant dense<0.000000e+00> : vector<256xf32>
    %107 = vector.multi_reduction <add>, %106, %cst_43 [0] : vector<32x256xf32> to vector<256xf32>
    %108 = vector.shape_cast %107 : vector<256xf32> to vector<1x256xf32>
    %cst_44 = arith.constant 3.200000e+01 : f32
    %109 = vector.broadcast %cst_44 : f32 to vector<1x256xf32>
    %110 = arith.divf %108, %109 : vector<1x256xf32>
    %111 = vector.broadcast %103 : vector<1x256xf32> to vector<32x256xf32>
    %112 = arith.subf %97, %111 : vector<32x256xf32>
    %cst_45 = arith.constant 9.99999974E-6 : f32
    %113 = vector.broadcast %cst_45 : f32 to vector<1x256xf32>
    %114 = arith.addf %110, %113 : vector<1x256xf32>
    %115 = math.rsqrt %114 : vector<1x256xf32>
    %116 = vector.broadcast %115 : vector<1x256xf32> to vector<32x256xf32>
    %117 = arith.mulf %112, %116 : vector<32x256xf32>
    %118 = vector.broadcast %98 : vector<32x1xf32> to vector<32x256xf32>
    %119 = arith.mulf %117, %118 : vector<32x256xf32>
    %120 = vector.broadcast %99 : vector<32x1xf32> to vector<32x256xf32>
    %121 = arith.addf %119, %120 : vector<32x256xf32>
    %c0_46 = arith.constant 0 : index
    %c0_47 = arith.constant 0 : index
    %122 = vector.load %arg10[%c0_46, %c0_47] : memref<32x32xf32, #tpu.memory_space<vmem>>, vector<32x32xf32>
    %cst_48 = arith.constant dense<0.000000e+00> : vector<32x256xf32>
    %123 = tpu.matmul %122, %121, %cst_48 {dimension_numbers = #tpu.dot_dimension_numbers<[1], [0], [0], [1], [0, 0, 1, 1], [], []>} : vector<32x32xf32>, vector<32x256xf32>, vector<32x256xf32> -> vector<32x256xf32>
    %c0_49 = arith.constant 0 : index
    %c0_50 = arith.constant 0 : index
    %124 = vector.load %arg11[%c0_49, %c0_50] : memref<32x1xf32, #tpu.memory_space<vmem>>, vector<32x1xf32>
    %125 = vector.broadcast %124 : vector<32x1xf32> to vector<32x256xf32>
    %126 = arith.addf %123, %125 : vector<32x256xf32>
    %cst_51 = arith.constant 5.000000e-01 : f32
    %127 = vector.broadcast %cst_51 : f32 to vector<32x256xf32>
    %128 = arith.mulf %127, %126 : vector<32x256xf32>
    %cst_52 = arith.constant 0.707106769 : f32
    %129 = vector.broadcast %cst_52 : f32 to vector<32x256xf32>
    %130 = arith.mulf %126, %129 : vector<32x256xf32>
    %131 = math.erf %130 : vector<32x256xf32>
    %cst_53 = arith.constant 1.000000e+00 : f32
    %132 = vector.broadcast %cst_53 : f32 to vector<32x256xf32>
    %133 = arith.addf %132, %131 : vector<32x256xf32>
    %134 = arith.mulf %128, %133 : vector<32x256xf32>
    %c0_54 = arith.constant 0 : index
    %c0_55 = arith.constant 0 : index
    %135 = vector.load %arg12[%c0_54, %c0_55] : memref<32x32xf32, #tpu.memory_space<vmem>>, vector<32x32xf32>
    %cst_56 = arith.constant dense<0.000000e+00> : vector<32x256xf32>
    %136 = tpu.matmul %135, %134, %cst_56 {dimension_numbers = #tpu.dot_dimension_numbers<[1], [0], [0], [1], [0, 0, 1, 1], [], []>} : vector<32x32xf32>, vector<32x256xf32>, vector<32x256xf32> -> vector<32x256xf32>
    %c0_57 = arith.constant 0 : index
    %c0_58 = arith.constant 0 : index
    %137 = vector.load %arg13[%c0_57, %c0_58] : memref<32x1xf32, #tpu.memory_space<vmem>>, vector<32x1xf32>
    %138 = vector.broadcast %137 : vector<32x1xf32> to vector<32x256xf32>
    %139 = arith.addf %136, %138 : vector<32x256xf32>
    %140 = arith.addf %139, %97 : vector<32x256xf32>
    %c0_59 = arith.constant 0 : index
    %c0_60 = arith.constant 0 : index
    %c0_61 = arith.constant 0 : index
    %141 = vector.load %arg14[%c0_59, %c0_60, %c0_61] : memref<1x32x256xf32, #tpu.memory_space<vmem>>, vector<1x32x256xf32>
    %142 = vector.shape_cast %141 : vector<1x32x256xf32> to vector<32x256xf32>
    %143 = vector.shape_cast %140 : vector<32x256xf32> to vector<1x32x256xf32>
    tpu.vector_store %arg14[%c0_59, %c0_60, %c0_61], %143 {strides = array<i32>} : memref<1x32x256xf32, #tpu.memory_space<vmem>>, vector<1x32x256xf32>,
    return
  }
  func.func @transform_0(%arg0: i32) -> (i32, i32, i32) {
    %c0_i32 = arith.constant 0 : i32
    %c0_i32_0 = arith.constant 0 : i32
    %c0_i32_1 = arith.constant 0 : i32
    return %arg0, %c0_i32, %c0_i32_0 : i32, i32, i32
  }
  func.func @transform_1(%arg0: i32) -> (i32, i32) {
    %c0_i32 = arith.constant 0 : i32
    %c0_i32_0 = arith.constant 0 : i32
    %c0_i32_1 = arith.constant 0 : i32
    return %c0_i32, %c0_i32_0 : i32, i32
  }
  func.func @transform_2(%arg0: i32) -> (i32, i32) {
    %c0_i32 = arith.constant 0 : i32
    %c0_i32_0 = arith.constant 0 : i32
    %c0_i32_1 = arith.constant 0 : i32
    return %c0_i32, %c0_i32_0 : i32, i32
  }
  func.func @transform_3(%arg0: i32) -> (i32, i32) {
    %c0_i32 = arith.constant 0 : i32
    %c0_i32_0 = arith.constant 0 : i32
    %c0_i32_1 = arith.constant 0 : i32
    return %c0_i32, %c0_i32_0 : i32, i32
  }
  func.func @transform_4(%arg0: i32) -> (i32, i32) {
    %c0_i32 = arith.constant 0 : i32
    %c0_i32_0 = arith.constant 0 : i32
    %c0_i32_1 = arith.constant 0 : i32
    return %c0_i32, %c0_i32_0 : i32, i32
  }
  func.func @transform_5(%arg0: i32) -> (i32, i32) {
    %c0_i32 = arith.constant 0 : i32
    %c0_i32_0 = arith.constant 0 : i32
    %c0_i32_1 = arith.constant 0 : i32
    return %c0_i32, %c0_i32_0 : i32, i32
  }
  func.func @transform_6(%arg0: i32) -> (i32, i32) {
    %c0_i32 = arith.constant 0 : i32
    %c0_i32_0 = arith.constant 0 : i32
    %c0_i32_1 = arith.constant 0 : i32
    return %c0_i32, %c0_i32_0 : i32, i32
  }
  func.func @transform_7(%arg0: i32) -> (i32, i32) {
    %c0_i32 = arith.constant 0 : i32
    %c0_i32_0 = arith.constant 0 : i32
    %c0_i32_1 = arith.constant 0 : i32
    return %c0_i32, %c0_i32_0 : i32, i32
  }
  func.func @transform_8(%arg0: i32) -> (i32, i32) {
    %c0_i32 = arith.constant 0 : i32
    %c0_i32_0 = arith.constant 0 : i32
    %c0_i32_1 = arith.constant 0 : i32
    return %c0_i32, %c0_i32_0 : i32, i32
  }
  func.func @transform_9(%arg0: i32) -> (i32, i32) {
    %c0_i32 = arith.constant 0 : i32
    %c0_i32_0 = arith.constant 0 : i32
    %c0_i32_1 = arith.constant 0 : i32
    return %c0_i32, %c0_i32_0 : i32, i32
  }
  func.func @transform_10(%arg0: i32) -> (i32, i32) {
    %c0_i32 = arith.constant 0 : i32
    %c0_i32_0 = arith.constant 0 : i32
    %c0_i32_1 = arith.constant 0 : i32
    return %c0_i32, %c0_i32_0 : i32, i32
  }
  func.func @transform_11(%arg0: i32) -> (i32, i32) {
    %c0_i32 = arith.constant 0 : i32
    %c0_i32_0 = arith.constant 0 : i32
    %c0_i32_1 = arith.constant 0 : i32
    return %c0_i32, %c0_i32_0 : i32, i32
  }
  func.func @transform_12(%arg0: i32) -> (i32, i32) {
    %c0_i32 = arith.constant 0 : i32
    %c0_i32_0 = arith.constant 0 : i32
    %c0_i32_1 = arith.constant 0 : i32
    return %c0_i32, %c0_i32_0 : i32, i32
  }
  func.func @transform_13(%arg0: i32) -> (i32, i32, i32) {
    %c0_i32 = arith.constant 0 : i32
    %c0_i32_0 = arith.constant 0 : i32
    %c0_i32_1 = arith.constant 0 : i32
    return %arg0, %c0_i32, %c0_i32_0 : i32, i32, i32
  }
}

</mosaic_0001>

<bundles_post_ra>
// kernel: tpu_custom_call.1
= control target key start
LH: loop header
LB: loop body
LE: loop exit
PB: predicated region body
PF: predicated region fallthrough
CT: control target
= control target key end

     0   :  { %18 = vsyncpa [#allocation3], 0  ;;  %s14339_s0 = inlined_call_operand.vmem [shape: f32[2,32,256], index: 0, kind: input, shape index: {}]   ;;  %s14340_s1 = inlined_call_operand.vmem [shape: f32[32,1], index: 1, kind: input, shape index: {}]   ;;  %s14341_s2 = inlined_call_operand.vmem [shape: f32[32,1], index: 2, kind: input, shape index: {}]   ;;  %s14342_s3 = inlined_call_operand.vmem [shape: f32[96,32], index: 3, kind: input, shape index: {}]   ;;  %s14343_s4 = inlined_call_operand.vmem [shape: f32[96,1], index: 4, kind: input, shape index: {}]   ;;  %s14344_s5 = inlined_call_operand.vmem [shape: f32[32,32], index: 5, kind: input, shape index: {}]   ;;  %s14345_s6 = inlined_call_operand.vmem [shape: f32[32,1], index: 6, kind: input, shape index: {}]   ;;  %s14346_s7 = inlined_call_operand.vmem [shape: f32[32,1], index: 7, kind: input, shape index: {}]   ;;  %s14347_s8 = inlined_call_operand.vmem [shape: f32[32,1], index: 8, kind: input, shape index: {}]   ;;  %s14348_s9 = inlined_call_operand.vmem [shape: f32[32,32], index: 9, kind: input, shape index: {}]   ;;  %s14349_s10 = inlined_call_operand.vmem [shape: f32[32,1], index: 10, kind: input, shape index: {}]   ;;  %s14350_s11 = inlined_call_operand.vmem [shape: f32[32,32], index: 11, kind: input, shape index: {}]   ;;  %s14351_s12 = inlined_call_operand.vmem [shape: f32[32,1], index: 12, kind: input, shape index: {}]   ;;  %s14352_s13 = inlined_call_operand.hbm [shape: f32[2,32,256], index: 13, kind: output, shape index: {}]  }
   0x1   :  { %20 = vsyncpa [#allocation3 + $0x1], 0  ;;  %s8409_s25 = smov 0   ;;  %s8411_s26 = smov 0  }
   0x2   :  { %s8413_s27 = smov 0   ;;  %s8415_s28 = smov 0  }
   0x3 LB: > { %14623 = sst [smem:[#allocation5_spill]] %s8326_s27  ;;  %s8430_s29 = sadd.s32 4294967295, %s8330_s28   ;;  %s8330_s28 = sphi %s8415_s28, %s15392_s28   ;;  %s8326_s27 = sphi %s8413_s27, %s15394_s27   ;;  %s8322_s26 = sphi %s8411_s26, %s15396_s26   ;;  %s8318_s25 = sphi %s8409_s25, %s15395_s25  }
   0x4   : > { %s7090_s30 = sadd.s32 4294967294, %s8330_s28   ;;  %s8434_s14 = sadd.s32 1, %s8330_s28  }
   0x5   : > { %14624 = sst [smem:[#allocation6_spill]] %s8434_s14  ;;  %s311_s15 = sadd.s32 1, %s8326_s27 }
   0x6   : > { %s308_s16 = ssub.s32 %s8330_s28, %s8434_s14  ;;  %p321_p0 = scmp.ne.s32.totalorder %s8326_s27, %s8322_s26 }
   0x7   : > { %p309_p1 = scmp.eq.s32.totalorder %s308_s16, 0  ;;  %p322_p2 = scmp.eq.s32.totalorder %s8430_s29, 1 }
   0x8   : > { %p327_p3 = scmp.ne.s32.totalorder %s8322_s26, %s8318_s25  ;;  %p328_p4 = scmp.eq.s32.totalorder %s7090_s30, 1 }
   0x9   : > { %s8445_s17 = scalar_select %p309_p1, %s8326_s27, %s311_s15  }
   0xa   : > { %p8447_p5 = por %p322_p2, %p321_p0  ;;  %p8451_p6 = por %p328_p4, %p327_p3 }
   0xb   : > { %14625 = sst [smem:[#allocation7_spill]] %s8445_s17  ;;  %p7093_p7 = scmp.ge.s32.totalorder %s8330_s28, 1 }
   0xc   : > { %s14627_s19 = scalar_select %p8451_p6, 1, 0 }
   0xd   : > { %p390_p8 = scmp.lt.s32.totalorder %s8330_s28, 3 }
   0xe   : > { %14628 = sst [smem:[#allocation8_spill]] %s14627_s19 }
   0xf   : > { %p391_p9 = pnand %p7093_p7, %p390_p8 }
  0x11   : > { %394 = sbr.rel (%p391_p9) target bundleno = 4413 (0x113d), region = 72 }
  0x16   : > { %v454_v0 = vld [vmem:[%s14341_s2 + $0x18] sm:$0xff]  ;;  %v8332_v2 = vmov 0   ;;  %v453_v3 = vld [vmem:[%s14341_s2 + $0x10] sm:$0xff]  ;;  %p434_p10 = scmp.lt.s32.totalorder %s8430_s29, 1  ;;  %v448_v5 = vld [vmem:[%s14340_s1 + $0x8] sm:$0xff]  ;;  %v8333_v19 = vmov 32.0  }
  0x17   : > { %v450_v1 = vld [vmem:[%s14340_s1 + $0x18] sm:$0xff]  ;;  %7464 = vset.pattern.permute.xlu1 %v8332_v2  ;;  %7463 = vset.pattern.permute.xlu0 %v8332_v2  ;;  %v449_v4 = vld [vmem:[%s14340_s1 + $0x10] sm:$0xff]  ;;  %v447_v6 = vld [vmem:[%s14340_s1] sm:$0xff]  ;;  %7466 = vrcp.f32 %v8333_v19  ;;  %vm688_vm7 = vcmask 261120   ;;  %vm903_vm8 = vcmask 64512   ;;  %s8334_s16 = smov 120  }
  0x18   : > { %593 = vperm.xlu1 %7464, %v454_v0   ;;  %565 = vperm.xlu0 %7463, %v450_v1   ;;  %s435_s22 = scalar_select %p434_p10, %s8430_s29, 1  ;;  %v452_v7 = vld [vmem:[%s14341_s2 + $0x8] sm:$0xff]  ;;  %v451_v8 = vld [vmem:[%s14341_s2] sm:$0xff]  ;;  %v618_v24 = vld [vmem:[%s14343_s4 + $0x10] sm:$0xff] }
  0x19   : > { %7465 = vset.pattern.permute.xlu2 %v8332_v2  ;;  %v616_v9 = vld [vmem:[%s14343_s4] sm:$0xff]  ;;  %v617_v23 = vld [vmem:[%s14343_s4 + $0x8] sm:$0xff]  ;;  %v619_v27 = vld [vmem:[%s14343_s4 + $0x18] sm:$0xff]  ;;  %s8336_s19 = smov 104   ;;  %s431_s14 = sand.u32 1, %s8322_s26  }
  0x1a   : > { %588 = vperm.xlu2 %7465, %v453_v3   ;;  %s7414_s24 = sshll.u32 %s435_s22, 6  ;;  %v620_v37 = vld [vmem:[%s14343_s4 + $0x20] sm:$0xff]  ;;  %s7415_s23 = sshll.u32 %s8430_s29, 6 }
  0x1b   : > { %s8486_s21 = scalar_lea.vmem %s14339_s0, %s7414_s24  ;;  %s7024_s15 = scalar_lea.hbm %s14352_s13, %s7415_s23 }
  0x1c   : > { %v439_v10 = vld [vmem:[%s8486_s21] sm:$0xff]  ;;  %v441_v11 = vld [vmem:[%s8486_s21 + $0x10] sm:$0xff]  ;;  %v440_v12 = vld [vmem:[%s8486_s21 + $0x8] sm:$0xff]  ;;  %s7013_s20 = scalar_lea.sflag [#allocation3], %s431_s14  ;;  %s8288_s23 = scalar_lea.hbm %s14352_s13, 128 }
  0x1d   : > { %v455_v13 = vadd.f32 %v441_v11, %v439_v10  ;;  %v442_v14 = vld [vmem:[%s8486_s21 + $0x18] sm:$0xff]  ;;  %v443_v15 = vld [vmem:[%s8486_s21 + $0x20] sm:$0xff]  ;;  %v444_v16 = vld [vmem:[%s8486_s21 + $0x28] sm:$0xff]  ;;  %v7467_v30 = vpop.eup %7466 }
  0x1e   : > { %v464_v17 = vadd.f32 %v442_v14, %v440_v12  ;;  %v445_v20 = vld [vmem:[%s8486_s21 + $0x30] sm:$0xff]  ;;  %v446_v21 = vld [vmem:[%s8486_s21 + $0x38] sm:$0xff]  ;;  %v474_v32 = vmul.f32 32.0, %v7467_v30  ;;  %vm478_vm0 = vweird.f32 %v7467_v30 }
  0x1f   : > { %v456_v18 = vadd.f32 %v455_v13, %v443_v15 }
  0x20   : > { %560 = vperm.xlu0 %7463, %v449_v4   ;;  %555 = vperm.xlu1 %7464, %v448_v5   ;;  %v465_v22 = vadd.f32 %v464_v17, %v444_v16  ;;  %v475_v35 = vsub.f32 1.0, %v474_v32 }
  0x21   : > { %v457_v25 = vadd.f32 %v456_v18, %v445_v20 }
  0x22   : > { %550 = vperm.xlu2 %7465, %v447_v6   ;;  %v466_v26 = vadd.f32 %v465_v22, %v446_v21  ;;  %v476_v39 = vmul.f32 %v7467_v30, %v475_v35 }
  0x23   : > { %v458_v28 = vrot.slane %v457_v25, 4 }
  0x24   : > { %v467_v29 = vrot.slane %v466_v26, 4  ;;  %v477_v42 = vadd.f32 %v7467_v30, %v476_v39 }
  0x25   : > { %v459_v31 = vadd.f32 %v458_v28, %v457_v25 }
  0x26   : > { %v468_v33 = vadd.f32 %v467_v29, %v466_v26  ;;  %v8511_v45 = vsel %vm478_vm0, %v7467_v30, %v477_v42 }
  0x27   : > { %v460_v34 = vrot.slane %v459_v31, 2  ;;  %14629 = vst [vmem:[#allocation9_spill] sm:$0xff] %v8511_v45 }
  0x28   : > { %583 = vperm.xlu0 %7463, %v452_v7   ;;  %578 = vperm.xlu1 %7464, %v451_v8   ;;  %v469_v36 = vrot.slane %v468_v33, 2 }
  0x29   : > { %v461_v38 = vadd.f32 %v460_v34, %v459_v31 }
  0x2a   : > { %630 = vperm.xlu2 %7465, %v616_v9   ;;  %v470_v40 = vadd.f32 %v469_v36, %v468_v33 }
  0x2b   : > { %v462_v41 = vrot.slane %v461_v38, 1 }
  0x2c   : > { %v471_v43 = vrot.slane %v470_v40, 1 }
  0x2d   : > { %v463_v44 = vadd.f32 %v462_v41, %v461_v38 }
  0x2e   : > { %v472_v46 = vadd.f32 %v471_v43, %v470_v40 }
  0x2f   : > { %v480_v47 = vmul.f32 %v8511_v45, %v463_v44 }
  0x30   : > { %635 = vperm.xlu0 %7463, %v617_v23   ;;  %640 = vperm.xlu1 %7464, %v618_v24   ;;  %v481_v48 = vmul.f32 %v8511_v45, %v472_v46 }
  0x31   : > { %v8515_v49 = vsub.f32 %v439_v10, %v480_v47  ;;  %v8517_v50 = vsub.f32 %v441_v11, %v480_v47  ;;  %v8523_v53 = vsub.f32 %v443_v15, %v480_v47  ;;  %v488_v59 = vsub.f32 %v445_v20, %v480_v47 }
  0x32   : > { %645 = vperm.xlu2 %7465, %v619_v27   ;;  %v8519_v51 = vsub.f32 %v440_v12, %v481_v48  ;;  %v8521_v52 = vsub.f32 %v442_v14, %v481_v48  ;;  %v8529_v56 = vsub.f32 %v444_v16, %v481_v48  ;;  %v489_v62 = vsub.f32 %v446_v21, %v481_v48 }
  0x33   : > { %v490_v54 = vmul.f32 %v8515_v49, %v8515_v49  ;;  %v492_v55 = vmul.f32 %v8517_v50, %v8517_v50  ;;  %v494_v60 = vmul.f32 %v8523_v53, %v8523_v53  ;;  %v496_v1 = vmul.f32 %v488_v59, %v488_v59 }
  0x34   : > { %v491_v57 = vmul.f32 %v8519_v51, %v8519_v51  ;;  %v493_v58 = vmul.f32 %v8521_v52, %v8521_v52  ;;  %v495_v63 = vmul.f32 %v8529_v56, %v8529_v56  ;;  %v497_v3 = vmul.f32 %v489_v62, %v489_v62 }
  0x35   : > { %v498_v61 = vadd.f32 %v492_v55, %v490_v54 }
  0x36   : > { %v507_v0 = vadd.f32 %v493_v58, %v491_v57 }
  0x37   : > { %v499_v2 = vadd.f32 %v498_v61, %v494_v60 }
  0x38   : > { %650 = vperm.xlu0 %7463, %v620_v37   ;;  %v508_v4 = vadd.f32 %v507_v0, %v495_v63 }
  0x39   : > { %v500_v5 = vadd.f32 %v499_v2, %v496_v1 }
  0x3a   : > { %v509_v6 = vadd.f32 %v508_v4, %v497_v3 }
  0x3b   : > { %v501_v7 = vrot.slane %v500_v5, 4 }
  0x3c   : > { %v510_v8 = vrot.slane %v509_v6, 4 }
  0x3d   : > { %v502_v9 = vadd.f32 %v501_v7, %v500_v5 }
  0x3e   : > { %v511_v10 = vadd.f32 %v510_v8, %v509_v6 }
  0x3f   : > { %v503_v11 = vrot.slane %v502_v9, 2 }
  0x40   : > { %v512_v12 = vrot.slane %v511_v10, 2 }
  0x41   : > { %v504_v13 = vadd.f32 %v503_v11, %v502_v9  ;;  %v607_v9 = vld [vmem:[%s14342_s3 + $0x18] sm:$0xff] }
  0x42   : > { %v513_v14 = vadd.f32 %v512_v12, %v511_v10  ;;  %v608_v10 = vld [vmem:[%s14342_s3 + $0x20] sm:$0xff] }
  0x43   : > { %v505_v15 = vrot.slane %v504_v13, 1 }
  0x44   : > { %v514_v16 = vrot.slane %v513_v14, 1 }
  0x45   : > { %v506_v17 = vadd.f32 %v505_v15, %v504_v13 }
  0x46   : > { %v515_v18 = vadd.f32 %v514_v16, %v513_v14 }
  0x47   : > { %v516_v19 = vmul.f32 %v506_v17, %v8511_v45 }
  0x48   : > { %v517_v20 = vmul.f32 %v515_v18, %v8511_v45 }
  0x49   : > { %v518_v21 = vadd.f32 1e-05, %v516_v19 }
  0x4a   : > { %v519_v22 = vadd.f32 1e-05, %v517_v20 }
  0x4b   : > { %7468 = vrsqrt.f32 %v518_v21  ;;  %vm526_vm1 = vweird.f32 %v518_v21 }
  0x4c   : > { %7470 = vrsqrt.f32 %v519_v22  ;;  %vm536_vm3 = vweird.f32 %v519_v22 }
  0x51   : > { %v7469_v23 = vpop.eup %7468 }
  0x52   : > { %v7471_v24 = vpop.eup %7470  ;;  %v521_v25 = vmul.f32 %v7469_v23, %v518_v21  ;;  %vm527_vm2 = vweird.f32 %v7469_v23 }
  0x53   : > { %v531_v26 = vmul.f32 %v7471_v24, %v519_v22  ;;  %vm537_vm4 = vweird.f32 %v7471_v24  ;;  %vm528_vm5 = vmor %vm526_vm1, %vm527_vm2 }
  0x54   : > { %v522_v27 = vmul.f32 %v7469_v23, %v521_v25  ;;  %vm538_vm6 = vmor %vm536_vm3, %vm537_vm4 }
  0x55   : > { %v532_v28 = vmul.f32 %v7471_v24, %v531_v26 }
  0x56   : > { %v523_v29 = vmul.f32 0.5, %v522_v27 }
  0x57   : > { %v533_v30 = vmul.f32 0.5, %v532_v28 }
  0x58   : > { %v524_v31 = vsub.f32 1.5, %v523_v29 }
  0x59   : > { %v534_v32 = vsub.f32 1.5, %v533_v30 }
  0x5a   : > { %v525_v33 = vmul.f32 %v7469_v23, %v524_v31 }
  0x5b   : > { %v535_v34 = vmul.f32 %v7471_v24, %v534_v32 }
  0x5c   : > { %v529_v35 = vsel %vm528_vm5, %v7469_v23, %v525_v33 }
  0x5d   : > { %v539_v36 = vsel %vm538_vm6, %v7471_v24, %v535_v34  ;;  %v546_v37 = vmul.f32 %v529_v35, %v488_v59  ;;  %v544_v47 = vmul.f32 %v529_v35, %v8523_v53  ;;  %v542_v61 = vmul.f32 %v529_v35, %v8517_v50 }
  0x5e   : > { %v547_v38 = vmul.f32 %v539_v36, %v489_v62  ;;  %v545_v48 = vmul.f32 %v539_v36, %v8529_v56  ;;  %v543_v62 = vmul.f32 %v539_v36, %v8521_v52  ;;  %v540_v63 = vmul.f32 %v529_v35, %v8515_v49  ;;  %v604_v52 = vld [vmem:[%s14342_s3] sm:$0xff]  ;;  %v605_v49 = vld [vmem:[%s14342_s3 + $0x8] sm:$0xff] }
  0x5f   : > { %v541_v0 = vmul.f32 %v539_v36, %v8519_v51  ;;  %v606_v51 = vld [vmem:[%s14342_s3 + $0x10] sm:$0xff] }
  0x74   : > { %v589_v46 = vpop.permute.xlu2 %588 }
  0x7c   : > { %v551_v1 = vpop.permute.xlu2 %550 }
  0x7d   : > { %v568_v6 = vmul.f32 %v551_v1, %v540_v63  ;;  %v569_v7 = vmul.f32 %v551_v1, %v541_v0 }
  0x84   : > { %v631_v11 = vpop.permute.xlu2 %630 }
  0x8a   : > { %v594_v39 = vpop.permute.xlu1 %593  ;;  %v566_v40 = vpop.permute.xlu0 %565 }
  0x8b   : > { %v574_v41 = vmul.f32 %v566_v40, %v546_v37  ;;  %v575_v42 = vmul.f32 %v566_v40, %v547_v38 }
  0x8c   : > { %v646_v32 = vpop.permute.xlu2 %645 }
  0x8d   : > { %v602_v43 = vadd.f32 %v594_v39, %v574_v41  ;;  %v603_v44 = vadd.f32 %v594_v39, %v575_v42 }
  0x8f   : > { %737 = vmatpush.msra.mxu0 %v602_v43  ;;  %790 = vmatpush.msra.mxu1 %v603_v44 }
  0x92   : > { %v561_v54 = vpop.permute.xlu0 %560  ;;  %v556_v55 = vpop.permute.xlu1 %555 }
  0x93   : > { %v572_v57 = vmul.f32 %v561_v54, %v544_v47  ;;  %v573_v58 = vmul.f32 %v561_v54, %v545_v48  ;;  %v570_v53 = vmul.f32 %v556_v55, %v542_v61  ;;  %v571_v2 = vmul.f32 %v556_v55, %v543_v62 }
  0x95   : > { %v600_v60 = vadd.f32 %v589_v46, %v572_v57  ;;  %v601_v59 = vadd.f32 %v589_v46, %v573_v58 }
  0x97   : > { %738 = vmatpush.msra.mxu0 %v600_v60  ;;  %791 = vmatpush.msra.mxu1 %v601_v59 }
  0x9a   : > { %v584_v56 = vpop.permute.xlu0 %583  ;;  %v579_v3 = vpop.permute.xlu1 %578 }
  0x9b   : > { %v598_v4 = vadd.f32 %v584_v56, %v570_v53  ;;  %v599_v5 = vadd.f32 %v584_v56, %v571_v2  ;;  %v596_v50 = vadd.f32 %v579_v3, %v568_v6  ;;  %v597_v8 = vadd.f32 %v579_v3, %v569_v7 }
  0x9d   : > { %739 = vmatpush.msra.mxu0 %v598_v4  ;;  %792 = vmatpush.msra.mxu1 %v599_v5 }
  0x9f   : > { %740 = vmatpush.msra.mxu0 %v596_v50  ;;  %793 = vmatpush.msra.mxu1 %v597_v8 }
  0xa0   : > { %7097 = vmatmul.msk.f32.vlgmr.msra.gmra.mxu0 %vm688_vm7, %v604_v52  ;;  %7109 = vmatmul.msk.f32.vlgmr.msra.gmra.mxu1 %vm688_vm7, %v604_v52 }
  0xa2   : > { %v636_v18 = vpop.permute.xlu0 %635  ;;  %v641_v25 = vpop.permute.xlu1 %640 }
  0xa8   : > { %7098 = vmatmul.msk.f32.gmra.mxu0 %vm688_vm7, %v605_v49  ;;  %7110 = vmatmul.msk.f32.gmra.mxu1 %vm688_vm7, %v605_v49 }
  0xaa   : > { %v651_v39 = vpop.permute.xlu0 %650 }
  0xb0   : > { %7099 = vmatmul.msk.f32.gmra.mxu0 %vm688_vm7, %v606_v51  ;;  %7111 = vmatmul.msk.f32.gmra.mxu1 %vm688_vm7, %v606_v51 }
  0xb8   : > { %7100 = vmatmul.msk.f32.gmra.mxu0 %vm688_vm7, %v607_v9  ;;  %7112 = vmatmul.msk.f32.gmra.mxu1 %vm688_vm7, %v607_v9 }
  0xc0   : > { %7101 = vmatmul.msk.f32.gmra.mxu0 %vm688_vm7, %v608_v10  ;;  %7113 = vmatmul.msk.f32.gmra.mxu1 %vm688_vm7, %v608_v10 }
 0x11d   : > { %v742_v12 = vpop.f32.mrf.mxu0  ;;  %v795_v13 = vpop.f32.mrf.mxu1 }
 0x11e   : > { %v743_v14 = vadd.f32 %v742_v12, %v631_v11  ;;  %v796_v15 = vadd.f32 %v795_v13, %v631_v11 }
 0x120   : > { %v831_v16 = vmul.f32 0.35355338, %v743_v14  ;;  %v832_v17 = vmul.f32 0.35355338, %v796_v15 }
 0x122   : > { %871 = vxpose.xlu2.b32.start [1/4] (short) %v832_v17, 128  ;;  %839 = vxpose.xlu1.b32.start [1/4] (short) %v831_v16, 128 }
 0x125   : > { %v745_v19 = vpop.f32.mrf.mxu0  ;;  %v798_v20 = vpop.f32.mrf.mxu1 }
 0x126   : > { %v746_v21 = vadd.f32 %v745_v19, %v636_v18  ;;  %v799_v22 = vadd.f32 %v798_v20, %v636_v18 }
 0x128   : > { %v833_v23 = vmul.f32 0.35355338, %v746_v21  ;;  %v834_v24 = vmul.f32 0.35355338, %v799_v22 }
 0x12a   : > { %872 = vxpose.xlu2.b32.cont [2/4] (short) %v834_v24, 128  ;;  %840 = vxpose.xlu1.b32.cont [2/4] (short) %v833_v23, 128 }
 0x12d   : > { %v748_v26 = vpop.f32.mrf.mxu0  ;;  %v801_v27 = vpop.f32.mrf.mxu1 }
 0x12e   : > { %v749_v28 = vadd.f32 %v748_v26, %v641_v25  ;;  %v802_v29 = vadd.f32 %v801_v27, %v641_v25 }
 0x130   : > { %v835_v30 = vmul.f32 0.35355338, %v749_v28  ;;  %v836_v31 = vmul.f32 0.35355338, %v802_v29 }
 0x132   : > { %873 = vxpose.xlu2.b32.cont [3/4] (short) %v836_v31, 128  ;;  %841 = vxpose.xlu1.b32.cont [3/4] (short) %v835_v30, 128 }
 0x135   : > { %v751_v33 = vpop.f32.mrf.mxu0  ;;  %v804_v34 = vpop.f32.mrf.mxu1 }
 0x136   : > { %v752_v35 = vadd.f32 %v751_v33, %v646_v32  ;;  %v805_v36 = vadd.f32 %v804_v34, %v646_v32 }
 0x138   : > { %v837_v37 = vmul.f32 0.35355338, %v752_v35  ;;  %v838_v38 = vmul.f32 0.35355338, %v805_v36 }
 0x13a   : > { %874 = vxpose.xlu2.b32.end [4/4] (short) %v838_v38, 128  ;;  %842 = vxpose.xlu1.b32.end [4/4] (short) %v837_v37, 128 }
 0x13d   : > { %v754_v40 = vpop.f32.mrf.mxu0  ;;  %v807_v41 = vpop.f32.mrf.mxu1 }
 0x13e   : > { %v755_v42 = vadd.f32 %v754_v40, %v651_v39  ;;  %v808_v43 = vadd.f32 %v807_v41, %v651_v39 }
 0x140   : > { %1015 = vmatpush.msra.mxu2 %v755_v42  ;;  %1128 = vmatpush.msra.mxu3 %v808_v43 }
 0x1bb   : > { %v8644_v63 = vpop.trf.xlu2 }
 0x1bc   : > { %14642 = vst [vmem:[#allocation22_spill] sm:$0xff] %v8644_v63 }
 0x1c3   : > { %v8658_v53 = vpop.trf.xlu2 }
 0x1c4   : > { %14645 = vst [vmem:[#allocation25_spill] sm:$0xff] %v8658_v53 }
 0x1c6   : > { %v8572_v44 = vpop.trf.xlu1 }
 0x1c7   : > { %14630 = vst [vmem:[#allocation10_spill] sm:$0xff] %v8572_v44  ;;  %7121 = vmatmul.msk.f32.vlgmr.msra.gmra.mxu2 %vm903_vm8, %v8572_v44  ;;  %7153 = vmatmul.msk.f32.vlgmr.msra.gmra.mxu3 %vm903_vm8, %v8572_v44 }
 0x1cb   : > { %v8666_v56 = vpop.trf.xlu2 }
 0x1cc   : > { %14647 = vst [vmem:[#allocation27_spill] sm:$0xff] %v8666_v56 }
 0x1ce   : > { %v8578_v46 = vpop.trf.xlu1 }
 0x1cf   : > { %14631 = vst [vmem:[#allocation11_spill] sm:$0xff] %v8578_v46  ;;  %7122 = vmatmul.msk.f32.gmra.mxu2 %vm903_vm8, %v8578_v46  ;;  %7154 = vmatmul.msk.f32.gmra.mxu3 %vm903_vm8, %v8578_v46 }
 0x1d3   : > { %v8674_v4 = vpop.trf.xlu2 }
 0x1d4   : > { %14649 = vst [vmem:[#allocation29_spill] sm:$0xff] %v8674_v4 }
 0x1d6   : > { %v8584_v47 = vpop.trf.xlu1 }
 0x1d7   : > { %14632 = vst [vmem:[#allocation12_spill] sm:$0xff] %v8584_v47  ;;  %7123 = vmatmul.msk.f32.gmra.mxu2 %vm903_vm8, %v8584_v47  ;;  %7155 = vmatmul.msk.f32.gmra.mxu3 %vm903_vm8, %v8584_v47 }
 0x1db   : > { %v8684_v7 = vpop.trf.xlu2 }
 0x1dc   : > { %14652 = vst [vmem:[#allocation32_spill] sm:$0xff] %v8684_v7 }
 0x1de   : > { %v8590_v48 = vpop.trf.xlu1 }
 0x1df   : > { %14633 = vst [vmem:[#allocation13_spill] sm:$0xff] %v8590_v48  ;;  %7124 = vmatmul.msk.f32.gmra.mxu2 %vm903_vm8, %v8590_v48  ;;  %7156 = vmatmul.msk.f32.gmra.mxu3 %vm903_vm8, %v8590_v48 }
 0x1e3   : > { %v8698_v52 = vpop.trf.xlu2 }
 0x1e4   : > { %14653 = vst [vmem:[#allocation33_spill] sm:$0xff] %v8698_v52 }
 0x1e6   : > { %v8596_v54 = vpop.trf.xlu1 }
 0x1e7   : > { %14634 = vst [vmem:[#allocation14_spill] sm:$0xff] %v8596_v54  ;;  %7125 = vmatmul.msk.f32.gmra.mxu2 %vm903_vm8, %v8596_v54  ;;  %7157 = vmatmul.msk.f32.gmra.mxu3 %vm903_vm8, %v8596_v54 }
 0x1eb   : > { %v8708_v9 = vpop.trf.xlu2 }
 0x1ec   : > { %14654 = vst [vmem:[#allocation34_spill] sm:$0xff] %v8708_v9 }
 0x1ee   : > { %v8602_v55 = vpop.trf.xlu1 }
 0x1ef   : > { %14635 = vst [vmem:[#allocation15_spill] sm:$0xff] %v8602_v55  ;;  %7126 = vmatmul.msk.f32.gmra.mxu2 %vm903_vm8, %v8602_v55  ;;  %7158 = vmatmul.msk.f32.gmra.mxu3 %vm903_vm8, %v8602_v55 }
 0x1f3   : > { %v8722_v14 = vpop.trf.xlu2 }
 0x1f4   : > { %14655 = vst [vmem:[#allocation35_spill] sm:$0xff] %v8722_v14 }
 0x1f6   : > { %v8608_v57 = vpop.trf.xlu1 }
 0x1f7   : > { %14636 = vst [vmem:[#allocation16_spill] sm:$0xff] %v8608_v57  ;;  %7127 = vmatmul.msk.f32.gmra.mxu2 %vm903_vm8, %v8608_v57  ;;  %7159 = vmatmul.msk.f32.gmra.mxu3 %vm903_vm8, %v8608_v57 }
 0x1fb   : > { %v8732_v17 = vpop.trf.xlu2 }
 0x1fc   : > { %14656 = vst [vmem:[#allocation36_spill] sm:$0xff] %v8732_v17 }
 0x1fe   : > { %v8614_v58 = vpop.trf.xlu1 }
 0x1ff   : > { %14637 = vst [vmem:[#allocation17_spill] sm:$0xff] %v8614_v58  ;;  %7128 = vmatmul.msk.f32.gmra.mxu2 %vm903_vm8, %v8614_v58  ;;  %7160 = vmatmul.msk.f32.gmra.mxu3 %vm903_vm8, %v8614_v58 }
 0x203   : > { %v8746_v20 = vpop.trf.xlu2 }
 0x204   : > { %14657 = vst [vmem:[#allocation37_spill] sm:$0xff] %v8746_v20 }
 0x206   : > { %v8620_v60 = vpop.trf.xlu1 }
 0x207   : > { %14638 = vst [vmem:[#allocation18_spill] sm:$0xff] %v8620_v60  ;;  %7129 = vmatmul.msk.f32.gmra.mxu2 %vm903_vm8, %v8620_v60  ;;  %7161 = vmatmul.msk.f32.gmra.mxu3 %vm903_vm8, %v8620_v60 }
 0x20b   : > { %v8756_v23 = vpop.trf.xlu2 }
 0x20c   : > { %14658 = vst [vmem:[#allocation38_spill] sm:$0xff] %v8756_v23 }
 0x20e   : > { %v8626_v59 = vpop.trf.xlu1 }
 0x20f   : > { %14639 = vst [vmem:[#allocation19_spill] sm:$0xff] %v8626_v59  ;;  %7130 = vmatmul.msk.f32.gmra.mxu2 %vm903_vm8, %v8626_v59  ;;  %7162 = vmatmul.msk.f32.gmra.mxu3 %vm903_vm8, %v8626_v59 }
 0x213   : > { %v8770_v28 = vpop.trf.xlu2 }
 0x214   : > { %14659 = vst [vmem:[#allocation39_spill] sm:$0xff] %v8770_v28 }
 0x216   : > { %v8632_v61 = vpop.trf.xlu1 }
 0x217   : > { %14640 = vst [vmem:[#allocation20_spill] sm:$0xff] %v8632_v61  ;;  %7131 = vmatmul.msk.f32.gmra.mxu2 %vm903_vm8, %v8632_v61  ;;  %7163 = vmatmul.msk.f32.gmra.mxu3 %vm903_vm8, %v8632_v61 }
 0x21b   : > { %v8780_v31 = vpop.trf.xlu2 }
 0x21c   : > { %14660 = vst [vmem:[#allocation40_spill] sm:$0xff] %v8780_v31 }
 0x21e   : > { %v8638_v62 = vpop.trf.xlu1 }
 0x21f   : > { %14641 = vst [vmem:[#allocation21_spill] sm:$0xff] %v8638_v62  ;;  %7132 = vmatmul.msk.f32.gmra.mxu2 %vm903_vm8, %v8638_v62  ;;  %7164 = vmatmul.msk.f32.gmra.mxu3 %vm903_vm8, %v8638_v62 }
 0x223   : > { %v8796_v35 = vpop.trf.xlu2 }
 0x224   : > { %14661 = vst [vmem:[#allocation41_spill] sm:$0xff] %v8796_v35 }
 0x226   : > { %v8646_v0 = vpop.trf.xlu1 }
 0x227   : > { %14643 = vst [vmem:[#allocation23_spill] sm:$0xff] %v8646_v0  ;;  %7133 = vmatmul.msk.f32.gmra.mxu2 %vm903_vm8, %v8646_v0  ;;  %7165 = vmatmul.msk.f32.gmra.mxu3 %vm903_vm8, %v8646_v0 }
 0x22b   : > { %v8806_v38 = vpop.trf.xlu2 }
 0x22c   : > { %14662 = vst [vmem:[#allocation42_spill] sm:$0xff] %v8806_v38 }
 0x22e   : > { %v8652_v1 = vpop.trf.xlu1 }
 0x22f   : > { %14644 = vst [vmem:[#allocation24_spill] sm:$0xff] %v8652_v1  ;;  %7134 = vmatmul.msk.f32.gmra.mxu2 %vm903_vm8, %v8652_v1  ;;  %7166 = vmatmul.msk.f32.gmra.mxu3 %vm903_vm8, %v8652_v1 }
 0x233   : > { %v8818_v45 = vpop.trf.xlu2 }
 0x234   : > { %14663 = vst [vmem:[#allocation43_spill] sm:$0xff] %v8818_v45 }
 0x236   : > { %v8660_v2 = vpop.trf.xlu1 }
 0x237   : > { %14646 = vst [vmem:[#allocation26_spill] sm:$0xff] %v8660_v2  ;;  %7135 = vmatmul.msk.f32.gmra.mxu2 %vm903_vm8, %v8660_v2  ;;  %7167 = vmatmul.msk.f32.gmra.mxu3 %vm903_vm8, %v8660_v2 }
 0x23e   : > { %v8668_v3 = vpop.trf.xlu1 }
 0x23f   : > { %14648 = vst [vmem:[#allocation28_spill] sm:$0xff] %v8668_v3  ;;  %7136 = vmatmul.msk.f32.gmra.mxu2 %vm903_vm8, %v8668_v3  ;;  %7168 = vmatmul.msk.f32.gmra.mxu3 %vm903_vm8, %v8668_v3 }
 0x247   : > { %7137 = vmatmul.msk.f32.gmra.mxu2 %vm903_vm8, %v8644_v63  ;;  %7169 = vmatmul.msk.f32.gmra.mxu3 %vm903_vm8, %v8644_v63 }
 0x24a   : > { %v8680_v5 = vpop.f32.mrf.mxu2  ;;  %v8682_v6 = vpop.f32.mrf.mxu3 }
 0x24b   : > { %14650 = vst [vmem:[#allocation30_spill] sm:$0xff] %v8680_v5 }
 0x24c   : > { %14651 = vst [vmem:[#allocation31_spill] sm:$0xff] %v8682_v6 }
 0x24f   : > { %7138 = vmatmul.msk.f32.gmra.mxu2 %vm903_vm8, %v8658_v53  ;;  %7170 = vmatmul.msk.f32.gmra.mxu3 %vm903_vm8, %v8658_v53 }
 0x252   : > { %v8690_v50 = vpop.f32.mrf.mxu2  ;;  %v8692_v8 = vpop.f32.mrf.mxu3 }
 0x257   : > { %7139 = vmatmul.msk.f32.gmra.mxu2 %vm903_vm8, %v8666_v56  ;;  %7171 = vmatmul.msk.f32.gmra.mxu3 %vm903_vm8, %v8666_v56 }
 0x25a   : > { %v8700_v49 = vpop.f32.mrf.mxu2  ;;  %v8702_v51 = vpop.f32.mrf.mxu3 }
 0x25f   : > { %7140 = vmatmul.msk.f32.gmra.mxu2 %vm903_vm8, %v8674_v4  ;;  %7172 = vmatmul.msk.f32.gmra.mxu3 %vm903_vm8, %v8674_v4 }
 0x262   : > { %v8710_v10 = vpop.f32.mrf.mxu2  ;;  %v8712_v11 = vpop.f32.mrf.mxu3 }
 0x267   : > { %7141 = vmatmul.msk.f32.gmra.mxu2 %vm903_vm8, %v8684_v7  ;;  %7173 = vmatmul.msk.f32.gmra.mxu3 %vm903_vm8, %v8684_v7 }
 0x26a   : > { %v8718_v12 = vpop.f32.mrf.mxu2  ;;  %v8720_v13 = vpop.f32.mrf.mxu3 }
 0x26f   : > { %7142 = vmatmul.msk.f32.gmra.mxu2 %vm903_vm8, %v8698_v52  ;;  %7174 = vmatmul.msk.f32.gmra.mxu3 %vm903_vm8, %v8698_v52 }
 0x272   : > { %v8728_v15 = vpop.f32.mrf.mxu2  ;;  %v8730_v16 = vpop.f32.mrf.mxu3 }
 0x277   : > { %7143 = vmatmul.msk.f32.gmra.mxu2 %vm903_vm8, %v8708_v9  ;;  %7175 = vmatmul.msk.f32.gmra.mxu3 %vm903_vm8, %v8708_v9 }
 0x27a   : > { %v8738_v18 = vpop.f32.mrf.mxu2  ;;  %v8740_v19 = vpop.f32.mrf.mxu3 }
 0x27f   : > { %7144 = vmatmul.msk.f32.gmra.mxu2 %vm903_vm8, %v8722_v14  ;;  %7176 = vmatmul.msk.f32.gmra.mxu3 %vm903_vm8, %v8722_v14 }
 0x282   : > { %v8748_v21 = vpop.f32.mrf.mxu2  ;;  %v8750_v22 = vpop.f32.mrf.mxu3 }
 0x287   : > { %7145 = vmatmul.msk.f32.gmra.mxu2 %vm903_vm8, %v8732_v17  ;;  %7177 = vmatmul.msk.f32.gmra.mxu3 %vm903_vm8, %v8732_v17 }
 0x28a   : > { %v8758_v24 = vpop.f32.mrf.mxu2  ;;  %v8760_v25 = vpop.f32.mrf.mxu3 }
 0x28f   : > { %7146 = vmatmul.msk.f32.gmra.mxu2 %vm903_vm8, %v8746_v20  ;;  %7178 = vmatmul.msk.f32.gmra.mxu3 %vm903_vm8, %v8746_v20 }
 0x292   : > { %v8766_v26 = vpop.f32.mrf.mxu2  ;;  %v8768_v27 = vpop.f32.mrf.mxu3 }
 0x297   : > { %7147 = vmatmul.msk.f32.gmra.mxu2 %vm903_vm8, %v8756_v23  ;;  %7179 = vmatmul.msk.f32.gmra.mxu3 %vm903_vm8, %v8756_v23 }
 0x29a   : > { %v8776_v29 = vpop.f32.mrf.mxu2  ;;  %v8778_v30 = vpop.f32.mrf.mxu3 }
 0x29f   : > { %7148 = vmatmul.msk.f32.gmra.mxu2 %vm903_vm8, %v8770_v28  ;;  %7180 = vmatmul.msk.f32.gmra.mxu3 %vm903_vm8, %v8770_v28 }
 0x2a2   : > { %v8786_v32 = vpop.f32.mrf.mxu2  ;;  %v8788_v33 = vpop.f32.mrf.mxu3 }
 0x2a3   : > { %v1259_v34 = vmax.f32 %v8786_v32, %v8788_v33 }
 0x2a5   : > { %1260 = vmax.xlane.f32.xlu1 %v1259_v34 }
 0x2a7   : > { %7149 = vmatmul.msk.f32.gmra.mxu2 %vm903_vm8, %v8780_v31  ;;  %7181 = vmatmul.msk.f32.gmra.mxu3 %vm903_vm8, %v8780_v31 }
 0x2aa   : > { %v8798_v36 = vpop.f32.mrf.mxu2  ;;  %v8800_v37 = vpop.f32.mrf.mxu3 }
 0x2af   : > { %7150 = vmatmul.msk.f32.gmra.mxu2 %vm903_vm8, %v8796_v35  ;;  %7182 = vmatmul.msk.f32.gmra.mxu3 %vm903_vm8, %v8796_v35 }
 0x2b2   : > { %v1056_v39 = vpop.f32.mrf.mxu2  ;;  %v1169_v40 = vpop.f32.mrf.mxu3 }
 0x2b3   : > { %v1265_v41 = vmax.f32 %v1056_v39, %v1169_v40 }
 0x2b5   : > { %1266 = vmax.xlane.f32.xlu0 %v1265_v41 }
 0x2b7   : > { %7151 = vmatmul.msk.f32.gmra.mxu2 %vm903_vm8, %v8806_v38  ;;  %7183 = vmatmul.msk.f32.gmra.mxu3 %vm903_vm8, %v8806_v38 }
 0x2ba   : > { %v8812_v42 = vpop.f32.mrf.mxu2  ;;  %v8814_v43 = vpop.f32.mrf.mxu3 }
 0x2bb   : > { %v1268_v34 = vmax.f32 %v8812_v42, %v8814_v43 }
 0x2bd   : > { %1269 = vmax.xlane.f32.xlu0 %v1268_v34  ;;  %v1262_v34 = vmax.f32 %v8798_v36, %v8800_v37 }
 0x2bf   : > { %7152 = vmatmul.msk.f32.gmra.mxu2 %vm903_vm8, %v8818_v45  ;;  %7184 = vmatmul.msk.f32.gmra.mxu3 %vm903_vm8, %v8818_v45 }
 0x2c2   : > { %v8824_v41 = vpop.f32.mrf.mxu2  ;;  %v8826_v31 = vpop.f32.mrf.mxu3 }
 0x2c3   : > { %14664 = vst [vmem:[#allocation44_spill] sm:$0xff] %v8824_v41  ;;  %v1271_v20 = vmax.f32 %v8824_v41, %v8826_v31 }
 0x2c4   : > { %14665 = vst [vmem:[#allocation45_spill] sm:$0xff] %v8826_v31 }
 0x2c5   : > { %1272 = vmax.xlane.f32.xlu0 %v1271_v20 }
 0x2ca   : > { %v8830_v38 = vpop.f32.mrf.mxu2  ;;  %v8832_v9 = vpop.f32.mrf.mxu3 }
 0x2cb   : > { %14666 = vst [vmem:[#allocation46_spill] sm:$0xff] %v8830_v38  ;;  %v1274_v52 = vmax.f32 %v8830_v38, %v8832_v9 }
 0x2cc   : > { %14667 = vst [vmem:[#allocation47_spill] sm:$0xff] %v8832_v9 }
 0x2cd   : > { %1263 = vmax.xlane.f32.xlu0 %v1262_v34 }
 0x2d2   : > { %v8836_v35 = vpop.f32.mrf.mxu2  ;;  %v8838_v28 = vpop.f32.mrf.mxu3 }
 0x2d3   : > { %14668 = vst [vmem:[#allocation48_spill] sm:$0xff] %v8836_v35  ;;  %v1277_v63 = vmax.f32 %v8836_v35, %v8838_v28 }
 0x2d4   : > { %14669 = vst [vmem:[#allocation49_spill] sm:$0xff] %v8838_v28 }
 0x2da   : > { %v8840_v45 = vpop.f32.mrf.mxu2  ;;  %v8842_v4 = vpop.f32.mrf.mxu3 }
 0x2db   : > { %14670 = vst [vmem:[#allocation50_spill] sm:$0xff] %v8840_v45  ;;  %v1280_v23 = vmax.f32 %v8840_v45, %v8842_v4 }
 0x2dc   : > { %14671 = vst [vmem:[#allocation51_spill] sm:$0xff] %v8842_v4 }
 0x2dd   : > { %1281 = vmax.xlane.f32.xlu1 %v1280_v23 }
 0x2e2   : > { %v8846_v20 = vpop.f32.mrf.mxu2  ;;  %v8848_v17 = vpop.f32.mrf.mxu3 }
 0x2e5   : > { %1278 = vmax.xlane.f32.xlu1 %v1277_v63 }
 0x2ea   : > { %v8852_v34 = vpop.f32.mrf.mxu2  ;;  %v8854_v14 = vpop.f32.mrf.mxu3 }
 0x2ed   : > { %1275 = vmax.xlane.f32.xlu1 %v1274_v52 }
 0x2f2   : > { %v8858_v1 = vpop.f32.mrf.mxu2  ;;  %v8860_v7 = vpop.f32.mrf.mxu3 }
 0x2fa   : > { %v8862_v23 = vpop.f32.mrf.mxu2  ;;  %v8864_v56 = vpop.f32.mrf.mxu3 }
 0x302   : > { %v8866_v61 = vpop.f32.mrf.mxu2  ;;  %v8868_v53 = vpop.f32.mrf.mxu3 }
 0x30a   : > { %v8870_v63 = vpop.f32.mrf.mxu2  ;;  %v8872_v3 = vpop.f32.mrf.mxu3 }
 0x312   : > { %v8874_v58 = vpop.f32.mrf.mxu2  ;;  %v8876_v2 = vpop.f32.mrf.mxu3 }
 0x31a   : > { %v8878_v52 = vpop.f32.mrf.mxu2  ;;  %v8880_v0 = vpop.f32.mrf.mxu3 }
 0x322   : > { %v8882_v54 = vpop.f32.mrf.mxu2  ;;  %v8884_v62 = vpop.f32.mrf.mxu3 }
 0x328   : > { %v1267_v59 = vpop.xlane.xlu0 %1266 }
 0x329   : > { %v1348_v47 = vsub.f32 %v1056_v39, %v1267_v59  ;;  %v1349_v9 = vsub.f32 %v1169_v40, %v1267_v59 }
 0x32a   : > { %v8886_v46 = vpop.f32.mrf.mxu2  ;;  %v8888_v60 = vpop.f32.mrf.mxu3 }
 0x32b   : > { %v1438_v4 = vmul.f32 1.442695, %v1348_v47  ;;  %v1440_v45 = vmul.f32 1.442695, %v1349_v9  ;;  %v1261_v9 = vpop.xlane.xlu1 %1260 }
 0x32d   : > { %7472 = vpow2.f32 %v1438_v4 }
 0x32e   : > { %7474 = vpow2.f32 %v1440_v45 }
 0x330   : > { %v8890_v57 = vpop.xlane.xlu0 %1269 }
 0x332   : > { %v8892_v44 = vpop.f32.mrf.mxu2  ;;  %v8894_v55 = vpop.f32.mrf.mxu3 }
 0x333   : > { %v1313_v39 = vmax.f32 %v8892_v44, %v8894_v55 }
 0x338   : > { %v8896_v48 = vpop.xlane.xlu0 %1272 }
 0x33a   : > { %v8898_v38 = vpop.f32.mrf.mxu2  ;;  %v8900_v28 = vpop.f32.mrf.mxu3 }
 0x33b   : > { %v1316_v35 = vmax.f32 %v8898_v38, %v8900_v28 }
 0x33d   : > { %1317 = vmax.xlane.f32.xlu0 %v1316_v35  ;;  %v8914_v35 = vpop.eup %7472 }
 0x33e   : > { %v8916_v45 = vpop.eup %7474 }
 0x340   : > { %v1264_v5 = vpop.xlane.xlu0 %1263 }
 0x341   : > { %v1346_v6 = vsub.f32 %v8798_v36, %v1264_v5  ;;  %v1347_v31 = vsub.f32 %v8800_v37, %v1264_v5  ;;  %v1344_v5 = vsub.f32 %v8786_v32, %v1261_v9  ;;  %v1345_v36 = vsub.f32 %v8788_v33, %v1261_v9 }
 0x342   : > { %v8906_v41 = vpop.f32.mrf.mxu2  ;;  %v8908_v59 = vpop.f32.mrf.mxu3  ;;  %v1256_v37 = vmax.f32 %v8776_v29, %v8778_v30  ;;  %v1310_v32 = vmax.f32 %v8886_v46, %v8888_v60 }
 0x343   : > { %14672 = vst [vmem:[#allocation52_spill] sm:$0xff] %v8908_v59  ;;  %v1319_v40 = vmax.f32 %v8906_v41, %v8908_v59  ;;  %v1434_v47 = vmul.f32 1.442695, %v1346_v6  ;;  %v1436_v4 = vmul.f32 1.442695, %v1347_v31  ;;  %v1553_v6 = vadd.f32 %v8916_v45, %v8914_v35 }
 0x344   : > { %v1432_v31 = vmul.f32 1.442695, %v1345_v36  ;;  %v1307_v36 = vmax.f32 %v8882_v54, %v8884_v62 }
 0x345   : > { %1314 = vmax.xlane.f32.xlu0 %v1313_v39  ;;  %1320 = vmax.xlane.f32.xlu2 %v1319_v40  ;;  %7476 = vpow2.f32 %v1434_v47  ;;  %v1430_v39 = vmul.f32 1.442695, %v1344_v5 }
 0x346   : > { %7478 = vpow2.f32 %v1436_v4  ;;  %v1253_v4 = vmax.f32 %v8766_v26, %v8768_v27 }
 0x347   : > { %7480 = vpow2.f32 %v1430_v39  ;;  %v1247_v39 = vmax.f32 %v8748_v21, %v8750_v22 }
 0x348   : > { %7482 = vpow2.f32 %v1432_v31  ;;  %v1301_v31 = vmax.f32 %v8874_v58, %v8876_v2 }
 0x34b   : > { %v8924_v40 = vpop.eup %7476 }
 0x34c   : > { %14673 = vst [vmem:[#allocation53_spill] sm:$0xff] %v8924_v40  ;;  %v8926_v59 = vpop.eup %7478 }
 0x34d   : > { %1257 = vmax.xlane.f32.xlu0 %v1256_v37  ;;  %1554 = vadd.xlane.f32.xlu2 %v1553_v6  ;;  %14674 = vst [vmem:[#allocation54_spill] sm:$0xff] %v8926_v59  ;;  %v1550_v33 = vadd.f32 %v8926_v59, %v8924_v40  ;;  %v8932_v47 = vpop.eup %7480  ;;  %v1250_v37 = vmax.f32 %v8758_v24, %v8760_v25 }
 0x34e   : > { %14675 = vst [vmem:[#allocation55_spill] sm:$0xff] %v8932_v47  ;;  %v8934_v9 = vpop.eup %7482  ;;  %v1304_v6 = vmax.f32 %v8878_v52, %v8880_v0  ;;  %v1232_v59 = vmax.f32 %v8700_v49, %v8702_v51 }
 0x34f   : > { %14676 = vst [vmem:[#allocation56_spill] sm:$0xff] %v8934_v9  ;;  %v1547_v5 = vadd.f32 %v8934_v9, %v8932_v47 }
 0x355   : > { %1311 = vmax.xlane.f32.xlu0 %v1310_v32  ;;  %1551 = vadd.xlane.f32.xlu2 %v1550_v33  ;;  %v1244_v32 = vmax.f32 %v8738_v18, %v8740_v19  ;;  %v1298_v33 = vmax.f32 %v8870_v63, %v8872_v3 }
 0x35d   : > { %1254 = vmax.xlane.f32.xlu0 %v1253_v4  ;;  %1548 = vadd.xlane.f32.xlu2 %v1547_v5  ;;  %v1241_v4 = vmax.f32 %v8728_v15, %v8730_v16  ;;  %v1295_v5 = vmax.f32 %v8866_v61, %v8868_v53 }
 0x365   : > { %1308 = vmax.xlane.f32.xlu0 %v1307_v36  ;;  %v1238_v36 = vmax.f32 %v8718_v12, %v8720_v13 }
 0x36d   : > { %1251 = vmax.xlane.f32.xlu0 %v1250_v37 }
 0x375   : > { %1305 = vmax.xlane.f32.xlu0 %v1304_v6  ;;  %v1292_v6 = vmax.f32 %v8862_v23, %v8864_v56 }
 0x37d   : > { %1248 = vmax.xlane.f32.xlu0 %v1247_v39 }
 0x385   : > { %1302 = vmax.xlane.f32.xlu0 %v1301_v31  ;;  %v1235_v31 = vmax.f32 %v8710_v10, %v8712_v11 }
 0x38d   : > { %1245 = vmax.xlane.f32.xlu0 %v1244_v32 }
 0x395   : > { %1299 = vmax.xlane.f32.xlu0 %v1298_v33 }
 0x39d   : > { %1242 = vmax.xlane.f32.xlu0 %v1241_v4 }
 0x3a5   : > { %1296 = vmax.xlane.f32.xlu0 %v1295_v5 }
 0x3ad   : > { %1239 = vmax.xlane.f32.xlu0 %v1238_v36  ;;  %v1289_v36 = vmax.f32 %v8858_v1, %v8860_v7 }
 0x3b0   : > { %v8960_v37 = vpop.xlane.xlu0 %1317 }
 0x3b5   : > { %1293 = vmax.xlane.f32.xlu0 %v1292_v6 }
 0x3b8   : > { %v8964_v39 = vpop.xlane.xlu0 %1314 }
 0x3bd   : > { %1236 = vmax.xlane.f32.xlu0 %v1235_v31 }
 0x3c0   : > { %v1258_v32 = vpop.xlane.xlu0 %1257 }
 0x3c1   : > { %v1342_v33 = vsub.f32 %v8776_v29, %v1258_v32  ;;  %v1343_v4 = vsub.f32 %v8778_v30, %v1258_v32  ;;  %v1286_v32 = vmax.f32 %v8852_v34, %v8854_v14 }
 0x3c3   : > { %v1426_v5 = vmul.f32 1.442695, %v1342_v33  ;;  %v1428_v9 = vmul.f32 1.442695, %v1343_v4 }
 0x3c5   : > { %7484 = vpow2.f32 %v1426_v5  ;;  %1290 = vmax.xlane.f32.xlu0 %v1289_v36 }
 0x3c6   : > { %7486 = vpow2.f32 %v1428_v9  ;;  %v1350_v9 = vsub.f32 %v8812_v42, %v8890_v57 }
 0x3c8   : > { %v1312_v6 = vpop.xlane.xlu0 %1311 }
 0x3cb   : > { %v8972_v47 = vpop.eup %7484 }
 0x3cc   : > { %14677 = vst [vmem:[#allocation57_spill] sm:$0xff] %v8972_v47  ;;  %v8976_v31 = vpop.eup %7486 }
 0x3cd   : > { %14678 = vst [vmem:[#allocation58_spill] sm:$0xff] %v8976_v31  ;;  %1233 = vmax.xlane.f32.xlu0 %v1232_v59  ;;  %v1544_v29 = vadd.f32 %v8976_v31, %v8972_v47  ;;  %v1351_v59 = vsub.f32 %v8814_v43, %v8890_v57  ;;  %v1442_v31 = vmul.f32 1.442695, %v1350_v9  ;;  %v1378_v57 = vsub.f32 %v8886_v46, %v1312_v6 }
 0x3ce   : > { %v1283_v9 = vmax.f32 %v8846_v20, %v8848_v17 }
 0x3cf   : > { %1545 = vadd.xlane.f32.xlu1 %v1544_v29  ;;  %v1229_v29 = vmax.f32 %v8690_v50, %v8692_v8 }
 0x3d0   : > { %v1255_v30 = vpop.xlane.xlu0 %1254 }
 0x3d5   : > { %1287 = vmax.xlane.f32.xlu0 %v1286_v32  ;;  %v1444_v32 = vmul.f32 1.442695, %v1351_v59  ;;  %v1340_v59 = vsub.f32 %v8766_v26, %v1255_v30 }
 0x3d8   : > { %v1309_v33 = vpop.xlane.xlu0 %1308 }
 0x3d9   : > { %v1376_v4 = vsub.f32 %v8882_v54, %v1309_v33  ;;  %v1377_v5 = vsub.f32 %v8884_v62, %v1309_v33 }
 0x3db   : > { %v1494_v36 = vmul.f32 1.442695, %v1376_v4  ;;  %v1496_v40 = vmul.f32 1.442695, %v1377_v5 }
 0x3dd   : > { %7488 = vpow2.f32 %v1494_v36  ;;  %1230 = vmax.xlane.f32.xlu0 %v1229_v29  ;;  %v1341_v36 = vsub.f32 %v8768_v27, %v1255_v30  ;;  %v14682_v27 = vld [vmem:[#allocation44_spill] sm:$0xff] }
 0x3de   : > { %7490 = vpow2.f32 %v1496_v40  ;;  %v1379_v40 = vsub.f32 %v8888_v60, %v1312_v6  ;;  %v1352_v30 = vsub.f32 %v14682_v27, %v8896_v48 }
 0x3df   : > { %7492 = vpow2.f32 %v1442_v31 }
 0x3e0   : > { %v1252_v47 = vpop.xlane.xlu0 %1251  ;;  %7494 = vpow2.f32 %v1444_v32  ;;  %v1500_v31 = vmul.f32 1.442695, %v1379_v40  ;;  %v1422_v32 = vmul.f32 1.442695, %v1340_v59  ;;  %v14684_v40 = vld [vmem:[#allocation45_spill] sm:$0xff]  ;;  %v14685_v59 = vld [vmem:[#allocation31_spill] sm:$0xff] }
 0x3e1   : > { %v1338_v42 = vsub.f32 %v8758_v24, %v1252_v47  ;;  %v1339_v54 = vsub.f32 %v8760_v25, %v1252_v47  ;;  %v1498_v47 = vmul.f32 1.442695, %v1378_v57 }
 0x3e3   : > { %v8992_v62 = vpop.eup %7488  ;;  %v1418_v43 = vmul.f32 1.442695, %v1338_v42  ;;  %v1420_v33 = vmul.f32 1.442695, %v1339_v54  ;;  %v1424_v54 = vmul.f32 1.442695, %v1341_v36 }
 0x3e4   : > { %14679 = vst [vmem:[#allocation59_spill] sm:$0xff] %v8992_v62  ;;  %v8997_v4 = vpop.eup %7490  ;;  %v14686_v36 = vld [vmem:[#allocation30_spill] sm:$0xff] }
 0x3e5   : > { %14680 = vst [vmem:[#allocation60_spill] sm:$0xff] %v8997_v4  ;;  %7496 = vpow2.f32 %v1418_v43  ;;  %1284 = vmax.xlane.f32.xlu0 %v1283_v9  ;;  %v1595_v24 = vadd.f32 %v8997_v4, %v8992_v62  ;;  %v9002_v25 = vpop.eup %7492 }
 0x3e6   : > { %7498 = vpow2.f32 %v1420_v33  ;;  %v9004_v46 = vpop.eup %7494 }
 0x3e7   : > { %1596 = vadd.xlane.f32.xlu1 %v1595_v24  ;;  %7500 = vpow2.f32 %v1498_v47  ;;  %v1556_v6 = vadd.f32 %v9004_v46, %v9002_v25  ;;  %v1353_v24 = vsub.f32 %v14684_v40, %v8896_v48 }
 0x3e8   : > { %v9006_v5 = vpop.xlane.xlu0 %1305  ;;  %7502 = vpow2.f32 %v1500_v31 }
 0x3e9   : > { %7504 = vpow2.f32 %v1422_v32 }
 0x3ea   : > { %7506 = vpow2.f32 %v1424_v54  ;;  %v1380_v54 = vsub.f32 %v8892_v44, %v8964_v39 }
 0x3eb   : > { %v9010_v60 = vpop.eup %7496 }
 0x3ec   : > { %v9014_v29 = vpop.eup %7498 }
 0x3ed   : > { %1557 = vadd.xlane.f32.xlu0 %v1556_v6  ;;  %v1538_v42 = vadd.f32 %v9014_v29, %v9010_v60  ;;  %v9018_v26 = vpop.eup %7500  ;;  %v1226_v6 = vmax.f32 %v14686_v36, %v14685_v59 }
 0x3ee   : > { %14681 = vst [vmem:[#allocation61_spill] sm:$0xff] %v9018_v26  ;;  %v9024_v9 = vpop.eup %7502 }
 0x3ef   : > { %1539 = vadd.xlane.f32.xlu2 %v1538_v42  ;;  %14683 = vst [vmem:[#allocation44_spill] sm:$0xff] %v9024_v9  ;;  %v1446_v42 = vmul.f32 1.442695, %v1352_v30  ;;  %v1598_v32 = vadd.f32 %v9024_v9, %v9018_v26 }
 0x3f0   : > { %v1249_v57 = vpop.xlane.xlu0 %1248 }
 0x3f1   : > { %v1336_v43 = vsub.f32 %v8748_v21, %v1249_v57  ;;  %v1337_v33 = vsub.f32 %v8750_v22, %v1249_v57  ;;  %v1448_v21 = vmul.f32 1.442695, %v1353_v24  ;;  %v9032_v22 = vpop.eup %7504 }
 0x3f2   : > { %v9034_v57 = vpop.eup %7506 }
 0x3f3   : > { %v1414_v47 = vmul.f32 1.442695, %v1336_v43  ;;  %v1416_v31 = vmul.f32 1.442695, %v1337_v33  ;;  %v1381_v43 = vsub.f32 %v8894_v55, %v8964_v39 }
 0x3f5   : > { %7508 = vpow2.f32 %v1414_v47  ;;  %1227 = vmax.xlane.f32.xlu0 %v1226_v6  ;;  %v1541_v47 = vadd.f32 %v9034_v57, %v9032_v22  ;;  %v1502_v6 = vmul.f32 1.442695, %v1380_v54 }
 0x3f6   : > { %7510 = vpow2.f32 %v1416_v31 }
 0x3f7   : > { %1599 = vadd.xlane.f32.xlu2 %v1598_v32  ;;  %7512 = vpow2.f32 %v1446_v42  ;;  %v1382_v42 = vsub.f32 %v8898_v38, %v8960_v37  ;;  %v1383_v32 = vsub.f32 %v8900_v28, %v8960_v37  ;;  %v1321_v28 = vpop.xlane.xlu2 %1320 }
 0x3f8   : > { %v1303_v48 = vpop.xlane.xlu0 %1302  ;;  %7514 = vpow2.f32 %v1448_v21 }
 0x3f9   : > { %v1372_v27 = vsub.f32 %v8874_v58, %v1303_v48  ;;  %v1373_v30 = vsub.f32 %v8876_v2, %v1303_v48  ;;  %v1504_v58 = vmul.f32 1.442695, %v1381_v43  ;;  %v1508_v43 = vmul.f32 1.442695, %v1383_v32 }
 0x3fb   : > { %v9042_v33 = vpop.eup %7508  ;;  %v1486_v40 = vmul.f32 1.442695, %v1372_v27  ;;  %v1488_v24 = vmul.f32 1.442695, %v1373_v30  ;;  %v1506_v27 = vmul.f32 1.442695, %v1382_v42 }
 0x3fc   : > { %v9046_v31 = vpop.eup %7510 }
 0x3fd   : > { %7516 = vpow2.f32 %v1486_v40  ;;  %1542 = vadd.xlane.f32.xlu0 %v1541_v47  ;;  %v1535_v44 = vadd.f32 %v9046_v31, %v9042_v33  ;;  %v9050_v2 = vpop.eup %7512 }
 0x3fe   : > { %7518 = vpow2.f32 %v1488_v24  ;;  %v9052_v55 = vpop.eup %7514  ;;  %v1384_v24 = vsub.f32 %v8906_v41, %v1321_v28 }
 0x3ff   : > { %1536 = vadd.xlane.f32.xlu1 %v1535_v44  ;;  %7520 = vpow2.f32 %v1502_v6  ;;  %v1559_v48 = vadd.f32 %v9052_v55, %v9050_v2  ;;  %v14691_v44 = vld [vmem:[#allocation52_spill] sm:$0xff] }
 0x400   : > { %v9054_v39 = vpop.xlane.xlu0 %1245  ;;  %7522 = vpow2.f32 %v1504_v58  ;;  %v1385_v58 = vsub.f32 %v14691_v44, %v1321_v28 }
 0x401   : > { %7524 = vpow2.f32 %v1506_v27 }
 0x402   : > { %7526 = vpow2.f32 %v1508_v43 }
 0x403   : > { %v9060_v21 = vpop.eup %7516 }
 0x404   : > { %14687 = vst [vmem:[#allocation45_spill] sm:$0xff] %v9060_v21  ;;  %v9064_v54 = vpop.eup %7518 }
 0x405   : > { %14688 = vst [vmem:[#allocation31_spill] sm:$0xff] %v9064_v54  ;;  %1560 = vadd.xlane.f32.xlu0 %v1559_v48  ;;  %v1589_v30 = vadd.f32 %v9064_v54, %v9060_v21  ;;  %v9068_v40 = vpop.eup %7520  ;;  %v1512_v54 = vmul.f32 1.442695, %v1385_v58 }
 0x406   : > { %14689 = vst [vmem:[#allocation30_spill] sm:$0xff] %v9068_v40  ;;  %v9070_v38 = vpop.eup %7522 }
 0x407   : > { %1590 = vadd.xlane.f32.xlu2 %v1589_v30  ;;  %14690 = vst [vmem:[#allocation62_spill] sm:$0xff] %v9070_v38  ;;  %v1601_v32 = vadd.f32 %v9070_v38, %v9068_v40  ;;  %v1510_v30 = vmul.f32 1.442695, %v1384_v24  ;;  %v9078_v27 = vpop.eup %7524  ;;  %v14723_v40 = vld [vmem:[#allocation12_spill] sm:$0xff] }
 0x408   : > { %v1300_v37 = vpop.xlane.xlu0 %1299  ;;  %14692 = vst [vmem:[#allocation52_spill] sm:$0xff] %v9078_v27  ;;  %v9080_v41 = vpop.eup %7526 }
 0x409   : > { %v1370_v47 = vsub.f32 %v8870_v63, %v1300_v37  ;;  %v1371_v6 = vsub.f32 %v8872_v3, %v1300_v37  ;;  %14693 = vst [vmem:[#allocation63_spill] sm:$0xff] %v9080_v41  ;;  %v1374_v3 = vsub.f32 %v8878_v52, %v9006_v5  ;;  %v1375_v37 = vsub.f32 %v8880_v0, %v9006_v5 }
 0x40a   : > { %v1604_v44 = vadd.f32 %v9080_v41, %v9078_v27 }
 0x40b   : > { %v1482_v42 = vmul.f32 1.442695, %v1370_v47  ;;  %v1484_v48 = vmul.f32 1.442695, %v1371_v6 }
 0x40d   : > { %7528 = vpow2.f32 %v1482_v42  ;;  %1602 = vadd.xlane.f32.xlu0 %v1601_v32  ;;  %v1490_v42 = vmul.f32 1.442695, %v1374_v3 }
 0x40e   : > { %7530 = vpow2.f32 %v1484_v48  ;;  %v1335_v48 = vsub.f32 %v8740_v19, %v9054_v39 }
 0x40f   : > { %7532 = vpow2.f32 %v1510_v30 }
 0x410   : > { %v1243_v63 = vpop.xlane.xlu0 %1242  ;;  %7534 = vpow2.f32 %v1512_v54  ;;  %v1334_v54 = vsub.f32 %v8738_v18, %v9054_v39 }
 0x411   : > { %v1332_v43 = vsub.f32 %v8728_v15, %v1243_v63  ;;  %v1333_v28 = vsub.f32 %v8730_v16, %v1243_v63  ;;  %v1492_v16 = vmul.f32 1.442695, %v1375_v37 }
 0x412   : > { %v1410_v3 = vmul.f32 1.442695, %v1334_v54 }
 0x413   : > { %v9088_v24 = vpop.eup %7528  ;;  %v1406_v47 = vmul.f32 1.442695, %v1332_v43  ;;  %v1408_v6 = vmul.f32 1.442695, %v1333_v28  ;;  %v1412_v28 = vmul.f32 1.442695, %v1335_v48 }
 0x414   : > { %14694 = vst [vmem:[#allocation64_spill] sm:$0xff] %v9088_v24  ;;  %v9092_v58 = vpop.eup %7530 }
 0x415   : > { %14695 = vst [vmem:[#allocation65_spill] sm:$0xff] %v9092_v58  ;;  %7536 = vpow2.f32 %v1406_v47  ;;  %1605 = vadd.xlane.f32.xlu0 %v1604_v44  ;;  %v1586_v15 = vadd.f32 %v9092_v58, %v9088_v24  ;;  %v9096_v52 = vpop.eup %7532 }
 0x416   : > { %7538 = vpow2.f32 %v1408_v6  ;;  %v9098_v0 = vpop.eup %7534 }
 0x417   : > { %1587 = vadd.xlane.f32.xlu1 %v1586_v15  ;;  %14696 = vst [vmem:[#allocation66_spill] sm:$0xff] %v9098_v0  ;;  %7540 = vpow2.f32 %v1490_v42  ;;  %v1607_v30 = vadd.f32 %v9098_v0, %v9096_v52 }
 0x418   : > { %v1297_v5 = vpop.xlane.xlu0 %1296  ;;  %7542 = vpow2.f32 %v1492_v16 }
 0x419   : > { %7544 = vpow2.f32 %v1410_v3  ;;  %v1368_v19 = vsub.f32 %v8866_v61, %v1297_v5  ;;  %v1369_v44 = vsub.f32 %v8868_v53, %v1297_v5 }
 0x41a   : > { %7546 = vpow2.f32 %v1412_v28 }
 0x41b   : > { %v9104_v32 = vpop.eup %7536  ;;  %v1478_v54 = vmul.f32 1.442695, %v1368_v19  ;;  %v1480_v48 = vmul.f32 1.442695, %v1369_v44 }
 0x41c   : > { %v9108_v63 = vpop.eup %7538 }
 0x41d   : > { %1608 = vadd.xlane.f32.xlu0 %v1607_v30  ;;  %v1529_v43 = vadd.f32 %v9108_v63, %v9104_v32  ;;  %v9112_v37 = vpop.eup %7540 }
 0x41e   : > { %14697 = vst [vmem:[#allocation67_spill] sm:$0xff] %v9112_v37  ;;  %v9114_v18 = vpop.eup %7542 }
 0x41f   : > { %1530 = vadd.xlane.f32.xlu2 %v1529_v43  ;;  %14698 = vst [vmem:[#allocation68_spill] sm:$0xff] %v9114_v18  ;;  %v1592_v16 = vadd.f32 %v9114_v18, %v9112_v37  ;;  %v9122_v30 = vpop.eup %7544 }
 0x420   : > { %v1240_v47 = vpop.xlane.xlu0 %1239  ;;  %v9124_v61 = vpop.eup %7546 }
 0x421   : > { %v1330_v39 = vsub.f32 %v8718_v12, %v1240_v47  ;;  %v1331_v6 = vsub.f32 %v8720_v13, %v1240_v47  ;;  %v1532_v28 = vadd.f32 %v9124_v61, %v9122_v30 }
 0x423   : > { %v1402_v42 = vmul.f32 1.442695, %v1330_v39  ;;  %v1404_v15 = vmul.f32 1.442695, %v1331_v6 }
 0x425   : > { %7548 = vpow2.f32 %v1402_v42  ;;  %1593 = vadd.xlane.f32.xlu0 %v1592_v16 }
 0x426   : > { %7550 = vpow2.f32 %v1404_v15 }
 0x427   : > { %7552 = vpow2.f32 %v1478_v54 }
 0x428   : > { %v1294_v12 = vpop.xlane.xlu0 %1293  ;;  %7554 = vpow2.f32 %v1480_v48 }
 0x429   : > { %v1366_v13 = vsub.f32 %v8862_v23, %v1294_v12  ;;  %v1367_v53 = vsub.f32 %v8864_v56, %v1294_v12 }
 0x42b   : > { %v9128_v5 = vpop.eup %7548  ;;  %v1474_v3 = vmul.f32 1.442695, %v1366_v13  ;;  %v1476_v43 = vmul.f32 1.442695, %v1367_v53 }
 0x42c   : > { %v9132_v47 = vpop.eup %7550 }
 0x42d   : > { %7556 = vpow2.f32 %v1474_v3  ;;  %1533 = vadd.xlane.f32.xlu0 %v1532_v28  ;;  %v1526_v19 = vadd.f32 %v9132_v47, %v9128_v5  ;;  %v9136_v39 = vpop.eup %7552 }
 0x42e   : > { %7558 = vpow2.f32 %v1476_v43  ;;  %14699 = vst [vmem:[#allocation69_spill] sm:$0xff] %v9136_v39  ;;  %v9138_v56 = vpop.eup %7554 }
 0x42f   : > { %1527 = vadd.xlane.f32.xlu1 %v1526_v19  ;;  %14700 = vst [vmem:[#allocation70_spill] sm:$0xff] %v9138_v56  ;;  %v1583_v54 = vadd.f32 %v9138_v56, %v9136_v39  ;;  %v609_v19 = vld [vmem:[%s14342_s3 + $0x28] sm:$0xff] }
 0x430   : > { %v1237_v23 = vpop.xlane.xlu0 %1236  ;;  %7102 = vmatmul.msk.f32.gmra.mxu0 %vm688_vm7, %v609_v19  ;;  %7114 = vmatmul.msk.f32.gmra.mxu1 %vm688_vm7, %v609_v19 }
 0x431   : > { %v1328_v6 = vsub.f32 %v8710_v10, %v1237_v23  ;;  %v1329_v44 = vsub.f32 %v8712_v11, %v1237_v23 }
 0x433   : > { %v9142_v42 = vpop.eup %7556  ;;  %v1398_v15 = vmul.f32 1.442695, %v1328_v6  ;;  %v1400_v16 = vmul.f32 1.442695, %v1329_v44 }
 0x434   : > { %14701 = vst [vmem:[#allocation71_spill] sm:$0xff] %v9142_v42  ;;  %v9146_v48 = vpop.eup %7558 }
 0x435   : > { %14702 = vst [vmem:[#allocation72_spill] sm:$0xff] %v9146_v48  ;;  %7560 = vpow2.f32 %v1398_v15  ;;  %1584 = vadd.xlane.f32.xlu0 %v1583_v54  ;;  %v1580_v12 = vadd.f32 %v9146_v48, %v9142_v42 }
 0x436   : > { %7562 = vpow2.f32 %v1400_v16 }
 0x437   : > { %1581 = vadd.xlane.f32.xlu2 %v1580_v12  ;;  %v610_v12 = vld [vmem:[%s14342_s3 + $0x30] sm:$0xff] }
 0x438   : > { %v1291_v13 = vpop.xlane.xlu0 %1290  ;;  %7103 = vmatmul.msk.f32.gmra.mxu0 %vm688_vm7, %v610_v12  ;;  %7115 = vmatmul.msk.f32.gmra.mxu1 %vm688_vm7, %v610_v12 }
 0x439   : > { %v1364_v10 = vsub.f32 %v8858_v1, %v1291_v13  ;;  %v1365_v11 = vsub.f32 %v8860_v7, %v1291_v13 }
 0x43b   : > { %v9152_v53 = vpop.eup %7560  ;;  %v1470_v3 = vmul.f32 1.442695, %v1364_v10  ;;  %v1472_v43 = vmul.f32 1.442695, %v1365_v11 }
 0x43c   : > { %v9154_v28 = vpop.eup %7562 }
 0x43d   : > { %7564 = vpow2.f32 %v1470_v3  ;;  %v1523_v23 = vadd.f32 %v9154_v28, %v9152_v53 }
 0x43e   : > { %7566 = vpow2.f32 %v1472_v43 }
 0x43f   : > { %1524 = vadd.xlane.f32.xlu0 %v1523_v23  ;;  %v611_v23 = vld [vmem:[%s14342_s3 + $0x38] sm:$0xff] }
 0x440   : > { %v1234_v1 = vpop.xlane.xlu0 %1233  ;;  %7104 = vmatmul.msk.f32.gmra.mxu0 %vm688_vm7, %v611_v23  ;;  %7116 = vmatmul.msk.f32.gmra.mxu1 %vm688_vm7, %v611_v23 }
 0x441   : > { %v1326_v7 = vsub.f32 %v8700_v49, %v1234_v1  ;;  %v1327_v6 = vsub.f32 %v8702_v51, %v1234_v1 }
 0x443   : > { %v9165_v44 = vpop.eup %7564  ;;  %v1394_v15 = vmul.f32 1.442695, %v1326_v7  ;;  %v1396_v16 = vmul.f32 1.442695, %v1327_v6 }
 0x444   : > { %14703 = vst [vmem:[#allocation73_spill] sm:$0xff] %v9165_v44  ;;  %v9167_v54 = vpop.eup %7566 }
 0x445   : > { %14704 = vst [vmem:[#allocation74_spill] sm:$0xff] %v9167_v54  ;;  %7568 = vpow2.f32 %v1394_v15  ;;  %v1577_v13 = vadd.f32 %v9167_v54, %v9165_v44  ;;  %v14718_v54 = vld [vmem:[#allocation47_spill] sm:$0xff] }
 0x446   : > { %7570 = vpow2.f32 %v1396_v16  ;;  %v14706_v16 = vld [vmem:[#allocation50_spill] sm:$0xff] }
 0x447   : > { %1578 = vadd.xlane.f32.xlu1 %v1577_v13 }
 0x448   : > { %v1288_v49 = vpop.xlane.xlu0 %1287 }
 0x449   : > { %v1362_v51 = vsub.f32 %v8852_v34, %v1288_v49  ;;  %v1363_v10 = vsub.f32 %v8854_v14, %v1288_v49  ;;  %v1282_v34 = vpop.xlane.xlu1 %1281 }
 0x44a   : > { %v1358_v12 = vsub.f32 %v14706_v16, %v1282_v34  ;;  %v14709_v16 = vld [vmem:[#allocation48_spill] sm:$0xff] }
 0x44b   : > { %v9178_v11 = vpop.eup %7568  ;;  %v1466_v3 = vmul.f32 1.442695, %v1362_v51  ;;  %v1468_v43 = vmul.f32 1.442695, %v1363_v10  ;;  %v14708_v10 = vld [vmem:[#allocation51_spill] sm:$0xff] }
 0x44c   : > { %v9180_v19 = vpop.eup %7570 }
 0x44d   : > { %7572 = vpow2.f32 %v1466_v3  ;;  %v1520_v1 = vadd.f32 %v9180_v19, %v9178_v11  ;;  %v1359_v3 = vsub.f32 %v14708_v10, %v1282_v34 }
 0x44e   : > { %7574 = vpow2.f32 %v1468_v43  ;;  %v612_v43 = vld [vmem:[%s14342_s3 + $0x40] sm:$0xff] }
 0x44f   : > { %1521 = vadd.xlane.f32.xlu2 %v1520_v1  ;;  %7105 = vmatmul.msk.f32.gmra.mxu0 %vm688_vm7, %v612_v43  ;;  %v1460_v23 = vmul.f32 1.442695, %v1359_v3 }
 0x450   : > { %v1231_v14 = vpop.xlane.xlu0 %1230  ;;  %7117 = vmatmul.msk.f32.gmra.mxu1 %vm688_vm7, %v612_v43  ;;  %v9212_v43 = vpop.xlane.xlu2 %1554 }
 0x451   : > { %v1324_v7 = vsub.f32 %v8690_v50, %v1231_v14  ;;  %v1325_v6 = vsub.f32 %v8692_v8, %v1231_v14  ;;  %v1458_v8 = vmul.f32 1.442695, %v1358_v12  ;;  %v1279_v1 = vpop.xlane.xlu1 %1278  ;;  %vm1823_vm12 = vweird.f32 %v9212_v43 }
 0x453   : > { %v9191_v15 = vpop.eup %7572  ;;  %v1390_v13 = vmul.f32 1.442695, %v1324_v7  ;;  %v1392_v49 = vmul.f32 1.442695, %v1325_v6 }
 0x454   : > { %14705 = vst [vmem:[#allocation75_spill] sm:$0xff] %v9191_v15  ;;  %v9194_v51 = vpop.eup %7574 }
 0x455   : > { %14707 = vst [vmem:[#allocation50_spill] sm:$0xff] %v9194_v51  ;;  %7576 = vpow2.f32 %v1390_v13  ;;  %v1574_v50 = vadd.f32 %v9194_v51, %v9191_v15  ;;  %v1356_v13 = vsub.f32 %v14709_v16, %v1279_v1 }
 0x456   : > { %7578 = vpow2.f32 %v1392_v49  ;;  %v14710_v49 = vld [vmem:[#allocation49_spill] sm:$0xff] }
 0x457   : > { %1575 = vadd.xlane.f32.xlu0 %v1574_v50  ;;  %7580 = vpow2.f32 %v1458_v8  ;;  %v1357_v12 = vsub.f32 %v14710_v49, %v1279_v1 }
 0x458   : > { %v1285_v14 = vpop.xlane.xlu0 %1284  ;;  %7582 = vpow2.f32 %v1460_v23 }
 0x459   : > { %v1360_v34 = vsub.f32 %v8846_v20, %v1285_v14  ;;  %v1361_v7 = vsub.f32 %v8848_v17, %v1285_v14  ;;  %v1454_v17 = vmul.f32 1.442695, %v1356_v13  ;;  %v1456_v3 = vmul.f32 1.442695, %v1357_v12  ;;  %v1276_v16 = vpop.xlane.xlu1 %1275 }
 0x45b   : > { %v9206_v6 = vpop.eup %7576  ;;  %v1462_v10 = vmul.f32 1.442695, %v1360_v34  ;;  %v1464_v51 = vmul.f32 1.442695, %v1361_v7  ;;  %v9230_v7 = vpop.xlane.xlu2 %1551 }
 0x45c   : > { %v9209_v15 = vpop.eup %7578  ;;  %vm1807_vm5 = vweird.f32 %v9230_v7 }
 0x45d   : > { %7584 = vpow2.f32 %v1462_v10  ;;  %v1517_v20 = vadd.f32 %v9209_v15, %v9206_v6  ;;  %v9218_v8 = vpop.eup %7580 }
 0x45e   : > { %7586 = vpow2.f32 %v1464_v51  ;;  %14711 = vst [vmem:[#allocation51_spill] sm:$0xff] %v9218_v8  ;;  %v9220_v14 = vpop.eup %7582 }
 0x45f   : > { %1518 = vadd.xlane.f32.xlu1 %v1517_v20  ;;  %14712 = vst [vmem:[#allocation48_spill] sm:$0xff] %v9220_v14  ;;  %7588 = vpow2.f32 %v1454_v17  ;;  %v1568_v51 = vadd.f32 %v9220_v14, %v9218_v8  ;;  %v14717_v17 = vld [vmem:[#allocation46_spill] sm:$0xff]  ;;  %v1355_v14 = vsub.f32 %v14718_v54, %v1276_v16 }
 0x460   : > { %v9216_v50 = vpop.xlane.xlu0 %1557  ;;  %7590 = vpow2.f32 %v1456_v3  ;;  %v1354_v3 = vsub.f32 %v14717_v17, %v1276_v16 }
 0x461   : > { %v9259_v16 = vpop.xlane.xlu1 %1545  ;;  %vm1839_vm11 = vweird.f32 %v9216_v50 }
 0x463   : > { %v9222_v34 = vpop.eup %7584 }
 0x464   : > { %14713 = vst [vmem:[#allocation49_spill] sm:$0xff] %v9222_v34  ;;  %v9224_v23 = vpop.eup %7586 }
 0x465   : > { %14714 = vst [vmem:[#allocation76_spill] sm:$0xff] %v9224_v23  ;;  %v1571_v1 = vadd.f32 %v9224_v23, %v9222_v34  ;;  %v9232_v10 = vpop.eup %7588 }
 0x466   : > { %14715 = vst [vmem:[#allocation77_spill] sm:$0xff] %v9232_v10  ;;  %v9236_v20 = vpop.eup %7590 }
 0x467   : > { %1572 = vadd.xlane.f32.xlu2 %v1571_v1  ;;  %1569 = vadd.xlane.f32.xlu1 %v1568_v51  ;;  %14716 = vst [vmem:[#allocation78_spill] sm:$0xff] %v9236_v20  ;;  %v1565_v1 = vadd.f32 %v9236_v20, %v9232_v10  ;;  %v1450_v51 = vmul.f32 1.442695, %v1354_v3  ;;  %v624_v10 = vld [vmem:[%s14343_s4 + $0x40] sm:$0xff] }
 0x468   : > { %v1228_v13 = vpop.xlane.xlu0 %1227 }
 0x469   : > { %v1322_v49 = vsub.f32 %v14686_v36, %v1228_v13  ;;  %v1323_v12 = vsub.f32 %v14685_v59, %v1228_v13  ;;  %v1452_v36 = vmul.f32 1.442695, %v1355_v14  ;;  %v9246_v59 = vpop.xlane.xlu2 %1548  ;;  %v9284_v39 = vpop.xlane.xlu1 %1596 }
 0x46b   : > { %v1386_v23 = vmul.f32 1.442695, %v1322_v49  ;;  %v1388_v34 = vmul.f32 1.442695, %v1323_v12 }
 0x46d   : > { %7592 = vpow2.f32 %v1386_v23 }
 0x46e   : > { %7594 = vpow2.f32 %v1388_v34 }
 0x46f   : > { %7596 = vrcp.f32 %v9216_v50  ;;  %1566 = vadd.xlane.f32.xlu2 %v1565_v1 }
 0x470   : > { %v9243_v8 = vpop.xlane.xlu0 %1542  ;;  %7598 = vrcp.f32 %v9212_v43 }
 0x471   : > { %7600 = vpow2.f32 %v1450_v51  ;;  %v9265_v3 = vpop.xlane.xlu2 %1539 }
 0x472   : > { %7602 = vpow2.f32 %v1452_v36  ;;  %v9317_v38 = vpop.xlane.xlu1 %1536 }
 0x473   : > { %v9248_v13 = vpop.eup %7592  ;;  %7604 = vrcp.f32 %v9230_v7 }
 0x474   : > { %v9250_v54 = vpop.eup %7594 }
 0x475   : > { %v9252_v23 = vpop.eup %7596  ;;  %v1514_v34 = vadd.f32 %v9250_v54, %v9248_v13 }
 0x476   : > { %v9257_v14 = vpop.eup %7598  ;;  %v1835_v49 = vmul.f32 %v9252_v23, %v9216_v50  ;;  %vm1840_vm9 = vweird.f32 %v9252_v23 }
 0x477   : > { %1515 = vadd.xlane.f32.xlu0 %v1514_v34  ;;  %v9263_v17 = vpop.eup %7600  ;;  %v1819_v51 = vmul.f32 %v9257_v14, %v9212_v43  ;;  %vm1824_vm13 = vweird.f32 %v9257_v14  ;;  %vm9306_vm15 = vmor %vm1839_vm11, %vm1840_vm9 }
 0x478   : > { %v1561_v12 = vpop.xlane.xlu0 %1560  ;;  %14719 = vst [vmem:[#allocation46_spill] sm:$0xff] %v9263_v17  ;;  %v9267_v1 = vpop.eup %7602  ;;  %v1836_v34 = vsub.f32 1.0, %v1835_v49  ;;  %vm9340_vm4 = vmor %vm1823_vm12, %vm1824_vm13  ;;  %vm1791_vm12 = vweird.f32 %v9246_v59 }
 0x479   : > { %7606 = vrcp.f32 %v1561_v12  ;;  %14720 = vst [vmem:[#allocation47_spill] sm:$0xff] %v9267_v1  ;;  %v9272_v36 = vpop.eup %7604  ;;  %v1562_v20 = vadd.f32 %v9267_v1, %v9263_v17  ;;  %v1820_v44 = vsub.f32 1.0, %v1819_v51  ;;  %v9292_v18 = vpop.xlane.xlu2 %1599  ;;  %vm1855_vm14 = vweird.f32 %v1561_v12 }
 0x47a   : > { %7608 = vrcp.f32 %v9246_v59  ;;  %v1803_v48 = vmul.f32 %v9272_v36, %v9230_v7  ;;  %v1837_v1 = vmul.f32 %v9252_v23, %v1836_v34  ;;  %v1859_v34 = vand.u32 2147483647, %v1561_v12 }
 0x47b   : > { %7610 = vrcp.f32 %v9259_v16  ;;  %v1821_v51 = vmul.f32 %v9257_v14, %v1820_v44  ;;  %vm1808_vm3 = vweird.f32 %v9272_v36 }
 0x47c   : > { %v1804_v17 = vsub.f32 1.0, %v1803_v48  ;;  %7612 = vrcp.f32 %v9243_v8  ;;  %v1838_v44 = vadd.f32 %v9252_v23, %v1837_v1  ;;  %vm1860_vm1 = vcmp.eq.f32.partialorder %v1859_v34, 8.507059e+37  ;;  %vm9358_vm9 = vmor %vm1807_vm5, %vm1808_vm3 }
 0x47d   : > { %v1822_v9 = vadd.f32 %v9257_v14, %v1821_v51  ;;  %7614 = vrcp.f32 %v9265_v3 }
 0x47e   : > { %7616 = vrcp.f32 %v9317_v38 }
 0x47f   : > { %v7607_v42 = vpop.eup %7606  ;;  %1563 = vadd.xlane.f32.xlu0 %v1562_v20  ;;  %v1861_v20 = vand.u32 2147483648, %v1561_v12 }
 0x480   : > { %v9282_v56 = vpop.eup %7608  ;;  %v1851_v49 = vmul.f32 %v7607_v42, %v1561_v12  ;;  %670 = vperm.xlu1 %7464, %v624_v10   ;;  %v9286_v58 = vpop.xlane.xlu0 %1602  ;;  %v621_v10 = vld [vmem:[%s14343_s4 + $0x28] sm:$0xff]  ;;  %vm1856_vm10 = vweird.f32 %v7607_v42 }
 0x481   : > { %v1787_v21 = vmul.f32 %v9282_v56, %v9246_v59  ;;  %v9296_v37 = vpop.eup %7610  ;;  %vm1857_vm0 = vmor %vm1855_vm14, %vm1856_vm10  ;;  %v1862_v26 = vor.u32 1.1754944e-38, %v1861_v20  ;;  %v9334_v62 = vpop.xlane.xlu2 %1590  ;;  %vm1792_vm10 = vweird.f32 %v9282_v56 }
 0x482   : > { %v1852_v24 = vsub.f32 1.0, %v1851_v49  ;;  %v1845_v49 = vand.u32 2147483648, %v9216_v50  ;;  %v1771_v1 = vmul.f32 %v9296_v37, %v9259_v16  ;;  %v9326_v41 = vpop.eup %7612  ;;  %vm9389_vm13 = vmor %vm1791_vm12, %vm1792_vm10  ;;  %vm1776_vm14 = vweird.f32 %v9296_v37 }
 0x483   : > { %v1788_v12 = vsub.f32 1.0, %v1787_v21  ;;  %v1827_v21 = vand.u32 2147483647, %v9212_v43  ;;  %v9351_v34 = vpop.eup %7614  ;;  %vm1743_vm10 = vweird.f32 %v9265_v3 }
 0x484   : > { %v1853_v48 = vmul.f32 %v7607_v42, %v1852_v24  ;;  %v1843_v24 = vand.u32 2147483647, %v9216_v50  ;;  %v1846_v27 = vor.u32 1.1754944e-38, %v1845_v49 }
 0x485   : > { %vm1828_vm6 = vcmp.eq.f32.partialorder %v1827_v21, 8.507059e+37 }
 0x486   : > { %v1854_v4 = vadd.f32 %v7607_v42, %v1853_v48  ;;  %v1805_v48 = vmul.f32 %v9272_v36, %v1804_v17  ;;  %v1829_v17 = vand.u32 2147483648, %v9212_v43  ;;  %vm1844_vm2 = vcmp.eq.f32.partialorder %v1843_v24, 8.507059e+37 }
 0x487   : > { %655 = vperm.xlu2 %7465, %v621_v10   ;;  %v1842_v10 = vsel %vm9306_vm15, %v9252_v23, %v1838_v44  ;;  %v1826_v23 = vsel %vm9340_vm4, %v9257_v14, %v1822_v9  ;;  %v1813_v44 = vand.u32 2147483648, %v9230_v7  ;;  %v1811_v9 = vand.u32 2147483647, %v9230_v7 }
 0x488   : > { %2206 = vrot.lane.b32.xlu1 %v14723_v40, %s8334_s16  ;;  %v9321_v50 = vpop.xlane.xlu0 %1605  ;;  %v1858_v51 = vsel %vm1857_vm0, %v7607_v42, %v1854_v4  ;;  %v1772_v4 = vsub.f32 1.0, %v1771_v1  ;;  %v1847_v42 = vsel %vm1844_vm2, %v1846_v27, %v1842_v10  ;;  %v1789_v27 = vmul.f32 %v9282_v56, %v1788_v12 }
 0x489   : > { %v1863_v20 = vsel %vm1860_vm1, %v1862_v26, %v1858_v51  ;;  %v1830_v43 = vor.u32 1.1754944e-38, %v1829_v17  ;;  %v1848_v49 = vmul.f32 %v9002_v25, %v1847_v42  ;;  %v1849_v14 = vmul.f32 %v9004_v46, %v1847_v42  ;;  %v14729_v51 = vld [vmem:[#allocation15_spill] sm:$0xff]  ;;  %v9378_v46 = vpop.eup %7616  ;;  %v14730_v42 = vld [vmem:[#allocation10_spill] sm:$0xff] }
 0x48a   : > { %v1864_v0 = vmul.f32 %v9050_v2, %v1863_v20  ;;  %v1865_v40 = vmul.f32 %v9052_v55, %v1863_v20  ;;  %v1806_v2 = vadd.f32 %v9272_v36, %v1805_v48  ;;  %v1755_v55 = vmul.f32 %v9326_v41, %v9243_v8 }
 0x48b   : > { %v1831_v24 = vsel %vm1828_vm6, %v1830_v43, %v1826_v23  ;;  %v1773_v25 = vmul.f32 %v9296_v37, %v1772_v4  ;;  %v1739_v48 = vmul.f32 %v9351_v34, %v9265_v3  ;;  %v1790_v10 = vadd.f32 %v9282_v56, %v1789_v27 }
 0x48c   : > { %2122 = vmatpush.xpose.msrb.mxu0 %v1864_v0  ;;  %2142 = vmatpush.xpose.msrb.mxu1 %v1865_v40  ;;  %v14728_v0 = vld [vmem:[#allocation13_spill] sm:$0xff]  ;;  %v1810_v1 = vsel %vm9358_vm9, %v9272_v36, %v1806_v2  ;;  %v1756_v12 = vsub.f32 1.0, %v1755_v55  ;;  %v1814_v36 = vor.u32 1.1754944e-38, %v1813_v44  ;;  %v1797_v20 = vand.u32 2147483648, %v9246_v59 }
 0x48d   : > { %v1832_v21 = vmul.f32 %v8914_v35, %v1831_v24  ;;  %vm1812_vm11 = vcmp.eq.f32.partialorder %v1811_v9, 8.507059e+37  ;;  %v1795_v17 = vand.u32 2147483647, %v9246_v59  ;;  %v1833_v26 = vmul.f32 %v8916_v45, %v1831_v24  ;;  %v14737_v24 = vld [vmem:[#allocation54_spill] sm:$0xff] }
 0x48e   : > { %v1815_v2 = vsel %vm1812_vm11, %v1814_v36, %v1810_v1  ;;  %v1774_v23 = vadd.f32 %v9296_v37, %v1773_v25  ;;  %v1740_v35 = vsub.f32 1.0, %v1739_v48  ;;  %v1723_v59 = vmul.f32 %v9378_v46, %v9317_v38 }
 0x48f   : > { %2208 = vrot.lane.b32.xlu2 %v14728_v0, %s8334_s16  ;;  %v1794_v27 = vsel %vm9389_vm13, %v9282_v56, %v1790_v10  ;;  %v1757_v45 = vmul.f32 %v9326_v41, %v1756_v12  ;;  %v1798_v43 = vor.u32 1.1754944e-38, %v1797_v20  ;;  %vm1775_vm15 = vweird.f32 %v9259_v16  ;;  %v14736_v56 = vld [vmem:[#allocation16_spill] sm:$0xff]  ;;  %v14738_v10 = vld [vmem:[#allocation18_spill] sm:$0xff] }
 0x490   : > { %2212 = vrot.lane.b32.xlu1 %v14729_v51, %s8334_s16  ;;  %2123 = vmatpush.xpose.msrb.mxu0 %v1848_v49  ;;  %v9374_v7 = vpop.xlane.xlu0 %1608  ;;  %v1781_v44 = vand.u32 2147483648, %v9259_v16  ;;  %v14733_v49 = vld [vmem:[#allocation53_spill] sm:$0xff]  ;;  %vm1796_vm0 = vcmp.eq.f32.partialorder %v1795_v17, 8.507059e+37  ;;  %vm9405_vm1 = vmor %vm1775_vm15, %vm1776_vm14  ;;  %v1817_v1 = vmul.f32 %v14737_v24, %v1815_v2  ;;  %v1724_v12 = vsub.f32 1.0, %v1723_v59  ;;  %v14741_v59 = vld [vmem:[#allocation56_spill] sm:$0xff] }
 0x491   : > { %2143 = vmatpush.xpose.msrb.mxu1 %v1849_v14  ;;  %v1816_v40 = vmul.f32 %v14733_v49, %v1815_v2  ;;  %v1779_v14 = vand.u32 2147483647, %v9259_v16  ;;  %v1799_v25 = vsel %vm1796_vm0, %v1798_v43, %v1794_v27  ;;  %v1778_v48 = vsel %vm9405_vm1, %v9296_v37, %v1774_v23  ;;  %v14739_v37 = vld [vmem:[#allocation55_spill] sm:$0xff] }
 0x492   : > { %v9384_v4 = vpop.xlane.xlu2 %1530  ;;  %v1758_v20 = vadd.f32 %v9326_v41, %v1757_v45  ;;  %vm1760_vm2 = vweird.f32 %v9326_v41  ;;  %v1741_v16 = vmul.f32 %v9351_v34, %v1740_v35  ;;  %v1765_v17 = vand.u32 2147483648, %v9243_v8  ;;  %v14740_v23 = vld [vmem:[#allocation11_spill] sm:$0xff]  ;;  %v14750_v35 = vld [vmem:[#allocation14_spill] sm:$0xff] }
 0x493   : > { %2202 = vrot.lane.b32.xlu0 %v14730_v42, %s8334_s16  ;;  %7618 = vrcp.f32 %v9384_v4  ;;  %v1800_v2 = vmul.f32 %v14739_v37, %v1799_v25  ;;  %vm1780_vm3 = vcmp.eq.f32.partialorder %v1779_v14, 8.507059e+37  ;;  %vm1759_vm4 = vweird.f32 %v9243_v8  ;;  %v14744_v14 = vld [vmem:[#allocation57_spill] sm:$0xff] }
 0x494   : > { %2124 = vmatpush.xpose.msrb.mxu0 %v1832_v21  ;;  %v1782_v21 = vor.u32 1.1754944e-38, %v1781_v44  ;;  %v1763_v55 = vand.u32 2147483647, %v9243_v8  ;;  %v1801_v27 = vmul.f32 %v14741_v59, %v1799_v25  ;;  %vm9432_vm5 = vmor %vm1759_vm4, %vm1760_vm2  ;;  %v1742_v49 = vadd.f32 %v9351_v34, %v1741_v16  ;;  %v14745_v25 = vld [vmem:[#allocation19_spill] sm:$0xff] }
 0x495   : > { %2144 = vmatpush.xpose.msrb.mxu1 %v1833_v26  ;;  %v9424_v26 = vpop.xlane.xlu1 %1587  ;;  %v1762_v44 = vsel %vm9432_vm5, %v9326_v41, %v1758_v20  ;;  %vm1744_vm6 = vweird.f32 %v9351_v34  ;;  %v1725_v8 = vmul.f32 %v9378_v46, %v1724_v12  ;;  %v1749_v9 = vand.u32 2147483648, %v9265_v3 }
 0x496   : > { %v1783_v45 = vsel %vm1780_vm3, %v1782_v21, %v1778_v48  ;;  %vm1764_vm9 = vcmp.eq.f32.partialorder %v1763_v55, 8.507059e+37  ;;  %v14746_v48 = vld [vmem:[#allocation58_spill] sm:$0xff]  ;;  %vm9453_vm11 = vmor %vm1743_vm10, %vm1744_vm6  ;;  %v14749_v21 = vld [vmem:[#allocation21_spill] sm:$0xff]  ;;  %vm1728_vm12 = vweird.f32 %v9378_v46  ;;  %v1733_v55 = vand.u32 2147483648, %v9317_v38 }
 0x497   : > { %2214 = vrot.lane.b32.xlu2 %v14736_v56, %s8334_s16  ;;  %v1784_v24 = vmul.f32 %v14744_v14, %v1783_v45  ;;  %v1785_v20 = vmul.f32 %v14746_v48, %v1783_v45  ;;  %v1726_v37 = vadd.f32 %v9378_v46, %v1725_v8  ;;  %vm1727_vm14 = vweird.f32 %v9317_v38 }
 0x498   : > { %2218 = vrot.lane.b32.xlu1 %v14738_v10, %s8334_s16  ;;  %v9418_v36 = vpop.xlane.xlu0 %1593  ;;  %2125 = vmatpush.xpose.msrb.mxu0 %v1816_v40  ;;  %v1766_v40 = vor.u32 1.1754944e-38, %v1765_v17  ;;  %v1731_v45 = vand.u32 2147483647, %v9317_v38  ;;  %vm1729_vm15 = vmor %vm1727_vm14, %vm1728_vm12  ;;  %v1734_v8 = vor.u32 1.1754944e-38, %v1733_v55  ;;  %vm1695_vm3 = vweird.f32 %v9384_v4 }
 0x499   : > { %2145 = vmatpush.xpose.msrb.mxu1 %v1817_v1  ;;  %v9436_v43 = vpop.eup %7618  ;;  %v1747_v1 = vand.u32 2147483647, %v9265_v3  ;;  %v1746_v3 = vsel %vm9453_vm11, %v9351_v34, %v1742_v49 }
 0x49a   : > { %v1691_v41 = vmul.f32 %v9436_v43, %v9384_v4  ;;  %v1767_v12 = vsel %vm1764_vm9, %v1766_v40, %v1762_v44  ;;  %vm1732_vm0 = vcmp.eq.f32.partialorder %v1731_v45, 8.507059e+37  ;;  %vm1696_vm1 = vweird.f32 %v9436_v43 }
 0x49b   : > { %2204 = vrot.lane.b32.xlu0 %v14740_v23, %s8334_s16  ;;  %vm1748_vm13 = vcmp.eq.f32.partialorder %v1747_v1, 8.507059e+37  ;;  %v1769_v44 = vmul.f32 %v9034_v57, %v1767_v12  ;;  %v1701_v45 = vand.u32 2147483648, %v9384_v4  ;;  %vm9503_vm5 = vmor %vm1695_vm3, %vm1696_vm1 }
 0x49c   : > { %2126 = vmatpush.xpose.msrb.mxu0 %v1800_v2  ;;  %v1750_v2 = vor.u32 1.1754944e-38, %v1749_v9  ;;  %v1692_v34 = vsub.f32 1.0, %v1691_v41  ;;  %v14751_v9 = vld [vmem:[#allocation23_spill] sm:$0xff]  ;;  %v14752_v41 = vld [vmem:[#allocation26_spill] sm:$0xff] }
 0x49d   : > { %2146 = vmatpush.xpose.msrb.mxu1 %v1801_v27  ;;  %v1768_v27 = vmul.f32 %v9032_v22, %v1767_v12  ;;  %v1730_v22 = vsel %vm1729_vm15, %v9378_v46, %v1726_v37 }
 0x49e   : > { %v1751_v49 = vsel %vm1748_vm13, %v1750_v2, %v1746_v3  ;;  %v1693_v57 = vmul.f32 %v9436_v43, %v1692_v34 }
 0x49f   : > { %2220 = vrot.lane.b32.xlu2 %v14745_v25, %s8334_s16  ;;  %v1752_v40 = vmul.f32 %v9010_v60, %v1751_v49  ;;  %v1753_v14 = vmul.f32 %v9014_v29, %v1751_v49  ;;  %v14753_v29 = vld [vmem:[#allocation17_spill] sm:$0xff]  ;;  %v14756_v49 = vld [vmem:[#allocation28_spill] sm:$0xff] }
 0x4a0   : > { %2224 = vrot.lane.b32.xlu1 %v14749_v21, %s8334_s16  ;;  %v9459_v17 = vpop.xlane.xlu0 %1533  ;;  %2127 = vmatpush.xpose.msrb.mxu0 %v1784_v24  ;;  %v1735_v24 = vsel %vm1732_vm0, %v1734_v8, %v1730_v22  ;;  %v1694_v37 = vadd.f32 %v9436_v43, %v1693_v57 }
 0x4a1   : > { %7620 = vrcp.f32 %v9459_v17  ;;  %2147 = vmatpush.xpose.msrb.mxu1 %v1785_v20  ;;  %v1736_v12 = vmul.f32 %v9042_v33, %v1735_v24  ;;  %v1737_v16 = vmul.f32 %v9046_v31, %v1735_v24  ;;  %v1717_v3 = vand.u32 2147483648, %v9459_v17 }
 0x4a2   : > { %v9468_v59 = vpop.xlane.xlu1 %1527  ;;  %v1699_v33 = vand.u32 2147483647, %v9384_v4  ;;  %vm1711_vm4 = vweird.f32 %v9459_v17  ;;  %v1698_v8 = vsel %vm9503_vm5, %v9436_v43, %v1694_v37  ;;  %v1702_v24 = vor.u32 1.1754944e-38, %v1701_v45 }
 0x4a3   : > { %7622 = vrcp.f32 %v9468_v59  ;;  %2210 = vrot.lane.b32.xlu0 %v14750_v35, %s8334_s16  ;;  %v1718_v22 = vor.u32 1.1754944e-38, %v1717_v3  ;;  %v1685_v57 = vand.u32 2147483648, %v9468_v59  ;;  %vm1679_vm12 = vweird.f32 %v9468_v59 }
 0x4a4   : > { %2128 = vmatpush.xpose.msrb.mxu0 %v1768_v27  ;;  %v1715_v27 = vand.u32 2147483647, %v9459_v17  ;;  %vm1700_vm11 = vcmp.eq.f32.partialorder %v1699_v33, 8.507059e+37  ;;  %v1683_v43 = vand.u32 2147483647, %v9468_v59 }
 0x4a5   : > { %2148 = vmatpush.xpose.msrb.mxu1 %v1769_v44  ;;  %v1686_v3 = vor.u32 1.1754944e-38, %v1685_v57 }
 0x4a6   : > { %vm1716_vm9 = vcmp.eq.f32.partialorder %v1715_v27, 8.507059e+37  ;;  %vm1684_vm14 = vcmp.eq.f32.partialorder %v1683_v43, 8.507059e+37 }
 0x4a7   : > { %v7621_v38 = vpop.eup %7620  ;;  %2226 = vrot.lane.b32.xlu2 %v14751_v9, %s8334_s16 }
 0x4a8   : > { %v1707_v1 = vmul.f32 %v7621_v38, %v9459_v17  ;;  %2230 = vrot.lane.b32.xlu1 %v14752_v41, %s8334_s16  ;;  %v9488_v46 = vpop.xlane.xlu0 %1584  ;;  %2129 = vmatpush.xpose.msrb.mxu0 %v1752_v40  ;;  %vm1712_vm2 = vweird.f32 %v7621_v38  ;;  %v14757_v40 = vld [vmem:[#allocation25_spill] sm:$0xff] }
 0x4a9   : > { %v7623_v48 = vpop.eup %7622  ;;  %2149 = vmatpush.xpose.msrb.mxu1 %v1753_v14  ;;  %vm1713_vm6 = vmor %vm1711_vm4, %vm1712_vm2 }
 0x4aa   : > { %v1708_v60 = vsub.f32 1.0, %v1707_v1  ;;  %v1675_v20 = vmul.f32 %v7623_v48, %v9468_v59  ;;  %vm1680_vm10 = vweird.f32 %v7623_v48  ;;  %v14760_v59 = vld [vmem:[#allocation32_spill] sm:$0xff]  ;;  %v9527_v27 = vpop.xlane.xlu2 %1581 }
 0x4ab   : > { %2216 = vrot.lane.b32.xlu0 %v14753_v29, %s8334_s16  ;;  %vm1681_vm13 = vmor %vm1679_vm12, %vm1680_vm10 }
 0x4ac   : > { %v1676_v2 = vsub.f32 1.0, %v1675_v20  ;;  %2130 = vmatpush.xpose.msrb.mxu0 %v1736_v12  ;;  %v1709_v55 = vmul.f32 %v7621_v38, %v1708_v60  ;;  %v1703_v12 = vsel %vm1700_vm11, %v1702_v24, %v1698_v8  ;;  %v14763_v8 = vld [vmem:[#allocation35_spill] sm:$0xff] }
 0x4ad   : > { %2150 = vmatpush.xpose.msrb.mxu1 %v1737_v16  ;;  %v1704_v37 = vmul.f32 %v9104_v32, %v1703_v12  ;;  %v14761_v32 = vld [vmem:[#allocation24_spill] sm:$0xff] }
 0x4ae   : > { %v1710_v31 = vadd.f32 %v7621_v38, %v1709_v55  ;;  %v1677_v44 = vmul.f32 %v7623_v48, %v1676_v2 }
 0x4af   : > { %2232 = vrot.lane.b32.xlu2 %v14756_v49, %s8334_s16 }
 0x4b0   : > { %2236 = vrot.lane.b32.xlu1 %v14757_v40, %s8334_s16  ;;  %v1714_v4 = vsel %vm1713_vm6, %v7621_v38, %v1710_v31  ;;  %v1678_v17 = vadd.f32 %v7623_v48, %v1677_v44  ;;  %v14758_v38 = vld [vmem:[#allocation20_spill] sm:$0xff] }
 0x4b1   : > { %v1719_v14 = vsel %vm1716_vm9, %v1718_v22, %v1714_v4  ;;  %v14762_v22 = vld [vmem:[#allocation33_spill] sm:$0xff] }
 0x4b2   : > { %v1525_v1 = vpop.xlane.xlu0 %1524  ;;  %v1720_v60 = vmul.f32 %v9122_v30, %v1719_v14  ;;  %v1721_v20 = vmul.f32 %v9124_v61, %v1719_v14  ;;  %v1682_v16 = vsel %vm1681_vm13, %v7623_v48, %v1678_v17  ;;  %v14759_v30 = vld [vmem:[#allocation27_spill] sm:$0xff]  ;;  %v1705_v61 = vmul.f32 %v9108_v63, %v1703_v12 }
 0x4b3   : > { %7624 = vrcp.f32 %v1525_v1  ;;  %2222 = vrot.lane.b32.xlu0 %v14758_v38, %s8334_s16  ;;  %v1687_v2 = vsel %vm1684_vm14, %v1686_v3, %v1682_v16  ;;  %v1669_v63 = vand.u32 2147483648, %v1525_v1  ;;  %v1667_v44 = vand.u32 2147483647, %v1525_v1  ;;  %v613_v3 = vld [vmem:[%s14342_s3 + $0x48] sm:$0xff] }
 0x4b4   : > { %2131 = vmatpush.xpose.msrb.mxu0 %v1720_v60  ;;  %2151 = vmatpush.xpose.msrb.mxu1 %v1721_v20  ;;  %v1688_v48 = vmul.f32 %v9128_v5, %v1687_v2  ;;  %v1689_v45 = vmul.f32 %v9132_v47, %v1687_v2  ;;  %vm1663_vm0 = vweird.f32 %v1525_v1  ;;  %v14764_v47 = vld [vmem:[#allocation22_spill] sm:$0xff]  ;;  %v14765_v20 = vld [vmem:[#allocation36_spill] sm:$0xff] }
 0x4b5   : > { %v1670_v5 = vor.u32 1.1754944e-38, %v1669_v63  ;;  %vm1668_vm2 = vcmp.eq.f32.partialorder %v1667_v44, 8.507059e+37  ;;  %7106 = vmatmul.msk.f32.gmra.mxu0 %vm688_vm7, %v613_v3  ;;  %7118 = vmatmul.msk.f32.gmra.mxu1 %vm688_vm7, %v613_v3  ;;  %v14770_v44 = vld [vmem:[#allocation34_spill] sm:$0xff]  ;;  %v9579_v3 = vpop.f32.mrf.mxu1 }
 0x4b7   : > { %2238 = vrot.lane.b32.xlu2 %v14759_v30, %s8334_s16 }
 0x4b8   : > { %2242 = vrot.lane.b32.xlu1 %v14760_v59, %s8334_s16  ;;  %2132 = vmatpush.xpose.msrb.mxu0 %v1704_v37 }
 0x4b9   : > { %v7625_v55 = vpop.eup %7624  ;;  %2152 = vmatpush.xpose.msrb.mxu1 %v1705_v61 }
 0x4ba   : > { %v1659_v33 = vmul.f32 %v7625_v55, %v1525_v1  ;;  %vm1664_vm15 = vweird.f32 %v7625_v55  ;;  %v14766_v1 = vld [vmem:[#allocation38_spill] sm:$0xff]  ;;  %v9545_v12 = vpop.xlane.xlu1 %1578 }
 0x4bb   : > { %2228 = vrot.lane.b32.xlu0 %v14761_v32, %s8334_s16  ;;  %vm1665_vm1 = vmor %vm1663_vm0, %vm1664_vm15  ;;  %vm2063_vm15 = vweird.f32 %v9292_v18  ;;  %vm2111_vm0 = vweird.f32 %v9374_v7 }
 0x4bc   : > { %v1660_v31 = vsub.f32 1.0, %v1659_v33  ;;  %2133 = vmatpush.xpose.msrb.mxu0 %v1688_v48  ;;  %v14769_v33 = vld [vmem:[#allocation41_spill] sm:$0xff] }
 0x4bd   : > { %2153 = vmatpush.xpose.msrb.mxu1 %v1689_v45 }
 0x4be   : > { %v1661_v34 = vmul.f32 %v7625_v55, %v1660_v31 }
 0x4bf   : > { %2244 = vrot.lane.b32.xlu2 %v14762_v22, %s8334_s16 }
 0x4c0   : > { %2248 = vrot.lane.b32.xlu1 %v14763_v8, %s8334_s16  ;;  %v1662_v4 = vadd.f32 %v7625_v55, %v1661_v34  ;;  %v614_v34 = vld [vmem:[%s14342_s3 + $0x50] sm:$0xff] }
 0x4c1   : > { %7107 = vmatmul.msk.f32.gmra.mxu0 %vm688_vm7, %v614_v34  ;;  %7119 = vmatmul.msk.f32.gmra.mxu1 %vm688_vm7, %v614_v34 }
 0x4c2   : > { %v1522_v17 = vpop.xlane.xlu2 %1521  ;;  %v1666_v14 = vsel %vm1665_vm1, %v7625_v55, %v1662_v4  ;;  %v14768_v55 = vld [vmem:[#allocation39_spill] sm:$0xff]  ;;  %vm2079_vm1 = vweird.f32 %v9286_v58 }
 0x4c3   : > { %7626 = vrcp.f32 %v1522_v17  ;;  %2234 = vrot.lane.b32.xlu0 %v14764_v47, %s8334_s16  ;;  %v1671_v24 = vsel %vm1668_vm2, %v1670_v5, %v1666_v14  ;;  %v1653_v37 = vand.u32 2147483648, %v1522_v17  ;;  %v1651_v2 = vand.u32 2147483647, %v1522_v17  ;;  %v14771_v14 = vld [vmem:[#allocation42_spill] sm:$0xff] }
 0x4c4   : > { %v1672_v57 = vmul.f32 %v9152_v53, %v1671_v24  ;;  %v1673_v60 = vmul.f32 %v9154_v28, %v1671_v24  ;;  %v14767_v53 = vld [vmem:[#allocation29_spill] sm:$0xff]  ;;  %vm1647_vm4 = vweird.f32 %v1522_v17 }
 0x4c5   : > { %v1654_v45 = vor.u32 1.1754944e-38, %v1653_v37  ;;  %vm1652_vm6 = vcmp.eq.f32.partialorder %v1651_v2, 8.507059e+37 }
 0x4c6   : > { %2134 = vmatpush.xpose.msrb.mxu0 %v1672_v57  ;;  %2154 = vmatpush.xpose.msrb.mxu1 %v1673_v60  ;;  %v615_v60 = vld [vmem:[%s14342_s3 + $0x58] sm:$0xff] }
 0x4c7   : > { %2250 = vrot.lane.b32.xlu2 %v14765_v20, %s8334_s16 }
 0x4c8   : > { %2254 = vrot.lane.b32.xlu1 %v14766_v1, %s8334_s16 }
 0x4c9   : > { %v7627_v43 = vpop.eup %7626  ;;  %7108 = vmatmul.msk.f32.gmra.mxu0 %vm688_vm7, %v615_v60  ;;  %7120 = vmatmul.msk.f32.gmra.mxu1 %vm688_vm7, %v615_v60 }
 0x4ca   : > { %v1643_v16 = vmul.f32 %v7627_v43, %v1522_v17  ;;  %vm1648_vm3 = vweird.f32 %v7627_v43 }
 0x4cb   : > { %2240 = vrot.lane.b32.xlu0 %v14767_v53, %s8334_s16  ;;  %vm1649_vm5 = vmor %vm1647_vm4, %vm1648_vm3 }
 0x4cc   : > { %v1644_v28 = vsub.f32 1.0, %v1643_v16 }
 0x4ce   : > { %v1645_v61 = vmul.f32 %v7627_v43, %v1644_v28 }
 0x4cf   : > { %2256 = vrot.lane.b32.xlu2 %v14768_v55, %s8334_s16 }
 0x4d0   : > { %2260 = vrot.lane.b32.xlu1 %v14769_v33, %s8334_s16  ;;  %v1646_v48 = vadd.f32 %v7627_v43, %v1645_v61 }
 0x4d2   : > { %v1519_v31 = vpop.xlane.xlu1 %1518  ;;  %v1650_v63 = vsel %vm1649_vm5, %v7627_v43, %v1646_v48  ;;  %v14772_v43 = vld [vmem:[#allocation37_spill] sm:$0xff]  ;;  %v9584_v48 = vpop.xlane.xlu0 %1575 }
 0x4d3   : > { %7628 = vrcp.f32 %v1519_v31  ;;  %2246 = vrot.lane.b32.xlu0 %v14770_v44, %s8334_s16  ;;  %v1655_v4 = vsel %vm1652_vm6, %v1654_v45, %v1650_v63  ;;  %v1637_v16 = vand.u32 2147483648, %v1519_v31  ;;  %v1635_v37 = vand.u32 2147483647, %v1519_v31  ;;  %v14773_v63 = vld [vmem:[#allocation40_spill] sm:$0xff] }
 0x4d4   : > { %v1656_v5 = vmul.f32 %v9178_v11, %v1655_v4  ;;  %v1657_v17 = vmul.f32 %v9180_v19, %v1655_v4  ;;  %v9576_v19 = vpop.f32.mrf.mxu0  ;;  %7630 = vrcp.f32 %v9374_v7  ;;  %vm1631_vm10 = vweird.f32 %v1519_v31 }
 0x4d5   : > { %7632 = vrcp.f32 %v9292_v18  ;;  %v1638_v2 = vor.u32 1.1754944e-38, %v1637_v16  ;;  %vm1636_vm12 = vcmp.eq.f32.partialorder %v1635_v37, 8.507059e+37  ;;  %v9605_v16 = vpop.f32.mrf.mxu1 }
 0x4d6   : > { %2135 = vmatpush.xpose.msrb.mxu0 %v1656_v5  ;;  %2155 = vmatpush.xpose.msrb.mxu1 %v1657_v17  ;;  %7634 = vrcp.f32 %v9284_v39  ;;  %14775 = vst [vmem:[#allocation54_spill] sm:$0xff] %v9605_v16 }
 0x4d7   : > { %2262 = vrot.lane.b32.xlu2 %v14771_v14, %s8334_s16  ;;  %7636 = vrcp.f32 %v9321_v50 }
 0x4d8   : > { %7638 = vrcp.f32 %v9286_v58 }
 0x4d9   : > { %v7629_v24 = vpop.eup %7628 }
 0x4da   : > { %v1627_v57 = vmul.f32 %v7629_v24, %v1519_v31  ;;  %vm1632_vm9 = vweird.f32 %v7629_v24  ;;  %v9588_v4 = vpop.eup %7630 }
 0x4db   : > { %2252 = vrot.lane.b32.xlu0 %v14772_v43, %s8334_s16  ;;  %vm1633_vm11 = vmor %vm1631_vm10, %vm1632_vm9  ;;  %vm2112_vm14 = vweird.f32 %v9588_v4 }
 0x4dc   : > { %v1628_v11 = vsub.f32 1.0, %v1627_v57  ;;  %v9592_v57 = vpop.eup %7632  ;;  %v9599_v60 = vpop.f32.mrf.mxu0  ;;  %vm9655_vm2 = vmor %vm2111_vm0, %vm2112_vm14 }
 0x4dd   : > { %v9594_v31 = vpop.eup %7634  ;;  %14774 = vst [vmem:[#allocation53_spill] sm:$0xff] %v9599_v60  ;;  %vm2064_vm13 = vweird.f32 %v9592_v57 }
 0x4de   : > { %v1629_v28 = vmul.f32 %v7629_v24, %v1628_v11  ;;  %v9601_v11 = vpop.eup %7636  ;;  %vm2048_vm5 = vweird.f32 %v9594_v31 }
 0x4df   : > { %v2091_v37 = vmul.f32 %v9601_v11, %v9321_v50  ;;  %vm2096_vm4 = vweird.f32 %v9601_v11 }
 0x4e0   : > { %v1630_v61 = vadd.f32 %v7629_v24, %v1629_v28 }
 0x4e1   : > { %v2092_v16 = vsub.f32 1.0, %v2091_v37 }
 0x4e2   : > { %v1634_v45 = vsel %vm1633_vm11, %v7629_v24, %v1630_v61  ;;  %v2107_v24 = vmul.f32 %v9588_v4, %v9374_v7  ;;  %vm2095_vm11 = vweird.f32 %v9321_v50 }
 0x4e3   : > { %2258 = vrot.lane.b32.xlu0 %v14773_v63, %s8334_s16  ;;  %v1639_v34 = vsel %vm1636_vm12, %v1638_v2, %v1634_v45  ;;  %v14776_v2 = vld [vmem:[#allocation43_spill] sm:$0xff]  ;;  %v9613_v45 = vpop.eup %7638  ;;  %vm2047_vm12 = vweird.f32 %v9284_v39  ;;  %vm9674_vm0 = vmor %vm2095_vm11, %vm2096_vm4  ;;  %vm2031_vm11 = vweird.f32 %v9418_v36 }
 0x4e4   : > { %v1640_v5 = vmul.f32 %v9206_v6, %v1639_v34  ;;  %v1641_v17 = vmul.f32 %v9209_v15, %v1639_v34  ;;  %v2059_v6 = vmul.f32 %v9592_v57, %v9292_v18  ;;  %v2043_v15 = vmul.f32 %v9594_v31, %v9284_v39  ;;  %vm9697_vm4 = vmor %vm2063_vm15, %vm2064_vm13 }
 0x4e5   : > { %v2108_v61 = vsub.f32 1.0, %v2107_v24  ;;  %v9620_v24 = vpop.f32.mrf.mxu0 }
 0x4e6   : > { %2136 = vmatpush.xpose.msrb.mxu0 %v1640_v5  ;;  %2156 = vmatpush.xpose.msrb.mxu1 %v1641_v17  ;;  %v2060_v34 = vsub.f32 1.0, %v2059_v6  ;;  %v2044_v5 = vsub.f32 1.0, %v2043_v15  ;;  %v2075_v17 = vmul.f32 %v9613_v45, %v9286_v58  ;;  %14777 = vst [vmem:[#allocation55_spill] sm:$0xff] %v9620_v24  ;;  %v9630_v15 = vpop.f32.mrf.mxu1  ;;  %v2117_v6 = vand.u32 2147483648, %v9374_v7  ;;  %v9638_v24 = vpop.xlane.xlu1 %1569 }
 0x4e7   : > { %v2109_v60 = vmul.f32 %v9588_v4, %v2108_v61  ;;  %14778 = vst [vmem:[#allocation56_spill] sm:$0xff] %v9630_v15 }
 0x4e8   : > { %v2061_v63 = vmul.f32 %v9592_v57, %v2060_v34  ;;  %v9623_v44 = vmul.f32 %v9594_v31, %v2044_v5  ;;  %v2076_v34 = vsub.f32 1.0, %v2075_v17  ;;  %v2118_v1 = vor.u32 1.1754944e-38, %v2117_v6 }
 0x4e9   : > { %v2110_v5 = vadd.f32 %v9588_v4, %v2109_v60 }
 0x4ea   : > { %v1516_v28 = vpop.xlane.xlu0 %1515  ;;  %v9642_v15 = vadd.f32 %v9592_v57, %v2061_v63 }
 0x4eb   : > { %7640 = vrcp.f32 %v1516_v28  ;;  %2264 = vrot.lane.b32.xlu0 %v14776_v2, %s8334_s16  ;;  %v2093_v2 = vmul.f32 %v9601_v11, %v2092_v16  ;;  %v1621_v60 = vand.u32 2147483648, %v1516_v28  ;;  %v2115_v16 = vand.u32 2147483647, %v9374_v7  ;;  %s8335_s16 = smov 112  }
 0x4ec   : > { %7642 = vrcp.f32 %v9334_v62  ;;  %v1619_v61 = vand.u32 2147483647, %v1516_v28  ;;  %v2114_v33 = vsel %vm9655_vm2, %v9588_v4, %v2110_v5  ;;  %v2077_v7 = vmul.f32 %v9613_v45, %v2076_v34 }
 0x4ed   : > { %7644 = vrcp.f32 %v9418_v36  ;;  %v2094_v47 = vadd.f32 %v9601_v11, %v2093_v2  ;;  %vm1615_vm6 = vweird.f32 %v1516_v28  ;;  %v1622_v20 = vor.u32 1.1754944e-38, %v1621_v60  ;;  %v766_v5 = vpop.f32.mrf.mxu0 }
 0x4ee   : > { %7646 = vrcp.f32 %v9424_v26  ;;  %vm2116_vm10 = vcmp.eq.f32.partialorder %v2115_v16, 8.507059e+37  ;;  %v2099_v4 = vand.u32 2147483647, %v9321_v50  ;;  %vm1620_vm14 = vcmp.eq.f32.partialorder %v1619_v61, 8.507059e+37 }
 0x4ef   : > { %v2119_v34 = vsel %vm2116_vm10, %v2118_v1, %v2114_v33  ;;  %vm2080_vm2 = vweird.f32 %v9613_v45  ;;  %v819_v33 = vpop.f32.mrf.mxu1  ;;  %7648 = vrcp.f32 %v9488_v46 }
 0x4f0   : > { %7650 = vrcp.f32 %v9527_v27 }
 0x4f1   : > { %v7641_v43 = vpop.eup %7640  ;;  %7652 = vrcp.f32 %v9545_v12 }
 0x4f2   : > { %v9627_v53 = vpop.eup %7642  ;;  %v1611_v37 = vmul.f32 %v7641_v43, %v1516_v28  ;;  %vm1616_vm3 = vweird.f32 %v7641_v43  ;;  %7654 = vrcp.f32 %v9584_v48 }
 0x4f3   : > { %v9647_v17 = vmul.f32 %v9627_v53, %v9334_v62  ;;  %v9666_v55 = vpop.eup %7644  ;;  %vm1617_vm9 = vmor %vm1615_vm6, %vm1616_vm3  ;;  %vm2100_vm3 = vcmp.eq.f32.partialorder %v2099_v4, 8.507059e+37  ;;  %vm2016_vm10 = vweird.f32 %v9627_v53 }
 0x4f4   : > { %v1612_v14 = vsub.f32 1.0, %v1611_v37  ;;  %v2027_v28 = vmul.f32 %v9666_v55, %v9418_v36  ;;  %v9685_v1 = vpop.eup %7646  ;;  %vm9705_vm6 = vmor %vm2079_vm1, %vm2080_vm2 }
 0x4f5   : > { %vm9739_vm1 = vmor %vm2047_vm12, %vm2048_vm5  ;;  %vm2000_vm2 = vweird.f32 %v9685_v1 }
 0x4f6   : > { %v1613_v37 = vmul.f32 %v7641_v43, %v1612_v14  ;;  %v2101_v14 = vand.u32 2147483648, %v9321_v50  ;;  %v2098_v50 = vsel %vm9674_vm0, %v9601_v11, %v2094_v47  ;;  %v2067_v11 = vand.u32 2147483647, %v9292_v18  ;;  %v14795_v47 = vld [vmem:[#allocation30_spill] sm:$0xff] }
 0x4f8   : > { %v1614_v32 = vadd.f32 %v7641_v43, %v1613_v37  ;;  %v2102_v63 = vor.u32 1.1754944e-38, %v2101_v14  ;;  %v2085_v37 = vand.u32 2147483648, %v9286_v58  ;;  %v2028_v14 = vsub.f32 1.0, %v2027_v28 }
 0x4f9   : > { %vm2068_vm15 = vcmp.eq.f32.partialorder %v2067_v11, 8.507059e+37 }
 0x4fa   : > { %v1618_v2 = vsel %vm1617_vm9, %v7641_v43, %v1614_v32  ;;  %v2078_v32 = vadd.f32 %v9613_v45, %v2077_v7  ;;  %v671_v43 = vpop.permute.xlu1 %670  ;;  %v2046_v7 = vadd.f32 %v9594_v31, %v9623_v44  ;;  %v14788_v44 = vld [vmem:[#allocation52_spill] sm:$0xff]  ;;  %vm2032_vm9 = vweird.f32 %v9666_v55 }
 0x4fb   : > { %v1623_v60 = vsel %vm1620_vm14, %v1622_v20, %v1618_v2  ;;  %v2120_v20 = vmul.f32 %v9096_v52, %v2119_v34  ;;  %v14783_v2 = vld [vmem:[#allocation66_spill] sm:$0xff]  ;;  %v9716_v4 = vadd.f32 %v766_v5, %v671_v43  ;;  %v14789_v5 = vld [vmem:[#allocation63_spill] sm:$0xff]  ;;  %vm9778_vm12 = vmor %vm2031_vm11, %vm2032_vm9  ;;  %vm2015_vm14 = vweird.f32 %v9334_v62 }
 0x4fc   : > { %v1624_v61 = vmul.f32 %v9248_v13, %v1623_v60  ;;  %v1625_v16 = vmul.f32 %v9250_v54, %v1623_v60  ;;  %v2121_v6 = vmul.f32 %v14783_v2, %v2119_v34  ;;  %v2103_v13 = vsel %vm2100_vm3, %v2102_v63, %v2098_v50  ;;  %v14796_v52 = vld [vmem:[#allocation62_spill] sm:$0xff]  ;;  %vm9792_vm0 = vmor %vm2015_vm14, %vm2016_vm10 }
 0x4fd   : > { %v2066_v54 = vsel %vm9697_vm4, %v9592_v57, %v9642_v15  ;;  %v9718_v34 = vadd.f32 %v819_v33, %v671_v43  ;;  %v2082_v60 = vsel %vm9705_vm6, %v9613_v45, %v2078_v32  ;;  %v2012_v50 = vsub.f32 1.0, %v9647_v17 }
 0x4fe   : > { %2137 = vmatpush.xpose.msrb.mxu0 %v1624_v61  ;;  %2157 = vmatpush.xpose.msrb.mxu1 %v1625_v16  ;;  %v1995_v57 = vmul.f32 %v9685_v1, %v9424_v26  ;;  %v2086_v15 = vor.u32 1.1754944e-38, %v2085_v37  ;;  %v2104_v28 = vmul.f32 %v14788_v44, %v2103_v13  ;;  %v2105_v33 = vmul.f32 %v14789_v5, %v2103_v13  ;;  %v9743_v16 = vpop.eup %7648  ;;  %v14800_v61 = vld [vmem:[#allocation59_spill] sm:$0xff] }
 0x4ff   : > { %v14790_v43 = vand.u32 2147483647, %v9286_v58  ;;  %v14791_v45 = vand.u32 2147483648, %v9292_v18  ;;  %v2050_v58 = vsel %vm9739_vm1, %v9594_v31, %v2046_v7  ;;  %v2029_v18 = vmul.f32 %v9666_v55, %v2028_v14  ;;  %v14798_v7 = vld [vmem:[#allocation61_spill] sm:$0xff] }
 0x500   : > { %v1996_v37 = vsub.f32 1.0, %v1995_v57  ;;  %v1979_v31 = vmul.f32 %v9743_v16, %v9488_v46  ;;  %vm1999_vm4 = vweird.f32 %v9424_v26  ;;  %vm1967_vm11 = vweird.f32 %v9527_v27 }
 0x501   : > { %2138 = vmatmul.f32.vlgmr.msrb.gmra.mxu0 %v9716_v4  ;;  %2158 = vmatmul.f32.vlgmr.msrb.gmra.mxu1 %v9718_v34  ;;  %vm2084_vm13 = vcmp.eq.f32.partialorder %v14790_v43, 8.507059e+37  ;;  %v2070_v17 = vor.u32 1.1754944e-38, %v14791_v45  ;;  %v2030_v44 = vadd.f32 %v9666_v55, %v2029_v18  ;;  %v9773_v45 = vpop.xlane.xlu2 %1572 }
 0x502   : > { %2162 = vmatpush.xpose.msra.mxu0 %v2120_v20  ;;  %2182 = vmatpush.xpose.msra.mxu1 %v2121_v6  ;;  %v2087_v32 = vsel %vm2084_vm13, %v2086_v15, %v2082_v60  ;;  %v14794_v20 = vand.u32 2147483648, %v9284_v39  ;;  %v2013_v6 = vmul.f32 %v9627_v53, %v2012_v50  ;;  %v9757_v60 = vpop.eup %7650  ;;  %v14799_v50 = vld [vmem:[#allocation44_spill] sm:$0xff]  ;;  %7656 = vrcp.f32 %v9773_v45  ;;  %vm9808_vm13 = vmor %vm1999_vm4, %vm2000_vm2 }
 0x503   : > { %v2071_v63 = vsel %vm2068_vm15, %v2070_v17, %v2066_v54  ;;  %v2088_v13 = vmul.f32 %v14795_v47, %v2087_v32  ;;  %v2089_v11 = vmul.f32 %v14796_v52, %v2087_v32  ;;  %v14797_v54 = vand.u32 2147483647, %v9284_v39  ;;  %v9782_v18 = vpop.eup %7652 }
 0x504   : > { %v2054_v2 = vor.u32 1.1754944e-38, %v14794_v20  ;;  %v2072_v14 = vmul.f32 %v14798_v7, %v2071_v63  ;;  %v2073_v15 = vmul.f32 %v14799_v50, %v2071_v63  ;;  %v2037_v39 = vand.u32 2147483648, %v9418_v36  ;;  %v9806_v7 = vpop.eup %7654 }
 0x505   : > { %vm2052_vm5 = vcmp.eq.f32.partialorder %v14797_v54, 8.507059e+37  ;;  %v2014_v5 = vadd.f32 %v9627_v53, %v2013_v6  ;;  %v1963_v43 = vmul.f32 %v9757_v60, %v9527_v27  ;;  %v2035_v17 = vand.u32 2147483647, %v9418_v36 }
 0x506   : > { %2163 = vmatpush.xpose.msra.mxu0 %v2104_v28  ;;  %2183 = vmatpush.xpose.msra.mxu1 %v2105_v33  ;;  %v2055_v57 = vsel %vm2052_vm5, %v2054_v2, %v2050_v58  ;;  %v2021_v28 = vand.u32 2147483648, %v9334_v62  ;;  %v1997_v33 = vmul.f32 %v9685_v1, %v1996_v37  ;;  %v1980_v32 = vsub.f32 1.0, %v1979_v31  ;;  %v14803_v37 = vld [vmem:[#allocation60_spill] sm:$0xff]  ;;  %v14810_v58 = vld [vmem:[#allocation45_spill] sm:$0xff] }
 0x507   : > { %v2056_v63 = vmul.f32 %v14800_v61, %v2055_v57  ;;  %v2057_v20 = vmul.f32 %v14803_v37, %v2055_v57  ;;  %v2034_v2 = vsel %vm9778_vm12, %v9666_v55, %v2030_v44  ;;  %v2019_v36 = vand.u32 2147483647, %v9334_v62  ;;  %v14808_v44 = vld [vmem:[#allocation67_spill] sm:$0xff] }
 0x508   : > { %v2038_v6 = vor.u32 1.1754944e-38, %v2037_v39  ;;  %v1998_v52 = vadd.f32 %v9685_v1, %v1997_v33  ;;  %vm2036_vm3 = vcmp.eq.f32.partialorder %v2035_v17, 8.507059e+37  ;;  %v2018_v55 = vsel %vm9792_vm0, %v9627_v53, %v2014_v5  ;;  %v14809_v39 = vld [vmem:[#allocation68_spill] sm:$0xff] }
 0x509   : > { %v1947_v62 = vmul.f32 %v9782_v18, %v9545_v12  ;;  %v1981_v31 = vmul.f32 %v9743_v16, %v1980_v32  ;;  %vm2020_vm6 = vcmp.eq.f32.partialorder %v2019_v36, 8.507059e+37  ;;  %v2005_v53 = vand.u32 2147483648, %v9424_v26  ;;  %v9825_v61 = vpop.xlane.xlu2 %1566 }
 0x50a   : > { %2164 = vmatpush.xpose.msra.mxu0 %v2088_v13  ;;  %2184 = vmatpush.xpose.msra.mxu1 %v2089_v11  ;;  %v2022_v13 = vor.u32 1.1754944e-38, %v2021_v28  ;;  %v1964_v11 = vsub.f32 1.0, %v1963_v43  ;;  %v2039_v54 = vsel %vm2036_vm3, %v2038_v6, %v2034_v2  ;;  %v2002_v50 = vsel %vm9808_vm13, %v9685_v1, %v1998_v52  ;;  %v14811_v2 = vld [vmem:[#allocation31_spill] sm:$0xff] }
 0x50b   : > { %v2040_v28 = vmul.f32 %v14808_v44, %v2039_v54  ;;  %v2041_v5 = vmul.f32 %v14809_v39, %v2039_v54  ;;  %vm1984_vm15 = vweird.f32 %v9743_v16  ;;  %v1948_v43 = vsub.f32 1.0, %v1947_v62  ;;  %v9849_v62 = vpop.xlane.xlu0 %1563 }
 0x50c   : > { %v2023_v57 = vsel %vm2020_vm6, %v2022_v13, %v2018_v55  ;;  %v1965_v33 = vmul.f32 %v9757_v60, %v1964_v11  ;;  %v1931_v17 = vmul.f32 %v9806_v7, %v9584_v48  ;;  %7658 = vrcp.f32 %v9638_v24 }
 0x50d   : > { %v1982_v32 = vadd.f32 %v9743_v16, %v1981_v31  ;;  %v1989_v1 = vand.u32 2147483648, %v9488_v46  ;;  %v2024_v37 = vmul.f32 %v14810_v58, %v2023_v57  ;;  %vm1983_vm5 = vweird.f32 %v9488_v46 }
 0x50e   : > { %2165 = vmatpush.xpose.msra.mxu0 %v2072_v14  ;;  %2185 = vmatpush.xpose.msra.mxu1 %v2073_v15  ;;  %v2003_v15 = vand.u32 2147483647, %v9424_v26  ;;  %v2006_v26 = vor.u32 1.1754944e-38, %v2005_v53  ;;  %v2025_v36 = vmul.f32 %v14811_v2, %v2023_v57  ;;  %vm9836_vm9 = vmor %vm1983_vm5, %vm1984_vm15  ;;  %v1966_v13 = vadd.f32 %v9757_v60, %v1965_v33  ;;  %v14816_v57 = vld [vmem:[#allocation64_spill] sm:$0xff] }
 0x50f   : > { %vm1968_vm10 = vweird.f32 %v9757_v60  ;;  %v1932_v52 = vsub.f32 1.0, %v1931_v17  ;;  %7660 = vrcp.f32 %v9825_v61  ;;  %v1949_v11 = vmul.f32 %v9782_v18, %v1948_v43  ;;  %v14823_v53 = vld [vmem:[#allocation72_spill] sm:$0xff] }
 0x510   : > { %vm2004_vm1 = vcmp.eq.f32.partialorder %v2003_v15, 8.507059e+37  ;;  %v1990_v54 = vor.u32 1.1754944e-38, %v1989_v1  ;;  %v1973_v31 = vand.u32 2147483648, %v9527_v27  ;;  %vm9855_vm14 = vmor %vm1967_vm11, %vm1968_vm10  ;;  %v14817_v15 = vld [vmem:[#allocation65_spill] sm:$0xff]  ;;  %7662 = vrcp.f32 %v9849_v62 }
 0x511   : > { %v2007_v6 = vsel %vm2004_vm1, %v2006_v26, %v2002_v50  ;;  %v1970_v39 = vsel %vm9855_vm14, %v9757_v60, %v1966_v13  ;;  %vm1952_vm0 = vweird.f32 %v9782_v18  ;;  %v1933_v33 = vmul.f32 %v9806_v7, %v1932_v52  ;;  %v14818_v1 = vld [vmem:[#allocation69_spill] sm:$0xff] }
 0x512   : > { %2166 = vmatpush.xpose.msra.mxu0 %v2056_v63  ;;  %2186 = vmatpush.xpose.msra.mxu1 %v2057_v20  ;;  %v9828_v63 = vpop.eup %7656  ;;  %v1987_v20 = vand.u32 2147483647, %v9488_v46  ;;  %v1986_v46 = vsel %vm9836_vm9, %v9743_v16, %v1982_v32  ;;  %v1971_v16 = vand.u32 2147483647, %v9527_v27  ;;  %v2008_v50 = vmul.f32 %v14816_v57, %v2007_v6 }
 0x513   : > { %v1915_v55 = vmul.f32 %v9828_v63, %v9773_v45  ;;  %v9853_v14 = vpop.eup %7658  ;;  %v2009_v44 = vmul.f32 %v14817_v15, %v2007_v6  ;;  %v1974_v17 = vor.u32 1.1754944e-38, %v1973_v31  ;;  %v1957_v32 = vand.u32 2147483648, %v9545_v12 }
 0x514   : > { %vm1988_vm12 = vcmp.eq.f32.partialorder %v1987_v20, 8.507059e+37  ;;  %v1899_v27 = vmul.f32 %v9853_v14, %v9638_v24  ;;  %vm1972_vm2 = vcmp.eq.f32.partialorder %v1971_v16, 8.507059e+37  ;;  %vm1951_vm3 = vweird.f32 %v9545_v12 }
 0x515   : > { %v1916_v43 = vsub.f32 1.0, %v1915_v55  ;;  %v9872_v26 = vpop.eup %7660  ;;  %v1955_v60 = vand.u32 2147483647, %v9545_v12  ;;  %v1975_v2 = vsel %vm1972_vm2, %v1974_v17, %v1970_v39  ;;  %vm9880_vm4 = vmor %vm1951_vm3, %vm1952_vm0  ;;  %v1934_v47 = vadd.f32 %v9806_v7, %v1933_v33 }
 0x516   : > { %2167 = vmatpush.xpose.msra.mxu0 %v2040_v28  ;;  %2187 = vmatpush.xpose.msra.mxu1 %v2041_v5  ;;  %v1991_v28 = vsel %vm1988_vm12, %v1990_v54, %v1986_v46  ;;  %v1950_v5 = vadd.f32 %v9782_v18, %v1949_v11  ;;  %vm1936_vm6 = vweird.f32 %v9806_v7  ;;  %v1941_v12 = vand.u32 2147483648, %v9584_v48  ;;  %v9893_v55 = vpop.eup %7662  ;;  %v14822_v54 = vld [vmem:[#allocation71_spill] sm:$0xff] }
 0x517   : > { %v1992_v58 = vmul.f32 %v14818_v1, %v1991_v28  ;;  %v1900_v13 = vsub.f32 1.0, %v1899_v27  ;;  %v1883_v52 = vmul.f32 %v9872_v26, %v9825_v61  ;;  %v1958_v46 = vor.u32 1.1754944e-38, %v1957_v32  ;;  %v14825_v27 = vld [vmem:[#allocation74_spill] sm:$0xff] }
 0x518   : > { %v1954_v6 = vsel %vm9880_vm4, %v9782_v18, %v1950_v5  ;;  %v1917_v11 = vmul.f32 %v9828_v63, %v1916_v43  ;;  %vm1956_vm13 = vcmp.eq.f32.partialorder %v1955_v60, 8.507059e+37  ;;  %vm1935_vm15 = vweird.f32 %v9584_v48  ;;  %v14824_v5 = vld [vmem:[#allocation73_spill] sm:$0xff] }
 0x519   : > { %v1939_v18 = vand.u32 2147483647, %v9584_v48  ;;  %v1976_v31 = vmul.f32 %v14822_v54, %v1975_v2  ;;  %v1977_v16 = vmul.f32 %v14823_v53, %v1975_v2  ;;  %v1959_v57 = vsel %vm1956_vm13, %v1958_v46, %v1954_v6  ;;  %vm1937_vm1 = vmor %vm1935_vm15, %vm1936_vm6  ;;  %v14828_v2 = vld [vmem:[#allocation75_spill] sm:$0xff] }
 0x51a   : > { %2168 = vmatpush.xpose.msra.mxu0 %v2024_v37  ;;  %2188 = vmatpush.xpose.msra.mxu1 %v2025_v36  ;;  %v14819_v37 = vld [vmem:[#allocation70_spill] sm:$0xff]  ;;  %v1942_v15 = vor.u32 1.1754944e-38, %v1941_v12  ;;  %vm1920_vm5 = vweird.f32 %v9828_v63  ;;  %v1918_v48 = vadd.f32 %v9828_v63, %v1917_v11  ;;  %v1901_v39 = vmul.f32 %v9853_v14, %v1900_v13 }
 0x51b   : > { %v1993_v20 = vmul.f32 %v14819_v37, %v1991_v28  ;;  %v1867_v28 = vmul.f32 %v9893_v55, %v9849_v62  ;;  %v1960_v33 = vmul.f32 %v14824_v5, %v1959_v57  ;;  %vm1940_vm9 = vcmp.eq.f32.partialorder %v1939_v18, 8.507059e+37  ;;  %v14833_v5 = vld [vmem:[#allocation48_spill] sm:$0xff] }
 0x51c   : > { %v1925_v43 = vand.u32 2147483648, %v9773_v45  ;;  %vm1919_vm10 = vweird.f32 %v9773_v45  ;;  %v1923_v32 = vand.u32 2147483647, %v9773_v45  ;;  %vm1904_vm12 = vweird.f32 %v9853_v14 }
 0x51d   : > { %vm9912_vm11 = vmor %vm1919_vm10, %vm1920_vm5  ;;  %v1868_v1 = vsub.f32 1.0, %v1867_v28  ;;  %v1902_v37 = vadd.f32 %v9853_v14, %v1901_v39  ;;  %v1909_v6 = vand.u32 2147483648, %v9638_v24  ;;  %vm1903_vm0 = vweird.f32 %v9638_v24 }
 0x51e   : > { %2169 = vmatpush.xpose.msra.mxu0 %v2008_v50  ;;  %2189 = vmatpush.xpose.msra.mxu1 %v2009_v44  ;;  %v1938_v50 = vsel %vm1937_vm1, %v9806_v7, %v1934_v47  ;;  %v1884_v44 = vsub.f32 1.0, %v1883_v52  ;;  %v1961_v7 = vmul.f32 %v14825_v27, %v1959_v57  ;;  %v1926_v45 = vor.u32 1.1754944e-38, %v1925_v43  ;;  %v14829_v47 = vld [vmem:[#allocation50_spill] sm:$0xff]  ;;  %vm1905_vm2 = vmor %vm1903_vm0, %vm1904_vm12 }
 0x51f   : > { %v1943_v17 = vsel %vm1940_vm9, %v1942_v15, %v1938_v50  ;;  %vm1924_vm14 = vcmp.eq.f32.partialorder %v1923_v32, 8.507059e+37  ;;  %v1907_v13 = vand.u32 2147483647, %v9638_v24  ;;  %vm1888_vm3 = vweird.f32 %v9872_v26  ;;  %v14830_v24 = vld [vmem:[#allocation49_spill] sm:$0xff]  ;;  %v14835_v32 = vld [vmem:[#allocation78_spill] sm:$0xff] }
 0x520   : > { %v1944_v36 = vmul.f32 %v14828_v2, %v1943_v17  ;;  %v1945_v12 = vmul.f32 %v14829_v47, %v1943_v17  ;;  %v1869_v11 = vmul.f32 %v9893_v55, %v1868_v1  ;;  %v1910_v18 = vor.u32 1.1754944e-38, %v1909_v6  ;;  %v14837_v2 = vld [vmem:[#allocation47_spill] sm:$0xff] }
 0x521   : > { %v1891_v54 = vand.u32 2147483647, %v9825_v61  ;;  %vm1908_vm4 = vcmp.eq.f32.partialorder %v1907_v13, 8.507059e+37  ;;  %vm1887_vm6 = vweird.f32 %v9825_v61  ;;  %vm1872_vm15 = vweird.f32 %v9893_v55 }
 0x522   : > { %2170 = vmatpush.xpose.msra.mxu0 %v1992_v58  ;;  %2190 = vmatpush.xpose.msra.mxu1 %v1993_v20  ;;  %v1922_v58 = vsel %vm9912_vm11, %v9828_v63, %v1918_v48  ;;  %v1885_v20 = vmul.f32 %v9872_v26, %v1884_v44  ;;  %v1906_v63 = vsel %vm1905_vm2, %v9853_v14, %v1902_v37  ;;  %vm1889_vm13 = vmor %vm1887_vm6, %vm1888_vm3  ;;  %v1877_v28 = vand.u32 2147483648, %v9849_v62  ;;  %v14832_v48 = vld [vmem:[#allocation51_spill] sm:$0xff]  ;;  %v14836_v37 = vld [vmem:[#allocation46_spill] sm:$0xff] }
 0x523   : > { %v1927_v52 = vsel %vm1924_vm14, %v1926_v45, %v1922_v58  ;;  %v1911_v50 = vsel %vm1908_vm4, %v1910_v18, %v1906_v63  ;;  %v1870_v15 = vadd.f32 %v9893_v55, %v1869_v11  ;;  %vm1892_vm1 = vcmp.eq.f32.partialorder %v1891_v54, 8.507059e+37  ;;  %v656_v58 = vpop.permute.xlu2 %655 }
 0x524   : > { %v1886_v46 = vadd.f32 %v9872_v26, %v1885_v20  ;;  %v1928_v53 = vmul.f32 %v14830_v24, %v1927_v52  ;;  %v1912_v39 = vmul.f32 %v14832_v48, %v1911_v50  ;;  %vm1871_vm5 = vweird.f32 %v9849_v62 }
 0x525   : > { %vm1873_vm9 = vmor %vm1871_vm5, %vm1872_vm15  ;;  %v1878_v27 = vor.u32 1.1754944e-38, %v1877_v28  ;;  %v811_v45 = vadd.f32 %v9579_v3, %v656_v58 }
 0x526   : > { %2171 = vmatpush.xpose.msra.mxu0 %v1976_v31  ;;  %2191 = vmatpush.xpose.msra.mxu1 %v1977_v16  ;;  %v1893_v31 = vand.u32 2147483648, %v9825_v61  ;;  %v14831_v16 = vld [vmem:[#allocation76_spill] sm:$0xff]  ;;  %v1890_v14 = vsel %vm1889_vm13, %v9872_v26, %v1886_v46  ;;  %v1875_v61 = vand.u32 2147483647, %v9849_v62  ;;  %v1874_v26 = vsel %vm1873_vm9, %v9893_v55, %v1870_v15  ;;  %v2203_v55 = vpop.permute.xlu0 %2202 }
 0x527   : > { %v1929_v57 = vmul.f32 %v14831_v16, %v1927_v52 }
 0x528   : > { %v1894_v44 = vor.u32 1.1754944e-38, %v1893_v31  ;;  %vm1876_vm10 = vcmp.eq.f32.partialorder %v1875_v61, 8.507059e+37 }
 0x529   : > { %v1879_v1 = vsel %vm1876_vm10, %v1878_v27, %v1874_v26 }
 0x52a   : > { %2172 = vmatpush.xpose.msra.mxu0 %v1960_v33  ;;  %2192 = vmatpush.xpose.msra.mxu1 %v1961_v7  ;;  %v1913_v33 = vmul.f32 %v14833_v5, %v1911_v50  ;;  %v1895_v43 = vsel %vm1892_vm1, %v1894_v44, %v1890_v14  ;;  %v14834_v7 = vld [vmem:[#allocation77_spill] sm:$0xff]  ;;  %v1880_v20 = vmul.f32 %v14836_v37, %v1879_v1 }
 0x52b   : > { %v1896_v17 = vmul.f32 %v14834_v7, %v1895_v43  ;;  %v1897_v60 = vmul.f32 %v14835_v32, %v1895_v43  ;;  %v1881_v62 = vmul.f32 %v14837_v2, %v1879_v1  ;;  %v2209_v3 = vpop.permute.xlu2 %2208 }
 0x52e   : > { %2173 = vmatpush.xpose.msra.mxu0 %v1944_v36  ;;  %2193 = vmatpush.xpose.msra.mxu1 %v1945_v12  ;;  %v758_v36 = vadd.f32 %v9576_v19, %v656_v58  ;;  %v2205_v6 = vpop.permute.xlu0 %2204  ;;  %v2207_v19 = vpop.permute.xlu1 %2206 }
 0x532   : > { %2174 = vmatpush.xpose.msra.mxu0 %v1928_v53  ;;  %2194 = vmatpush.xpose.msra.mxu1 %v1929_v57  ;;  %v9975_v46 = vpop.f32.mrf.mxu0  ;;  %v9977_v11 = vpop.f32.mrf.mxu1 }
 0x533   : > { %v2215_v47 = vpop.permute.xlu2 %2214  ;;  %14838 = vst [vmem:[#allocation57_spill] sm:$0xff] %v9975_v46 }
 0x534   : > { %14839 = vst [vmem:[#allocation58_spill] sm:$0xff] %v9977_v11 }
 0x536   : > { %2175 = vmatpush.xpose.msra.mxu0 %v1912_v39  ;;  %2195 = vmatpush.xpose.msra.mxu1 %v1913_v33 }
 0x53a   : > { %2176 = vmatpush.xpose.msra.mxu0 %v1896_v17  ;;  %2196 = vmatpush.xpose.msra.mxu1 %v1897_v60 }
 0x53b   : > { %v2221_v52 = vpop.permute.xlu2 %2220 }
 0x53e   : > { %2177 = vmatpush.xpose.msra.mxu0 %v1880_v20  ;;  %2197 = vmatpush.xpose.msra.mxu1 %v1881_v62  ;;  %v9983_v54 = vpop.f32.mrf.mxu0  ;;  %v9985_v31 = vpop.f32.mrf.mxu1 }
 0x53f   : > { %14840 = vst [vmem:[#allocation66_spill] sm:$0xff] %v9983_v54 }
 0x540   : > { %14841 = vst [vmem:[#allocation52_spill] sm:$0xff] %v9985_v31 }
 0x541   : > { %2178 = vmatmul.f32.vlgmr.msra.gmra.mxu0 %v9716_v4  ;;  %2198 = vmatmul.f32.vlgmr.msra.gmra.mxu1 %v9718_v34  ;;  %v2211_v4 = vpop.permute.xlu0 %2210  ;;  %v2213_v34 = vpop.permute.xlu1 %2212 }
 0x542   : > { %2345 = vmatpush.msrb.mxu0 %v758_v36  ;;  %2458 = vmatpush.msrb.mxu1 %v811_v45 }
 0x543   : > { %v2227_v24 = vpop.permute.xlu2 %2226 }
 0x546   : > { %v9989_v53 = vpop.f32.mrf.mxu0  ;;  %v9991_v16 = vpop.f32.mrf.mxu1 }
 0x547   : > { %14842 = vst [vmem:[#allocation63_spill] sm:$0xff] %v9989_v53 }
 0x548   : > { %14843 = vst [vmem:[#allocation30_spill] sm:$0xff] %v9991_v16 }
 0x549   : > { %7185 = vmatmul.msk.f32.vlgmr.msrb.gmra.mxu0 %vm903_vm8, %v2203_v55  ;;  %7217 = vmatmul.msk.f32.vlgmr.msrb.gmra.mxu1 %vm903_vm8, %v2203_v55  ;;  %v2217_v12 = vpop.permute.xlu0 %2216  ;;  %v2219_v13 = vpop.permute.xlu1 %2218 }
 0x54b   : > { %v2233_v48 = vpop.permute.xlu2 %2232 }
 0x551   : > { %7186 = vmatmul.msk.f32.gmra.mxu0 %vm903_vm8, %v2205_v6  ;;  %7218 = vmatmul.msk.f32.gmra.mxu1 %vm903_vm8, %v2205_v6  ;;  %v2223_v63 = vpop.permute.xlu0 %2222  ;;  %v2225_v18 = vpop.permute.xlu1 %2224 }
 0x553   : > { %v2239_v32 = vpop.permute.xlu2 %2238 }
 0x559   : > { %7187 = vmatmul.msk.f32.gmra.mxu0 %vm903_vm8, %v2207_v19  ;;  %7219 = vmatmul.msk.f32.gmra.mxu1 %vm903_vm8, %v2207_v19  ;;  %v2229_v57 = vpop.permute.xlu0 %2228  ;;  %v2231_v15 = vpop.permute.xlu1 %2230 }
 0x55b   : > { %v2245_v19 = vpop.permute.xlu2 %2244 }
 0x561   : > { %7188 = vmatmul.msk.f32.gmra.mxu0 %vm903_vm8, %v2209_v3  ;;  %7220 = vmatmul.msk.f32.gmra.mxu1 %vm903_vm8, %v2209_v3  ;;  %v2235_v33 = vpop.permute.xlu0 %2234  ;;  %v2237_v26 = vpop.permute.xlu1 %2236 }
 0x569   : > { %7189 = vmatmul.msk.f32.gmra.mxu0 %vm903_vm8, %v2211_v4  ;;  %7221 = vmatmul.msk.f32.gmra.mxu1 %vm903_vm8, %v2211_v4  ;;  %v2241_v37 = vpop.permute.xlu0 %2240  ;;  %v2243_v36 = vpop.permute.xlu1 %2242 }
 0x571   : > { %7190 = vmatmul.msk.f32.gmra.mxu0 %vm903_vm8, %v2213_v34  ;;  %7222 = vmatmul.msk.f32.gmra.mxu1 %vm903_vm8, %v2213_v34 }
 0x579   : > { %7191 = vmatmul.msk.f32.gmra.mxu0 %vm903_vm8, %v2215_v47  ;;  %7223 = vmatmul.msk.f32.gmra.mxu1 %vm903_vm8, %v2215_v47  ;;  %v2247_v47 = vpop.permute.xlu0 %2246 }
 0x57e   : > { %v9995_v50 = vpop.f32.mrf.mxu0  ;;  %v9997_v14 = vpop.f32.mrf.mxu1 }
 0x57f   : > { %14844 = vst [vmem:[#allocation62_spill] sm:$0xff] %v9995_v50 }
 0x580   : > { %14845 = vst [vmem:[#allocation61_spill] sm:$0xff] %v9997_v14 }
 0x581   : > { %7192 = vmatmul.msk.f32.gmra.mxu0 %vm903_vm8, %v2217_v12  ;;  %7224 = vmatmul.msk.f32.gmra.mxu1 %vm903_vm8, %v2217_v12 }
 0x589   : > { %7193 = vmatmul.msk.f32.gmra.mxu0 %vm903_vm8, %v2219_v13  ;;  %7225 = vmatmul.msk.f32.gmra.mxu1 %vm903_vm8, %v2219_v13 }
 0x591   : > { %7194 = vmatmul.msk.f32.gmra.mxu0 %vm903_vm8, %v2221_v52  ;;  %7226 = vmatmul.msk.f32.gmra.mxu1 %vm903_vm8, %v2221_v52 }
 0x599   : > { %7195 = vmatmul.msk.f32.gmra.mxu0 %vm903_vm8, %v2223_v63  ;;  %7227 = vmatmul.msk.f32.gmra.mxu1 %vm903_vm8, %v2223_v63  ;;  %v2249_v63 = vpop.permute.xlu1 %2248 }
 0x5a1   : > { %7196 = vmatmul.msk.f32.gmra.mxu0 %vm903_vm8, %v2225_v18  ;;  %7228 = vmatmul.msk.f32.gmra.mxu1 %vm903_vm8, %v2225_v18 }
 0x5a9   : > { %7197 = vmatmul.msk.f32.gmra.mxu0 %vm903_vm8, %v2227_v24  ;;  %7229 = vmatmul.msk.f32.gmra.mxu1 %vm903_vm8, %v2227_v24 }
 0x5b1   : > { %7198 = vmatmul.msk.f32.gmra.mxu0 %vm903_vm8, %v2229_v57  ;;  %7230 = vmatmul.msk.f32.gmra.mxu1 %vm903_vm8, %v2229_v57 }
 0x5b9   : > { %7199 = vmatmul.msk.f32.gmra.mxu0 %vm903_vm8, %v2231_v15  ;;  %7231 = vmatmul.msk.f32.gmra.mxu1 %vm903_vm8, %v2231_v15  ;;  %v2251_v15 = vpop.permute.xlu2 %2250 }
 0x5be   : > { %v10001_v44 = vpop.f32.mrf.mxu0  ;;  %v10003_v28 = vpop.f32.mrf.mxu1 }
 0x5bf   : > { %14846 = vst [vmem:[#allocation44_spill] sm:$0xff] %v10001_v44 }
 0x5c0   : > { %14847 = vst [vmem:[#allocation59_spill] sm:$0xff] %v10003_v28 }
 0x5c1   : > { %7200 = vmatmul.msk.f32.gmra.mxu0 %vm903_vm8, %v2233_v48  ;;  %7232 = vmatmul.msk.f32.gmra.mxu1 %vm903_vm8, %v2233_v48 }
 0x5c6   : > { %v10007_v39 = vpop.f32.mrf.mxu0  ;;  %v10009_v5 = vpop.f32.mrf.mxu1 }
 0x5c9   : > { %7201 = vmatmul.msk.f32.gmra.mxu0 %vm903_vm8, %v2235_v33  ;;  %7233 = vmatmul.msk.f32.gmra.mxu1 %vm903_vm8, %v2235_v33 }
 0x5ce   : > { %v10013_v61 = vpop.f32.mrf.mxu0  ;;  %v10015_v43 = vpop.f32.mrf.mxu1 }
 0x5d1   : > { %7202 = vmatmul.msk.f32.gmra.mxu0 %vm903_vm8, %v2237_v26  ;;  %7234 = vmatmul.msk.f32.gmra.mxu1 %vm903_vm8, %v2237_v26 }
 0x5d6   : > { %v10019_v27 = vpop.f32.mrf.mxu0  ;;  %v10021_v7 = vpop.f32.mrf.mxu1 }
 0x5d7   : > { %14848 = vst [vmem:[#allocation60_spill] sm:$0xff] %v10019_v27  ;;  %v2562_v17 = vmax.f32 %v10019_v27, %v10021_v7 }
 0x5d8   : > { %14849 = vst [vmem:[#allocation67_spill] sm:$0xff] %v10021_v7 }
 0x5d9   : > { %2563 = vmax.xlane.f32.xlu1 %v2562_v17  ;;  %7203 = vmatmul.msk.f32.gmra.mxu0 %vm903_vm8, %v2239_v32  ;;  %v2253_v17 = vpop.permute.xlu0 %2252 }
 0x5da   : > { %7235 = vmatmul.msk.f32.gmra.mxu1 %vm903_vm8, %v2239_v32 }
 0x5de   : > { %v10027_v60 = vpop.f32.mrf.mxu0  ;;  %v10029_v1 = vpop.f32.mrf.mxu1 }
 0x5df   : > { %14850 = vst [vmem:[#allocation68_spill] sm:$0xff] %v10027_v60  ;;  %v2565_v58 = vmax.f32 %v10027_v60, %v10029_v1 }
 0x5e0   : > { %14851 = vst [vmem:[#allocation45_spill] sm:$0xff] %v10029_v1 }
 0x5e1   : > { %2566 = vmax.xlane.f32.xlu2 %v2565_v58  ;;  %7204 = vmatmul.msk.f32.gmra.mxu0 %vm903_vm8, %v2241_v37 }
 0x5e2   : > { %7236 = vmatmul.msk.f32.gmra.mxu1 %vm903_vm8, %v2241_v37 }
 0x5e6   : > { %v10035_v20 = vpop.f32.mrf.mxu0  ;;  %v10037_v2 = vpop.f32.mrf.mxu1 }
 0x5e7   : > { %v2568_v62 = vmax.f32 %v10035_v20, %v10037_v2 }
 0x5e9   : > { %2569 = vmax.xlane.f32.xlu0 %v2568_v62  ;;  %7205 = vmatmul.msk.f32.gmra.mxu0 %vm903_vm8, %v2243_v36  ;;  %v2255_v62 = vpop.permute.xlu1 %2254 }
 0x5ea   : > { %7237 = vmatmul.msk.f32.gmra.mxu1 %vm903_vm8, %v2243_v36 }
 0x5ee   : > { %v10043_v45 = vpop.f32.mrf.mxu0  ;;  %v10045_v55 = vpop.f32.mrf.mxu1 }
 0x5ef   : > { %v2571_v6 = vmax.f32 %v10043_v45, %v10045_v55 }
 0x5f1   : > { %2572 = vmax.xlane.f32.xlu1 %v2571_v6  ;;  %7206 = vmatmul.msk.f32.gmra.mxu0 %vm903_vm8, %v2245_v19 }
 0x5f2   : > { %7238 = vmatmul.msk.f32.gmra.mxu1 %vm903_vm8, %v2245_v19 }
 0x5f6   : > { %v10051_v3 = vpop.f32.mrf.mxu0  ;;  %v10053_v4 = vpop.f32.mrf.mxu1 }
 0x5f7   : > { %14852 = vst [vmem:[#allocation31_spill] sm:$0xff] %v10051_v3  ;;  %v2574_v34 = vmax.f32 %v10051_v3, %v10053_v4 }
 0x5f8   : > { %14853 = vst [vmem:[#allocation64_spill] sm:$0xff] %v10053_v4 }
 0x5f9   : > { %2575 = vmax.xlane.f32.xlu2 %v2574_v34  ;;  %7207 = vmatmul.msk.f32.gmra.mxu0 %vm903_vm8, %v2247_v47  ;;  %v2257_v34 = vpop.permute.xlu2 %2256 }
 0x5fa   : > { %7239 = vmatmul.msk.f32.gmra.mxu1 %vm903_vm8, %v2247_v47 }
 0x5fe   : > { %v10059_v12 = vpop.f32.mrf.mxu0  ;;  %v10061_v13 = vpop.f32.mrf.mxu1 }
 0x5ff   : > { %v2577_v52 = vmax.f32 %v10059_v12, %v10061_v13 }
 0x601   : > { %2578 = vmax.xlane.f32.xlu0 %v2577_v52  ;;  %7208 = vmatmul.msk.f32.gmra.mxu0 %vm903_vm8, %v2249_v63 }
 0x602   : > { %7240 = vmatmul.msk.f32.gmra.mxu1 %vm903_vm8, %v2249_v63 }
 0x606   : > { %v10067_v18 = vpop.f32.mrf.mxu0  ;;  %v10069_v24 = vpop.f32.mrf.mxu1 }
 0x607   : > { %v2580_v57 = vmax.f32 %v10067_v18, %v10069_v24 }
 0x609   : > { %2581 = vmax.xlane.f32.xlu1 %v2580_v57  ;;  %7209 = vmatmul.msk.f32.gmra.mxu0 %vm903_vm8, %v2251_v15  ;;  %v2259_v57 = vpop.permute.xlu0 %2258 }
 0x60a   : > { %7241 = vmatmul.msk.f32.gmra.mxu1 %vm903_vm8, %v2251_v15 }
 0x60e   : > { %v10075_v48 = vpop.f32.mrf.mxu0  ;;  %v10077_v33 = vpop.f32.mrf.mxu1 }
 0x60f   : > { %v2583_v26 = vmax.f32 %v10075_v48, %v10077_v33 }
 0x611   : > { %2584 = vmax.xlane.f32.xlu2 %v2583_v26  ;;  %7210 = vmatmul.msk.f32.gmra.mxu0 %vm903_vm8, %v2253_v17  ;;  %v2265_v28 = vpop.permute.xlu0 %2264 }
 0x612   : > { %7242 = vmatmul.msk.f32.gmra.mxu1 %vm903_vm8, %v2253_v17 }
 0x616   : > { %v10083_v32 = vpop.f32.mrf.mxu0  ;;  %v10085_v58 = vpop.f32.mrf.mxu1 }
 0x617   : > { %v2586_v37 = vmax.f32 %v10083_v32, %v10085_v58 }
 0x619   : > { %2587 = vmax.xlane.f32.xlu0 %v2586_v37  ;;  %7211 = vmatmul.msk.f32.gmra.mxu0 %vm903_vm8, %v2255_v62  ;;  %v2261_v37 = vpop.permute.xlu1 %2260 }
 0x61a   : > { %7243 = vmatmul.msk.f32.gmra.mxu1 %vm903_vm8, %v2255_v62 }
 0x61e   : > { %v10091_v36 = vpop.f32.mrf.mxu0  ;;  %v10093_v6 = vpop.f32.mrf.mxu1 }
 0x61f   : > { %v2589_v19 = vmax.f32 %v10091_v36, %v10093_v6 }
 0x621   : > { %2590 = vmax.xlane.f32.xlu1 %v2589_v19  ;;  %7212 = vmatmul.msk.f32.gmra.mxu0 %vm903_vm8, %v2257_v34 }
 0x622   : > { %7244 = vmatmul.msk.f32.gmra.mxu1 %vm903_vm8, %v2257_v34 }
 0x626   : > { %v10099_v47 = vpop.f32.mrf.mxu0  ;;  %v10101_v52 = vpop.f32.mrf.mxu1 }
 0x627   : > { %v2592_v63 = vmax.f32 %v10099_v47, %v10101_v52 }
 0x629   : > { %2593 = vmax.xlane.f32.xlu2 %v2592_v63  ;;  %7213 = vmatmul.msk.f32.gmra.mxu0 %vm903_vm8, %v2259_v57  ;;  %v2263_v63 = vpop.permute.xlu2 %2262 }
 0x62a   : > { %7245 = vmatmul.msk.f32.gmra.mxu1 %vm903_vm8, %v2259_v57 }
 0x62e   : > { %v10107_v15 = vpop.f32.mrf.mxu0  ;;  %v10109_v26 = vpop.f32.mrf.mxu1 }
 0x62f   : > { %v2595_v17 = vmax.f32 %v10107_v15, %v10109_v26 }
 0x631   : > { %2596 = vmax.xlane.f32.xlu0 %v2595_v17  ;;  %7214 = vmatmul.msk.f32.gmra.mxu0 %vm903_vm8, %v2261_v37 }
 0x632   : > { %7246 = vmatmul.msk.f32.gmra.mxu1 %vm903_vm8, %v2261_v37 }
 0x636   : > { %v10115_v62 = vpop.f32.mrf.mxu0  ;;  %v10117_v19 = vpop.f32.mrf.mxu1 }
 0x637   : > { %v2598_v34 = vmax.f32 %v10115_v62, %v10117_v19 }
 0x639   : > { %2599 = vmax.xlane.f32.xlu2 %v2598_v34  ;;  %7215 = vmatmul.msk.f32.gmra.mxu0 %vm903_vm8, %v2263_v63 }
 0x63a   : > { %7247 = vmatmul.msk.f32.gmra.mxu1 %vm903_vm8, %v2263_v63 }
 0x63e   : > { %v10123_v57 = vpop.f32.mrf.mxu0  ;;  %v10125_v17 = vpop.f32.mrf.mxu1 }
 0x63f   : > { %v2601_v37 = vmax.f32 %v10123_v57, %v10125_v17 }
 0x641   : > { %2602 = vmax.xlane.f32.xlu1 %v2601_v37  ;;  %7216 = vmatmul.msk.f32.gmra.mxu0 %vm903_vm8, %v2265_v28 }
 0x642   : > { %7248 = vmatmul.msk.f32.gmra.mxu1 %vm903_vm8, %v2265_v28 }
 0x646   : > { %v10131_v44 = vpop.f32.mrf.mxu0  ;;  %v10133_v34 = vpop.f32.mrf.mxu1 }
 0x64c   : > { %v10211_v1 = vpop.xlane.xlu1 %2563 }
 0x64d   : > { %14866 = vst [vmem:[#allocation48_spill] sm:$0xff] %v10211_v1 }
 0x64e   : > { %v10135_v14 = vpop.f32.mrf.mxu0  ;;  %v10137_v63 = vpop.f32.mrf.mxu1 }
 0x654   : > { %v10177_v49 = vpop.xlane.xlu2 %2566 }
 0x655   : > { %14862 = vst [vmem:[#allocation50_spill] sm:$0xff] %v10177_v49 }
 0x656   : > { %v10139_v50 = vpop.f32.mrf.mxu0 }
 0x657   : > { %14854 = vst [vmem:[#allocation65_spill] sm:$0xff] %v10139_v50  ;;  %v10141_v16 = vpop.f32.mrf.mxu1 }
 0x658   : > { %14855 = vst [vmem:[#allocation69_spill] sm:$0xff] %v10141_v16 }
 0x65e   : > { %v10143_v53 = vpop.f32.mrf.mxu0 }
 0x65f   : > { %14856 = vst [vmem:[#allocation70_spill] sm:$0xff] %v10143_v53  ;;  %v10145_v31 = vpop.f32.mrf.mxu1 }
 0x660   : > { %14857 = vst [vmem:[#allocation71_spill] sm:$0xff] %v10145_v31 }
 0x666   : > { %v10147_v37 = vpop.f32.mrf.mxu0 }
 0x667   : > { %14858 = vst [vmem:[#allocation72_spill] sm:$0xff] %v10147_v37  ;;  %v10149_v54 = vpop.f32.mrf.mxu1 }
 0x668   : > { %14859 = vst [vmem:[#allocation73_spill] sm:$0xff] %v10149_v54  ;;  %v2616_v28 = vmax.f32 %v10147_v37, %v10149_v54 }
 0x66a   : > { %2617 = vmax.xlane.f32.xlu2 %v2616_v28 }
 0x66c   : > { %v10185_v9 = vpop.xlane.xlu2 %2575 }
 0x66d   : > { %14863 = vst [vmem:[#allocation49_spill] sm:$0xff] %v10185_v9 }
 0x66e   : > { %v10153_v11 = vpop.f32.mrf.mxu0 }
 0x66f   : > { %v10155_v46 = vpop.f32.mrf.mxu1 }
 0x670   : > { %v2619_v8 = vmax.f32 %v10153_v11, %v10155_v46 }
 0x672   : > { %2620 = vmax.xlane.f32.xlu0 %v2619_v8 }
 0x676   : > { %v10159_v38 = vpop.f32.mrf.mxu0 }
 0x677   : > { %v10161_v22 = vpop.f32.mrf.mxu1 }
 0x678   : > { %v2622_v59 = vmax.f32 %v10159_v38, %v10161_v22 }
 0x67a   : > { %2623 = vmax.xlane.f32.xlu1 %v2622_v59 }
 0x67e   : > { %v10165_v29 = vpop.f32.mrf.mxu0 }
 0x67f   : > { %14860 = vst [vmem:[#allocation74_spill] sm:$0xff] %v10165_v29  ;;  %v10167_v30 = vpop.f32.mrf.mxu1 }
 0x680   : > { %14861 = vst [vmem:[#allocation75_spill] sm:$0xff] %v10167_v30  ;;  %v2625_v28 = vmax.f32 %v10165_v29, %v10167_v30 }
 0x682   : > { %2626 = vmax.xlane.f32.xlu2 %v2625_v28 }
 0x684   : > { %v10195_v10 = vpop.xlane.xlu2 %2584 }
 0x686   : > { %v10171_v40 = vpop.f32.mrf.mxu0 }
 0x687   : > { %v10173_v35 = vpop.f32.mrf.mxu1 }
 0x688   : > { %v2628_v8 = vmax.f32 %v10171_v40, %v10173_v35 }
 0x68a   : > { %2629 = vmax.xlane.f32.xlu0 %v2628_v8  ;;  %v10193_v8 = vpop.xlane.xlu0 %2569 }
 0x68e   : > { %v10179_v41 = vpop.f32.mrf.mxu0 }
 0x68f   : > { %v10181_v59 = vpop.f32.mrf.mxu1 }
 0x690   : > { %v2631_v42 = vmax.f32 %v10179_v41, %v10181_v59 }
 0x692   : > { %2632 = vmax.xlane.f32.xlu1 %v2631_v42  ;;  %v10203_v0 = vpop.xlane.xlu0 %2578 }
 0x696   : > { %v10187_v28 = vpop.f32.mrf.mxu0 }
 0x697   : > { %14864 = vst [vmem:[#allocation76_spill] sm:$0xff] %v10187_v28  ;;  %v10189_v21 = vpop.f32.mrf.mxu1 }
 0x698   : > { %14865 = vst [vmem:[#allocation51_spill] sm:$0xff] %v10189_v21  ;;  %v2634_v25 = vmax.f32 %v10187_v28, %v10189_v21  ;;  %v10221_v21 = vpop.xlane.xlu1 %2572 }
 0x69a   : > { %2635 = vmax.xlane.f32.xlu2 %v2634_v25  ;;  %v2588_v60 = vpop.xlane.xlu0 %2587 }
 0x69c   : > { %v2594_v23 = vpop.xlane.xlu2 %2593 }
 0x69e   : > { %v10197_v56 = vpop.f32.mrf.mxu0 }
 0x69f   : > { %v10199_v51 = vpop.f32.mrf.mxu1 }
 0x6a0   : > { %v2637_v42 = vmax.f32 %v10197_v56, %v10199_v51 }
 0x6a2   : > { %2638 = vmax.xlane.f32.xlu0 %v2637_v42 }
 0x6a6   : > { %v10205_v54 = vpop.f32.mrf.mxu0 }
 0x6a7   : > { %v10207_v37 = vpop.f32.mrf.mxu1 }
 0x6a8   : > { %v2640_v25 = vmax.f32 %v10205_v54, %v10207_v37 }
 0x6aa   : > { %2641 = vmax.xlane.f32.xlu1 %v2640_v25  ;;  %v2597_v25 = vpop.xlane.xlu0 %2596 }
 0x6ab   : > { %v2678_v7 = vsub.f32 %v10107_v15, %v2597_v25 }
 0x6ac   : > { %v2600_v49 = vpop.xlane.xlu2 %2599 }
 0x6ad   : > { %v2680_v30 = vsub.f32 %v10115_v62, %v2600_v49  ;;  %v2681_v42 = vsub.f32 %v10117_v19, %v2600_v49  ;;  %v2679_v62 = vsub.f32 %v10109_v26, %v2597_v25  ;;  %v2613_v19 = vmax.f32 %v10143_v53, %v10145_v31 }
 0x6ae   : > { %v10214_v29 = vpop.f32.mrf.mxu0  ;;  %v2676_v26 = vsub.f32 %v10099_v47, %v2594_v23  ;;  %v2677_v25 = vsub.f32 %v10101_v52, %v2594_v23  ;;  %v2670_v47 = vsub.f32 %v10075_v48, %v10195_v10  ;;  %v2672_v52 = vsub.f32 %v10083_v32, %v2588_v60 }
 0x6af   : > { %v10217_v4 = vpop.f32.mrf.mxu1  ;;  %v2772_v9 = vmul.f32 1.442695, %v2680_v30  ;;  %v2774_v28 = vmul.f32 1.442695, %v2681_v42  ;;  %v2582_v42 = vpop.xlane.xlu1 %2581  ;;  %v2770_v1 = vmul.f32 1.442695, %v2679_v62  ;;  %v2607_v48 = vmax.f32 %v10135_v14, %v10137_v63 }
 0x6b0   : > { %v2643_v3 = vmax.f32 %v10214_v29, %v10217_v4  ;;  %v2766_v23 = vmul.f32 1.442695, %v2677_v25  ;;  %v2671_v25 = vsub.f32 %v10077_v33, %v10195_v10  ;;  %v2668_v10 = vsub.f32 %v10067_v18, %v2582_v42 }
 0x6b1   : > { %7664 = vpow2.f32 %v2772_v9  ;;  %v2669_v33 = vsub.f32 %v10069_v24, %v2582_v42 }
 0x6b2   : > { %2644 = vmax.xlane.f32.xlu2 %v2643_v3  ;;  %7666 = vpow2.f32 %v2774_v28  ;;  %v2768_v3 = vmul.f32 1.442695, %v2678_v7  ;;  %v2610_v7 = vmax.f32 %v10139_v50, %v10141_v16  ;;  %v2673_v50 = vsub.f32 %v10085_v58, %v2588_v60 }
 0x6b3   : > { %v2559_v60 = vmax.f32 %v10013_v61, %v10015_v43  ;;  %v2750_v24 = vmul.f32 1.442695, %v2669_v33 }
 0x6b4   : > { %7668 = vpow2.f32 %v2768_v3  ;;  %v2758_v58 = vmul.f32 1.442695, %v2673_v50 }
 0x6b5   : > { %7670 = vpow2.f32 %v2770_v1 }
 0x6b6   : > { %v10224_v27 = vpop.f32.mrf.mxu0 }
 0x6b7   : > { %v10227_v49 = vpop.f32.mrf.mxu1  ;;  %v10233_v15 = vpop.eup %7664 }
 0x6b8   : > { %v2646_v30 = vmax.f32 %v10224_v27, %v10227_v49  ;;  %v10235_v9 = vpop.eup %7666  ;;  %v2591_v3 = vpop.xlane.xlu1 %2590 }
 0x6b9   : > { %v2674_v53 = vsub.f32 %v10091_v36, %v2591_v3 }
 0x6ba   : > { %2614 = vmax.xlane.f32.xlu2 %v2613_v19  ;;  %2647 = vmax.xlane.f32.xlu0 %v2646_v30  ;;  %v2886_v19 = vadd.f32 %v10235_v9, %v10233_v15  ;;  %v2764_v30 = vmul.f32 1.442695, %v2676_v26  ;;  %v10251_v1 = vpop.eup %7668  ;;  %v2752_v26 = vmul.f32 1.442695, %v2670_v47 }
 0x6bb   : > { %v10254_v16 = vpop.eup %7670  ;;  %v2760_v36 = vmul.f32 1.442695, %v2674_v53  ;;  %v2604_v53 = vmax.f32 %v10131_v44, %v10133_v34 }
 0x6bc   : > { %7672 = vpow2.f32 %v2764_v30  ;;  %v2883_v32 = vadd.f32 %v10254_v16, %v10251_v1  ;;  %v2754_v30 = vmul.f32 1.442695, %v2671_v25 }
 0x6bd   : > { %7674 = vpow2.f32 %v2766_v23  ;;  %v2556_v23 = vmax.f32 %v10007_v39, %v10009_v5 }
 0x6be   : > { %v10238_v28 = vpop.f32.mrf.mxu0  ;;  %7676 = vpow2.f32 %v2752_v26  ;;  %v2748_v26 = vmul.f32 1.442695, %v2668_v10 }
 0x6bf   : > { %v10241_v31 = vpop.f32.mrf.mxu1 }
 0x6c0   : > { %v2649_v62 = vmax.f32 %v10238_v28, %v10241_v31  ;;  %v2603_v42 = vpop.xlane.xlu1 %2602 }
 0x6c2   : > { %2611 = vmax.xlane.f32.xlu2 %v2610_v7  ;;  %2887 = vadd.xlane.f32.xlu0 %v2886_v19  ;;  %v2675_v7 = vsub.f32 %v10093_v6, %v2591_v3  ;;  %v10267_v19 = vpop.eup %7672 }
 0x6c3   : > { %2650 = vmax.xlane.f32.xlu1 %v2649_v62  ;;  %v2756_v62 = vmul.f32 1.442695, %v2672_v52  ;;  %v10269_v47 = vpop.eup %7674 }
 0x6c4   : > { %v2762_v6 = vmul.f32 1.442695, %v2675_v7  ;;  %v2880_v50 = vadd.f32 %v10269_v47, %v10267_v19  ;;  %v10277_v3 = vpop.eup %7676 }
 0x6c5   : > { %7678 = vpow2.f32 %v2756_v62  ;;  %14867 = vst [vmem:[#allocation77_spill] sm:$0xff] %v10277_v3  ;;  %v2682_v62 = vsub.f32 %v10123_v57, %v2603_v42 }
 0x6c6   : > { %7680 = vpow2.f32 %v2758_v58 }
 0x6c7   : > { %7682 = vpow2.f32 %v2760_v36 }
 0x6c8   : > { %7684 = vpow2.f32 %v2762_v6  ;;  %v2776_v6 = vmul.f32 1.442695, %v2682_v62 }
 0x6c9   : > { %7686 = vpow2.f32 %v2754_v30 }
 0x6ca   : > { %2608 = vmax.xlane.f32.xlu2 %v2607_v48  ;;  %2884 = vadd.xlane.f32.xlu0 %v2883_v32  ;;  %7688 = vpow2.f32 %v2748_v26  ;;  %v2683_v32 = vsub.f32 %v10125_v17, %v2603_v42 }
 0x6cb   : > { %2560 = vmax.xlane.f32.xlu1 %v2559_v60  ;;  %v10281_v52 = vpop.eup %7678  ;;  %7690 = vpow2.f32 %v2750_v24 }
 0x6cc   : > { %v10283_v18 = vpop.eup %7680  ;;  %v2778_v30 = vmul.f32 1.442695, %v2683_v32  ;;  %7692 = vpow2.f32 %v2776_v6  ;;  %v2666_v6 = vsub.f32 %v10059_v12, %v10203_v0 }
 0x6cd   : > { %14868 = vst [vmem:[#allocation78_spill] sm:$0xff] %v10283_v18  ;;  %v10285_v7 = vpop.eup %7682  ;;  %v2874_v60 = vadd.f32 %v10283_v18, %v10281_v52 }
 0x6ce   : > { %v10287_v48 = vpop.eup %7684  ;;  %7694 = vpow2.f32 %v2778_v30 }
 0x6cf   : > { %v10289_v25 = vpop.eup %7686  ;;  %v2877_v58 = vadd.f32 %v10287_v48, %v10285_v7 }
 0x6d0   : > { %14869 = vst [vmem:[#allocation46_spill] sm:$0xff] %v10289_v25  ;;  %v2871_v36 = vadd.f32 %v10289_v25, %v10277_v3  ;;  %v10299_v10 = vpop.eup %7688 }
 0x6d1   : > { %14870 = vst [vmem:[#allocation47_spill] sm:$0xff] %v10299_v10  ;;  %v10301_v57 = vpop.eup %7690 }
 0x6d2   : > { %2605 = vmax.xlane.f32.xlu2 %v2604_v53  ;;  %2881 = vadd.xlane.f32.xlu0 %v2880_v50  ;;  %14871 = vst [vmem:[#allocation79_spill] sm:$0xff] %v10301_v57  ;;  %v2868_v17 = vadd.f32 %v10301_v57, %v10299_v10  ;;  %v10305_v33 = vpop.eup %7692  ;;  %v2744_v57 = vmul.f32 1.442695, %v2666_v6 }
 0x6d3   : > { %2557 = vmax.xlane.f32.xlu1 %v2556_v23 }
 0x6d4   : > { %v10307_v53 = vpop.eup %7694 }
 0x6d5   : > { %v2889_v50 = vadd.f32 %v10307_v53, %v10305_v33 }
 0x6da   : > { %2875 = vadd.xlane.f32.xlu2 %v2874_v60  ;;  %2878 = vadd.xlane.f32.xlu0 %v2877_v58 }
 0x6db   : > { %2872 = vadd.xlane.f32.xlu1 %v2871_v36 }
 0x6dd   : > { %v10313_v26 = vpop.xlane.xlu2 %2617 }
 0x6e2   : > { %2869 = vadd.xlane.f32.xlu0 %v2868_v17 }
 0x6e5   : > { %v10311_v23 = vpop.xlane.xlu0 %2620 }
 0x6ea   : > { %2890 = vadd.xlane.f32.xlu0 %v2889_v50  ;;  %v2667_v50 = vsub.f32 %v10061_v13, %v10203_v0 }
 0x6ec   : > { %v2746_v10 = vmul.f32 1.442695, %v2667_v50 }
 0x6ed   : > { %v10315_v24 = vpop.xlane.xlu1 %2623 }
 0x6f5   : > { %v10317_v62 = vpop.xlane.xlu2 %2626 }
 0x6fd   : > { %v2630_v42 = vpop.xlane.xlu0 %2629 }
 0x6fe   : > { %v2700_v18 = vsub.f32 %v10171_v40, %v2630_v42  ;;  %v2701_v12 = vsub.f32 %v10173_v35, %v2630_v42 }
 0x705   : > { %v2633_v32 = vpop.xlane.xlu1 %2632 }
 0x706   : > { %v2702_v0 = vsub.f32 %v10179_v41, %v2633_v32  ;;  %v2703_v6 = vsub.f32 %v10181_v59, %v2633_v32  ;;  %v2660_v59 = vsub.f32 %v10035_v20, %v10193_v8  ;;  %v2661_v32 = vsub.f32 %v10037_v2, %v10193_v8 }
 0x708   : > { %v2816_v35 = vmul.f32 1.442695, %v2702_v0  ;;  %v2732_v2 = vmul.f32 1.442695, %v2660_v59 }
 0x70d   : > { %v10325_v25 = vpop.xlane.xlu2 %2635 }
 0x715   : > { %v2639_v60 = vpop.xlane.xlu0 %2638 }
 0x716   : > { %v2706_v58 = vsub.f32 %v10197_v56, %v2639_v60  ;;  %v2707_v36 = vsub.f32 %v10199_v51, %v2639_v60 }
 0x718   : > { %v2824_v30 = vmul.f32 1.442695, %v2706_v58  ;;  %v2826_v17 = vmul.f32 1.442695, %v2707_v36 }
 0x71a   : > { %7696 = vpow2.f32 %v2824_v30  ;;  %v2812_v30 = vmul.f32 1.442695, %v2700_v18 }
 0x71b   : > { %7698 = vpow2.f32 %v2826_v17 }
 0x71c   : > { %7700 = vpow2.f32 %v2744_v57 }
 0x71d   : > { %v2642_v3 = vpop.xlane.xlu1 %2641  ;;  %7702 = vpow2.f32 %v2746_v10 }
 0x71e   : > { %v2708_v56 = vsub.f32 %v10205_v54, %v2642_v3  ;;  %v2709_v51 = vsub.f32 %v10207_v37, %v2642_v3  ;;  %v2814_v54 = vmul.f32 1.442695, %v2701_v12  ;;  %v2818_v37 = vmul.f32 1.442695, %v2703_v6 }
 0x71f   : > { %v2734_v12 = vmul.f32 1.442695, %v2661_v32 }
 0x720   : > { %v10331_v60 = vpop.eup %7696  ;;  %v2828_v13 = vmul.f32 1.442695, %v2708_v56  ;;  %v2830_v58 = vmul.f32 1.442695, %v2709_v51 }
 0x721   : > { %14872 = vst [vmem:[#allocation80_spill] sm:$0xff] %v10331_v60  ;;  %v10334_v36 = vpop.eup %7698 }
 0x722   : > { %14873 = vst [vmem:[#allocation81_spill] sm:$0xff] %v10334_v36  ;;  %7704 = vpow2.f32 %v2828_v13  ;;  %v2925_v40 = vadd.f32 %v10334_v36, %v10331_v60  ;;  %v10339_v57 = vpop.eup %7700 }
 0x723   : > { %7706 = vpow2.f32 %v2830_v58  ;;  %v10343_v42 = vpop.eup %7702 }
 0x724   : > { %2926 = vadd.xlane.f32.xlu2 %v2925_v40  ;;  %7708 = vpow2.f32 %v2812_v30  ;;  %v2865_v20 = vadd.f32 %v10343_v42, %v10339_v57  ;;  %v2694_v40 = vsub.f32 %v10153_v11, %v10311_v23 }
 0x725   : > { %v2645_v3 = vpop.xlane.xlu2 %2644  ;;  %7710 = vpow2.f32 %v2814_v54 }
 0x726   : > { %v2710_v41 = vsub.f32 %v10214_v29, %v2645_v3  ;;  %v2711_v10 = vsub.f32 %v10217_v4, %v2645_v3  ;;  %7712 = vpow2.f32 %v2816_v35  ;;  %v2662_v29 = vsub.f32 %v10043_v45, %v10221_v21 }
 0x727   : > { %7714 = vpow2.f32 %v2818_v37  ;;  %v2663_v4 = vsub.f32 %v10045_v55, %v10221_v21  ;;  %v2695_v35 = vsub.f32 %v10155_v46, %v10311_v23  ;;  %v2800_v23 = vmul.f32 1.442695, %v2694_v40 }
 0x728   : > { %v10347_v18 = vpop.eup %7704  ;;  %v2832_v17 = vmul.f32 1.442695, %v2710_v41  ;;  %v2834_v50 = vmul.f32 1.442695, %v2711_v10  ;;  %v2736_v45 = vmul.f32 1.442695, %v2662_v29  ;;  %v2697_v41 = vsub.f32 %v10161_v22, %v10315_v24 }
 0x729   : > { %14874 = vst [vmem:[#allocation82_spill] sm:$0xff] %v10347_v18  ;;  %v10351_v56 = vpop.eup %7706  ;;  %v2738_v21 = vmul.f32 1.442695, %v2663_v4  ;;  %v2802_v32 = vmul.f32 1.442695, %v2695_v35 }
 0x72a   : > { %14875 = vst [vmem:[#allocation83_spill] sm:$0xff] %v10351_v56  ;;  %7716 = vpow2.f32 %v2832_v17  ;;  %v2928_v51 = vadd.f32 %v10351_v56, %v10347_v18  ;;  %v10361_v8 = vpop.eup %7708 }
 0x72b   : > { %7718 = vpow2.f32 %v2834_v50  ;;  %14876 = vst [vmem:[#allocation84_spill] sm:$0xff] %v10361_v8  ;;  %v10363_v0 = vpop.eup %7710  ;;  %v2806_v50 = vmul.f32 1.442695, %v2697_v41 }
 0x72c   : > { %2866 = vadd.xlane.f32.xlu2 %v2865_v20  ;;  %2929 = vadd.xlane.f32.xlu0 %v2928_v51  ;;  %14877 = vst [vmem:[#allocation85_spill] sm:$0xff] %v10363_v0  ;;  %v10365_v58 = vpop.eup %7712  ;;  %7720 = vpow2.f32 %v2732_v2  ;;  %v2916_v11 = vadd.f32 %v10363_v0, %v10361_v8 }
 0x72d   : > { %v2648_v13 = vpop.xlane.xlu0 %2647  ;;  %14878 = vst [vmem:[#allocation86_spill] sm:$0xff] %v10365_v58  ;;  %v10369_v30 = vpop.eup %7714  ;;  %7722 = vpow2.f32 %v2734_v12  ;;  %v14882_v12 = vld [vmem:[#allocation48_spill] sm:$0xff] }
 0x72e   : > { %v2712_v55 = vsub.f32 %v10224_v27, %v2648_v13  ;;  %v2713_v6 = vsub.f32 %v10227_v49, %v2648_v13  ;;  %14879 = vst [vmem:[#allocation87_spill] sm:$0xff] %v10369_v30  ;;  %7724 = vpow2.f32 %v2736_v45  ;;  %v2696_v27 = vsub.f32 %v10159_v38, %v10315_v24  ;;  %v10383_v10 = vpop.xlane.xlu2 %2614  ;;  %v14883_v45 = vld [vmem:[#allocation60_spill] sm:$0xff] }
 0x72f   : > { %7726 = vpow2.f32 %v2738_v21  ;;  %v2919_v59 = vadd.f32 %v10369_v30, %v10365_v58  ;;  %v2656_v13 = vsub.f32 %v14883_v45, %v14882_v12  ;;  %v14884_v21 = vld [vmem:[#allocation67_spill] sm:$0xff] }
 0x730   : > { %v10373_v54 = vpop.eup %7716  ;;  %v2836_v37 = vmul.f32 1.442695, %v2712_v55  ;;  %v2838_v49 = vmul.f32 1.442695, %v2713_v6  ;;  %v2804_v17 = vmul.f32 1.442695, %v2696_v27  ;;  %v2657_v55 = vsub.f32 %v14884_v21, %v14882_v12 }
 0x731   : > { %14880 = vst [vmem:[#allocation88_spill] sm:$0xff] %v10373_v54  ;;  %v10377_v3 = vpop.eup %7718  ;;  %v14893_v21 = vld [vmem:[#allocation64_spill] sm:$0xff] }
 0x732   : > { %14881 = vst [vmem:[#allocation89_spill] sm:$0xff] %v10377_v3  ;;  %v2931_v46 = vadd.f32 %v10377_v3, %v10373_v54  ;;  %7728 = vpow2.f32 %v2836_v37  ;;  %v10391_v38 = vpop.eup %7720  ;;  %v14885_v37 = vld [vmem:[#allocation76_spill] sm:$0xff] }
 0x733   : > { %7730 = vpow2.f32 %v2838_v49  ;;  %v10395_v24 = vpop.eup %7722  ;;  %v14887_v49 = vld [vmem:[#allocation51_spill] sm:$0xff] }
 0x734   : > { %2917 = vadd.xlane.f32.xlu2 %v2916_v11  ;;  %2932 = vadd.xlane.f32.xlu1 %v2931_v46  ;;  %v10397_v4 = vpop.eup %7724  ;;  %7732 = vpow2.f32 %v2800_v23  ;;  %v2705_v41 = vsub.f32 %v14887_v49, %v10325_v25  ;;  %v2724_v46 = vmul.f32 1.442695, %v2656_v13  ;;  %v14895_v49 = vld [vmem:[#allocation70_spill] sm:$0xff] }
 0x735   : > { %2920 = vadd.xlane.f32.xlu0 %v2919_v59  ;;  %v10393_v22 = vpop.xlane.xlu0 %2887  ;;  %v10401_v2 = vpop.eup %7726  ;;  %7734 = vpow2.f32 %v2802_v32 }
 0x736   : > { %v2651_v29 = vpop.xlane.xlu1 %2650  ;;  %7736 = vpow2.f32 %v2804_v17  ;;  %v2859_v11 = vadd.f32 %v10401_v2, %v10397_v4  ;;  %v2612_v23 = vpop.xlane.xlu2 %2611  ;;  %v2726_v17 = vmul.f32 1.442695, %v2657_v55  ;;  %vm3169_vm11 = vweird.f32 %v10393_v22 }
 0x737   : > { %v2714_v20 = vsub.f32 %v10238_v28, %v2651_v29  ;;  %v2715_v51 = vsub.f32 %v10241_v31, %v2651_v29  ;;  %7738 = vpow2.f32 %v2806_v50  ;;  %v2704_v28 = vsub.f32 %v14885_v37, %v10325_v25  ;;  %v14890_v25 = vld [vmem:[#allocation49_spill] sm:$0xff] }
 0x738   : > { %v10407_v35 = vpop.eup %7728  ;;  %v2856_v31 = vadd.f32 %v10395_v24, %v10391_v38  ;;  %v2822_v37 = vmul.f32 1.442695, %v2705_v41  ;;  %v14897_v41 = vld [vmem:[#allocation65_spill] sm:$0xff]  ;;  %v3175_v36 = vand.u32 2147483648, %v10393_v22 }
 0x739   : > { %v2840_v6 = vmul.f32 1.442695, %v2714_v20  ;;  %v2842_v40 = vmul.f32 1.442695, %v2715_v51  ;;  %v10413_v27 = vpop.eup %7730  ;;  %v14891_v20 = vld [vmem:[#allocation31_spill] sm:$0xff] }
 0x73a   : > { %14886 = vst [vmem:[#allocation48_spill] sm:$0xff] %v10413_v27  ;;  %v2934_v59 = vadd.f32 %v10413_v27, %v10407_v35  ;;  %v10421_v32 = vpop.eup %7732  ;;  %v2664_v51 = vsub.f32 %v14891_v20, %v14890_v25  ;;  %v2820_v12 = vmul.f32 1.442695, %v2704_v28  ;;  %v14896_v28 = vld [vmem:[#allocation71_spill] sm:$0xff] }
 0x73b   : > { %7740 = vpow2.f32 %v2840_v6  ;;  %14888 = vst [vmem:[#allocation60_spill] sm:$0xff] %v10421_v32  ;;  %v10425_v29 = vpop.eup %7734  ;;  %v2665_v6 = vsub.f32 %v14893_v21, %v14890_v25  ;;  %v14898_v21 = vld [vmem:[#allocation69_spill] sm:$0xff] }
 0x73c   : > { %2857 = vadd.xlane.f32.xlu2 %v2856_v31  ;;  %7742 = vpow2.f32 %v2842_v40  ;;  %14889 = vst [vmem:[#allocation67_spill] sm:$0xff] %v10425_v29  ;;  %2935 = vadd.xlane.f32.xlu1 %v2934_v59  ;;  %v10429_v13 = vpop.eup %7736  ;;  %v2691_v59 = vsub.f32 %v14896_v28, %v10383_v10  ;;  %v2740_v25 = vmul.f32 1.442695, %v2664_v51 }
 0x73d   : > { %2860 = vadd.xlane.f32.xlu0 %v2859_v11  ;;  %v10423_v50 = vpop.xlane.xlu0 %2884  ;;  %14892 = vst [vmem:[#allocation76_spill] sm:$0xff] %v10429_v13  ;;  %v10435_v31 = vpop.eup %7738  ;;  %7744 = vpow2.f32 %v2724_v46  ;;  %v2690_v11 = vsub.f32 %v14895_v49, %v10383_v10  ;;  %v2742_v46 = vmul.f32 1.442695, %v2665_v6 }
 0x73e   : > { %v2561_v45 = vpop.xlane.xlu1 %2560  ;;  %14894 = vst [vmem:[#allocation51_spill] sm:$0xff] %v10435_v31  ;;  %7746 = vpow2.f32 %v2726_v17  ;;  %v2689_v17 = vsub.f32 %v14898_v21, %v2612_v23  ;;  %v2910_v10 = vadd.f32 %v10435_v31, %v10429_v13  ;;  %vm3153_vm15 = vweird.f32 %v10423_v50 }
 0x73f   : > { %v2654_v55 = vsub.f32 %v10013_v61, %v2561_v45  ;;  %v2655_v40 = vsub.f32 %v10015_v43, %v2561_v45  ;;  %7748 = vpow2.f32 %v2820_v12  ;;  %v2688_v61 = vsub.f32 %v14897_v41, %v2612_v23 }
 0x740   : > { %v2907_v43 = vadd.f32 %v10425_v29, %v10421_v32  ;;  %7750 = vpow2.f32 %v2822_v37  ;;  %v2794_v12 = vmul.f32 1.442695, %v2691_v59  ;;  %v2609_v37 = vpop.xlane.xlu2 %2608  ;;  %v14907_v29 = vld [vmem:[#allocation68_spill] sm:$0xff] }
 0x741   : > { %v2720_v20 = vmul.f32 1.442695, %v2654_v55  ;;  %v2722_v0 = vmul.f32 1.442695, %v2655_v40  ;;  %v10441_v8 = vpop.eup %7740  ;;  %v2792_v55 = vmul.f32 1.442695, %v2690_v11  ;;  %v2686_v59 = vsub.f32 %v10135_v14, %v2609_v37 }
 0x742   : > { %v10446_v45 = vpop.eup %7742  ;;  %v2788_v6 = vmul.f32 1.442695, %v2688_v61  ;;  %v14899_v11 = vld [vmem:[#allocation74_spill] sm:$0xff] }
 0x743   : > { %7752 = vpow2.f32 %v2720_v20  ;;  %v2937_v51 = vadd.f32 %v10446_v45, %v10441_v8  ;;  %v10455_v49 = vpop.eup %7744  ;;  %v2698_v28 = vsub.f32 %v14899_v11, %v10317_v62  ;;  %v2790_v20 = vmul.f32 1.442695, %v2689_v17 }
 0x744   : > { %2908 = vadd.xlane.f32.xlu2 %v2907_v43  ;;  %7754 = vpow2.f32 %v2722_v0  ;;  %v10457_v23 = vpop.eup %7746 }
 0x745   : > { %2911 = vadd.xlane.f32.xlu0 %v2910_v10  ;;  %v10453_v40 = vpop.xlane.xlu0 %2881  ;;  %7756 = vpow2.f32 %v2740_v25  ;;  %2938 = vadd.xlane.f32.xlu1 %v2937_v51  ;;  %v10461_v41 = vpop.eup %7748  ;;  %v2687_v25 = vsub.f32 %v10137_v63, %v2609_v37  ;;  %v2808_v10 = vmul.f32 1.442695, %v2698_v28  ;;  %v2850_v17 = vadd.f32 %v10457_v23, %v10455_v49 }
 0x746   : > { %7758 = vpow2.f32 %v2742_v46  ;;  %14900 = vst [vmem:[#allocation49_spill] sm:$0xff] %v10461_v41  ;;  %v10463_v0 = vpop.eup %7750  ;;  %v14902_v46 = vld [vmem:[#allocation75_spill] sm:$0xff]  ;;  %v2784_v63 = vmul.f32 1.442695, %v2686_v59  ;;  %vm3137_vm10 = vweird.f32 %v10453_v40 }
 0x747   : > { %7760 = vpow2.f32 %v2792_v55  ;;  %14901 = vst [vmem:[#allocation31_spill] sm:$0xff] %v10463_v0  ;;  %v2699_v21 = vsub.f32 %v14902_v46, %v10317_v62  ;;  %v2922_v14 = vadd.f32 %v10463_v0, %v10461_v41  ;;  %v2786_v37 = vmul.f32 1.442695, %v2687_v25  ;;  %v14906_v46 = vld [vmem:[#allocation50_spill] sm:$0xff]  ;;  %v14910_v25 = vld [vmem:[#allocation72_spill] sm:$0xff] }
 0x748   : > { %7762 = vpow2.f32 %v2794_v12  ;;  %v2658_v32 = vsub.f32 %v14907_v29, %v14906_v46 }
 0x749   : > { %v10466_v43 = vpop.eup %7752  ;;  %7764 = vpow2.f32 %v2788_v6  ;;  %v2810_v28 = vmul.f32 1.442695, %v2699_v21 }
 0x74a   : > { %v10469_v61 = vpop.eup %7754  ;;  %7766 = vpow2.f32 %v2790_v20 }
 0x74b   : > { %v10475_v55 = vpop.eup %7756  ;;  %v2847_v51 = vadd.f32 %v10469_v61, %v10466_v43  ;;  %7768 = vpow2.f32 %v2808_v10  ;;  %v2728_v10 = vmul.f32 1.442695, %v2658_v32 }
 0x74c   : > { %v10481_v12 = vpop.eup %7758  ;;  %7770 = vrcp.f32 %v10393_v22 }
 0x74d   : > { %2851 = vadd.xlane.f32.xlu0 %v2850_v17  ;;  %v10483_v6 = vpop.xlane.xlu0 %2878  ;;  %v10485_v62 = vpop.eup %7760  ;;  %2923 = vadd.xlane.f32.xlu1 %v2922_v14  ;;  %v14909_v17 = vld [vmem:[#allocation45_spill] sm:$0xff]  ;;  %7772 = vpow2.f32 %v2784_v63  ;;  %v2692_v14 = vsub.f32 %v14910_v25, %v10313_v26  ;;  %v2862_v13 = vadd.f32 %v10481_v12, %v10475_v55 }
 0x74e   : > { %14903 = vst [vmem:[#allocation64_spill] sm:$0xff] %v10485_v62  ;;  %2848 = vadd.xlane.f32.xlu2 %v2847_v51  ;;  %v10487_v11 = vpop.eup %7762  ;;  %v2659_v31 = vsub.f32 %v14909_v17, %v14906_v46  ;;  %7774 = vpow2.f32 %v2786_v37  ;;  %v14911_v51 = vld [vmem:[#allocation73_spill] sm:$0xff] }
 0x74f   : > { %14904 = vst [vmem:[#allocation70_spill] sm:$0xff] %v10487_v11  ;;  %v10489_v20 = vpop.eup %7764  ;;  %7776 = vpow2.f32 %v2810_v28  ;;  %v2901_v21 = vadd.f32 %v10487_v11, %v10485_v62  ;;  %v2693_v29 = vsub.f32 %v14911_v51, %v10313_v26  ;;  %v2796_v28 = vmul.f32 1.442695, %v2692_v14  ;;  %v10517_v26 = vpop.xlane.xlu2 %2605 }
 0x750   : > { %14905 = vst [vmem:[#allocation71_spill] sm:$0xff] %v10489_v20  ;;  %v10494_v59 = vpop.eup %7766  ;;  %v2730_v63 = vmul.f32 1.442695, %v2659_v31  ;;  %7778 = vrcp.f32 %v10423_v50  ;;  %v3173_v62 = vand.u32 2147483647, %v10393_v22 }
 0x751   : > { %14908 = vst [vmem:[#allocation65_spill] sm:$0xff] %v10494_v59  ;;  %v2898_v30 = vadd.f32 %v10494_v59, %v10489_v20  ;;  %v10508_v46 = vpop.eup %7768  ;;  %7780 = vpow2.f32 %v2728_v10  ;;  %v2798_v51 = vmul.f32 1.442695, %v2693_v29 }
 0x752   : > { %14912 = vst [vmem:[#allocation69_spill] sm:$0xff] %v10508_v46  ;;  %v10512_v37 = vpop.eup %7770  ;;  %7782 = vpow2.f32 %v2730_v63  ;;  %vm10570_vm14 = vcmp.eq.f32.partialorder %v3173_v62, 8.507059e+37 }
 0x753   : > { %v10514_v32 = vpop.eup %7772  ;;  %7784 = vpow2.f32 %v2796_v28  ;;  %v3165_v31 = vmul.f32 %v10512_v37, %v10393_v22  ;;  %vm3170_vm12 = vweird.f32 %v10512_v37  ;;  %v625_v22 = vld [vmem:[%s14343_s4 + $0x48] sm:$0xff] }
 0x754   : > { %14913 = vst [vmem:[#allocation74_spill] sm:$0xff] %v10514_v32  ;;  %v10519_v25 = vpop.eup %7774  ;;  %7786 = vrcp.f32 %v10453_v40  ;;  %vm10583_vm2 = vmor %vm3169_vm11, %vm3170_vm12 }
 0x755   : > { %2902 = vadd.xlane.f32.xlu0 %v2901_v21  ;;  %v10510_v17 = vpop.xlane.xlu0 %2869  ;;  %2863 = vadd.xlane.f32.xlu1 %v2862_v13  ;;  %14914 = vst [vmem:[#allocation75_spill] sm:$0xff] %v10519_v25  ;;  %v10521_v59 = vpop.eup %7776  ;;  %v2895_v13 = vadd.f32 %v10519_v25, %v10514_v32  ;;  %7788 = vpow2.f32 %v2798_v51  ;;  %v3166_v63 = vsub.f32 1.0, %v3165_v31 }
 0x756   : > { %2899 = vadd.xlane.f32.xlu2 %v2898_v30  ;;  %14915 = vst [vmem:[#allocation50_spill] sm:$0xff] %v10521_v59  ;;  %v2558_v30 = vpop.xlane.xlu1 %2557  ;;  %v2913_v14 = vadd.f32 %v10521_v59, %v10508_v46  ;;  %v10530_v21 = vpop.eup %7778 }
 0x757   : > { %v10534_v29 = vpop.eup %7780  ;;  %v3149_v51 = vmul.f32 %v10530_v21, %v10423_v50  ;;  %v2652_v31 = vsub.f32 %v10007_v39, %v2558_v30  ;;  %v2653_v11 = vsub.f32 %v10009_v5, %v2558_v30  ;;  %vm3154_vm3 = vweird.f32 %v10530_v21 }
 0x758   : > { %v10537_v28 = vpop.eup %7782  ;;  %vm10621_vm1 = vmor %vm3153_vm15, %vm3154_vm3 }
 0x759   : > { %v10539_v20 = vpop.eup %7784  ;;  %v3150_v46 = vsub.f32 1.0, %v3149_v51  ;;  %v2853_v0 = vadd.f32 %v10537_v28, %v10534_v29  ;;  %v2716_v30 = vmul.f32 1.442695, %v2652_v31  ;;  %v2718_v60 = vmul.f32 1.442695, %v2653_v11 }
 0x75a   : > { %14916 = vst [vmem:[#allocation68_spill] sm:$0xff] %v10539_v20  ;;  %v10544_v25 = vpop.eup %7786 }
 0x75b   : > { %v10548_v32 = vpop.eup %7788  ;;  %v3133_v58 = vmul.f32 %v10544_v25, %v10453_v40  ;;  %vm3138_vm9 = vweird.f32 %v10544_v25 }
 0x75c   : > { %14917 = vst [vmem:[#allocation45_spill] sm:$0xff] %v10548_v32  ;;  %vm10647_vm11 = vmor %vm3137_vm10, %vm3138_vm9 }
 0x75d   : > { %2896 = vadd.xlane.f32.xlu0 %v2895_v13  ;;  %v10532_v10 = vpop.xlane.xlu0 %2890  ;;  %2914 = vadd.xlane.f32.xlu1 %v2913_v14  ;;  %v10546_v13 = vpop.xlane.xlu2 %2875  ;;  %v3167_v14 = vmul.f32 %v10512_v37, %v3166_v63  ;;  %v2904_v63 = vadd.f32 %v10548_v32, %v10539_v20  ;;  %v3157_v32 = vand.u32 2147483647, %v10423_v50  ;;  %v3134_v20 = vsub.f32 1.0, %v3133_v58 }
 0x75e   : > { %7790 = vrcp.f32 %v10532_v10  ;;  %v10559_v41 = vpop.xlane.xlu1 %2872  ;;  %v3191_v31 = vand.u32 2147483648, %v10532_v10  ;;  %v3189_v11 = vand.u32 2147483647, %v10532_v10  ;;  %vm3185_vm4 = vweird.f32 %v10532_v10 }
 0x75f   : > { %7792 = vrcp.f32 %v10483_v6  ;;  %v3168_v51 = vadd.f32 %v10512_v37, %v3167_v14  ;;  %vm10625_vm5 = vcmp.eq.f32.partialorder %v3157_v32, 8.507059e+37 }
 0x760   : > { %7794 = vrcp.f32 %v10546_v13  ;;  %vm3190_vm13 = vcmp.eq.f32.partialorder %v3189_v11, 8.507059e+37 }
 0x761   : > { %7796 = vrcp.f32 %v10559_v41 }
 0x762   : > { %7798 = vpow2.f32 %v2716_v30 }
 0x763   : > { %7800 = vpow2.f32 %v2718_v60 }
 0x764   : > { %v7791_v59 = vpop.eup %7790  ;;  %7802 = vrcp.f32 %v10510_v17 }
 0x765   : > { %v3181_v39 = vmul.f32 %v7791_v59, %v10532_v10  ;;  %v10565_v5 = vpop.eup %7792  ;;  %2854 = vadd.xlane.f32.xlu1 %v2853_v0  ;;  %v3151_v0 = vmul.f32 %v10530_v21, %v3150_v46  ;;  %vm3186_vm0 = vweird.f32 %v7791_v59  ;;  %v3172_v46 = vsel %vm10583_vm2, %v10512_v37, %v3168_v51 }
 0x766   : > { %v3117_v14 = vmul.f32 %v10565_v5, %v10483_v6  ;;  %v10587_v58 = vpop.eup %7794  ;;  %vm3187_vm6 = vmor %vm3185_vm4, %vm3186_vm0  ;;  %v3135_v37 = vmul.f32 %v10544_v25, %v3134_v20  ;;  %vm3122_vm12 = vweird.f32 %v10565_v5  ;;  %vm3121_vm0 = vweird.f32 %v10483_v6 }
 0x767   : > { %v3182_v56 = vsub.f32 1.0, %v3181_v39  ;;  %v2684_v39 = vsub.f32 %v10131_v44, %v10517_v26  ;;  %v3192_v44 = vor.u32 1.1754944e-38, %v3191_v31  ;;  %v3152_v30 = vadd.f32 %v10530_v21, %v3151_v0  ;;  %vm10675_vm2 = vmor %vm3121_vm0, %vm3122_vm12 }
 0x768   : > { %v3101_v51 = vmul.f32 %v10587_v58, %v10546_v13  ;;  %v3176_v31 = vor.u32 1.1754944e-38, %v3175_v36  ;;  %v3159_v0 = vand.u32 2147483648, %v10423_v50  ;;  %vm3106_vm3 = vweird.f32 %v10587_v58 }
 0x769   : > { %v3183_v3 = vmul.f32 %v7791_v59, %v3182_v56  ;;  %v2685_v56 = vsub.f32 %v10133_v34, %v10517_v26  ;;  %v3118_v34 = vsub.f32 1.0, %v3117_v14  ;;  %v10606_v26 = vpop.eup %7796  ;;  %v2780_v62 = vmul.f32 1.442695, %v2684_v39 }
 0x76a   : > { %v3102_v50 = vsub.f32 1.0, %v3101_v51  ;;  %v3085_v18 = vmul.f32 %v10606_v26, %v10559_v41  ;;  %v3156_v11 = vsel %vm10621_vm1, %v10530_v21, %v3152_v30  ;;  %vm3090_vm15 = vweird.f32 %v10606_v26 }
 0x76b   : > { %v3184_v54 = vadd.f32 %v7791_v59, %v3183_v3  ;;  %v622_v3 = vld [vmem:[%s14343_s4 + $0x30] sm:$0xff]  ;;  %v2782_v20 = vmul.f32 1.442695, %v2685_v56  ;;  %v3119_v32 = vmul.f32 %v10565_v5, %v3118_v34  ;;  %7804 = vpow2.f32 %v2780_v62 }
 0x76c   : > { %v3143_v56 = vand.u32 2147483648, %v10453_v40  ;;  %v3095_v21 = vand.u32 2147483648, %v10559_v41  ;;  %vm3073_vm12 = vweird.f32 %v10510_v17 }
 0x76d   : > { %v3188_v60 = vsel %vm3187_vm6, %v7791_v59, %v3184_v54  ;;  %2905 = vadd.xlane.f32.xlu1 %v2904_v63  ;;  %v10615_v54 = vpop.eup %7798  ;;  %v3177_v59 = vsel %vm10570_vm14, %v3176_v31, %v3172_v46  ;;  %v3160_v46 = vor.u32 1.1754944e-38, %v3159_v0  ;;  %7806 = vpow2.f32 %v2782_v20  ;;  %v14931_v63 = vld [vmem:[#allocation12_spill] sm:$0xff] }
 0x76e   : > { %675 = vperm.xlu2 %7465, %v625_v22   ;;  %v3193_v10 = vsel %vm3190_vm13, %v3192_v44, %v3188_v60  ;;  %v3178_v22 = vmul.f32 %v10233_v15, %v3177_v59  ;;  %v3141_v44 = vand.u32 2147483647, %v10453_v40  ;;  %v3120_v34 = vadd.f32 %v10565_v5, %v3119_v32  ;;  %v14928_v60 = vld [vmem:[#allocation11_spill] sm:$0xff] }
 0x76f   : > { %v3194_v27 = vmul.f32 %v10305_v33, %v3193_v10  ;;  %v3195_v14 = vmul.f32 %v10307_v53, %v3193_v10  ;;  %v3136_v33 = vadd.f32 %v10544_v25, %v3135_v37  ;;  %v10631_v53 = vpop.eup %7800  ;;  %v3161_v37 = vsel %vm10625_vm5, %v3160_v46, %v3156_v11 }
 0x770   : > { %v10639_v39 = vpop.eup %7802  ;;  %v2844_v30 = vadd.f32 %v10631_v53, %v10615_v54  ;;  %v3103_v40 = vmul.f32 %v10587_v58, %v3102_v50  ;;  %v3144_v62 = vor.u32 1.1754944e-38, %v3143_v56  ;;  %vm3142_vm14 = vcmp.eq.f32.partialorder %v3141_v44, 8.507059e+37  ;;  %v14949_v56 = vld [vmem:[#allocation14_spill] sm:$0xff] }
 0x771   : > { %660 = vperm.xlu0 %7463, %v622_v3   ;;  %3452 = vmatpush.xpose.msrb.mxu2 %v3194_v27  ;;  %v3179_v27 = vmul.f32 %v10235_v9, %v3177_v59  ;;  %v3140_v15 = vsel %vm10647_vm11, %v10544_v25, %v3136_v33  ;;  %v3086_v9 = vsub.f32 1.0, %v3085_v18  ;;  %v3069_v51 = vmul.f32 %v10639_v39, %v10510_v17  ;;  %v10670_v31 = vpop.eup %7804 }
 0x772   : > { %3472 = vmatpush.xpose.msrb.mxu3 %v3195_v14  ;;  %v3127_v3 = vand.u32 2147483648, %v10483_v6  ;;  %v3162_v25 = vmul.f32 %v10251_v1, %v3161_v37  ;;  %v3125_v10 = vand.u32 2147483647, %v10483_v6  ;;  %v3163_v0 = vmul.f32 %v10254_v16, %v3161_v37  ;;  %v14935_v37 = vld [vmem:[#allocation15_spill] sm:$0xff]  ;;  %v14939_v14 = vld [vmem:[#allocation18_spill] sm:$0xff] }
 0x773   : > { %v3145_v20 = vsel %vm3142_vm14, %v3144_v62, %v3140_v15  ;;  %v10680_v59 = vpop.eup %7806  ;;  %v3070_v1 = vsub.f32 1.0, %v3069_v51  ;;  %v3124_v16 = vsel %vm10675_vm2, %v10565_v5, %v3120_v34  ;;  %v3104_v6 = vadd.f32 %v10587_v58, %v3103_v40 }
 0x774   : > { %v3087_v36 = vmul.f32 %v10606_v26, %v3086_v9  ;;  %v3128_v33 = vor.u32 1.1754944e-38, %v3127_v3  ;;  %v3111_v50 = vand.u32 2147483648, %v10546_v13  ;;  %v3146_v18 = vmul.f32 %v10267_v19, %v3145_v20 }
 0x775   : > { %3453 = vmatpush.xpose.msrb.mxu2 %v3178_v22  ;;  %2845 = vadd.xlane.f32.xlu1 %v2844_v30  ;;  %vm3126_vm4 = vcmp.eq.f32.partialorder %v3125_v10, 8.507059e+37  ;;  %vm3105_vm6 = vweird.f32 %v10546_v13  ;;  %v3109_v11 = vand.u32 2147483647, %v10546_v13  ;;  %v2892_v32 = vadd.f32 %v10680_v59, %v10670_v31 }
 0x776   : > { %3534 = vrot.lane.b32.xlu2 %v14928_v60, %s8335_s16  ;;  %3473 = vmatpush.xpose.msrb.mxu3 %v3179_v27  ;;  %v3147_v5 = vmul.f32 %v10269_v47, %v3145_v20  ;;  %v3129_v46 = vsel %vm3126_vm4, %v3128_v33, %v3124_v16  ;;  %vm10698_vm13 = vmor %vm3105_vm6, %vm3106_vm3  ;;  %v3088_v22 = vadd.f32 %v10606_v26, %v3087_v36  ;;  %v14934_v47 = vld [vmem:[#allocation13_spill] sm:$0xff]  ;;  %v3112_v27 = vor.u32 1.1754944e-38, %v3111_v50  ;;  %v14941_v16 = vld [vmem:[#allocation47_spill] sm:$0xff] }
 0x777   : > { %v3108_v19 = vsel %vm10698_vm13, %v10587_v58, %v3104_v6  ;;  %v3071_v13 = vmul.f32 %v10639_v39, %v3070_v1  ;;  %v3130_v44 = vmul.f32 %v10285_v7, %v3129_v46  ;;  %vm3110_vm1 = vcmp.eq.f32.partialorder %v3109_v11, 8.507059e+37  ;;  %v14943_v33 = vld [vmem:[#allocation19_spill] sm:$0xff]  ;;  %v14944_v50 = vld [vmem:[#allocation21_spill] sm:$0xff]  ;;  %v14946_v11 = vld [vmem:[#allocation10_spill] sm:$0xff] }
 0x778   : > { %vm3089_vm5 = vweird.f32 %v10559_v41  ;;  %v3093_v58 = vand.u32 2147483647, %v10559_v41  ;;  %v3113_v30 = vsel %vm3110_vm1, %v3112_v27, %v3108_v19  ;;  %v3131_v15 = vmul.f32 %v10287_v48, %v3129_v46  ;;  %v14936_v48 = vld [vmem:[#allocation78_spill] sm:$0xff]  ;;  %v14948_v46 = vld [vmem:[#allocation28_spill] sm:$0xff] }
 0x779   : > { %3536 = vrot.lane.b32.xlu0 %v14931_v63, %s8335_s16  ;;  %3454 = vmatpush.xpose.msrb.mxu2 %v3162_v25  ;;  %vm3091_vm9 = vmor %vm3089_vm5, %vm3090_vm15  ;;  %v3072_v51 = vadd.f32 %v10639_v39, %v3071_v13  ;;  %vm3074_vm10 = vweird.f32 %v10639_v39  ;;  %v3096_v7 = vor.u32 1.1754944e-38, %v3095_v21  ;;  %v3079_v34 = vand.u32 2147483648, %v10510_v17  ;;  %v14937_v25 = vld [vmem:[#allocation16_spill] sm:$0xff]  ;;  %v14951_v21 = vld [vmem:[#allocation27_spill] sm:$0xff] }
 0x77a   : > { %3474 = vmatpush.xpose.msrb.mxu3 %v3163_v0  ;;  %v3092_v9 = vsel %vm3091_vm9, %v10606_v26, %v3088_v22  ;;  %v3114_v41 = vmul.f32 %v10281_v52, %v3113_v30  ;;  %vm3094_vm11 = vcmp.eq.f32.partialorder %v3093_v58, 8.507059e+37  ;;  %v3077_v40 = vand.u32 2147483647, %v10510_v17  ;;  %vm3075_vm14 = vmor %vm3073_vm12, %vm3074_vm10  ;;  %v14938_v0 = vld [vmem:[#allocation77_spill] sm:$0xff]  ;;  %v14940_v17 = vld [vmem:[#allocation46_spill] sm:$0xff] }
 0x77b   : > { %v3097_v62 = vsel %vm3094_vm11, %v3096_v7, %v3092_v9  ;;  %v3115_v26 = vmul.f32 %v14936_v48, %v3113_v30  ;;  %v3076_v3 = vsel %vm3075_vm14, %v10639_v39, %v3072_v51  ;;  %v3080_v10 = vor.u32 1.1754944e-38, %v3079_v34  ;;  %v14942_v39 = vld [vmem:[#allocation79_spill] sm:$0xff]  ;;  %v14950_v22 = vld [vmem:[#allocation25_spill] sm:$0xff]  ;;  %v14953_v9 = vld [vmem:[#allocation32_spill] sm:$0xff] }
 0x77c   : > { %v3098_v20 = vmul.f32 %v14938_v0, %v3097_v62  ;;  %vm3078_vm0 = vcmp.eq.f32.partialorder %v3077_v40, 8.507059e+37  ;;  %v3099_v1 = vmul.f32 %v14940_v17, %v3097_v62  ;;  %v14952_v58 = vld [vmem:[#allocation17_spill] sm:$0xff] }
 0x77d   : > { %3455 = vmatpush.xpose.msrb.mxu2 %v3146_v18  ;;  %2893 = vadd.xlane.f32.xlu1 %v2892_v32  ;;  %v3081_v52 = vsel %vm3078_vm0, %v3080_v10, %v3076_v3  ;;  %v14945_v18 = vld [vmem:[#allocation23_spill] sm:$0xff]  ;;  %v14954_v40 = vld [vmem:[#allocation33_spill] sm:$0xff] }
 0x77e   : > { %3538 = vrot.lane.b32.xlu2 %v14934_v47, %s8335_s16  ;;  %3475 = vmatpush.xpose.msrb.mxu3 %v3147_v5  ;;  %v3082_v6 = vmul.f32 %v14941_v16, %v3081_v52  ;;  %v3083_v36 = vmul.f32 %v14942_v39, %v3081_v52  ;;  %v14947_v5 = vld [vmem:[#allocation26_spill] sm:$0xff]  ;;  %v14957_v16 = vld [vmem:[#allocation36_spill] sm:$0xff] }
 0x781   : > { %3542 = vrot.lane.b32.xlu0 %v14935_v37, %s8335_s16  ;;  %3456 = vmatpush.xpose.msrb.mxu2 %v3130_v44  ;;  %v14966_v37 = vld [vmem:[#allocation37_spill] sm:$0xff] }
 0x782   : > { %3476 = vmatpush.xpose.msrb.mxu3 %v3131_v15 }
 0x785   : > { %3457 = vmatpush.xpose.msrb.mxu2 %v3114_v41 }
 0x786   : > { %3544 = vrot.lane.b32.xlu2 %v14937_v25, %s8335_s16  ;;  %3477 = vmatpush.xpose.msrb.mxu3 %v3115_v26  ;;  %v14955_v26 = vld [vmem:[#allocation20_spill] sm:$0xff] }
 0x789   : > { %3548 = vrot.lane.b32.xlu0 %v14939_v14, %s8335_s16  ;;  %3458 = vmatpush.xpose.msrb.mxu2 %v3098_v20  ;;  %v14956_v20 = vld [vmem:[#allocation35_spill] sm:$0xff] }
 0x78a   : > { %3478 = vmatpush.xpose.msrb.mxu3 %v3099_v1 }
 0x78d   : > { %3459 = vmatpush.xpose.msrb.mxu2 %v3082_v6  ;;  %v14958_v6 = vld [vmem:[#allocation24_spill] sm:$0xff] }
 0x78e   : > { %3550 = vrot.lane.b32.xlu2 %v14943_v33, %s8335_s16  ;;  %3479 = vmatpush.xpose.msrb.mxu3 %v3083_v36 }
 0x791   : > { %3554 = vrot.lane.b32.xlu0 %v14944_v50, %s8335_s16 }
 0x796   : > { %3556 = vrot.lane.b32.xlu2 %v14945_v18, %s8335_s16  ;;  %3532 = vrot.lane.b32.xlu1 %v14946_v11, %s8335_s16 }
 0x797   : > { %v10742_v32 = vpop.xlane.xlu2 %2926 }
 0x799   : > { %3560 = vrot.lane.b32.xlu0 %v14947_v5, %s8335_s16 }
 0x79e   : > { %3562 = vrot.lane.b32.xlu2 %v14948_v46, %s8335_s16  ;;  %3540 = vrot.lane.b32.xlu1 %v14949_v56, %s8335_s16 }
 0x79f   : > { %v2867_v19 = vpop.xlane.xlu2 %2866  ;;  %v10752_v13 = vpop.xlane.xlu0 %2929 }
 0x7a0   : > { %7808 = vrcp.f32 %v2867_v19  ;;  %v3063_v51 = vand.u32 2147483648, %v2867_v19  ;;  %v3061_v34 = vand.u32 2147483647, %v2867_v19  ;;  %vm3057_vm3 = vweird.f32 %v2867_v19 }
 0x7a1   : > { %3566 = vrot.lane.b32.xlu0 %v14950_v22, %s8335_s16 }
 0x7a2   : > { %v3064_v62 = vor.u32 1.1754944e-38, %v3063_v51  ;;  %vm3062_vm6 = vcmp.eq.f32.partialorder %v3061_v34, 8.507059e+37  ;;  %v14963_v34 = vld [vmem:[#allocation42_spill] sm:$0xff] }
 0x7a6   : > { %v7809_v27 = vpop.eup %7808  ;;  %3568 = vrot.lane.b32.xlu2 %v14951_v21, %s8335_s16  ;;  %3546 = vrot.lane.b32.xlu1 %v14952_v58, %s8335_s16 }
 0x7a7   : > { %v3053_v44 = vmul.f32 %v7809_v27, %v2867_v19  ;;  %v10758_v30 = vpop.xlane.xlu1 %2932  ;;  %vm3058_vm2 = vweird.f32 %v7809_v27  ;;  %v10773_v17 = vpop.xlane.xlu2 %2917  ;;  %v14959_v19 = vld [vmem:[#allocation38_spill] sm:$0xff] }
 0x7a8   : > { %vm3059_vm4 = vmor %vm3057_vm3, %vm3058_vm2  ;;  %v10764_v48 = vpop.xlane.xlu0 %2920 }
 0x7a9   : > { %v3054_v15 = vsub.f32 1.0, %v3053_v44  ;;  %3572 = vrot.lane.b32.xlu0 %v14953_v9, %s8335_s16 }
 0x7ab   : > { %v3055_v7 = vmul.f32 %v7809_v27, %v3054_v15  ;;  %v14962_v15 = vld [vmem:[#allocation41_spill] sm:$0xff] }
 0x7ad   : > { %v3056_v41 = vadd.f32 %v7809_v27, %v3055_v7 }
 0x7ae   : > { %3574 = vrot.lane.b32.xlu2 %v14954_v40, %s8335_s16  ;;  %3552 = vrot.lane.b32.xlu1 %v14955_v26, %s8335_s16 }
 0x7af   : > { %v3060_v3 = vsel %vm3059_vm4, %v7809_v27, %v3056_v41  ;;  %v10768_v0 = vpop.xlane.xlu1 %2935  ;;  %v14960_v27 = vld [vmem:[#allocation39_spill] sm:$0xff] }
 0x7b0   : > { %v3065_v10 = vsel %vm3062_vm6, %v3064_v62, %v3060_v3  ;;  %v10780_v39 = vpop.xlane.xlu0 %2860  ;;  %v14964_v62 = vld [vmem:[#allocation29_spill] sm:$0xff] }
 0x7b1   : > { %3578 = vrot.lane.b32.xlu0 %v14956_v20, %s8335_s16  ;;  %v3066_v52 = vmul.f32 %v10339_v57, %v3065_v10  ;;  %v3067_v1 = vmul.f32 %v10343_v42, %v3065_v10  ;;  %v10786_v57 = vpop.xlane.xlu2 %2857  ;;  %v14961_v42 = vld [vmem:[#allocation22_spill] sm:$0xff]  ;;  %7810 = vrcp.f32 %v10780_v39  ;;  %vm3025_vm1 = vweird.f32 %v10780_v39 }
 0x7b2   : > { %7812 = vrcp.f32 %v10786_v57  ;;  %v14965_v20 = vld [vmem:[#allocation34_spill] sm:$0xff]  ;;  %vm3009_vm14 = vweird.f32 %v10786_v57  ;;  %v3013_v18 = vand.u32 2147483647, %v10786_v57 }
 0x7b3   : > { %3460 = vmatpush.xpose.msrb.mxu2 %v3066_v52  ;;  %3480 = vmatpush.xpose.msrb.mxu3 %v3067_v1 }
 0x7b4   : > { %vm3014_vm3 = vcmp.eq.f32.partialorder %v3013_v18, 8.507059e+37 }
 0x7b6   : > { %3580 = vrot.lane.b32.xlu2 %v14957_v16, %s8335_s16  ;;  %3558 = vrot.lane.b32.xlu1 %v14958_v6, %s8335_s16 }
 0x7b7   : > { %v7811_v41 = vpop.eup %7810 }
 0x7b8   : > { %v10782_v36 = vpop.xlane.xlu1 %2938  ;;  %v10797_v51 = vpop.xlane.xlu0 %2911  ;;  %v3021_v52 = vmul.f32 %v7811_v41, %v10780_v39  ;;  %vm3026_vm13 = vweird.f32 %v7811_v41 }
 0x7b9   : > { %3584 = vrot.lane.b32.xlu0 %v14959_v19, %s8335_s16  ;;  %v10800_v7 = vpop.xlane.xlu2 %2908  ;;  %v10806_v10 = vpop.eup %7812  ;;  %vm10829_vm9 = vmor %vm3025_vm1, %vm3026_vm13 }
 0x7ba   : > { %v3005_v1 = vmul.f32 %v10806_v10, %v10786_v57  ;;  %v3022_v19 = vsub.f32 1.0, %v3021_v52  ;;  %vm3010_vm10 = vweird.f32 %v10806_v10 }
 0x7bb   : > { %vm10855_vm2 = vmor %vm3009_vm14, %vm3010_vm10 }
 0x7bc   : > { %v3006_v22 = vsub.f32 1.0, %v3005_v1  ;;  %v3023_v16 = vmul.f32 %v7811_v41, %v3022_v19  ;;  %v3029_v19 = vand.u32 2147483647, %v10780_v39  ;;  %v3031_v1 = vand.u32 2147483648, %v10780_v39 }
 0x7be   : > { %3586 = vrot.lane.b32.xlu2 %v14960_v27, %s8335_s16  ;;  %3564 = vrot.lane.b32.xlu1 %v14961_v42, %s8335_s16  ;;  %v3007_v52 = vmul.f32 %v10806_v10, %v3006_v22  ;;  %v3024_v21 = vadd.f32 %v7811_v41, %v3023_v16  ;;  %v3032_v6 = vor.u32 1.1754944e-38, %v3031_v1  ;;  %vm3030_vm0 = vcmp.eq.f32.partialorder %v3029_v19, 8.507059e+37 }
 0x7c0   : > { %v10793_v44 = vpop.xlane.xlu1 %2923  ;;  %v3008_v39 = vadd.f32 %v10806_v10, %v3007_v52  ;;  %v3028_v46 = vsel %vm10829_vm9, %v7811_v41, %v3024_v21 }
 0x7c1   : > { %3590 = vrot.lane.b32.xlu0 %v14962_v15, %s8335_s16  ;;  %v10811_v15 = vpop.xlane.xlu0 %2851  ;;  %v10816_v9 = vpop.xlane.xlu2 %2848  ;;  %v3033_v42 = vsel %vm3030_vm0, %v3032_v6, %v3028_v46 }
 0x7c2   : > { %v3034_v19 = vmul.f32 %v10397_v4, %v3033_v42  ;;  %v3035_v46 = vmul.f32 %v10401_v2, %v3033_v42  ;;  %vm2977_vm13 = vweird.f32 %v10811_v15  ;;  %vm2961_vm9 = vweird.f32 %v10816_v9 }
 0x7c6   : > { %3592 = vrot.lane.b32.xlu2 %v14963_v34, %s8335_s16  ;;  %3570 = vrot.lane.b32.xlu1 %v14964_v62, %s8335_s16 }
 0x7c8   : > { %v2864_v3 = vpop.xlane.xlu1 %2863 }
 0x7c9   : > { %7814 = vrcp.f32 %v2864_v3  ;;  %v3047_v40 = vand.u32 2147483648, %v2864_v3  ;;  %v3045_v62 = vand.u32 2147483647, %v2864_v3  ;;  %vm3041_vm5 = vweird.f32 %v2864_v3 }
 0x7ca   : > { %7816 = vrcp.f32 %v10811_v15 }
 0x7cb   : > { %7818 = vrcp.f32 %v10816_v9  ;;  %vm3046_vm12 = vcmp.eq.f32.partialorder %v3045_v62, 8.507059e+37 }
 0x7cc   : > { %7820 = vrcp.f32 %v10782_v36 }
 0x7ce   : > { %3576 = vrot.lane.b32.xlu1 %v14965_v20, %s8335_s16 }
 0x7cf   : > { %v7815_v34 = vpop.eup %7814 }
 0x7d0   : > { %v10818_v27 = vpop.xlane.xlu1 %2914  ;;  %v3037_v5 = vmul.f32 %v7815_v34, %v2864_v3  ;;  %v10822_v14 = vpop.eup %7816  ;;  %vm3042_vm15 = vweird.f32 %v7815_v34 }
 0x7d1   : > { %v10835_v22 = vpop.eup %7818  ;;  %v2973_v16 = vmul.f32 %v10822_v14, %v10811_v15  ;;  %vm3043_vm11 = vmor %vm3041_vm5, %vm3042_vm15  ;;  %vm2978_vm4 = vweird.f32 %v10822_v14 }
 0x7d2   : > { %v3038_v50 = vsub.f32 1.0, %v3037_v5  ;;  %v2957_v11 = vmul.f32 %v10835_v22, %v10816_v9  ;;  %vm10900_vm1 = vmor %vm2977_vm13, %vm2978_vm4  ;;  %vm2962_vm10 = vweird.f32 %v10835_v22  ;;  %vm3409_vm4 = vweird.f32 %v10758_v30 }
 0x7d3   : > { %v2974_v21 = vsub.f32 1.0, %v2973_v16  ;;  %vm2963_vm14 = vmor %vm2961_vm9, %vm2962_vm10  ;;  %vm3425_vm10 = vweird.f32 %v10768_v0 }
 0x7d4   : > { %v3039_v20 = vmul.f32 %v7815_v34, %v3038_v50  ;;  %v3015_v50 = vand.u32 2147483648, %v10786_v57  ;;  %v3012_v57 = vsel %vm10855_vm2, %v10806_v10, %v3008_v39  ;;  %v2958_v62 = vsub.f32 1.0, %v2957_v11 }
 0x7d6   : > { %3582 = vrot.lane.b32.xlu1 %v14966_v37, %s8335_s16  ;;  %v3040_v5 = vadd.f32 %v7815_v34, %v3039_v20  ;;  %v3048_v20 = vor.u32 1.1754944e-38, %v3047_v40  ;;  %v2959_v39 = vmul.f32 %v10835_v22, %v2958_v62 }
 0x7d8   : > { %v10840_v37 = vpop.xlane.xlu1 %2854  ;;  %v3044_v3 = vsel %vm3043_vm11, %v7815_v34, %v3040_v5  ;;  %v2975_v5 = vmul.f32 %v10822_v14, %v2974_v21  ;;  %v14972_v21 = vld [vmem:[#allocation43_spill] sm:$0xff] }
 0x7d9   : > { %7822 = vrcp.f32 %v10840_v37  ;;  %v3049_v63 = vsel %vm3046_vm12, %v3048_v20, %v3044_v3  ;;  %v2999_v20 = vand.u32 2147483648, %v10840_v37  ;;  %vm2993_vm15 = vweird.f32 %v10840_v37 }
 0x7da   : > { %v3050_v40 = vmul.f32 %v10475_v55, %v3049_v63  ;;  %v3051_v52 = vmul.f32 %v10481_v12, %v3049_v63  ;;  %7824 = vrcp.f32 %v10742_v32  ;;  %v3016_v55 = vor.u32 1.1754944e-38, %v3015_v50  ;;  %v10864_v12 = vpop.eup %7820  ;;  %v14971_v63 = vld [vmem:[#allocation40_spill] sm:$0xff] }
 0x7db   : > { %7826 = vrcp.f32 %v10768_v0  ;;  %v3437_v4 = vmul.f32 %v10864_v12, %v10782_v36  ;;  %vm3442_vm2 = vweird.f32 %v10864_v12 }
 0x7dc   : > { %3461 = vmatpush.xpose.msrb.mxu2 %v3050_v40  ;;  %3481 = vmatpush.xpose.msrb.mxu3 %v3051_v52  ;;  %v3017_v6 = vsel %vm3014_vm3, %v3016_v55, %v3012_v57  ;;  %7828 = vrcp.f32 %v10752_v13  ;;  %v2997_v40 = vand.u32 2147483647, %v10840_v37  ;;  %v2976_v52 = vadd.f32 %v10822_v14, %v2975_v5 }
 0x7dd   : > { %7830 = vrcp.f32 %v10758_v30  ;;  %v3018_v2 = vmul.f32 %v10391_v38, %v3017_v6  ;;  %v3019_v16 = vmul.f32 %v10395_v24, %v3017_v6  ;;  %v2983_v38 = vand.u32 2147483648, %v10811_v15 }
 0x7de   : > { %3588 = vrot.lane.b32.xlu1 %v14971_v63, %s8335_s16  ;;  %v2981_v55 = vand.u32 2147483647, %v10811_v15  ;;  %vm2998_vm11 = vcmp.eq.f32.partialorder %v2997_v40, 8.507059e+37  ;;  %v2980_v15 = vsel %vm10900_vm1, %v10822_v14, %v2976_v52  ;;  %v2960_v5 = vadd.f32 %v10835_v22, %v2959_v39 }
 0x7df   : > { %v7823_v41 = vpop.eup %7822  ;;  %vm3441_vm3 = vweird.f32 %v10782_v36 }
 0x7e0   : > { %v2989_v10 = vmul.f32 %v7823_v41, %v10840_v37  ;;  %v10871_v1 = vpop.xlane.xlu1 %2905  ;;  %3462 = vmatpush.xpose.msrb.mxu2 %v3034_v19  ;;  %3482 = vmatpush.xpose.msrb.mxu3 %v3035_v46  ;;  %v10875_v50 = vpop.eup %7824  ;;  %vm2994_vm6 = vweird.f32 %v7823_v41  ;;  %v3438_v19 = vsub.f32 1.0, %v3437_v4  ;;  %v3000_v46 = vor.u32 1.1754944e-38, %v2999_v20 }
 0x7e1   : > { %v10881_v11 = vpop.eup %7826  ;;  %v3373_v34 = vmul.f32 %v10875_v50, %v10742_v32  ;;  %vm2995_vm5 = vmor %vm2993_vm15, %vm2994_vm6  ;;  %vm2982_vm12 = vcmp.eq.f32.partialorder %v2981_v55, 8.507059e+37  ;;  %v2964_v39 = vsel %vm2963_vm14, %v10835_v22, %v2960_v5 }
 0x7e2   : > { %v2990_v18 = vsub.f32 1.0, %v2989_v10  ;;  %v3421_v24 = vmul.f32 %v10881_v11, %v10768_v0  ;;  %v10905_v62 = vpop.eup %7828  ;;  %v3439_v52 = vmul.f32 %v10864_v12, %v3438_v19  ;;  %vm10955_vm6 = vmor %vm3441_vm3, %vm3442_vm2  ;;  %vm3426_vm15 = vweird.f32 %v10881_v11 }
 0x7e3   : > { %v10910_v6 = vpop.eup %7830  ;;  %v3389_v14 = vmul.f32 %v10905_v62, %v10752_v13 }
 0x7e4   : > { %v2991_v3 = vmul.f32 %v7823_v41, %v2990_v18  ;;  %3463 = vmatpush.xpose.msrb.mxu2 %v3018_v2  ;;  %3483 = vmatpush.xpose.msrb.mxu3 %v3019_v16  ;;  %v2984_v18 = vor.u32 1.1754944e-38, %v2983_v38  ;;  %v2967_v2 = vand.u32 2147483648, %v10816_v9  ;;  %v3440_v19 = vadd.f32 %v10864_v12, %v3439_v52 }
 0x7e5   : > { %v3390_v22 = vsub.f32 1.0, %v3389_v14  ;;  %v3431_v52 = vand.u32 2147483648, %v10768_v0  ;;  %vm3410_vm2 = vweird.f32 %v10910_v6 }
 0x7e6   : > { %3594 = vrot.lane.b32.xlu1 %v14972_v21, %s8335_s16  ;;  %v2992_v42 = vadd.f32 %v7823_v41, %v2991_v3  ;;  %v3374_v3 = vsub.f32 1.0, %v3373_v34  ;;  %v2985_v40 = vsel %vm2982_vm12, %v2984_v18, %v2980_v15  ;;  %v2968_v34 = vor.u32 1.1754944e-38, %v2967_v2 }
 0x7e7   : > { %v2986_v38 = vmul.f32 %v10455_v49, %v2985_v40  ;;  %v3413_v49 = vand.u32 2147483647, %v10758_v30  ;;  %v3447_v15 = vand.u32 2147483648, %v10782_v36  ;;  %vm3378_vm12 = vweird.f32 %v10875_v50 }
 0x7e8   : > { %v10912_v37 = vpop.xlane.xlu1 %2845  ;;  %v2996_v10 = vsel %vm2995_vm5, %v7823_v41, %v2992_v42  ;;  %v2965_v41 = vand.u32 2147483647, %v10816_v9  ;;  %v2987_v42 = vmul.f32 %v10457_v23, %v2985_v40  ;;  %v10937_v55 = vmul.f32 %v10875_v50, %v3374_v3 }
 0x7e9   : > { %7832 = vrcp.f32 %v10912_v37  ;;  %v3001_v4 = vsel %vm2998_vm11, %v3000_v46, %v2996_v10  ;;  %v10940_v46 = vpop.xlane.xlu2 %2899  ;;  %v2951_v2 = vand.u32 2147483648, %v10912_v37  ;;  %vm2945_vm1 = vweird.f32 %v10912_v37 }
 0x7ea   : > { %v3002_v16 = vmul.f32 %v10534_v29, %v3001_v4  ;;  %v3003_v20 = vmul.f32 %v10537_v28, %v3001_v4  ;;  %v3405_v29 = vmul.f32 %v10910_v6, %v10758_v30  ;;  %v3422_v28 = vsub.f32 1.0, %v3421_v24 }
 0x7eb   : > { %vm2966_vm0 = vcmp.eq.f32.partialorder %v2965_v41, 8.507059e+37  ;;  %7834 = vrcp.f32 %v10773_v17  ;;  %vm3393_vm11 = vweird.f32 %v10752_v13 }
 0x7ec   : > { %3464 = vmatpush.xpose.msrb.mxu2 %v3002_v16  ;;  %3484 = vmatpush.xpose.msrb.mxu3 %v3003_v20  ;;  %v2969_v57 = vsel %vm2966_vm0, %v2968_v34, %v2964_v39  ;;  %7836 = vrcp.f32 %v10793_v44  ;;  %v3406_v23 = vsub.f32 1.0, %v3405_v29  ;;  %v3423_v10 = vmul.f32 %v10881_v11, %v3422_v28  ;;  %vm10979_vm0 = vmor %vm3425_vm10, %vm3426_vm15  ;;  %v14982_v20 = vld [vmem:[#allocation58_spill] sm:$0xff] }
 0x7ed   : > { %v2970_v4 = vmul.f32 %v10466_v43, %v2969_v57  ;;  %v2971_v18 = vmul.f32 %v10469_v61, %v2969_v57  ;;  %7838 = vrcp.f32 %v10764_v48  ;;  %v3445_v16 = vand.u32 2147483647, %v10782_v36 }
 0x7ee   : > { %v2949_v43 = vand.u32 2147483647, %v10912_v37  ;;  %v3391_v61 = vmul.f32 %v10905_v62, %v3390_v22  ;;  %v3444_v36 = vsel %vm10955_vm6, %v10864_v12, %v3440_v19  ;;  %v3424_v40 = vadd.f32 %v10881_v11, %v3423_v10 }
 0x7ef   : > { %v7833_v9 = vpop.eup %7832  ;;  %v3407_v14 = vmul.f32 %v10910_v6, %v3406_v23  ;;  %v3448_v29 = vor.u32 1.1754944e-38, %v3447_v15  ;;  %v2952_v34 = vor.u32 1.1754944e-38, %v2951_v2  ;;  %vm3446_vm9 = vcmp.eq.f32.partialorder %v3445_v16, 8.507059e+37  ;;  %v14981_v2 = vld [vmem:[#allocation57_spill] sm:$0xff] }
 0x7f0   : > { %v2941_v24 = vmul.f32 %v7833_v9, %v10912_v37  ;;  %3465 = vmatpush.xpose.msrb.mxu2 %v2986_v38  ;;  %3485 = vmatpush.xpose.msrb.mxu3 %v2987_v42  ;;  %vm2946_vm13 = vweird.f32 %v7833_v9  ;;  %v3429_v12 = vand.u32 2147483647, %v10768_v0  ;;  %vm2950_vm14 = vcmp.eq.f32.partialorder %v2949_v43, 8.507059e+37 }
 0x7f1   : > { %v10961_v3 = vpop.eup %7834  ;;  %vm2947_vm5 = vmor %vm2945_vm1, %vm2946_vm13  ;;  %v3449_v42 = vsel %vm3446_vm9, %v3448_v29, %v3444_v36  ;;  %v676_v23 = vpop.permute.xlu2 %675  ;;  %v3432_v15 = vor.u32 1.1754944e-38, %v3431_v52  ;;  %vm3394_vm6 = vweird.f32 %v10905_v62  ;;  %7840 = vrcp.f32 %v10818_v27 }
 0x7f2   : > { %v2942_v5 = vsub.f32 1.0, %v2941_v24  ;;  %v10969_v39 = vpop.eup %7836  ;;  %v3408_v24 = vadd.f32 %v10910_v6, %v3407_v14  ;;  %vm3430_vm3 = vcmp.eq.f32.partialorder %v3429_v12, 8.507059e+37  ;;  %vm11005_vm13 = vmor %vm3409_vm4, %vm3410_vm2  ;;  %v11011_v16 = vadd.f32 %v14981_v2, %v676_v23 }
 0x7f3   : > { %v10984_v57 = vpop.eup %7838  ;;  %v3357_v0 = vmul.f32 %v10969_v39, %v10793_v44  ;;  %v3399_v14 = vand.u32 2147483648, %v10752_v13  ;;  %7842 = vrcp.f32 %v10797_v51  ;;  %vm3414_vm4 = vcmp.eq.f32.partialorder %v3413_v49, 8.507059e+37  ;;  %vm11034_vm15 = vmor %vm3393_vm11, %vm3394_vm6 }
 0x7f4   : > { %3466 = vmatpush.xpose.msrb.mxu2 %v2970_v4  ;;  %3486 = vmatpush.xpose.msrb.mxu3 %v2971_v18  ;;  %v2943_v41 = vmul.f32 %v7833_v9, %v2942_v5  ;;  %v3415_v5 = vand.u32 2147483648, %v10758_v30  ;;  %v3450_v4 = vmul.f32 %v10441_v8, %v3449_v42  ;;  %v3451_v18 = vmul.f32 %v10446_v45, %v3449_v42 }
 0x7f5   : > { %v3392_v8 = vadd.f32 %v10905_v62, %v3391_v61  ;;  %v3358_v45 = vsub.f32 1.0, %v3357_v0  ;;  %v3412_v43 = vsel %vm11005_vm13, %v10910_v6, %v3408_v24  ;;  %v3376_v61 = vadd.f32 %v10875_v50, %v10937_v55  ;;  %v14988_v0 = vld [vmem:[#allocation88_spill] sm:$0xff]  ;;  %v14995_v55 = vld [vmem:[#allocation81_spill] sm:$0xff] }
 0x7f6   : > { %v2944_v28 = vadd.f32 %v7833_v9, %v2943_v41  ;;  %v11014_v41 = vadd.f32 %v14982_v20, %v676_v23  ;;  %v3416_v36 = vor.u32 1.1754944e-38, %v3415_v5  ;;  %v3381_v12 = vand.u32 2147483647, %v10742_v32  ;;  %v11064_v5 = vpop.xlane.xlu0 %2902 }
 0x7f7   : > { %v3396_v30 = vsel %vm11034_vm15, %v10905_v62, %v3392_v8  ;;  %vm3377_vm1 = vweird.f32 %v10742_v32  ;;  %v11047_v49 = vpop.eup %7840  ;;  %v3400_v42 = vor.u32 1.1754944e-38, %v3399_v14  ;;  %7844 = vrcp.f32 %v10800_v7  ;;  %v14991_v8 = vld [vmem:[#allocation83_spill] sm:$0xff] }
 0x7f8   : > { %v2948_v38 = vsel %vm2947_vm5, %v7833_v9, %v2944_v28  ;;  %v3428_v9 = vsel %vm10979_vm0, %v10881_v11, %v3424_v40  ;;  %v3341_v11 = vmul.f32 %v10984_v57, %v10764_v48  ;;  %v3397_v40 = vand.u32 2147483647, %v10752_v13  ;;  %v14983_v28 = vld [vmem:[#allocation48_spill] sm:$0xff]  ;;  %vm11051_vm9 = vmor %vm3377_vm1, %vm3378_vm12 }
 0x7f9   : > { %v2953_v22 = vsel %vm2950_vm14, %v2952_v34, %v2948_v38  ;;  %v3417_v34 = vsel %vm3414_vm4, %v3416_v36, %v3412_v43  ;;  %v3383_v38 = vand.u32 2147483648, %v10742_v32  ;;  %v3359_v13 = vmul.f32 %v10969_v39, %v3358_v45 }
 0x7fa   : > { %v2954_v19 = vmul.f32 %v10615_v54, %v2953_v22  ;;  %v2955_v10 = vmul.f32 %v10631_v53, %v2953_v22  ;;  %v3433_v54 = vsel %vm3430_vm3, %v3432_v15, %v3428_v9  ;;  %v3342_v6 = vsub.f32 1.0, %v3341_v11  ;;  %v14989_v9 = vld [vmem:[#allocation89_spill] sm:$0xff] }
 0x7fb   : > { %v3434_v29 = vmul.f32 %v10407_v35, %v3433_v54  ;;  %v3435_v52 = vmul.f32 %v14983_v28, %v3433_v54  ;;  %v3325_v35 = vmul.f32 %v10961_v3, %v10773_v17  ;;  %vm3398_vm5 = vcmp.eq.f32.partialorder %v3397_v40, 8.507059e+37  ;;  %v14990_v54 = vld [vmem:[#allocation82_spill] sm:$0xff] }
 0x7fc   : > { %3467 = vmatpush.xpose.msrb.mxu2 %v2954_v19  ;;  %3487 = vmatpush.xpose.msrb.mxu3 %v2955_v10  ;;  %v3418_v22 = vmul.f32 %v14988_v0, %v3417_v34  ;;  %v3419_v62 = vmul.f32 %v14989_v9, %v3417_v34  ;;  %v3380_v32 = vsel %vm11051_vm9, %v10875_v50, %v3376_v61  ;;  %vm3382_vm10 = vcmp.eq.f32.partialorder %v3381_v12, 8.507059e+37  ;;  %v11062_v10 = vpop.eup %7842 }
 0x7fd   : > { %v3401_v24 = vsel %vm3398_vm5, %v3400_v42, %v3396_v30  ;;  %v3384_v23 = vor.u32 1.1754944e-38, %v3383_v38  ;;  %v3343_v19 = vmul.f32 %v10984_v57, %v3342_v6  ;;  %v3326_v15 = vsub.f32 1.0, %v3325_v35  ;;  %v11084_v40 = vpop.eup %7844  ;;  %v14994_v6 = vld [vmem:[#allocation80_spill] sm:$0xff] }
 0x7fe   : > { %vm3362_vm11 = vweird.f32 %v10969_v39  ;;  %v3367_v11 = vand.u32 2147483648, %v10793_v44  ;;  %v3402_v53 = vmul.f32 %v14990_v54, %v3401_v24  ;;  %v3403_v45 = vmul.f32 %v14991_v8, %v3401_v24  ;;  %v11115_v9 = vpop.xlane.xlu0 %2896 }
 0x7ff   : > { %3468 = vmatmul.f32.vlgmr.msrb.gmra.mxu2 %v11011_v16  ;;  %3488 = vmatmul.f32.vlgmr.msrb.gmra.mxu3 %v11014_v41  ;;  %v3385_v50 = vsel %vm3382_vm10, %v3384_v23, %v3380_v32  ;;  %vm3361_vm12 = vweird.f32 %v10793_v44  ;;  %v3365_v2 = vand.u32 2147483647, %v10793_v44  ;;  %v3293_v20 = vmul.f32 %v11062_v10, %v10797_v51  ;;  %v14999_v32 = vld [vmem:[#allocation31_spill] sm:$0xff] }
 0x800   : > { %3492 = vmatpush.xpose.msra.mxu2 %v3450_v4  ;;  %3512 = vmatpush.xpose.msra.mxu3 %v3451_v18  ;;  %v3309_v4 = vmul.f32 %v11047_v49, %v10818_v27  ;;  %v3360_v18 = vadd.f32 %v10969_v39, %v3359_v13  ;;  %7846 = vrcp.f32 %v10871_v1  ;;  %vm11078_vm14 = vmor %vm3361_vm12, %vm3362_vm11  ;;  %v3344_v36 = vadd.f32 %v10984_v57, %v3343_v19 }
 0x801   : > { %vm3346_vm0 = vweird.f32 %v10984_v57  ;;  %v3351_v61 = vand.u32 2147483648, %v10764_v48  ;;  %v3368_v28 = vor.u32 1.1754944e-38, %v3367_v11  ;;  %vm3345_vm2 = vweird.f32 %v10764_v48 }
 0x802   : > { %v3310_v14 = vsub.f32 1.0, %v3309_v4  ;;  %v3364_v44 = vsel %vm11078_vm14, %v10969_v39, %v3360_v18  ;;  %7848 = vrcp.f32 %v11064_v5  ;;  %v3386_v34 = vmul.f32 %v14994_v6, %v3385_v50  ;;  %vm11098_vm6 = vmor %vm3345_vm2, %vm3346_vm0 }
 0x803   : > { %v3387_v12 = vmul.f32 %v14995_v55, %v3385_v50  ;;  %vm3366_vm3 = vcmp.eq.f32.partialorder %v3365_v2, 8.507059e+37  ;;  %v3277_v38 = vmul.f32 %v11084_v40, %v10800_v7  ;;  %v3294_v35 = vsub.f32 1.0, %v3293_v20  ;;  %v15003_v20 = vld [vmem:[#allocation87_spill] sm:$0xff] }
 0x804   : > { %3493 = vmatpush.xpose.msra.mxu2 %v3434_v29  ;;  %3513 = vmatpush.xpose.msra.mxu3 %v3435_v52  ;;  %v3327_v29 = vmul.f32 %v10961_v3, %v3326_v15  ;;  %v3349_v52 = vand.u32 2147483647, %v10764_v48  ;;  %v3369_v30 = vsel %vm3366_vm3, %v3368_v28, %v3364_v44  ;;  %v3348_v48 = vsel %vm11098_vm6, %v10984_v57, %v3344_v36  ;;  %v14998_v57 = vld [vmem:[#allocation49_spill] sm:$0xff] }
 0x805   : > { %v3352_v13 = vor.u32 1.1754944e-38, %v3351_v61  ;;  %vm3330_vm13 = vweird.f32 %v10961_v3  ;;  %v3311_v37 = vmul.f32 %v11047_v49, %v3310_v14  ;;  %7850 = vrcp.f32 %v10940_v46 }
 0x806   : > { %v3328_v42 = vadd.f32 %v10961_v3, %v3327_v29  ;;  %v11110_v0 = vpop.eup %7846  ;;  %vm3350_vm4 = vcmp.eq.f32.partialorder %v3349_v52, 8.507059e+37  ;;  %vm3329_vm15 = vweird.f32 %v10773_v17  ;;  %v3371_v24 = vmul.f32 %v14999_v32, %v3369_v30  ;;  %v11150_v52 = vpop.xlane.xlu1 %2893 }
 0x807   : > { %v3353_v23 = vsel %vm3350_vm4, %v3352_v13, %v3348_v48  ;;  %v3333_v19 = vand.u32 2147483647, %v10773_v17  ;;  %v3278_v15 = vsub.f32 1.0, %v3277_v38  ;;  %vm11120_vm1 = vmor %vm3329_vm15, %vm3330_vm13  ;;  %v3295_v18 = vmul.f32 %v11062_v10, %v3294_v35  ;;  %v15006_v38 = vld [vmem:[#allocation84_spill] sm:$0xff] }
 0x808   : > { %3494 = vmatpush.xpose.msra.mxu2 %v3418_v22  ;;  %3514 = vmatpush.xpose.msra.mxu3 %v3419_v62  ;;  %v3335_v22 = vand.u32 2147483648, %v10773_v17  ;;  %v3370_v62 = vmul.f32 %v14998_v57, %v3369_v30  ;;  %v11125_v50 = vpop.eup %7848  ;;  %v3261_v11 = vmul.f32 %v11110_v0, %v10871_v1  ;;  %v3332_v54 = vsel %vm11120_vm1, %v10961_v3, %v3328_v42  ;;  %v15007_v30 = vld [vmem:[#allocation85_spill] sm:$0xff] }
 0x809   : > { %v3312_v17 = vadd.f32 %v11047_v49, %v3311_v37  ;;  %vm3314_vm5 = vweird.f32 %v11047_v49  ;;  %7852 = vrcp.f32 %v11115_v9  ;;  %v3319_v2 = vand.u32 2147483648, %v10818_v27 }
 0x80a   : > { %v3355_v43 = vmul.f32 %v15003_v20, %v3353_v23  ;;  %vm3334_vm9 = vcmp.eq.f32.partialorder %v3333_v19, 8.507059e+37  ;;  %vm3313_vm10 = vweird.f32 %v10818_v27  ;;  %v3317_v36 = vand.u32 2147483647, %v10818_v27  ;;  %v15011_v19 = vld [vmem:[#allocation50_spill] sm:$0xff] }
 0x80b   : > { %v11140_v14 = vpop.eup %7850  ;;  %v3245_v3 = vmul.f32 %v11125_v50, %v11064_v5  ;;  %vm11144_vm11 = vmor %vm3313_vm10, %vm3314_vm5  ;;  %v3296_v29 = vadd.f32 %v11062_v10, %v3295_v18  ;;  %vm3298_vm12 = vweird.f32 %v11062_v10  ;;  %v3262_v28 = vsub.f32 1.0, %v3261_v11 }
 0x80c   : > { %3495 = vmatpush.xpose.msra.mxu2 %v3402_v53  ;;  %3515 = vmatpush.xpose.msra.mxu3 %v3403_v45  ;;  %v15002_v53 = vld [vmem:[#allocation86_spill] sm:$0xff]  ;;  %v3336_v45 = vor.u32 1.1754944e-38, %v3335_v22  ;;  %v3316_v27 = vsel %vm11144_vm11, %v11047_v49, %v3312_v17  ;;  %v3303_v6 = vand.u32 2147483648, %v10797_v51  ;;  %v3320_v55 = vor.u32 1.1754944e-38, %v3319_v2 }
 0x80d   : > { %v3354_v8 = vmul.f32 %v15002_v53, %v3353_v23  ;;  %vm3297_vm14 = vweird.f32 %v10797_v51  ;;  %v3229_v39 = vmul.f32 %v11140_v14, %v10940_v46  ;;  %vm3318_vm0 = vcmp.eq.f32.partialorder %v3317_v36, 8.507059e+37  ;;  %v15015_v36 = vld [vmem:[#allocation51_spill] sm:$0xff] }
 0x80e   : > { %v3337_v44 = vsel %vm3334_vm9, %v3336_v45, %v3332_v54  ;;  %vm11165_vm2 = vmor %vm3297_vm14, %vm3298_vm12  ;;  %v3246_v42 = vsub.f32 1.0, %v3245_v3  ;;  %7854 = vrcp.f32 %v11150_v52  ;;  %v3304_v22 = vor.u32 1.1754944e-38, %v3303_v6  ;;  %v15014_v45 = vld [vmem:[#allocation76_spill] sm:$0xff]  ;;  %v15025_v54 = vld [vmem:[#allocation70_spill] sm:$0xff] }
 0x80f   : > { %v3338_v35 = vmul.f32 %v15006_v38, %v3337_v44  ;;  %v3339_v48 = vmul.f32 %v15007_v30, %v3337_v44  ;;  %v11169_v13 = vpop.eup %7852  ;;  %v3300_v37 = vsel %vm11165_vm2, %v11062_v10, %v3296_v29  ;;  %vm3282_vm3 = vweird.f32 %v11084_v40  ;;  %v15019_v38 = vld [vmem:[#allocation67_spill] sm:$0xff]  ;;  %v15028_v29 = vld [vmem:[#allocation74_spill] sm:$0xff] }
 0x810   : > { %3496 = vmatpush.xpose.msra.mxu2 %v3386_v34  ;;  %3516 = vmatpush.xpose.msra.mxu3 %v3387_v12  ;;  %v3279_v34 = vmul.f32 %v11084_v40, %v3278_v15  ;;  %v3301_v12 = vand.u32 2147483647, %v10797_v51  ;;  %v3321_v51 = vsel %vm3318_vm0, %v3320_v55, %v3316_v27  ;;  %vm3281_vm13 = vweird.f32 %v10800_v7 }
 0x811   : > { %v3287_v32 = vand.u32 2147483648, %v10800_v7  ;;  %v3323_v15 = vmul.f32 %v15011_v19, %v3321_v51  ;;  %v3285_v10 = vand.u32 2147483647, %v10800_v7  ;;  %v3230_v18 = vsub.f32 1.0, %v3229_v39  ;;  %vm11185_vm4 = vmor %vm3281_vm13, %vm3282_vm3 }
 0x812   : > { %v3280_v57 = vadd.f32 %v11084_v40, %v3279_v34  ;;  %vm3302_vm6 = vcmp.eq.f32.partialorder %v3301_v12, 8.507059e+37  ;;  %v3213_v11 = vmul.f32 %v11169_v13, %v11115_v9  ;;  %vm3266_vm15 = vweird.f32 %v11110_v0  ;;  %v15018_v12 = vld [vmem:[#allocation60_spill] sm:$0xff] }
 0x813   : > { %v3305_v4 = vsel %vm3302_vm6, %v3304_v22, %v3300_v37  ;;  %v3247_v7 = vmul.f32 %v11125_v50, %v3246_v42  ;;  %v3288_v20 = vor.u32 1.1754944e-38, %v3287_v32  ;;  %vm3286_vm1 = vcmp.eq.f32.partialorder %v3285_v10, 8.507059e+37 }
 0x814   : > { %3497 = vmatpush.xpose.msra.mxu2 %v3370_v62  ;;  %3517 = vmatpush.xpose.msra.mxu3 %v3371_v24  ;;  %v3263_v62 = vmul.f32 %v11110_v0, %v3262_v28  ;;  %v15010_v24 = vld [vmem:[#allocation69_spill] sm:$0xff]  ;;  %v3284_v17 = vsel %vm11185_vm4, %v11084_v40, %v3280_v57  ;;  %v3306_v2 = vmul.f32 %v15014_v45, %v3305_v4  ;;  %vm3265_vm5 = vweird.f32 %v10871_v1 }
 0x815   : > { %v3322_v23 = vmul.f32 %v15010_v24, %v3321_v51  ;;  %v3307_v3 = vmul.f32 %v15015_v36, %v3305_v4  ;;  %v3269_v40 = vand.u32 2147483647, %v10871_v1  ;;  %v3214_v44 = vsub.f32 1.0, %v3213_v11  ;;  %vm11202_vm9 = vmor %vm3265_vm5, %vm3266_vm15  ;;  %v15023_v24 = vld [vmem:[#allocation45_spill] sm:$0xff] }
 0x816   : > { %v3264_v53 = vadd.f32 %v11110_v0, %v3263_v62  ;;  %v3289_v61 = vsel %vm3286_vm1, %v3288_v20, %v3284_v17  ;;  %v3231_v28 = vmul.f32 %v11140_v14, %v3230_v18  ;;  %v3248_v34 = vadd.f32 %v11125_v50, %v3247_v7  ;;  %v15022_v62 = vld [vmem:[#allocation68_spill] sm:$0xff] }
 0x817   : > { %vm3250_vm10 = vweird.f32 %v11125_v50  ;;  %vm3249_vm11 = vweird.f32 %v11064_v5  ;;  %v3255_v55 = vand.u32 2147483648, %v11064_v5  ;;  %v3290_v39 = vmul.f32 %v15018_v12, %v3289_v61  ;;  %v15024_v18 = vld [vmem:[#allocation64_spill] sm:$0xff]  ;;  %v15030_v12 = vld [vmem:[#allocation53_spill] sm:$0xff] }
 0x818   : > { %3498 = vmatpush.xpose.msra.mxu2 %v3354_v8  ;;  %3518 = vmatpush.xpose.msra.mxu3 %v3355_v43  ;;  %v11195_v8 = vpop.eup %7854  ;;  %v3271_v43 = vand.u32 2147483648, %v10871_v1  ;;  %v3268_v6 = vsel %vm11202_vm9, %v11110_v0, %v3264_v53  ;;  %vm3270_vm12 = vcmp.eq.f32.partialorder %v3269_v40, 8.507059e+37  ;;  %v3253_v30 = vand.u32 2147483647, %v11064_v5  ;;  %vm11219_vm14 = vmor %vm3249_vm11, %vm3250_vm10 }
 0x819   : > { %v3197_v27 = vmul.f32 %v11195_v8, %v11150_v52  ;;  %v3232_v0 = vadd.f32 %v11140_v14, %v3231_v28  ;;  %vm3234_vm0 = vweird.f32 %v11140_v14  ;;  %v3252_v51 = vsel %vm11219_vm14, %v11125_v50, %v3248_v34 }
 0x81a   : > { %v3272_v1 = vor.u32 1.1754944e-38, %v3271_v43  ;;  %v3239_v37 = vand.u32 2147483648, %v10940_v46  ;;  %v3215_v5 = vmul.f32 %v11169_v13, %v3214_v44  ;;  %v3256_v22 = vor.u32 1.1754944e-38, %v3255_v55 }
 0x81b   : > { %v3198_v42 = vsub.f32 1.0, %v3197_v27  ;;  %vm3233_vm2 = vweird.f32 %v10940_v46  ;;  %v3237_v57 = vand.u32 2147483647, %v10940_v46  ;;  %vm3254_vm3 = vcmp.eq.f32.partialorder %v3253_v30, 8.507059e+37  ;;  %v15029_v27 = vld [vmem:[#allocation75_spill] sm:$0xff] }
 0x81c   : > { %3499 = vmatpush.xpose.msra.mxu2 %v3338_v35  ;;  %3519 = vmatpush.xpose.msra.mxu3 %v3339_v48  ;;  %v3291_v35 = vmul.f32 %v15019_v38, %v3289_v61  ;;  %v3273_v48 = vsel %vm3270_vm12, %v3272_v1, %v3268_v6  ;;  %vm3235_vm6 = vmor %vm3233_vm2, %vm3234_vm0  ;;  %v3257_v19 = vsel %vm3254_vm3, %v3256_v22, %v3252_v51  ;;  %v3240_v50 = vor.u32 1.1754944e-38, %v3239_v37  ;;  %v661_v1 = vpop.permute.xlu0 %660  ;;  %v15031_v38 = vld [vmem:[#allocation54_spill] sm:$0xff] }
 0x81d   : > { %v3274_v32 = vmul.f32 %v15022_v62, %v3273_v48  ;;  %v3216_v4 = vadd.f32 %v11169_v13, %v3215_v5  ;;  %vm3218_vm13 = vweird.f32 %v11169_v13  ;;  %v3199_v10 = vmul.f32 %v11195_v8, %v3198_v42 }
 0x81e   : > { %vm3238_vm4 = vcmp.eq.f32.partialorder %v3237_v57, 8.507059e+37  ;;  %vm3217_vm15 = vweird.f32 %v11115_v9  ;;  %v3223_v46 = vand.u32 2147483648, %v11115_v9  ;;  %v3258_v11 = vmul.f32 %v15024_v18, %v3257_v19 }
 0x81f   : > { %v3259_v17 = vmul.f32 %v15025_v54, %v3257_v19  ;;  %vm3219_vm1 = vmor %vm3217_vm15, %vm3218_vm13  ;;  %v3200_v45 = vadd.f32 %v11195_v8, %v3199_v10  ;;  %vm3202_vm5 = vweird.f32 %v11195_v8  ;;  %v3207_v36 = vand.u32 2147483648, %v11150_v52 }
 0x820   : > { %3500 = vmatpush.xpose.msra.mxu2 %v3322_v23  ;;  %3520 = vmatpush.xpose.msra.mxu3 %v3323_v15  ;;  %v3275_v23 = vmul.f32 %v15023_v24, %v3273_v48  ;;  %v3236_v15 = vsel %vm3235_vm6, %v11140_v14, %v3232_v0  ;;  %v3221_v14 = vand.u32 2147483647, %v11115_v9  ;;  %v3220_v7 = vsel %vm3219_vm1, %v11169_v13, %v3216_v4 }
 0x821   : > { %v3241_v53 = vsel %vm3238_vm4, %v3240_v50, %v3236_v15  ;;  %v3224_v43 = vor.u32 1.1754944e-38, %v3223_v46  ;;  %vm3201_vm10 = vweird.f32 %v11150_v52  ;;  %v3205_v9 = vand.u32 2147483647, %v11150_v52 }
 0x822   : > { %vm3222_vm9 = vcmp.eq.f32.partialorder %v3221_v14, 8.507059e+37  ;;  %vm3203_vm11 = vmor %vm3201_vm10, %vm3202_vm5  ;;  %v3208_v61 = vor.u32 1.1754944e-38, %v3207_v36 }
 0x823   : > { %v3225_v44 = vsel %vm3222_vm9, %v3224_v43, %v3220_v7  ;;  %v3204_v13 = vsel %vm3203_vm11, %v11195_v8, %v3200_v45  ;;  %vm3206_vm12 = vcmp.eq.f32.partialorder %v3205_v9, 8.507059e+37  ;;  %v3533_v8 = vpop.permute.xlu1 %3532 }
 0x824   : > { %3501 = vmatpush.xpose.msra.mxu2 %v3306_v2  ;;  %3521 = vmatpush.xpose.msra.mxu3 %v3307_v3  ;;  %v15026_v2 = vld [vmem:[#allocation71_spill] sm:$0xff]  ;;  %v15027_v3 = vld [vmem:[#allocation65_spill] sm:$0xff]  ;;  %v3226_v28 = vmul.f32 %v15028_v29, %v3225_v44  ;;  %v3227_v6 = vmul.f32 %v15029_v27, %v3225_v44  ;;  %v3209_v34 = vsel %vm3206_vm12, %v3208_v61, %v3204_v13 }
 0x825   : > { %v3242_v20 = vmul.f32 %v15026_v2, %v3241_v53  ;;  %v3243_v40 = vmul.f32 %v15027_v3, %v3241_v53  ;;  %v3210_v55 = vmul.f32 %v10670_v31, %v3209_v34  ;;  %v3211_v52 = vmul.f32 %v10680_v59, %v3209_v34  ;;  %v3535_v31 = vpop.permute.xlu2 %3534  ;;  %v3537_v59 = vpop.permute.xlu0 %3536 }
 0x828   : > { %3502 = vmatpush.xpose.msra.mxu2 %v3290_v39  ;;  %3522 = vmatpush.xpose.msra.mxu3 %v3291_v35  ;;  %v761_v39 = vadd.f32 %v15030_v12, %v661_v1  ;;  %v814_v35 = vadd.f32 %v15031_v38, %v661_v1 }
 0x82c   : > { %3503 = vmatpush.xpose.msra.mxu2 %v3274_v32  ;;  %3523 = vmatpush.xpose.msra.mxu3 %v3275_v23 }
 0x82d   : > { %v3539_v30 = vpop.permute.xlu2 %3538 }
 0x830   : > { %3504 = vmatpush.xpose.msra.mxu2 %v3258_v11  ;;  %3524 = vmatpush.xpose.msra.mxu3 %v3259_v17 }
 0x834   : > { %3505 = vmatpush.xpose.msra.mxu2 %v3242_v20  ;;  %3525 = vmatpush.xpose.msra.mxu3 %v3243_v40 }
 0x835   : > { %v3545_v48 = vpop.permute.xlu2 %3544 }
 0x838   : > { %3506 = vmatpush.xpose.msra.mxu2 %v3226_v28  ;;  %3526 = vmatpush.xpose.msra.mxu3 %v3227_v6 }
 0x83c   : > { %3507 = vmatpush.xpose.msra.mxu2 %v3210_v55  ;;  %3527 = vmatpush.xpose.msra.mxu3 %v3211_v52 }
 0x83d   : > { %v3551_v42 = vpop.permute.xlu2 %3550 }
 0x83f   : > { %3508 = vmatmul.f32.vlgmr.msra.gmra.mxu2 %v11011_v16  ;;  %3528 = vmatmul.f32.vlgmr.msra.gmra.mxu3 %v11014_v41  ;;  %v3541_v16 = vpop.permute.xlu1 %3540  ;;  %v3543_v41 = vpop.permute.xlu0 %3542 }
 0x840   : > { %3675 = vmatpush.msrb.mxu2 %v761_v39  ;;  %3788 = vmatpush.msrb.mxu3 %v814_v35 }
 0x845   : > { %v3557_v5 = vpop.permute.xlu2 %3556 }
 0x847   : > { %7249 = vmatmul.msk.f32.vlgmr.msrb.gmra.mxu2 %vm903_vm8, %v3533_v8  ;;  %7281 = vmatmul.msk.f32.vlgmr.msrb.gmra.mxu3 %vm903_vm8, %v3533_v8  ;;  %v3547_v49 = vpop.permute.xlu1 %3546  ;;  %v3549_v0 = vpop.permute.xlu0 %3548 }
 0x84d   : > { %v3563_v24 = vpop.permute.xlu2 %3562 }
 0x84f   : > { %7250 = vmatmul.msk.f32.gmra.mxu2 %vm903_vm8, %v3535_v31  ;;  %7282 = vmatmul.msk.f32.gmra.mxu3 %vm903_vm8, %v3535_v31  ;;  %v3553_v51 = vpop.permute.xlu1 %3552  ;;  %v3555_v37 = vpop.permute.xlu0 %3554 }
 0x855   : > { %v3569_v54 = vpop.permute.xlu2 %3568 }
 0x857   : > { %7251 = vmatmul.msk.f32.gmra.mxu2 %vm903_vm8, %v3537_v59  ;;  %7283 = vmatmul.msk.f32.gmra.mxu3 %vm903_vm8, %v3537_v59  ;;  %v3559_v22 = vpop.permute.xlu1 %3558  ;;  %v3561_v57 = vpop.permute.xlu0 %3560 }
 0x85d   : > { %v3575_v9 = vpop.permute.xlu2 %3574 }
 0x85f   : > { %7252 = vmatmul.msk.f32.gmra.mxu2 %vm903_vm8, %v3539_v30  ;;  %7284 = vmatmul.msk.f32.gmra.mxu3 %vm903_vm8, %v3539_v30  ;;  %v3565_v50 = vpop.permute.xlu1 %3564  ;;  %v3567_v46 = vpop.permute.xlu0 %3566 }
 0x865   : > { %v3581_v12 = vpop.permute.xlu2 %3580 }
 0x867   : > { %7253 = vmatmul.msk.f32.gmra.mxu2 %vm903_vm8, %v3541_v16  ;;  %7285 = vmatmul.msk.f32.gmra.mxu3 %vm903_vm8, %v3541_v16  ;;  %v3571_v7 = vpop.permute.xlu1 %3570  ;;  %v3573_v43 = vpop.permute.xlu0 %3572 }
 0x86f   : > { %7254 = vmatmul.msk.f32.gmra.mxu2 %vm903_vm8, %v3543_v41  ;;  %7286 = vmatmul.msk.f32.gmra.mxu3 %vm903_vm8, %v3543_v41  ;;  %v3577_v29 = vpop.permute.xlu1 %3576  ;;  %v3579_v34 = vpop.permute.xlu0 %3578 }
 0x877   : > { %7255 = vmatmul.msk.f32.gmra.mxu2 %vm903_vm8, %v3545_v48  ;;  %7287 = vmatmul.msk.f32.gmra.mxu3 %vm903_vm8, %v3545_v48  ;;  %v3583_v8 = vpop.permute.xlu1 %3582  ;;  %v3585_v16 = vpop.permute.xlu0 %3584 }
 0x87f   : > { %7256 = vmatmul.msk.f32.gmra.mxu2 %vm903_vm8, %v3547_v49  ;;  %7288 = vmatmul.msk.f32.gmra.mxu3 %vm903_vm8, %v3547_v49 }
 0x882   : > { %v11290_v62 = vpop.f32.mrf.mxu2  ;;  %v11292_v32 = vpop.f32.mrf.mxu3 }
 0x883   : > { %15032 = vst [vmem:[#allocation72_spill] sm:$0xff] %v11290_v62 }
 0x884   : > { %15033 = vst [vmem:[#allocation73_spill] sm:$0xff] %v11292_v32 }
 0x887   : > { %7257 = vmatmul.msk.f32.gmra.mxu2 %vm903_vm8, %v3549_v0  ;;  %7289 = vmatmul.msk.f32.gmra.mxu3 %vm903_vm8, %v3549_v0  ;;  %v3587_v0 = vpop.permute.xlu2 %3586 }
 0x88f   : > { %7258 = vmatmul.msk.f32.gmra.mxu2 %vm903_vm8, %v3551_v42  ;;  %7290 = vmatmul.msk.f32.gmra.mxu3 %vm903_vm8, %v3551_v42 }
 0x897   : > { %7259 = vmatmul.msk.f32.gmra.mxu2 %vm903_vm8, %v3553_v51  ;;  %7291 = vmatmul.msk.f32.gmra.mxu3 %vm903_vm8, %v3553_v51 }
 0x89f   : > { %7260 = vmatmul.msk.f32.gmra.mxu2 %vm903_vm8, %v3555_v37  ;;  %7292 = vmatmul.msk.f32.gmra.mxu3 %vm903_vm8, %v3555_v37 }
 0x8a7   : > { %7261 = vmatmul.msk.f32.gmra.mxu2 %vm903_vm8, %v3557_v5  ;;  %7293 = vmatmul.msk.f32.gmra.mxu3 %vm903_vm8, %v3557_v5  ;;  %v3589_v5 = vpop.permute.xlu1 %3588 }
 0x8af   : > { %7262 = vmatmul.msk.f32.gmra.mxu2 %vm903_vm8, %v3559_v22  ;;  %7294 = vmatmul.msk.f32.gmra.mxu3 %vm903_vm8, %v3559_v22 }
 0x8b7   : > { %7263 = vmatmul.msk.f32.gmra.mxu2 %vm903_vm8, %v3561_v57  ;;  %7295 = vmatmul.msk.f32.gmra.mxu3 %vm903_vm8, %v3561_v57 }
 0x8bf   : > { %7264 = vmatmul.msk.f32.gmra.mxu2 %vm903_vm8, %v3563_v24  ;;  %7296 = vmatmul.msk.f32.gmra.mxu3 %vm903_vm8, %v3563_v24 }
 0x8c2   : > { %v3509_v23 = vpop.f32.mrf.mxu2  ;;  %v3529_v19 = vpop.f32.mrf.mxu3 }
 0x8c3   : > { %v11296_v15 = vadd.f32 %v3529_v19, %v3509_v23  ;;  %v3591_v23 = vpop.permute.xlu0 %3590 }
 0x8c5   : > { %15034 = vst [vmem:[#allocation78_spill] sm:$0xff] %v11296_v15 }
 0x8c7   : > { %7265 = vmatmul.msk.f32.gmra.mxu2 %vm903_vm8, %v3565_v50  ;;  %7297 = vmatmul.msk.f32.gmra.mxu3 %vm903_vm8, %v3565_v50 }
 0x8ca   : > { %v11300_v4 = vpop.f32.mrf.mxu2  ;;  %v11302_v10 = vpop.f32.mrf.mxu3 }
 0x8cf   : > { %7266 = vmatmul.msk.f32.gmra.mxu2 %vm903_vm8, %v3567_v46  ;;  %7298 = vmatmul.msk.f32.gmra.mxu3 %vm903_vm8, %v3567_v46 }
 0x8d2   : > { %v11306_v18 = vpop.f32.mrf.mxu2  ;;  %v11308_v11 = vpop.f32.mrf.mxu3 }
 0x8d7   : > { %7267 = vmatmul.msk.f32.gmra.mxu2 %vm903_vm8, %v3569_v54  ;;  %7299 = vmatmul.msk.f32.gmra.mxu3 %vm903_vm8, %v3569_v54  ;;  %v3593_v54 = vpop.permute.xlu2 %3592 }
 0x8da   : > { %v11312_v17 = vpop.f32.mrf.mxu2  ;;  %v11314_v53 = vpop.f32.mrf.mxu3 }
 0x8db   : > { %15035 = vst [vmem:[#allocation77_spill] sm:$0xff] %v11312_v17  ;;  %v3892_v14 = vmax.f32 %v11312_v17, %v11314_v53 }
 0x8dc   : > { %15036 = vst [vmem:[#allocation46_spill] sm:$0xff] %v11314_v53 }
 0x8dd   : > { %3893 = vmax.xlane.f32.xlu0 %v3892_v14 }
 0x8df   : > { %7268 = vmatmul.msk.f32.gmra.mxu2 %vm903_vm8, %v3571_v7  ;;  %7300 = vmatmul.msk.f32.gmra.mxu3 %vm903_vm8, %v3571_v7 }
 0x8e2   : > { %v11320_v45 = vpop.f32.mrf.mxu2  ;;  %v11322_v2 = vpop.f32.mrf.mxu3 }
 0x8e3   : > { %15037 = vst [vmem:[#allocation47_spill] sm:$0xff] %v11320_v45  ;;  %v3895_v20 = vmax.f32 %v11320_v45, %v11322_v2 }
 0x8e4   : > { %15038 = vst [vmem:[#allocation79_spill] sm:$0xff] %v11322_v2 }
 0x8e5   : > { %3896 = vmax.xlane.f32.xlu2 %v3895_v20 }
 0x8e7   : > { %7269 = vmatmul.msk.f32.gmra.mxu2 %vm903_vm8, %v3573_v43  ;;  %7301 = vmatmul.msk.f32.gmra.mxu3 %vm903_vm8, %v3573_v43  ;;  %v3595_v43 = vpop.permute.xlu1 %3594 }
 0x8ea   : > { %v11328_v36 = vpop.f32.mrf.mxu2  ;;  %v11330_v3 = vpop.f32.mrf.mxu3 }
 0x8eb   : > { %v3898_v40 = vmax.f32 %v11328_v36, %v11330_v3 }
 0x8ed   : > { %3899 = vmax.xlane.f32.xlu1 %v3898_v40 }
 0x8ef   : > { %7270 = vmatmul.msk.f32.gmra.mxu2 %vm903_vm8, %v3575_v9  ;;  %7302 = vmatmul.msk.f32.gmra.mxu3 %vm903_vm8, %v3575_v9 }
 0x8f2   : > { %v11336_v44 = vpop.f32.mrf.mxu2  ;;  %v11338_v13 = vpop.f32.mrf.mxu3 }
 0x8f3   : > { %v3901_v61 = vmax.f32 %v11336_v44, %v11338_v13 }
 0x8f5   : > { %3902 = vmax.xlane.f32.xlu0 %v3901_v61 }
 0x8f7   : > { %7271 = vmatmul.msk.f32.gmra.mxu2 %vm903_vm8, %v3577_v29  ;;  %7303 = vmatmul.msk.f32.gmra.mxu3 %vm903_vm8, %v3577_v29 }
 0x8fa   : > { %v11344_v28 = vpop.f32.mrf.mxu2  ;;  %v11346_v27 = vpop.f32.mrf.mxu3 }
 0x8fb   : > { %15039 = vst [vmem:[#allocation57_spill] sm:$0xff] %v11344_v28  ;;  %v3904_v6 = vmax.f32 %v11344_v28, %v11346_v27 }
 0x8fc   : > { %15040 = vst [vmem:[#allocation58_spill] sm:$0xff] %v11346_v27 }
 0x8fd   : > { %3905 = vmax.xlane.f32.xlu2 %v3904_v6 }
 0x8ff   : > { %7272 = vmatmul.msk.f32.gmra.mxu2 %vm903_vm8, %v3579_v34  ;;  %7304 = vmatmul.msk.f32.gmra.mxu3 %vm903_vm8, %v3579_v34 }
 0x902   : > { %v11352_v1 = vpop.f32.mrf.mxu2  ;;  %v11354_v55 = vpop.f32.mrf.mxu3 }
 0x903   : > { %v3907_v52 = vmax.f32 %v11352_v1, %v11354_v55 }
 0x905   : > { %3908 = vmax.xlane.f32.xlu1 %v3907_v52 }
 0x907   : > { %7273 = vmatmul.msk.f32.gmra.mxu2 %vm903_vm8, %v3581_v12  ;;  %7305 = vmatmul.msk.f32.gmra.mxu3 %vm903_vm8, %v3581_v12 }
 0x90a   : > { %v11360_v39 = vpop.f32.mrf.mxu2  ;;  %v11362_v38 = vpop.f32.mrf.mxu3 }
 0x90b   : > { %v3910_v35 = vmax.f32 %v11360_v39, %v11362_v38 }
 0x90d   : > { %3911 = vmax.xlane.f32.xlu0 %v3910_v35 }
 0x90f   : > { %7274 = vmatmul.msk.f32.gmra.mxu2 %vm903_vm8, %v3583_v8  ;;  %7306 = vmatmul.msk.f32.gmra.mxu3 %vm903_vm8, %v3583_v8 }
 0x912   : > { %v11368_v31 = vpop.f32.mrf.mxu2  ;;  %v11370_v59 = vpop.f32.mrf.mxu3 }
 0x913   : > { %v3913_v30 = vmax.f32 %v11368_v31, %v11370_v59 }
 0x915   : > { %3914 = vmax.xlane.f32.xlu2 %v3913_v30 }
 0x917   : > { %7275 = vmatmul.msk.f32.gmra.mxu2 %vm903_vm8, %v3585_v16  ;;  %7307 = vmatmul.msk.f32.gmra.mxu3 %vm903_vm8, %v3585_v16 }
 0x91a   : > { %v11376_v41 = vpop.f32.mrf.mxu2  ;;  %v11378_v48 = vpop.f32.mrf.mxu3 }
 0x91b   : > { %v3916_v49 = vmax.f32 %v11376_v41, %v11378_v48 }
 0x91d   : > { %3917 = vmax.xlane.f32.xlu1 %v3916_v49 }
 0x91f   : > { %7276 = vmatmul.msk.f32.gmra.mxu2 %vm903_vm8, %v3587_v0  ;;  %7308 = vmatmul.msk.f32.gmra.mxu3 %vm903_vm8, %v3587_v0 }
 0x922   : > { %v11384_v42 = vpop.f32.mrf.mxu2  ;;  %v11386_v51 = vpop.f32.mrf.mxu3 }
 0x923   : > { %v3919_v37 = vmax.f32 %v11384_v42, %v11386_v51 }
 0x925   : > { %3920 = vmax.xlane.f32.xlu0 %v3919_v37 }
 0x927   : > { %7277 = vmatmul.msk.f32.gmra.mxu2 %vm903_vm8, %v3589_v5  ;;  %7309 = vmatmul.msk.f32.gmra.mxu3 %vm903_vm8, %v3589_v5 }
 0x92a   : > { %v11392_v22 = vpop.f32.mrf.mxu2  ;;  %v11394_v57 = vpop.f32.mrf.mxu3 }
 0x92b   : > { %v3922_v24 = vmax.f32 %v11392_v22, %v11394_v57 }
 0x92d   : > { %3923 = vmax.xlane.f32.xlu2 %v3922_v24 }
 0x92f   : > { %7278 = vmatmul.msk.f32.gmra.mxu2 %vm903_vm8, %v3591_v23  ;;  %7310 = vmatmul.msk.f32.gmra.mxu3 %vm903_vm8, %v3591_v23 }
 0x932   : > { %v11400_v19 = vpop.f32.mrf.mxu2  ;;  %v11402_v50 = vpop.f32.mrf.mxu3 }
 0x933   : > { %v3925_v46 = vmax.f32 %v11400_v19, %v11402_v50 }
 0x935   : > { %3926 = vmax.xlane.f32.xlu1 %v3925_v46 }
 0x937   : > { %7279 = vmatmul.msk.f32.gmra.mxu2 %vm903_vm8, %v3593_v54  ;;  %7311 = vmatmul.msk.f32.gmra.mxu3 %vm903_vm8, %v3593_v54 }
 0x93a   : > { %v11408_v14 = vpop.f32.mrf.mxu2  ;;  %v11410_v7 = vpop.f32.mrf.mxu3 }
 0x93b   : > { %v3928_v20 = vmax.f32 %v11408_v14, %v11410_v7 }
 0x93d   : > { %3929 = vmax.xlane.f32.xlu2 %v3928_v20 }
 0x93f   : > { %7280 = vmatmul.msk.f32.gmra.mxu2 %vm903_vm8, %v3595_v43  ;;  %7312 = vmatmul.msk.f32.gmra.mxu3 %vm903_vm8, %v3595_v43 }
 0x942   : > { %v11416_v40 = vpop.f32.mrf.mxu2  ;;  %v11418_v9 = vpop.f32.mrf.mxu3 }
 0x943   : > { %v3931_v61 = vmax.f32 %v11416_v40, %v11418_v9 }
 0x945   : > { %3932 = vmax.xlane.f32.xlu0 %v3931_v61 }
 0x94a   : > { %v11422_v29 = vpop.f32.mrf.mxu2  ;;  %v11424_v6 = vpop.f32.mrf.mxu3 }
 0x950   : > { %v11502_v2 = vpop.xlane.xlu0 %3893 }
 0x951   : > { %15053 = vst [vmem:[#allocation85_spill] sm:$0xff] %v11502_v2 }
 0x952   : > { %v11426_v34 = vpop.f32.mrf.mxu2  ;;  %v11428_v52 = vpop.f32.mrf.mxu3 }
 0x958   : > { %v11468_v32 = vpop.xlane.xlu2 %3896 }
 0x959   : > { %15049 = vst [vmem:[#allocation31_spill] sm:$0xff] %v11468_v32 }
 0x95a   : > { %v11430_v12 = vpop.f32.mrf.mxu2  ;;  %v11432_v35 = vpop.f32.mrf.mxu3 }
 0x95b   : > { %15041 = vst [vmem:[#allocation48_spill] sm:$0xff] %v11430_v12 }
 0x95c   : > { %15042 = vst [vmem:[#allocation88_spill] sm:$0xff] %v11432_v35 }
 0x962   : > { %v11434_v8 = vpop.f32.mrf.mxu2  ;;  %v11436_v30 = vpop.f32.mrf.mxu3 }
 0x963   : > { %15043 = vst [vmem:[#allocation89_spill] sm:$0xff] %v11434_v8  ;;  %v3943_v17 = vmax.f32 %v11434_v8, %v11436_v30 }
 0x964   : > { %15044 = vst [vmem:[#allocation82_spill] sm:$0xff] %v11436_v30 }
 0x96a   : > { %v11438_v16 = vpop.f32.mrf.mxu2  ;;  %v11440_v49 = vpop.f32.mrf.mxu3 }
 0x96b   : > { %15045 = vst [vmem:[#allocation83_spill] sm:$0xff] %v11438_v16  ;;  %v3946_v0 = vmax.f32 %v11438_v16, %v11440_v49 }
 0x96c   : > { %15046 = vst [vmem:[#allocation80_spill] sm:$0xff] %v11440_v49 }
 0x96d   : > { %3947 = vmax.xlane.f32.xlu2 %v3946_v0 }
 0x970   : > { %v11476_v63 = vpop.xlane.xlu2 %3905 }
 0x971   : > { %15050 = vst [vmem:[#allocation86_spill] sm:$0xff] %v11476_v63 }
 0x972   : > { %v11444_v37 = vpop.f32.mrf.mxu2  ;;  %v11446_v5 = vpop.f32.mrf.mxu3 }
 0x973   : > { %v3949_v24 = vmax.f32 %v11444_v37, %v11446_v5 }
 0x975   : > { %3950 = vmax.xlane.f32.xlu1 %v3949_v24 }
 0x97a   : > { %v11450_v23 = vpop.f32.mrf.mxu2  ;;  %v11452_v46 = vpop.f32.mrf.mxu3 }
 0x97b   : > { %v3952_v54 = vmax.f32 %v11450_v23, %v11452_v46 }
 0x97d   : > { %3953 = vmax.xlane.f32.xlu0 %v3952_v54 }
 0x982   : > { %v11456_v20 = vpop.f32.mrf.mxu2  ;;  %v11458_v43 = vpop.f32.mrf.mxu3 }
 0x983   : > { %15047 = vst [vmem:[#allocation81_spill] sm:$0xff] %v11456_v20  ;;  %v3955_v61 = vmax.f32 %v11456_v20, %v11458_v43 }
 0x984   : > { %15048 = vst [vmem:[#allocation49_spill] sm:$0xff] %v11458_v43 }
 0x985   : > { %3956 = vmax.xlane.f32.xlu2 %v3955_v61 }
 0x988   : > { %v11486_v58 = vpop.xlane.xlu2 %3914 }
 0x98a   : > { %v11462_v0 = vpop.f32.mrf.mxu2  ;;  %v11464_v15 = vpop.f32.mrf.mxu3 }
 0x98b   : > { %v3958_v24 = vmax.f32 %v11462_v0, %v11464_v15 }
 0x98d   : > { %3959 = vmax.xlane.f32.xlu1 %v3958_v24  ;;  %v11484_v24 = vpop.xlane.xlu1 %3899 }
 0x992   : > { %v11470_v62 = vpop.f32.mrf.mxu2  ;;  %v11472_v54 = vpop.f32.mrf.mxu3 }
 0x993   : > { %v3961_v21 = vmax.f32 %v11470_v62, %v11472_v54 }
 0x995   : > { %3962 = vmax.xlane.f32.xlu0 %v3961_v21  ;;  %v11494_v47 = vpop.xlane.xlu1 %3908 }
 0x99a   : > { %v11478_v61 = vpop.f32.mrf.mxu2  ;;  %v11480_v26 = vpop.f32.mrf.mxu3 }
 0x99b   : > { %15051 = vst [vmem:[#allocation87_spill] sm:$0xff] %v11478_v61  ;;  %v3964_v33 = vmax.f32 %v11478_v61, %v11480_v26 }
 0x99c   : > { %15052 = vst [vmem:[#allocation84_spill] sm:$0xff] %v11480_v26  ;;  %v11512_v26 = vpop.xlane.xlu0 %3902 }
 0x99d   : > { %3965 = vmax.xlane.f32.xlu2 %v3964_v33  ;;  %v3918_v45 = vpop.xlane.xlu1 %3917 }
 0x9a0   : > { %v3924_v60 = vpop.xlane.xlu2 %3923 }
 0x9a2   : > { %v11488_v25 = vpop.f32.mrf.mxu2  ;;  %v11490_v56 = vpop.f32.mrf.mxu3 }
 0x9a3   : > { %v3967_v21 = vmax.f32 %v11488_v25, %v11490_v56 }
 0x9a5   : > { %3968 = vmax.xlane.f32.xlu1 %v3967_v21 }
 0x9aa   : > { %v11496_v49 = vpop.f32.mrf.mxu2  ;;  %v11498_v16 = vpop.f32.mrf.mxu3 }
 0x9ab   : > { %v3970_v33 = vmax.f32 %v11496_v49, %v11498_v16 }
 0x9ad   : > { %3971 = vmax.xlane.f32.xlu0 %v3970_v33  ;;  %v3927_v33 = vpop.xlane.xlu1 %3926 }
 0x9ae   : > { %v4008_v53 = vsub.f32 %v11400_v19, %v3927_v33 }
 0x9b0   : > { %v3930_v32 = vpop.xlane.xlu2 %3929 }
 0x9b1   : > { %v4010_v43 = vsub.f32 %v11408_v14, %v3930_v32  ;;  %v4011_v20 = vsub.f32 %v11410_v7, %v3930_v32  ;;  %v4009_v14 = vsub.f32 %v11402_v50, %v3927_v33  ;;  %v4006_v50 = vsub.f32 %v11392_v22, %v3924_v60 }
 0x9b2   : > { %v11506_v21 = vpop.f32.mrf.mxu2  ;;  %v11508_v27 = vpop.f32.mrf.mxu3 }
 0x9b3   : > { %v3973_v28 = vmax.f32 %v11506_v21, %v11508_v27  ;;  %v4102_v63 = vmul.f32 1.442695, %v4010_v43  ;;  %v4104_v61 = vmul.f32 1.442695, %v4011_v20  ;;  %v4098_v43 = vmul.f32 1.442695, %v4008_v53  ;;  %v3912_v20 = vpop.xlane.xlu0 %3911 }
 0x9b4   : > { %v4100_v2 = vmul.f32 1.442695, %v4009_v14 }
 0x9b5   : > { %3974 = vmax.xlane.f32.xlu2 %v3973_v28  ;;  %7856 = vpow2.f32 %v4102_v63 }
 0x9b6   : > { %7858 = vpow2.f32 %v4104_v61  ;;  %v4007_v61 = vsub.f32 %v11394_v57, %v3924_v60  ;;  %v4000_v60 = vsub.f32 %v11368_v31, %v11486_v58  ;;  %v3937_v31 = vmax.f32 %v11426_v34, %v11428_v52 }
 0x9b7   : > { %7860 = vpow2.f32 %v4098_v43  ;;  %v4002_v43 = vsub.f32 %v11376_v41, %v3918_v45 }
 0x9b8   : > { %7862 = vpow2.f32 %v4100_v2  ;;  %v4096_v22 = vmul.f32 1.442695, %v4007_v61  ;;  %v4001_v61 = vsub.f32 %v11370_v59, %v11486_v58  ;;  %v3998_v58 = vsub.f32 %v11360_v39, %v3912_v20 }
 0x9b9   : > { %v3999_v59 = vsub.f32 %v11362_v38, %v3912_v20 }
 0x9ba   : > { %v11516_v32 = vpop.f32.mrf.mxu2  ;;  %v11518_v7 = vpop.f32.mrf.mxu3 }
 0x9bb   : > { %v3976_v28 = vmax.f32 %v11516_v32, %v11518_v7  ;;  %v11524_v19 = vpop.eup %7856  ;;  %v3921_v2 = vpop.xlane.xlu0 %3920  ;;  %v4080_v38 = vmul.f32 1.442695, %v3999_v59 }
 0x9bc   : > { %v11526_v63 = vpop.eup %7858  ;;  %v4004_v8 = vsub.f32 %v11384_v42, %v3921_v2 }
 0x9bd   : > { %3944 = vmax.xlane.f32.xlu2 %v3943_v17  ;;  %3977 = vmax.xlane.f32.xlu1 %v3976_v28  ;;  %v3940_v17 = vmax.f32 %v11430_v12, %v11432_v35  ;;  %v4216_v14 = vadd.f32 %v11526_v63, %v11524_v19  ;;  %v4094_v28 = vmul.f32 1.442695, %v4006_v50  ;;  %v11542_v57 = vpop.eup %7860  ;;  %v4003_v12 = vsub.f32 %v11378_v48, %v3918_v45 }
 0x9be   : > { %v11545_v35 = vpop.eup %7862  ;;  %v4082_v50 = vmul.f32 1.442695, %v4000_v60  ;;  %v3889_v45 = vmax.f32 %v11306_v18, %v11308_v11  ;;  %v4090_v42 = vmul.f32 1.442695, %v4004_v8 }
 0x9bf   : > { %7864 = vpow2.f32 %v4094_v28  ;;  %v4213_v41 = vadd.f32 %v11545_v35, %v11542_v57  ;;  %v4088_v48 = vmul.f32 1.442695, %v4003_v12  ;;  %v4084_v28 = vmul.f32 1.442695, %v4001_v61 }
 0x9c0   : > { %7866 = vpow2.f32 %v4096_v22  ;;  %v3934_v12 = vmax.f32 %v11422_v29, %v11424_v6  ;;  %v3886_v22 = vmax.f32 %v11300_v4, %v11302_v10 }
 0x9c1   : > { %7868 = vpow2.f32 %v4082_v50  ;;  %v4078_v50 = vmul.f32 1.442695, %v3998_v58 }
 0x9c2   : > { %v11530_v33 = vpop.f32.mrf.mxu2  ;;  %v11532_v30 = vpop.f32.mrf.mxu3 }
 0x9c3   : > { %v3979_v53 = vmax.f32 %v11530_v33, %v11532_v30  ;;  %v3933_v20 = vpop.xlane.xlu0 %3932 }
 0x9c5   : > { %3941 = vmax.xlane.f32.xlu2 %v3940_v17  ;;  %4217 = vadd.xlane.f32.xlu1 %v4216_v14  ;;  %v4005_v17 = vsub.f32 %v11386_v51, %v3921_v2  ;;  %v11558_v14 = vpop.eup %7864 }
 0x9c6   : > { %3980 = vmax.xlane.f32.xlu0 %v3979_v53  ;;  %v4086_v53 = vmul.f32 1.442695, %v4002_v43  ;;  %v11560_v60 = vpop.eup %7866 }
 0x9c7   : > { %v4092_v51 = vmul.f32 1.442695, %v4005_v17  ;;  %v4210_v8 = vadd.f32 %v11560_v60, %v11558_v14  ;;  %v11568_v2 = vpop.eup %7868 }
 0x9c8   : > { %7870 = vpow2.f32 %v4086_v53  ;;  %15054 = vst [vmem:[#allocation69_spill] sm:$0xff] %v11568_v2  ;;  %v4012_v53 = vsub.f32 %v11416_v40, %v3933_v20 }
 0x9c9   : > { %7872 = vpow2.f32 %v4088_v48 }
 0x9ca   : > { %7874 = vpow2.f32 %v4090_v42 }
 0x9cb   : > { %7876 = vpow2.f32 %v4092_v51  ;;  %v4106_v51 = vmul.f32 1.442695, %v4012_v53 }
 0x9cc   : > { %7878 = vpow2.f32 %v4084_v28 }
 0x9cd   : > { %3938 = vmax.xlane.f32.xlu2 %v3937_v31  ;;  %4214 = vadd.xlane.f32.xlu1 %v4213_v41  ;;  %7880 = vpow2.f32 %v4078_v50  ;;  %v4013_v41 = vsub.f32 %v11418_v9, %v3933_v20 }
 0x9ce   : > { %3890 = vmax.xlane.f32.xlu0 %v3889_v45  ;;  %v11572_v43 = vpop.eup %7870  ;;  %7882 = vpow2.f32 %v4080_v38 }
 0x9cf   : > { %v11574_v39 = vpop.eup %7872  ;;  %v4108_v28 = vmul.f32 1.442695, %v4013_v41  ;;  %7884 = vpow2.f32 %v4106_v51  ;;  %v3996_v51 = vsub.f32 %v11352_v1, %v11494_v47 }
 0x9d0   : > { %15055 = vst [vmem:[#allocation50_spill] sm:$0xff] %v11574_v39  ;;  %v11576_v17 = vpop.eup %7874  ;;  %v4204_v45 = vadd.f32 %v11574_v39, %v11572_v43 }
 0x9d1   : > { %v11578_v31 = vpop.eup %7876  ;;  %7886 = vpow2.f32 %v4108_v28 }
 0x9d2   : > { %v11580_v61 = vpop.eup %7878  ;;  %v4207_v48 = vadd.f32 %v11578_v31, %v11576_v17 }
 0x9d3   : > { %15056 = vst [vmem:[#allocation76_spill] sm:$0xff] %v11580_v61  ;;  %v4201_v42 = vadd.f32 %v11580_v61, %v11568_v2  ;;  %v11590_v58 = vpop.eup %7880 }
 0x9d4   : > { %15057 = vst [vmem:[#allocation51_spill] sm:$0xff] %v11590_v58  ;;  %v11592_v40 = vpop.eup %7882 }
 0x9d5   : > { %3935 = vmax.xlane.f32.xlu2 %v3934_v12  ;;  %4211 = vadd.xlane.f32.xlu1 %v4210_v8  ;;  %15058 = vst [vmem:[#allocation60_spill] sm:$0xff] %v11592_v40  ;;  %v4198_v9 = vadd.f32 %v11592_v40, %v11590_v58  ;;  %v11596_v59 = vpop.eup %7884  ;;  %v4074_v40 = vmul.f32 1.442695, %v3996_v51 }
 0x9d6   : > { %3887 = vmax.xlane.f32.xlu0 %v3886_v22 }
 0x9d7   : > { %v11598_v12 = vpop.eup %7886 }
 0x9d8   : > { %v4219_v8 = vadd.f32 %v11598_v12, %v11596_v59 }
 0x9dd   : > { %4205 = vadd.xlane.f32.xlu2 %v4204_v45  ;;  %4208 = vadd.xlane.f32.xlu1 %v4207_v48 }
 0x9de   : > { %4202 = vadd.xlane.f32.xlu0 %v4201_v42 }
 0x9e0   : > { %v11604_v50 = vpop.xlane.xlu2 %3947 }
 0x9e5   : > { %4199 = vadd.xlane.f32.xlu1 %v4198_v9 }
 0x9e8   : > { %v11602_v22 = vpop.xlane.xlu1 %3950 }
 0x9ed   : > { %4220 = vadd.xlane.f32.xlu1 %v4219_v8  ;;  %v3997_v8 = vsub.f32 %v11354_v55, %v11494_v47 }
 0x9ef   : > { %v4076_v58 = vmul.f32 1.442695, %v3997_v8 }
 0x9f0   : > { %v11606_v38 = vpop.xlane.xlu0 %3953 }
 0x9f8   : > { %v11608_v53 = vpop.xlane.xlu2 %3956 }
 0xa00   : > { %v3960_v20 = vpop.xlane.xlu1 %3959 }
 0xa01   : > { %v4030_v39 = vsub.f32 %v11462_v0, %v3960_v20  ;;  %v4031_v1 = vsub.f32 %v11464_v15, %v3960_v20 }
 0xa08   : > { %v3963_v41 = vpop.xlane.xlu0 %3962 }
 0xa09   : > { %v4032_v47 = vsub.f32 %v11470_v62, %v3963_v41  ;;  %v4033_v51 = vsub.f32 %v11472_v54, %v3963_v41  ;;  %v3990_v54 = vsub.f32 %v11328_v36, %v11484_v24  ;;  %v3992_v41 = vsub.f32 %v11336_v44, %v11512_v26 }
 0xa0b   : > { %v4146_v15 = vmul.f32 1.442695, %v4032_v47  ;;  %v4148_v0 = vmul.f32 1.442695, %v4033_v51  ;;  %v4062_v44 = vmul.f32 1.442695, %v3990_v54 }
 0xa0c   : > { %v4066_v47 = vmul.f32 1.442695, %v3992_v41 }
 0xa10   : > { %v11616_v61 = vpop.xlane.xlu2 %3965 }
 0xa18   : > { %v3969_v45 = vpop.xlane.xlu1 %3968 }
 0xa19   : > { %v4036_v48 = vsub.f32 %v11488_v25, %v3969_v45  ;;  %v4037_v42 = vsub.f32 %v11490_v56, %v3969_v45 }
 0xa1b   : > { %v4154_v28 = vmul.f32 1.442695, %v4036_v48  ;;  %v4156_v9 = vmul.f32 1.442695, %v4037_v42 }
 0xa1d   : > { %7888 = vpow2.f32 %v4154_v28  ;;  %v4142_v28 = vmul.f32 1.442695, %v4030_v39 }
 0xa1e   : > { %7890 = vpow2.f32 %v4156_v9 }
 0xa1f   : > { %7892 = vpow2.f32 %v4074_v40 }
 0xa20   : > { %v3972_v2 = vpop.xlane.xlu0 %3971  ;;  %7894 = vpow2.f32 %v4076_v58 }
 0xa21   : > { %v4038_v25 = vsub.f32 %v11496_v49, %v3972_v2  ;;  %v4039_v56 = vsub.f32 %v11498_v16, %v3972_v2  ;;  %v4144_v16 = vmul.f32 1.442695, %v4031_v1 }
 0xa23   : > { %v11622_v45 = vpop.eup %7888  ;;  %v4158_v55 = vmul.f32 1.442695, %v4038_v25  ;;  %v4160_v48 = vmul.f32 1.442695, %v4039_v56 }
 0xa24   : > { %15059 = vst [vmem:[#allocation67_spill] sm:$0xff] %v11622_v45  ;;  %v11625_v42 = vpop.eup %7890 }
 0xa25   : > { %15060 = vst [vmem:[#allocation68_spill] sm:$0xff] %v11625_v42  ;;  %7896 = vpow2.f32 %v4158_v55  ;;  %v4255_v49 = vadd.f32 %v11625_v42, %v11622_v45  ;;  %v11630_v40 = vpop.eup %7892 }
 0xa26   : > { %7898 = vpow2.f32 %v4160_v48  ;;  %v11634_v20 = vpop.eup %7894 }
 0xa27   : > { %4256 = vadd.xlane.f32.xlu2 %v4255_v49  ;;  %7900 = vpow2.f32 %v4142_v28  ;;  %v4195_v56 = vadd.f32 %v11634_v20, %v11630_v40  ;;  %v4024_v49 = vsub.f32 %v11444_v37, %v11602_v22  ;;  %v4025_v37 = vsub.f32 %v11446_v5, %v11602_v22 }
 0xa28   : > { %v3975_v2 = vpop.xlane.xlu2 %3974  ;;  %7902 = vpow2.f32 %v4144_v16 }
 0xa29   : > { %v4040_v62 = vsub.f32 %v11506_v21, %v3975_v2  ;;  %v4041_v58 = vsub.f32 %v11508_v27, %v3975_v2  ;;  %7904 = vpow2.f32 %v4146_v15  ;;  %v3993_v21 = vsub.f32 %v11338_v13, %v11512_v26 }
 0xa2a   : > { %7906 = vpow2.f32 %v4148_v0  ;;  %v3991_v27 = vsub.f32 %v11330_v3, %v11484_v24  ;;  %v4026_v15 = vsub.f32 %v11450_v23, %v11606_v38  ;;  %v4130_v54 = vmul.f32 1.442695, %v4024_v49 }
 0xa2b   : > { %v11638_v39 = vpop.eup %7896  ;;  %v4162_v9 = vmul.f32 1.442695, %v4040_v62  ;;  %v4164_v8 = vmul.f32 1.442695, %v4041_v58  ;;  %v4068_v26 = vmul.f32 1.442695, %v3993_v21 }
 0xa2c   : > { %15061 = vst [vmem:[#allocation45_spill] sm:$0xff] %v11638_v39  ;;  %v11642_v25 = vpop.eup %7898  ;;  %v4064_v3 = vmul.f32 1.442695, %v3991_v27 }
 0xa2d   : > { %15062 = vst [vmem:[#allocation64_spill] sm:$0xff] %v11642_v25  ;;  %7908 = vpow2.f32 %v4162_v9  ;;  %v4258_v36 = vadd.f32 %v11642_v25, %v11638_v39  ;;  %v11652_v1 = vpop.eup %7900  ;;  %v4134_v9 = vmul.f32 1.442695, %v4026_v15 }
 0xa2e   : > { %7910 = vpow2.f32 %v4164_v8  ;;  %15063 = vst [vmem:[#allocation70_spill] sm:$0xff] %v11652_v1  ;;  %v11654_v55 = vpop.eup %7902  ;;  %v4132_v8 = vmul.f32 1.442695, %v4025_v37 }
 0xa2f   : > { %4259 = vadd.xlane.f32.xlu1 %v4258_v36  ;;  %4196 = vadd.xlane.f32.xlu2 %v4195_v56  ;;  %15064 = vst [vmem:[#allocation71_spill] sm:$0xff] %v11654_v55  ;;  %v11656_v48 = vpop.eup %7904  ;;  %7912 = vpow2.f32 %v4062_v44  ;;  %v4246_v41 = vadd.f32 %v11654_v55, %v11652_v1 }
 0xa30   : > { %v3978_v13 = vpop.xlane.xlu1 %3977  ;;  %15065 = vst [vmem:[#allocation65_spill] sm:$0xff] %v11656_v48  ;;  %v11660_v28 = vpop.eup %7906  ;;  %7914 = vpow2.f32 %v4066_v47  ;;  %v15069_v47 = vld [vmem:[#allocation85_spill] sm:$0xff] }
 0xa31   : > { %v4042_v24 = vsub.f32 %v11516_v32, %v3978_v13  ;;  %v4043_v51 = vsub.f32 %v11518_v7, %v3978_v13  ;;  %15066 = vst [vmem:[#allocation74_spill] sm:$0xff] %v11660_v28  ;;  %7916 = vpow2.f32 %v4068_v26  ;;  %v4027_v32 = vsub.f32 %v11452_v46, %v11606_v38  ;;  %v11672_v7 = vpop.xlane.xlu2 %3944  ;;  %v15070_v26 = vld [vmem:[#allocation77_spill] sm:$0xff] }
 0xa32   : > { %7918 = vpow2.f32 %v4064_v3  ;;  %v4249_v23 = vadd.f32 %v11660_v28, %v11656_v48  ;;  %v3986_v13 = vsub.f32 %v15070_v26, %v15069_v47  ;;  %v15071_v3 = vld [vmem:[#allocation46_spill] sm:$0xff] }
 0xa33   : > { %v11664_v16 = vpop.eup %7908  ;;  %v4166_v0 = vmul.f32 1.442695, %v4042_v24  ;;  %v4168_v62 = vmul.f32 1.442695, %v4043_v51  ;;  %v4136_v38 = vmul.f32 1.442695, %v4027_v32  ;;  %v3987_v24 = vsub.f32 %v15071_v3, %v15069_v47 }
 0xa34   : > { %15067 = vst [vmem:[#allocation75_spill] sm:$0xff] %v11664_v16  ;;  %v11668_v2 = vpop.eup %7910  ;;  %v15081_v3 = vld [vmem:[#allocation58_spill] sm:$0xff] }
 0xa35   : > { %15068 = vst [vmem:[#allocation53_spill] sm:$0xff] %v11668_v2  ;;  %v4261_v58 = vadd.f32 %v11668_v2, %v11664_v16  ;;  %7920 = vpow2.f32 %v4166_v0  ;;  %v11682_v46 = vpop.eup %7912  ;;  %v15073_v0 = vld [vmem:[#allocation87_spill] sm:$0xff] }
 0xa36   : > { %7922 = vpow2.f32 %v4168_v62  ;;  %v11686_v22 = vpop.eup %7914  ;;  %v15075_v62 = vld [vmem:[#allocation84_spill] sm:$0xff] }
 0xa37   : > { %4262 = vadd.xlane.f32.xlu0 %v4261_v58  ;;  %4250 = vadd.xlane.f32.xlu1 %v4249_v23  ;;  %v11688_v27 = vpop.eup %7916  ;;  %7924 = vpow2.f32 %v4130_v54  ;;  %v4035_v37 = vsub.f32 %v15075_v62, %v11616_v61  ;;  %v4054_v54 = vmul.f32 1.442695, %v3986_v13  ;;  %v15083_v62 = vld [vmem:[#allocation89_spill] sm:$0xff] }
 0xa38   : > { %4247 = vadd.xlane.f32.xlu2 %v4246_v41  ;;  %v11684_v5 = vpop.xlane.xlu1 %4217  ;;  %v11692_v44 = vpop.eup %7918  ;;  %7926 = vpow2.f32 %v4134_v9 }
 0xa39   : > { %v3981_v21 = vpop.xlane.xlu0 %3980  ;;  %7928 = vpow2.f32 %v4136_v38  ;;  %v3942_v58 = vpop.xlane.xlu2 %3941  ;;  %v4186_v23 = vadd.f32 %v11692_v44, %v11682_v46  ;;  %v4056_v38 = vmul.f32 1.442695, %v3987_v24  ;;  %vm4499_vm14 = vweird.f32 %v11684_v5 }
 0xa3a   : > { %v4044_v36 = vsub.f32 %v11530_v33, %v3981_v21  ;;  %v4045_v56 = vsub.f32 %v11532_v30, %v3981_v21  ;;  %7930 = vpow2.f32 %v4132_v8  ;;  %v4034_v33 = vsub.f32 %v15073_v0, %v11616_v61  ;;  %v15078_v61 = vld [vmem:[#allocation86_spill] sm:$0xff] }
 0xa3b   : > { %v11698_v15 = vpop.eup %7920  ;;  %v4189_v30 = vadd.f32 %v11688_v27, %v11686_v22  ;;  %v4152_v0 = vmul.f32 1.442695, %v4035_v37  ;;  %v15085_v37 = vld [vmem:[#allocation48_spill] sm:$0xff]  ;;  %v4505_v45 = vand.u32 2147483648, %v11684_v5 }
 0xa3c   : > { %v4170_v51 = vmul.f32 1.442695, %v4044_v36  ;;  %v4172_v49 = vmul.f32 1.442695, %v4045_v56  ;;  %15072 = vst [vmem:[#allocation54_spill] sm:$0xff] %v11698_v15  ;;  %v11704_v32 = vpop.eup %7922  ;;  %v15079_v36 = vld [vmem:[#allocation57_spill] sm:$0xff] }
 0xa3d   : > { %15074 = vst [vmem:[#allocation85_spill] sm:$0xff] %v11704_v32  ;;  %v4264_v41 = vadd.f32 %v11704_v32, %v11698_v15  ;;  %v11712_v9 = vpop.eup %7924  ;;  %v3994_v56 = vsub.f32 %v15079_v36, %v15078_v61  ;;  %v4150_v47 = vmul.f32 1.442695, %v4034_v33  ;;  %v15084_v33 = vld [vmem:[#allocation82_spill] sm:$0xff]  ;;  %v4506_v16 = vor.u32 1.1754944e-38, %v4505_v45 }
 0xa3e   : > { %7932 = vpow2.f32 %v4170_v51  ;;  %15076 = vst [vmem:[#allocation77_spill] sm:$0xff] %v11712_v9  ;;  %v11716_v21 = vpop.eup %7926  ;;  %v3995_v51 = vsub.f32 %v15081_v3, %v15078_v61  ;;  %v15087_v3 = vld [vmem:[#allocation88_spill] sm:$0xff] }
 0xa3f   : > { %4190 = vadd.xlane.f32.xlu1 %v4189_v30  ;;  %7934 = vpow2.f32 %v4172_v49  ;;  %15077 = vst [vmem:[#allocation46_spill] sm:$0xff] %v11716_v21  ;;  %4265 = vadd.xlane.f32.xlu0 %v4264_v41  ;;  %v11720_v13 = vpop.eup %7928  ;;  %v4021_v41 = vsub.f32 %v15084_v33, %v11672_v7  ;;  %v4070_v61 = vmul.f32 1.442695, %v3994_v56 }
 0xa40   : > { %4187 = vadd.xlane.f32.xlu2 %v4186_v23  ;;  %v11714_v8 = vpop.xlane.xlu1 %4214  ;;  %15080 = vst [vmem:[#allocation87_spill] sm:$0xff] %v11720_v13  ;;  %v11726_v30 = vpop.eup %7930  ;;  %7936 = vpow2.f32 %v4054_v54  ;;  %v4020_v23 = vsub.f32 %v15083_v62, %v11672_v7  ;;  %v4072_v54 = vmul.f32 1.442695, %v3995_v51 }
 0xa41   : > { %v3891_v26 = vpop.xlane.xlu0 %3890  ;;  %15082 = vst [vmem:[#allocation84_spill] sm:$0xff] %v11726_v30  ;;  %7938 = vpow2.f32 %v4056_v38  ;;  %v4019_v38 = vsub.f32 %v15087_v3, %v3942_v58  ;;  %v4237_v7 = vadd.f32 %v11726_v30, %v11712_v9  ;;  %vm4483_vm5 = vweird.f32 %v11714_v8 }
 0xa42   : > { %v3984_v24 = vsub.f32 %v11306_v18, %v3891_v26  ;;  %v3985_v49 = vsub.f32 %v11308_v11, %v3891_v26  ;;  %7940 = vpow2.f32 %v4150_v47  ;;  %v4018_v18 = vsub.f32 %v15085_v37, %v3942_v58 }
 0xa43   : > { %v4240_v11 = vadd.f32 %v11720_v13, %v11716_v21  ;;  %7942 = vpow2.f32 %v4152_v0  ;;  %v4124_v47 = vmul.f32 1.442695, %v4021_v41  ;;  %v15088_v0 = vld [vmem:[#allocation81_spill] sm:$0xff]  ;;  %v15099_v13 = vld [vmem:[#allocation83_spill] sm:$0xff] }
 0xa44   : > { %v4050_v36 = vmul.f32 1.442695, %v3984_v24  ;;  %v4052_v55 = vmul.f32 1.442695, %v3985_v49  ;;  %v11732_v1 = vpop.eup %7932  ;;  %v4122_v24 = vmul.f32 1.442695, %v4020_v23  ;;  %v3939_v49 = vpop.xlane.xlu2 %3938  ;;  %v4028_v23 = vsub.f32 %v15088_v0, %v11608_v53 }
 0xa45   : > { %v11737_v26 = vpop.eup %7934  ;;  %v4118_v51 = vmul.f32 1.442695, %v4018_v18  ;;  %v15091_v18 = vld [vmem:[#allocation49_spill] sm:$0xff] }
 0xa46   : > { %15086 = vst [vmem:[#allocation86_spill] sm:$0xff] %v11737_v26  ;;  %7944 = vpow2.f32 %v4050_v36  ;;  %v4267_v56 = vadd.f32 %v11737_v26, %v11732_v1  ;;  %v11746_v33 = vpop.eup %7936  ;;  %v4120_v36 = vmul.f32 1.442695, %v4019_v38  ;;  %v4029_v3 = vsub.f32 %v15091_v18, %v11608_v53 }
 0xa47   : > { %4241 = vadd.xlane.f32.xlu1 %v4240_v11  ;;  %7946 = vpow2.f32 %v4052_v55  ;;  %v11748_v58 = vpop.eup %7938  ;;  %v4016_v55 = vsub.f32 %v11426_v34, %v3939_v49  ;;  %v4017_v11 = vsub.f32 %v11428_v52, %v3939_v49 }
 0xa48   : > { %4238 = vadd.xlane.f32.xlu2 %v4237_v7  ;;  %v11744_v62 = vpop.xlane.xlu1 %4211  ;;  %7948 = vpow2.f32 %v4070_v61  ;;  %4268 = vadd.xlane.f32.xlu0 %v4267_v56  ;;  %v11752_v37 = vpop.eup %7940  ;;  %v4138_v7 = vmul.f32 1.442695, %v4028_v23  ;;  %v4140_v0 = vmul.f32 1.442695, %v4029_v3  ;;  %v4022_v3 = vsub.f32 %v15099_v13, %v11604_v50 }
 0xa49   : > { %7950 = vpow2.f32 %v4072_v54  ;;  %15089 = vst [vmem:[#allocation57_spill] sm:$0xff] %v11752_v37  ;;  %v11755_v41 = vpop.eup %7942  ;;  %v4180_v54 = vadd.f32 %v11748_v58, %v11746_v33  ;;  %v4114_v34 = vmul.f32 1.442695, %v4016_v55  ;;  %v4116_v53 = vmul.f32 1.442695, %v4017_v11  ;;  %v15095_v55 = vld [vmem:[#allocation47_spill] sm:$0xff] }
 0xa4a   : > { %7952 = vpow2.f32 %v4122_v24  ;;  %15090 = vst [vmem:[#allocation58_spill] sm:$0xff] %v11755_v41  ;;  %v4252_v56 = vadd.f32 %v11755_v41, %v11752_v37  ;;  %v15098_v11 = vld [vmem:[#allocation79_spill] sm:$0xff]  ;;  %vm4467_vm12 = vweird.f32 %v11744_v62 }
 0xa4b   : > { %7954 = vpow2.f32 %v4124_v47 }
 0xa4c   : > { %v11758_v61 = vpop.eup %7944  ;;  %7956 = vpow2.f32 %v4118_v51 }
 0xa4d   : > { %v11764_v38 = vpop.eup %7946  ;;  %7958 = vpow2.f32 %v4120_v36  ;;  %v15094_v36 = vld [vmem:[#allocation31_spill] sm:$0xff] }
 0xa4e   : > { %v11766_v24 = vpop.eup %7948  ;;  %v4177_v52 = vadd.f32 %v11764_v38, %v11758_v61  ;;  %v3988_v18 = vsub.f32 %v15095_v55, %v15094_v36  ;;  %7960 = vpow2.f32 %v4138_v7  ;;  %v3989_v9 = vsub.f32 %v15098_v11, %v15094_v36  ;;  %v15100_v7 = vld [vmem:[#allocation80_spill] sm:$0xff] }
 0xa4f   : > { %4181 = vadd.xlane.f32.xlu1 %v4180_v54  ;;  %v11772_v47 = vpop.eup %7950  ;;  %7962 = vpow2.f32 %v4114_v34  ;;  %v4023_v55 = vsub.f32 %v15100_v7, %v11604_v50 }
 0xa50   : > { %v11774_v49 = vpop.xlane.xlu1 %4208  ;;  %v11776_v51 = vpop.eup %7952  ;;  %4178 = vadd.xlane.f32.xlu2 %v4177_v52  ;;  %4253 = vadd.xlane.f32.xlu0 %v4252_v56  ;;  %7964 = vpow2.f32 %v4116_v53  ;;  %v4058_v56 = vmul.f32 1.442695, %v3988_v18  ;;  %v4192_v53 = vadd.f32 %v11772_v47, %v11766_v24  ;;  %v4060_v13 = vmul.f32 1.442695, %v3989_v9 }
 0xa51   : > { %15092 = vst [vmem:[#allocation89_spill] sm:$0xff] %v11776_v51  ;;  %v11778_v23 = vpop.eup %7954  ;;  %7966 = vpow2.f32 %v4140_v0  ;;  %v4126_v18 = vmul.f32 1.442695, %v4022_v3  ;;  %v4128_v7 = vmul.f32 1.442695, %v4023_v55  ;;  %v3888_v9 = vpop.xlane.xlu0 %3887 }
 0xa52   : > { %15093 = vst [vmem:[#allocation82_spill] sm:$0xff] %v11778_v23  ;;  %v11782_v54 = vpop.eup %7956  ;;  %v4231_v52 = vadd.f32 %v11778_v23, %v11776_v51  ;;  %7968 = vrcp.f32 %v11684_v5  ;;  %v11805_v23 = vpop.xlane.xlu2 %3935 }
 0xa53   : > { %15096 = vst [vmem:[#allocation48_spill] sm:$0xff] %v11782_v54  ;;  %v11784_v30 = vpop.eup %7958  ;;  %7970 = vpow2.f32 %v4058_v56 }
 0xa54   : > { %15097 = vst [vmem:[#allocation88_spill] sm:$0xff] %v11784_v30  ;;  %v4228_v34 = vadd.f32 %v11784_v30, %v11782_v54  ;;  %v11799_v36 = vpop.eup %7960  ;;  %7972 = vrcp.f32 %v11714_v8 }
 0xa55   : > { %15101 = vst [vmem:[#allocation81_spill] sm:$0xff] %v11799_v36  ;;  %v11803_v11 = vpop.eup %7962  ;;  %7974 = vpow2.f32 %v4060_v13  ;;  %v3982_v13 = vsub.f32 %v11300_v4, %v3888_v9  ;;  %v3983_v4 = vsub.f32 %v11302_v10, %v3888_v9  ;;  %v4014_v9 = vsub.f32 %v11422_v29, %v11805_v23 }
 0xa56   : > { %15102 = vst [vmem:[#allocation49_spill] sm:$0xff] %v11803_v11  ;;  %v11807_v50 = vpop.eup %7964  ;;  %7976 = vpow2.f32 %v4126_v18 }
 0xa57   : > { %4232 = vadd.xlane.f32.xlu1 %v4231_v52  ;;  %15103 = vst [vmem:[#allocation31_spill] sm:$0xff] %v11807_v50  ;;  %v11809_v52 = vpop.eup %7966  ;;  %v4225_v3 = vadd.f32 %v11807_v50, %v11803_v11  ;;  %7978 = vrcp.f32 %v11744_v62  ;;  %v4110_v2 = vmul.f32 1.442695, %v4014_v9 }
 0xa58   : > { %v11801_v0 = vpop.xlane.xlu1 %4199  ;;  %4229 = vadd.xlane.f32.xlu2 %v4228_v34  ;;  %4193 = vadd.xlane.f32.xlu0 %v4192_v53  ;;  %15104 = vst [vmem:[#allocation47_spill] sm:$0xff] %v11809_v52  ;;  %v11812_v30 = vpop.eup %7968  ;;  %7980 = vpow2.f32 %v4128_v7  ;;  %v4243_v56 = vadd.f32 %v11809_v52, %v11799_v36 }
 0xa59   : > { %v4495_v34 = vmul.f32 %v11812_v30, %v11684_v5  ;;  %v11821_v55 = vpop.eup %7970  ;;  %v11843_v28 = vpop.xlane.xlu0 %4202  ;;  %vm4500_vm0 = vweird.f32 %v11812_v30 }
 0xa5a   : > { %v11823_v54 = vpop.eup %7972  ;;  %vm11875_vm6 = vmor %vm4499_vm14, %vm4500_vm0 }
 0xa5b   : > { %v11826_v18 = vpop.eup %7974  ;;  %v4496_v50 = vsub.f32 1.0, %v4495_v34  ;;  %v4479_v51 = vmul.f32 %v11823_v54, %v11714_v8  ;;  %vm4484_vm13 = vweird.f32 %v11823_v54 }
 0xa5c   : > { %v11829_v7 = vpop.eup %7976  ;;  %v4183_v34 = vadd.f32 %v11826_v18, %v11821_v55  ;;  %vm11903_vm9 = vmor %vm4483_vm5, %vm4484_vm13 }
 0xa5d   : > { %15105 = vst [vmem:[#allocation79_spill] sm:$0xff] %v11829_v7  ;;  %v11833_v11 = vpop.eup %7978  ;;  %v4497_v48 = vmul.f32 %v11812_v30, %v4496_v50  ;;  %v4480_v37 = vsub.f32 1.0, %v4479_v51  ;;  %v4503_v51 = vand.u32 2147483647, %v11684_v5 }
 0xa5e   : > { %v11837_v21 = vpop.eup %7980  ;;  %v4463_v36 = vmul.f32 %v11833_v11, %v11744_v62  ;;  %vm4468_vm10 = vweird.f32 %v11833_v11 }
 0xa5f   : > { %4226 = vadd.xlane.f32.xlu1 %v4225_v3  ;;  %v11831_v3 = vpop.xlane.xlu2 %4205  ;;  %15106 = vst [vmem:[#allocation83_spill] sm:$0xff] %v11837_v21  ;;  %v4234_v10 = vadd.f32 %v11837_v21, %v11829_v7  ;;  %v4498_v39 = vadd.f32 %v11812_v30, %v4497_v48  ;;  %v626_v48 = vld [vmem:[%s14343_s4 + $0x50] sm:$0xff]  ;;  %vm4504_vm1 = vcmp.eq.f32.partialorder %v4503_v51, 8.507059e+37  ;;  %v4473_v51 = vand.u32 2147483648, %v11744_v62  ;;  %vm11927_vm14 = vmor %vm4467_vm12, %vm4468_vm10 }
 0xa60   : > { %v4221_v53 = vpop.xlane.xlu1 %4220  ;;  %4244 = vadd.xlane.f32.xlu0 %v4243_v56  ;;  %v4046_v56 = vmul.f32 1.442695, %v3982_v13  ;;  %v4048_v13 = vmul.f32 1.442695, %v3983_v4  ;;  %v4464_v25 = vsub.f32 1.0, %v4463_v36  ;;  %vm4419_vm10 = vweird.f32 %v11843_v28 }
 0xa61   : > { %7982 = vrcp.f32 %v4221_v53  ;;  %v4521_v7 = vand.u32 2147483648, %v4221_v53  ;;  %vm4515_vm3 = vweird.f32 %v4221_v53  ;;  %v4502_v9 = vsel %vm11875_vm6, %v11812_v30, %v4498_v39 }
 0xa62   : > { %7984 = vrcp.f32 %v11774_v49 }
 0xa63   : > { %7986 = vrcp.f32 %v11831_v3 }
 0xa64   : > { %7988 = vpow2.f32 %v4046_v56  ;;  %v4519_v56 = vand.u32 2147483647, %v4221_v53 }
 0xa65   : > { %7990 = vrcp.f32 %v11843_v28 }
 0xa66   : > { %7992 = vpow2.f32 %v4048_v13  ;;  %vm4520_vm15 = vcmp.eq.f32.partialorder %v4519_v56, 8.507059e+37  ;;  %v4439_v56 = vand.u32 2147483647, %v11831_v3 }
 0xa67   : > { %v7983_v52 = vpop.eup %7982  ;;  %7994 = vrcp.f32 %v11801_v0 }
 0xa68   : > { %v11848_v41 = vpop.eup %7984  ;;  %v4511_v42 = vmul.f32 %v7983_v52, %v4221_v53  ;;  %4184 = vadd.xlane.f32.xlu0 %v4183_v34  ;;  %vm4516_vm2 = vweird.f32 %v7983_v52  ;;  %v4481_v34 = vmul.f32 %v11823_v54, %v4480_v37  ;;  %v4522_v53 = vor.u32 1.1754944e-38, %v4521_v7 }
 0xa69   : > { %v4447_v21 = vmul.f32 %v11848_v41, %v11774_v49  ;;  %v11862_v29 = vpop.eup %7986  ;;  %vm4517_vm4 = vmor %vm4515_vm3, %vm4516_vm2  ;;  %v4489_v7 = vand.u32 2147483648, %v11714_v8  ;;  %7996 = vpow2.f32 %v4110_v2  ;;  %vm4452_vm0 = vweird.f32 %v11848_v41 }
 0xa6a   : > { %v4512_v50 = vsub.f32 1.0, %v4511_v42  ;;  %v4015_v42 = vsub.f32 %v11424_v6, %v11805_v23  ;;  %v11880_v6 = vpop.eup %7988  ;;  %v4431_v45 = vmul.f32 %v11862_v29, %v11831_v3  ;;  %vm4451_vm2 = vweird.f32 %v11774_v49 }
 0xa6b   : > { %v4448_v23 = vsub.f32 1.0, %v4447_v21  ;;  %v11888_v5 = vpop.eup %7990  ;;  %v4487_v21 = vand.u32 2147483647, %v11714_v8  ;;  %v4490_v8 = vor.u32 1.1754944e-38, %v4489_v7  ;;  %vm11950_vm6 = vmor %vm4451_vm2, %vm4452_vm0  ;;  %vm4436_vm13 = vweird.f32 %v11862_v29 }
 0xa6c   : > { %v4513_v4 = vmul.f32 %v7983_v52, %v4512_v50  ;;  %v4482_v50 = vadd.f32 %v11823_v54, %v4481_v34  ;;  %v4112_v32 = vmul.f32 1.442695, %v4015_v42  ;;  %v11897_v30 = vpop.eup %7992  ;;  %vm4420_vm5 = vweird.f32 %v11888_v5 }
 0xa6d   : > { %vm4488_vm11 = vcmp.eq.f32.partialorder %v4487_v21, 8.507059e+37 }
 0xa6e   : > { %v4514_v36 = vadd.f32 %v7983_v52, %v4513_v4  ;;  %v4465_v4 = vmul.f32 %v11833_v11, %v4464_v25  ;;  %v4415_v25 = vmul.f32 %v11888_v5, %v11843_v28  ;;  %v4486_v2 = vsel %vm11903_vm9, %v11823_v54, %v4482_v50 }
 0xa6f   : > { %7998 = vpow2.f32 %v4112_v32  ;;  %v4471_v54 = vand.u32 2147483647, %v11744_v62  ;;  %vm4440_vm9 = vcmp.eq.f32.partialorder %v4439_v56, 8.507059e+37  ;;  %v15133_v56 = vld [vmem:[#allocation28_spill] sm:$0xff] }
 0xa70   : > { %v4518_v13 = vsel %vm4517_vm4, %v7983_v52, %v4514_v36  ;;  %680 = vperm.xlu2 %7465, %v626_v48   ;;  %4235 = vadd.xlane.f32.xlu0 %v4234_v10  ;;  %v4432_v52 = vsub.f32 1.0, %v4431_v45  ;;  %v4507_v10 = vsel %vm4504_vm1, %v4506_v16, %v4502_v9  ;;  %v623_v16 = vld [vmem:[%s14343_s4 + $0x38] sm:$0xff]  ;;  %v4416_v42 = vsub.f32 1.0, %v4415_v25 }
 0xa71   : > { %v4523_v15 = vsel %vm4520_vm15, %v4522_v53, %v4518_v13  ;;  %v4509_v34 = vmul.f32 %v11526_v63, %v4507_v10  ;;  %v4174_v36 = vadd.f32 %v11897_v30, %v11880_v6  ;;  %v4491_v48 = vsel %vm4488_vm11, %v4490_v8, %v4486_v2  ;;  %v15113_v53 = vld [vmem:[#allocation11_spill] sm:$0xff]  ;;  %vm4421_vm11 = vmor %vm4419_vm10, %vm4420_vm5 }
 0xa72   : > { %v4524_v26 = vmul.f32 %v11596_v59, %v4523_v15  ;;  %v4525_v39 = vmul.f32 %v11598_v12, %v4523_v15  ;;  %v11907_v59 = vpop.eup %7994  ;;  %v4449_v12 = vmul.f32 %v11848_v41, %v4448_v23  ;;  %v4466_v15 = vadd.f32 %v11833_v11, %v4465_v4 }
 0xa73   : > { %v4399_v32 = vmul.f32 %v11907_v59, %v11801_v0  ;;  %v11937_v45 = vpop.eup %7996  ;;  %v4457_v23 = vand.u32 2147483648, %v11774_v49  ;;  %v4474_v9 = vor.u32 1.1754944e-38, %v4473_v51  ;;  %v4492_v13 = vmul.f32 %v11542_v57, %v4491_v48 }
 0xa74   : > { %4782 = vmatpush.xpose.msra.mxu0 %v4524_v26  ;;  %4802 = vmatpush.xpose.msra.mxu1 %v4525_v39  ;;  %v4508_v26 = vmul.f32 %v11524_v19, %v4507_v10  ;;  %v4433_v19 = vmul.f32 %v11862_v29, %v4432_v52  ;;  %v4470_v63 = vsel %vm11927_vm14, %v11833_v11, %v4466_v15  ;;  %vm4472_vm3 = vcmp.eq.f32.partialorder %v4471_v54, 8.507059e+37 }
 0xa75   : > { %v4450_v62 = vadd.f32 %v11848_v41, %v4449_v12  ;;  %v4455_v11 = vand.u32 2147483647, %v11774_v49  ;;  %v11945_v50 = vpop.eup %7998  ;;  %v4400_v4 = vsub.f32 1.0, %v4399_v32  ;;  %v4493_v21 = vmul.f32 %v11545_v35, %v4491_v48 }
 0xa76   : > { %v4475_v7 = vsel %vm4472_vm3, %v4474_v9, %v4470_v63  ;;  %v4434_v25 = vadd.f32 %v11862_v29, %v4433_v19  ;;  %v4417_v49 = vmul.f32 %v11888_v5, %v4416_v42  ;;  %v4441_v35 = vand.u32 2147483648, %v11831_v3  ;;  %v15123_v9 = vld [vmem:[#allocation69_spill] sm:$0xff] }
 0xa77   : > { %v4454_v57 = vsel %vm11950_vm6, %v11848_v41, %v4450_v62  ;;  %v4458_v52 = vor.u32 1.1754944e-38, %v4457_v23  ;;  %vm4435_vm4 = vweird.f32 %v11831_v3  ;;  %v4476_v10 = vmul.f32 %v11558_v14, %v4475_v7 }
 0xa78   : > { %665 = vperm.xlu1 %7464, %v623_v16   ;;  %4783 = vmatpush.xpose.msra.mxu0 %v4508_v26  ;;  %vm4456_vm15 = vcmp.eq.f32.partialorder %v4455_v11, 8.507059e+37  ;;  %v4401_v12 = vmul.f32 %v11907_v59, %v4400_v4  ;;  %v4222_v41 = vadd.f32 %v11945_v50, %v11937_v45  ;;  %vm11967_vm1 = vmor %vm4435_vm4, %vm4436_vm13  ;;  %v15118_v16 = vld [vmem:[#allocation13_spill] sm:$0xff]  ;;  %v4477_v8 = vmul.f32 %v11560_v60, %v4475_v7  ;;  %v15119_v26 = vld [vmem:[#allocation14_spill] sm:$0xff] }
 0xa79   : > { %4864 = vrot.lane.b32.xlu2 %v15113_v53, %s8336_s19  ;;  %4175 = vadd.xlane.f32.xlu0 %v4174_v36  ;;  %v4459_v2 = vsel %vm4456_vm15, %v4458_v52, %v4454_v57  ;;  %v4438_v14 = vsel %vm11967_vm1, %v11862_v29, %v4434_v25  ;;  %v4418_v3 = vadd.f32 %v11888_v5, %v4417_v49  ;;  %v4442_v51 = vor.u32 1.1754944e-38, %v4441_v35  ;;  %v15122_v53 = vld [vmem:[#allocation17_spill] sm:$0xff]  ;;  %v15125_v4 = vld [vmem:[#allocation51_spill] sm:$0xff]  ;;  %v15128_v57 = vld [vmem:[#allocation20_spill] sm:$0xff] }
 0xa7a   : > { %4803 = vmatpush.xpose.msra.mxu1 %v4509_v34  ;;  %v4425_v34 = vand.u32 2147483648, %v11843_v28  ;;  %v4460_v54 = vmul.f32 %v11576_v17, %v4459_v2  ;;  %v4423_v60 = vand.u32 2147483647, %v11843_v28  ;;  %v4461_v42 = vmul.f32 %v11578_v31, %v4459_v2  ;;  %v15120_v31 = vld [vmem:[#allocation16_spill] sm:$0xff]  ;;  %v15126_v7 = vld [vmem:[#allocation19_spill] sm:$0xff]  ;;  %v15129_v25 = vld [vmem:[#allocation10_spill] sm:$0xff] }
 0xa7b   : > { %v4443_v29 = vsel %vm4440_vm9, %v4442_v51, %v4438_v14  ;;  %v4422_v32 = vsel %vm4421_vm11, %v11888_v5, %v4418_v3  ;;  %v4402_v36 = vadd.f32 %v11907_v59, %v4401_v12  ;;  %vm4404_vm12 = vweird.f32 %v11907_v59  ;;  %v15121_v5 = vld [vmem:[#allocation50_spill] sm:$0xff]  ;;  %v15130_v49 = vld [vmem:[#allocation23_spill] sm:$0xff]  ;;  %v15131_v35 = vld [vmem:[#allocation24_spill] sm:$0xff] }
 0xa7c   : > { %4784 = vmatpush.xpose.msra.mxu0 %v4492_v13  ;;  %v4409_v48 = vand.u32 2147483648, %v11801_v0  ;;  %v4426_v37 = vor.u32 1.1754944e-38, %v4425_v34  ;;  %vm4403_vm14 = vweird.f32 %v11801_v0  ;;  %v4444_v17 = vmul.f32 %v11572_v43, %v4443_v29  ;;  %v15134_v12 = vld [vmem:[#allocation22_spill] sm:$0xff]  ;;  %v15135_v2 = vld [vmem:[#allocation15_spill] sm:$0xff]  ;;  %v15137_v14 = vld [vmem:[#allocation29_spill] sm:$0xff] }
 0xa7d   : > { %vm4424_vm0 = vcmp.eq.f32.partialorder %v4423_v60, 8.507059e+37  ;;  %v4407_v28 = vand.u32 2147483647, %v11801_v0  ;;  %vm4405_vm2 = vmor %vm4403_vm14, %vm4404_vm12  ;;  %v4445_v63 = vmul.f32 %v15121_v5, %v4443_v29  ;;  %v15124_v0 = vld [vmem:[#allocation76_spill] sm:$0xff]  ;;  %v15138_v34 = vld [vmem:[#allocation18_spill] sm:$0xff] }
 0xa7e   : > { %4804 = vmatpush.xpose.msra.mxu1 %v4493_v21  ;;  %v4427_v19 = vsel %vm4424_vm0, %v4426_v37, %v4422_v32  ;;  %v4406_v62 = vsel %vm4405_vm2, %v11907_v59, %v4402_v36  ;;  %v4410_v23 = vor.u32 1.1754944e-38, %v4409_v48  ;;  %v15127_v59 = vld [vmem:[#allocation60_spill] sm:$0xff]  ;;  %v15139_v29 = vld [vmem:[#allocation33_spill] sm:$0xff]  ;;  %v15140_v32 = vld [vmem:[#allocation34_spill] sm:$0xff] }
 0xa7f   : > { %v4428_v43 = vmul.f32 %v15123_v9, %v4427_v19  ;;  %vm4408_vm3 = vcmp.eq.f32.partialorder %v4407_v28, 8.507059e+37  ;;  %v4429_v11 = vmul.f32 %v15124_v0, %v4427_v19 }
 0xa80   : > { %4868 = vrot.lane.b32.xlu1 %v15118_v16, %s8336_s19  ;;  %4785 = vmatpush.xpose.msra.mxu0 %v4476_v10  ;;  %v4411_v13 = vsel %vm4408_vm3, %v4410_v23, %v4406_v62  ;;  %v15132_v10 = vld [vmem:[#allocation12_spill] sm:$0xff]  ;;  %v15136_v16 = vld [vmem:[#allocation27_spill] sm:$0xff] }
 0xa81   : > { %4870 = vrot.lane.b32.xlu2 %v15119_v26, %s8336_s19  ;;  %4223 = vadd.xlane.f32.xlu0 %v4222_v41  ;;  %v4412_v21 = vmul.f32 %v15125_v4, %v4411_v13  ;;  %v4413_v39 = vmul.f32 %v15127_v59, %v4411_v13  ;;  %v15142_v23 = vld [vmem:[#allocation36_spill] sm:$0xff]  ;;  %v15144_v13 = vld [vmem:[#allocation26_spill] sm:$0xff]  ;;  %v15147_v4 = vld [vmem:[#allocation25_spill] sm:$0xff] }
 0xa82   : > { %4805 = vmatpush.xpose.msra.mxu1 %v4477_v8  ;;  %v15148_v59 = vld [vmem:[#allocation42_spill] sm:$0xff] }
 0xa84   : > { %4786 = vmatpush.xpose.msra.mxu0 %v4460_v54 }
 0xa86   : > { %4806 = vmatpush.xpose.msra.mxu1 %v4461_v42 }
 0xa88   : > { %4874 = vrot.lane.b32.xlu1 %v15120_v31, %s8336_s19  ;;  %4787 = vmatpush.xpose.msra.mxu0 %v4444_v17  ;;  %v15141_v31 = vld [vmem:[#allocation21_spill] sm:$0xff] }
 0xa89   : > { %4876 = vrot.lane.b32.xlu2 %v15122_v53, %s8336_s19  ;;  %v15143_v53 = vld [vmem:[#allocation37_spill] sm:$0xff] }
 0xa8a   : > { %4807 = vmatpush.xpose.msra.mxu1 %v4445_v63 }
 0xa8c   : > { %4788 = vmatpush.xpose.msra.mxu0 %v4428_v43 }
 0xa8e   : > { %4808 = vmatpush.xpose.msra.mxu1 %v4429_v11 }
 0xa90   : > { %4880 = vrot.lane.b32.xlu1 %v15126_v7, %s8336_s19  ;;  %4789 = vmatpush.xpose.msra.mxu0 %v4412_v21 }
 0xa91   : > { %4882 = vrot.lane.b32.xlu2 %v15128_v57, %s8336_s19  ;;  %v15149_v57 = vld [vmem:[#allocation43_spill] sm:$0xff] }
 0xa92   : > { %4809 = vmatpush.xpose.msra.mxu1 %v4413_v39 }
 0xa95   : > { %4862 = vrot.lane.b32.xlu0 %v15129_v25, %s8336_s19 }
 0xa98   : > { %4886 = vrot.lane.b32.xlu1 %v15130_v49, %s8336_s19 }
 0xa99   : > { %4888 = vrot.lane.b32.xlu2 %v15131_v35, %s8336_s19 }
 0xa9a   : > { %v12013_v52 = vpop.xlane.xlu2 %4256 }
 0xa9d   : > { %4866 = vrot.lane.b32.xlu0 %v15132_v10, %s8336_s19  ;;  %v15150_v10 = vld [vmem:[#allocation32_spill] sm:$0xff] }
 0xaa0   : > { %4892 = vrot.lane.b32.xlu1 %v15133_v56, %s8336_s19 }
 0xaa1   : > { %4894 = vrot.lane.b32.xlu2 %v15134_v12, %s8336_s19 }
 0xaa2   : > { %v4197_v41 = vpop.xlane.xlu2 %4196  ;;  %v12023_v15 = vpop.xlane.xlu1 %4259 }
 0xaa3   : > { %8000 = vrcp.f32 %v4197_v41  ;;  %v4393_v60 = vand.u32 2147483648, %v4197_v41  ;;  %vm4387_vm13 = vweird.f32 %v4197_v41  ;;  %v4391_v36 = vand.u32 2147483647, %v4197_v41 }
 0xaa5   : > { %4872 = vrot.lane.b32.xlu0 %v15135_v2, %s8336_s19  ;;  %v4394_v17 = vor.u32 1.1754944e-38, %v4393_v60  ;;  %vm4392_vm15 = vcmp.eq.f32.partialorder %v4391_v36, 8.507059e+37 }
 0xaa8   : > { %4898 = vrot.lane.b32.xlu1 %v15136_v16, %s8336_s19 }
 0xaa9   : > { %v8001_v8 = vpop.eup %8000  ;;  %4900 = vrot.lane.b32.xlu2 %v15137_v14, %s8336_s19 }
 0xaaa   : > { %v4383_v3 = vmul.f32 %v8001_v8, %v4197_v41  ;;  %v12029_v51 = vpop.xlane.xlu0 %4262  ;;  %vm4388_vm6 = vweird.f32 %v8001_v8  ;;  %v12037_v48 = vpop.xlane.xlu1 %4250 }
 0xaab   : > { %vm4389_vm4 = vmor %vm4387_vm13, %vm4388_vm6  ;;  %v12039_v28 = vpop.xlane.xlu2 %4247 }
 0xaac   : > { %v4384_v26 = vsub.f32 1.0, %v4383_v3 }
 0xaad   : > { %4878 = vrot.lane.b32.xlu0 %v15138_v34, %s8336_s19  ;;  %v15151_v34 = vld [vmem:[#allocation35_spill] sm:$0xff] }
 0xaae   : > { %v4385_v54 = vmul.f32 %v8001_v8, %v4384_v26 }
 0xab0   : > { %4904 = vrot.lane.b32.xlu1 %v15139_v29, %s8336_s19  ;;  %v4386_v42 = vadd.f32 %v8001_v8, %v4385_v54 }
 0xab1   : > { %4906 = vrot.lane.b32.xlu2 %v15140_v32, %s8336_s19 }
 0xab2   : > { %v4390_v37 = vsel %vm4389_vm4, %v8001_v8, %v4386_v42  ;;  %v12041_v19 = vpop.xlane.xlu0 %4265  ;;  %v12051_v9 = vpop.xlane.xlu1 %4190 }
 0xab3   : > { %v4395_v5 = vsel %vm4392_vm15, %v4394_v17, %v4390_v37  ;;  %v12057_v0 = vpop.xlane.xlu2 %4187  ;;  %8002 = vrcp.f32 %v12051_v9  ;;  %vm4355_vm9 = vweird.f32 %v12051_v9  ;;  %v4361_v17 = vand.u32 2147483648, %v12051_v9 }
 0xab4   : > { %v4396_v63 = vmul.f32 %v11630_v40, %v4395_v5  ;;  %v4397_v62 = vmul.f32 %v11634_v20, %v4395_v5  ;;  %v15145_v40 = vld [vmem:[#allocation39_spill] sm:$0xff]  ;;  %v15146_v20 = vld [vmem:[#allocation40_spill] sm:$0xff]  ;;  %8004 = vrcp.f32 %v12057_v0  ;;  %vm4339_vm10 = vweird.f32 %v12057_v0 }
 0xab5   : > { %4884 = vrot.lane.b32.xlu0 %v15141_v31, %s8336_s19 }
 0xab6   : > { %4790 = vmatpush.xpose.msra.mxu0 %v4396_v63  ;;  %4810 = vmatpush.xpose.msra.mxu1 %v4397_v62  ;;  %v4359_v62 = vand.u32 2147483647, %v12051_v9 }
 0xab8   : > { %4910 = vrot.lane.b32.xlu1 %v15142_v23, %s8336_s19  ;;  %vm4360_vm3 = vcmp.eq.f32.partialorder %v4359_v62, 8.507059e+37 }
 0xab9   : > { %4912 = vrot.lane.b32.xlu2 %v15143_v53, %s8336_s19  ;;  %v12075_v39 = vpop.eup %8002 }
 0xaba   : > { %v12068_v21 = vpop.xlane.xlu1 %4241  ;;  %v12079_v49 = vpop.eup %8004  ;;  %v4351_v35 = vmul.f32 %v12075_v39, %v12051_v9  ;;  %vm4356_vm1 = vweird.f32 %v12075_v39 }
 0xabb   : > { %v12053_v43 = vpop.xlane.xlu0 %4268  ;;  %v12071_v7 = vpop.xlane.xlu2 %4238  ;;  %v4335_v56 = vmul.f32 %v12079_v49, %v12057_v0  ;;  %vm12110_vm12 = vmor %vm4355_vm9, %vm4356_vm1  ;;  %vm4340_vm0 = vweird.f32 %v12079_v49 }
 0xabc   : > { %v4352_v41 = vsub.f32 1.0, %v4351_v35  ;;  %vm4341_vm6 = vmor %vm4339_vm10, %vm4340_vm0 }
 0xabd   : > { %4890 = vrot.lane.b32.xlu0 %v15144_v13, %s8336_s19  ;;  %v4336_v8 = vsub.f32 1.0, %v4335_v56 }
 0xabe   : > { %v4353_v3 = vmul.f32 %v12075_v39, %v4352_v41 }
 0xabf   : > { %v4337_v60 = vmul.f32 %v12079_v49, %v4336_v8 }
 0xac0   : > { %4916 = vrot.lane.b32.xlu1 %v15145_v40, %s8336_s19  ;;  %v4354_v37 = vadd.f32 %v12075_v39, %v4353_v3 }
 0xac1   : > { %4918 = vrot.lane.b32.xlu2 %v15146_v20, %s8336_s19  ;;  %v4338_v40 = vadd.f32 %v12079_v49, %v4337_v60  ;;  %v15154_v20 = vld [vmem:[#allocation38_spill] sm:$0xff] }
 0xac2   : > { %v12087_v12 = vpop.xlane.xlu1 %4181  ;;  %v4358_v9 = vsel %vm12110_vm12, %v12075_v39, %v4354_v37 }
 0xac3   : > { %v12064_v11 = vpop.xlane.xlu0 %4253  ;;  %v12089_v2 = vpop.xlane.xlu2 %4178  ;;  %vm4307_vm1 = vweird.f32 %v12087_v12 }
 0xac4   : > { %vm4291_vm10 = vweird.f32 %v12089_v2 }
 0xac5   : > { %4896 = vrot.lane.b32.xlu0 %v15147_v4, %s8336_s19 }
 0xac8   : > { %4922 = vrot.lane.b32.xlu1 %v15148_v59, %s8336_s19 }
 0xac9   : > { %4924 = vrot.lane.b32.xlu2 %v15149_v57, %s8336_s19  ;;  %v4345_v57 = vand.u32 2147483648, %v12057_v0 }
 0xacb   : > { %v4194_v25 = vpop.xlane.xlu0 %4193 }
 0xacc   : > { %8006 = vrcp.f32 %v4194_v25  ;;  %v4377_v29 = vand.u32 2147483648, %v4194_v25  ;;  %v4375_v36 = vand.u32 2147483647, %v4194_v25  ;;  %vm4371_vm11 = vweird.f32 %v4194_v25 }
 0xacd   : > { %4902 = vrot.lane.b32.xlu0 %v15150_v10, %s8336_s19  ;;  %8008 = vrcp.f32 %v12087_v12 }
 0xace   : > { %8010 = vrcp.f32 %v12089_v2  ;;  %v4378_v53 = vor.u32 1.1754944e-38, %v4377_v29  ;;  %vm4376_vm2 = vcmp.eq.f32.partialorder %v4375_v36, 8.507059e+37 }
 0xacf   : > { %8012 = vrcp.f32 %v12013_v52 }
 0xad0   : > { %8014 = vrcp.f32 %v12023_v15 }
 0xad2   : > { %v8007_v16 = vpop.eup %8006 }
 0xad3   : > { %v12092_v14 = vpop.xlane.xlu0 %4244  ;;  %v4367_v26 = vmul.f32 %v8007_v16, %v4194_v25  ;;  %v12101_v42 = vpop.eup %8008  ;;  %vm4372_vm5 = vweird.f32 %v8007_v16  ;;  %v4362_v25 = vor.u32 1.1754944e-38, %v4361_v17  ;;  %v15155_v17 = vld [vmem:[#allocation41_spill] sm:$0xff] }
 0xad4   : > { %v12107_v31 = vpop.eup %8010  ;;  %v4303_v23 = vmul.f32 %v12101_v42, %v12087_v12  ;;  %vm4373_vm14 = vmor %vm4371_vm11, %vm4372_vm5  ;;  %vm4308_vm4 = vweird.f32 %v12101_v42 }
 0xad5   : > { %4908 = vrot.lane.b32.xlu0 %v15151_v34, %s8336_s19  ;;  %v4368_v54 = vsub.f32 1.0, %v4367_v26  ;;  %v12128_v59 = vpop.eup %8012  ;;  %v4287_v35 = vmul.f32 %v12107_v31, %v12089_v2  ;;  %v4363_v3 = vsel %vm4360_vm3, %v4362_v25, %v4358_v9  ;;  %vm12178_vm9 = vmor %vm4307_vm1, %vm4308_vm4  ;;  %vm4292_vm12 = vweird.f32 %v12107_v31 }
 0xad6   : > { %v12136_v8 = vpop.eup %8014  ;;  %v4304_v39 = vsub.f32 1.0, %v4303_v23  ;;  %v4365_v60 = vmul.f32 %v11688_v27, %v4363_v3  ;;  %v4775_v25 = vand.u32 2147483647, %v12053_v43 }
 0xad7   : > { %v4369_v32 = vmul.f32 %v8007_v16, %v4368_v54  ;;  %v4288_v26 = vsub.f32 1.0, %v4287_v35  ;;  %v4364_v54 = vmul.f32 %v11686_v22, %v4363_v3  ;;  %v4311_v35 = vand.u32 2147483647, %v12087_v12 }
 0xad8   : > { %v4305_v29 = vmul.f32 %v12101_v42, %v4304_v39 }
 0xad9   : > { %v4370_v5 = vadd.f32 %v8007_v16, %v4369_v32  ;;  %v4289_v22 = vmul.f32 %v12107_v31, %v4288_v26  ;;  %vm4312_vm0 = vcmp.eq.f32.partialorder %v4311_v35, 8.507059e+37 }
 0xadb   : > { %v12117_v13 = vpop.xlane.xlu0 %4184  ;;  %v4374_v4 = vsel %vm4373_vm14, %v8007_v16, %v4370_v5  ;;  %v4343_v16 = vand.u32 2147483647, %v12057_v0 }
 0xadc   : > { %8016 = vrcp.f32 %v12117_v13  ;;  %v4379_v10 = vsel %vm4376_vm2, %v4378_v53, %v4374_v4  ;;  %v4329_v63 = vand.u32 2147483648, %v12117_v13  ;;  %v4719_v4 = vmul.f32 %v12136_v8, %v12023_v15  ;;  %vm12204_vm2 = vmor %vm4291_vm10, %vm4292_vm12 }
 0xadd   : > { %4914 = vrot.lane.b32.xlu0 %v15154_v20, %s8336_s19  ;;  %v4380_v56 = vmul.f32 %v11766_v24, %v4379_v10  ;;  %v4381_v41 = vmul.f32 %v11772_v47, %v4379_v10  ;;  %8018 = vrcp.f32 %v12053_v43  ;;  %v4342_v24 = vsel %vm4341_vm6, %v12079_v49, %v4338_v40 }
 0xade   : > { %8020 = vrcp.f32 %v12041_v19  ;;  %v4346_v47 = vor.u32 1.1754944e-38, %v4345_v57  ;;  %vm4344_vm13 = vcmp.eq.f32.partialorder %v4343_v16, 8.507059e+37  ;;  %v12155_v49 = vmul.f32 %v12128_v59, %v12013_v52 }
 0xadf   : > { %4791 = vmatpush.xpose.msra.mxu0 %v4380_v56  ;;  %4811 = vmatpush.xpose.msra.mxu1 %v4381_v41  ;;  %8022 = vrcp.f32 %v12029_v51  ;;  %v4327_v40 = vand.u32 2147483647, %v12117_v13  ;;  %v4306_v20 = vadd.f32 %v12101_v42, %v4305_v29  ;;  %vm4323_vm5 = vweird.f32 %v12117_v13 }
 0xae0   : > { %v4347_v36 = vsel %vm4344_vm13, %v4346_v47, %v4342_v24  ;;  %v4297_v10 = vand.u32 2147483648, %v12089_v2  ;;  %v4330_v56 = vor.u32 1.1754944e-38, %v4329_v63  ;;  %v4704_v29 = vsub.f32 1.0, %v12155_v49 }
 0xae1   : > { %v4348_v62 = vmul.f32 %v11682_v46, %v4347_v36  ;;  %v4349_v23 = vmul.f32 %v11692_v44, %v4347_v36  ;;  %v4313_v46 = vand.u32 2147483648, %v12087_v12  ;;  %vm4328_vm14 = vcmp.eq.f32.partialorder %v4327_v40, 8.507059e+37 }
 0xae2   : > { %v8017_v34 = vpop.eup %8016  ;;  %v4310_v39 = vsel %vm12178_vm9, %v12101_v42, %v4306_v20  ;;  %v4290_v12 = vadd.f32 %v12107_v31, %v4289_v22  ;;  %vm4771_vm13 = vweird.f32 %v12053_v43  ;;  %vm4776_vm10 = vcmp.eq.f32.partialorder %v4775_v25, 8.507059e+37  ;;  %v12341_v42 = vpop.xlane.xlu1 %4232 }
 0xae3   : > { %v4319_v32 = vmul.f32 %v8017_v34, %v12117_v13  ;;  %v12149_v0 = vpop.xlane.xlu0 %4235  ;;  %4792 = vmatpush.xpose.msra.mxu0 %v4364_v54  ;;  %4812 = vmatpush.xpose.msra.mxu1 %v4365_v60  ;;  %v12151_v37 = vpop.eup %8018  ;;  %vm4324_vm15 = vweird.f32 %v8017_v34  ;;  %v4314_v24 = vor.u32 1.1754944e-38, %v4313_v46  ;;  %v4295_v60 = vand.u32 2147483647, %v12089_v2 }
 0xae4   : > { %v12161_v5 = vpop.eup %8020  ;;  %v4767_v9 = vmul.f32 %v12151_v37, %v12053_v43  ;;  %vm4325_vm11 = vmor %vm4323_vm5, %vm4324_vm15  ;;  %v4298_v2 = vor.u32 1.1754944e-38, %v4297_v10  ;;  %vm4772_vm6 = vweird.f32 %v12151_v37  ;;  %vm4755_vm5 = vweird.f32 %v12041_v19 }
 0xae5   : > { %v4320_v27 = vsub.f32 1.0, %v4319_v32  ;;  %4920 = vrot.lane.b32.xlu0 %v15155_v17, %s8336_s19  ;;  %v4751_v44 = vmul.f32 %v12161_v5, %v12041_v19  ;;  %v12187_v41 = vpop.eup %8022  ;;  %v4720_v32 = vsub.f32 1.0, %v4719_v4  ;;  %vm4296_vm3 = vcmp.eq.f32.partialorder %v4295_v60, 8.507059e+37  ;;  %vm12244_vm4 = vmor %vm4771_vm13, %vm4772_vm6  ;;  %s7094_s19 = sshll.u32 %s431_s14, 6 }
 0xae6   : > { %v4768_v3 = vsub.f32 1.0, %v4767_v9  ;;  %v4777_v4 = vand.u32 2147483648, %v12053_v43  ;;  %vm4756_vm1 = vweird.f32 %v12161_v5  ;;  %vm4724_vm13 = vweird.f32 %v12136_v8  ;;  %s14288_s22 = scalar_lea.vmem [#allocation2], %s7094_s19 }
 0xae7   : > { %v4321_v53 = vmul.f32 %v8017_v34, %v4320_v27  ;;  %4793 = vmatpush.xpose.msra.mxu0 %v4348_v62  ;;  %4813 = vmatpush.xpose.msra.mxu1 %v4349_v23  ;;  %v4752_v36 = vsub.f32 1.0, %v4751_v44  ;;  %v12219_v62 = vmul.f32 %v12128_v59, %v4704_v29  ;;  %v12225_v23 = vpop.xlane.xlu2 %4229  ;;  %s7025_s16 = sshll.u32 %s14288_s22, 4  ;;  %s7026_s16 = int_to_ptr.vmem [resolvable:$true] %s7025_s16 }
 0xae8   : > { %v4769_v22 = vmul.f32 %v12151_v37, %v4768_v3 }
 0xae9   : > { %v4322_v57 = vadd.f32 %v8017_v34, %v4321_v53  ;;  %v4753_v40 = vmul.f32 %v12161_v5, %v4752_v36 }
 0xaea   : > { %v4770_v20 = vadd.f32 %v12151_v37, %v4769_v22  ;;  %v4745_v22 = vand.u32 2147483648, %v12029_v51 }
 0xaeb   : > { %v4326_v13 = vsel %vm4325_vm11, %v8017_v34, %v4322_v57  ;;  %v4315_v34 = vsel %vm4312_vm0, %v4314_v24, %v4310_v39  ;;  %v4761_v57 = vand.u32 2147483648, %v12041_v19  ;;  %v4754_v39 = vadd.f32 %v12161_v5, %v4753_v40 }
 0xaec   : > { %v12189_v16 = vpop.xlane.xlu0 %4175  ;;  %v4331_v47 = vsel %vm4328_vm14, %v4330_v56, %v4326_v13  ;;  %v4316_v27 = vmul.f32 %v11746_v33, %v4315_v34  ;;  %v4317_v17 = vmul.f32 %v11748_v58, %v4315_v34  ;;  %v4774_v43 = vsel %vm12244_vm4, %v12151_v37, %v4770_v20  ;;  %vm12265_vm14 = vmor %vm4755_vm5, %vm4756_vm1 }
 0xaed   : > { %8024 = vrcp.f32 %v12189_v16  ;;  %v4332_v26 = vmul.f32 %v11821_v55, %v4331_v47  ;;  %v4333_v54 = vmul.f32 %v11826_v18, %v4331_v47  ;;  %v4294_v55 = vsel %vm12204_vm2, %v12107_v31, %v4290_v12 }
 0xaee   : > { %8026 = vrcp.f32 %v12037_v48  ;;  %v4735_v18 = vmul.f32 %v12187_v41, %v12029_v51  ;;  %v4299_v63 = vsel %vm4296_vm3, %v4298_v2, %v4294_v55  ;;  %v12222_v31 = vmul.f32 %v12136_v8, %v4720_v32 }
 0xaef   : > { %4794 = vmatpush.xpose.msra.mxu0 %v4332_v26  ;;  %4814 = vmatpush.xpose.msra.mxu1 %v4333_v54  ;;  %8028 = vrcp.f32 %v12039_v28  ;;  %v4300_v46 = vmul.f32 %v11758_v61, %v4299_v63  ;;  %v4301_v44 = vmul.f32 %v11764_v38, %v4299_v63  ;;  %v4281_v35 = vand.u32 2147483648, %v12189_v16  ;;  %v681_v55 = vpop.permute.xlu2 %680  ;;  %v15167_v63 = vld [vmem:[#allocation66_spill] sm:$0xff] }
 0xaf0   : > { %8030 = vrcp.f32 %v12064_v11  ;;  %v4736_v58 = vsub.f32 1.0, %v4735_v18  ;;  %v4279_v61 = vand.u32 2147483647, %v12189_v16  ;;  %v4778_v24 = vor.u32 1.1754944e-38, %v4777_v4 }
 0xaf1   : > { %vm4275_vm9 = vweird.f32 %v12189_v16  ;;  %v4762_v26 = vor.u32 1.1754944e-38, %v4761_v57  ;;  %v4282_v54 = vor.u32 1.1754944e-38, %v4281_v35  ;;  %v4759_v37 = vand.u32 2147483647, %v12041_v19 }
 0xaf2   : > { %v4737_v12 = vmul.f32 %v12187_v41, %v4736_v58  ;;  %vm4280_vm12 = vcmp.eq.f32.partialorder %v4279_v61, 8.507059e+37  ;;  %v4779_v34 = vsel %vm4776_vm10, %v4778_v24, %v4774_v43  ;;  %vm4740_vm0 = vweird.f32 %v12187_v41  ;;  %v15173_v24 = vld [vmem:[#allocation75_spill] sm:$0xff] }
 0xaf3   : > { %v8025_v49 = vpop.eup %8024  ;;  %4795 = vmatpush.xpose.msra.mxu0 %v4316_v27  ;;  %4815 = vmatpush.xpose.msra.mxu1 %v4317_v17  ;;  %v4758_v32 = vsel %vm12265_vm14, %v12161_v5, %v4754_v39  ;;  %vm4739_vm2 = vweird.f32 %v12029_v51  ;;  %v4780_v2 = vmul.f32 %v11732_v1, %v4779_v34  ;;  %v15164_v27 = vld [vmem:[#allocation86_spill] sm:$0xff]  ;;  %vm4760_vm3 = vcmp.eq.f32.partialorder %v4759_v37, 8.507059e+37 }
 0xaf4   : > { %v4271_v53 = vmul.f32 %v8025_v49, %v12189_v16  ;;  %v12228_v33 = vpop.eup %8026  ;;  %vm4276_vm15 = vweird.f32 %v8025_v49  ;;  %v4738_v19 = vadd.f32 %v12187_v41, %v4737_v12  ;;  %v4781_v17 = vmul.f32 %v15164_v27, %v4779_v34  ;;  %vm12286_vm6 = vmor %vm4739_vm2, %vm4740_vm0 }
 0xaf5   : > { %v12242_v10 = vmul.f32 %v12228_v33, %v12037_v48  ;;  %v12249_v38 = vpop.eup %8028  ;;  %vm4277_vm11 = vmor %vm4275_vm9, %vm4276_vm15  ;;  %8032 = vrcp.f32 %v12092_v14  ;;  %v4763_v5 = vsel %vm4760_vm3, %v4762_v26, %v4758_v32  ;;  %vm4723_vm4 = vweird.f32 %v12023_v15  ;;  %v15174_v26 = vld [vmem:[#allocation53_spill] sm:$0xff] }
 0xaf6   : > { %v4272_v9 = vsub.f32 1.0, %v4271_v53  ;;  %v12257_v3 = vpop.eup %8030  ;;  %v12294_v53 = vadd.f32 %v15167_v63, %v681_v55  ;;  %v4742_v40 = vsel %vm12286_vm6, %v12187_v41, %v4738_v19  ;;  %v4729_v20 = vand.u32 2147483648, %v12023_v15  ;;  %vm12315_vm1 = vmor %vm4723_vm4, %vm4724_vm13 }
 0xaf7   : > { %4796 = vmatpush.xpose.msra.mxu0 %v4300_v46  ;;  %4816 = vmatpush.xpose.msra.mxu1 %v4301_v44  ;;  %v4687_v16 = vmul.f32 %v12257_v3, %v12064_v11  ;;  %v4727_v4 = vand.u32 2147483647, %v12023_v15  ;;  %8034 = vrcp.f32 %v12068_v21  ;;  %v15170_v44 = vld [vmem:[#allocation85_spill] sm:$0xff]  ;;  %v4655_v41 = vmul.f32 %v12249_v38, %v12039_v28 }
 0xaf8   : > { %v4273_v13 = vmul.f32 %v8025_v49, %v4272_v9  ;;  %v15169_v9 = vld [vmem:[#allocation54_spill] sm:$0xff]  ;;  %v4765_v57 = vmul.f32 %v15170_v44, %v4763_v5  ;;  %v4672_v25 = vsub.f32 1.0, %v12242_v10  ;;  %v4706_v61 = vadd.f32 %v12128_v59, %v12219_v62  ;;  %v15197_v44 = vld [vmem:[#allocation81_spill] sm:$0xff] }
 0xaf9   : > { %v4688_v1 = vsub.f32 1.0, %v4687_v16  ;;  %v4764_v46 = vmul.f32 %v15169_v9, %v4763_v5  ;;  %vm4708_vm5 = vweird.f32 %v12128_v59  ;;  %vm4707_vm9 = vweird.f32 %v12013_v52 }
 0xafa   : > { %v4274_v47 = vadd.f32 %v8025_v49, %v4273_v13  ;;  %v4713_v43 = vand.u32 2147483648, %v12013_v52  ;;  %v4730_v39 = vor.u32 1.1754944e-38, %v4729_v20  ;;  %v4711_v12 = vand.u32 2147483647, %v12013_v52  ;;  %v15182_v20 = vld [vmem:[#allocation68_spill] sm:$0xff] }
 0xafb   : > { %v4689_v56 = vmul.f32 %v12257_v3, %v4688_v1  ;;  %v12326_v10 = vpop.eup %8032  ;;  %8036 = vrcp.f32 %v12071_v7  ;;  %vm4728_vm10 = vcmp.eq.f32.partialorder %v4727_v4, 8.507059e+37  ;;  %v4673_v62 = vmul.f32 %v12228_v33, %v4672_v25 }
 0xafc   : > { %v4278_v60 = vsel %vm4277_vm11, %v8025_v49, %v4274_v47  ;;  %v4743_v49 = vand.u32 2147483647, %v12029_v51  ;;  %v15168_v51 = vld [vmem:[#allocation52_spill] sm:$0xff]  ;;  %vm12335_vm11 = vmor %vm4707_vm9, %vm4708_vm5  ;;  %v4639_v52 = vmul.f32 %v12326_v10, %v12092_v14  ;;  %v4714_v32 = vor.u32 1.1754944e-38, %v4713_v43  ;;  %v15186_v43 = vld [vmem:[#allocation58_spill] sm:$0xff] }
 0xafd   : > { %v4283_v29 = vsel %vm4280_vm12, %v4282_v54, %v4278_v60  ;;  %v12297_v58 = vadd.f32 %v15168_v51, %v681_v55  ;;  %v4656_v54 = vsub.f32 1.0, %v4655_v41  ;;  %v12339_v34 = vpop.eup %8034  ;;  %v4710_v16 = vsel %vm12335_vm11, %v12128_v59, %v4706_v61  ;;  %v15177_v55 = vld [vmem:[#allocation45_spill] sm:$0xff]  ;;  %v15181_v51 = vld [vmem:[#allocation67_spill] sm:$0xff] }
 0xafe   : > { %v4284_v18 = vmul.f32 %v11880_v6, %v4283_v29  ;;  %v4285_v36 = vmul.f32 %v11897_v30, %v4283_v29  ;;  %v4722_v30 = vadd.f32 %v12136_v8, %v12222_v31  ;;  %v4746_v31 = vor.u32 1.1754944e-38, %v4745_v22 }
 0xaff   : > { %vm4744_vm15 = vcmp.eq.f32.partialorder %v4743_v49, 8.507059e+37  ;;  %v4690_v29 = vadd.f32 %v12257_v3, %v4689_v56  ;;  %vm4692_vm12 = vweird.f32 %v12257_v3  ;;  %v4697_v19 = vand.u32 2147483648, %v12064_v11  ;;  %v12393_v56 = vpop.xlane.xlu1 %4226 }
 0xb00   : > { %4797 = vmatpush.xpose.msra.mxu0 %v4284_v18  ;;  %4817 = vmatpush.xpose.msra.mxu1 %v4285_v36  ;;  %v4747_v35 = vsel %vm4744_vm15, %v4746_v31, %v4742_v40  ;;  %v4726_v13 = vsel %vm12315_vm1, %v12136_v8, %v4722_v30  ;;  %vm4712_vm14 = vcmp.eq.f32.partialorder %v4711_v12, 8.507059e+37  ;;  %vm4691_vm0 = vweird.f32 %v12064_v11  ;;  %v15178_v36 = vld [vmem:[#allocation64_spill] sm:$0xff] }
 0xb01   : > { %v4748_v47 = vmul.f32 %v15173_v24, %v4747_v35  ;;  %v4749_v8 = vmul.f32 %v15174_v26, %v4747_v35  ;;  %v4731_v37 = vsel %vm4728_vm10, %v4730_v39, %v4726_v13  ;;  %v4657_v27 = vmul.f32 %v12249_v38, %v4656_v54  ;;  %vm12359_vm2 = vmor %vm4691_vm0, %vm4692_vm12  ;;  %v12363_v5 = vpop.eup %8036  ;;  %v15185_v13 = vld [vmem:[#allocation57_spill] sm:$0xff] }
 0xb02   : > { %v4732_v18 = vmul.f32 %v15177_v55, %v4731_v37  ;;  %v4733_v22 = vmul.f32 %v15178_v36, %v4731_v37  ;;  %v4623_v59 = vmul.f32 %v12339_v34, %v12068_v21  ;;  %8038 = vrcp.f32 %v12149_v0 }
 0xb03   : > { %4798 = vmatmul.f32.vlgmr.msra.gmra.mxu0 %v12294_v53  ;;  %4818 = vmatmul.f32.vlgmr.msra.gmra.mxu1 %v12297_v58  ;;  %v4640_v6 = vsub.f32 1.0, %v4639_v52  ;;  %v4674_v30 = vadd.f32 %v12228_v33, %v4673_v62  ;;  %vm4676_vm3 = vweird.f32 %v12228_v33  ;;  %vm4675_vm6 = vweird.f32 %v12037_v48  ;;  %v15189_v52 = vld [vmem:[#allocation65_spill] sm:$0xff] }
 0xb04   : > { %4822 = vmatpush.xpose.msrb.mxu0 %v4780_v2  ;;  %4842 = vmatpush.xpose.msrb.mxu1 %v4781_v17  ;;  %v4695_v2 = vand.u32 2147483647, %v12064_v11  ;;  %v4715_v17 = vsel %vm4712_vm14, %v4714_v32, %v4710_v16  ;;  %v4694_v11 = vsel %vm12359_vm2, %v12257_v3, %v4690_v29  ;;  %v4681_v1 = vand.u32 2147483648, %v12037_v48  ;;  %vm12378_vm4 = vmor %vm4675_vm6, %vm4676_vm3  ;;  %v15190_v29 = vld [vmem:[#allocation74_spill] sm:$0xff] }
 0xb05   : > { %v4698_v63 = vor.u32 1.1754944e-38, %v4697_v19  ;;  %8040 = vrcp.f32 %v12341_v42  ;;  %v4716_v40 = vmul.f32 %v15181_v51, %v4715_v17  ;;  %v4717_v31 = vmul.f32 %v15182_v20, %v4715_v17 }
 0xb06   : > { %vm4696_vm13 = vcmp.eq.f32.partialorder %v4695_v2, 8.507059e+37  ;;  %v4679_v4 = vand.u32 2147483647, %v12037_v48  ;;  %v4607_v3 = vmul.f32 %v12363_v5, %v12071_v7  ;;  %v4624_v9 = vsub.f32 1.0, %v4623_v59 }
 0xb07   : > { %v4678_v41 = vsel %vm12378_vm4, %v12228_v33, %v4674_v30  ;;  %v4658_v25 = vadd.f32 %v12249_v38, %v4657_v27  ;;  %vm4660_vm15 = vweird.f32 %v12249_v38  ;;  %vm4659_vm1 = vweird.f32 %v12039_v28  ;;  %v12429_v27 = vpop.xlane.xlu0 %4223  ;;  %v15194_v30 = vld [vmem:[#allocation71_spill] sm:$0xff] }
 0xb08   : > { %4823 = vmatpush.xpose.msrb.mxu0 %v4764_v46  ;;  %4843 = vmatpush.xpose.msrb.mxu1 %v4765_v57  ;;  %v4699_v46 = vsel %vm4696_vm13, %v4698_v63, %v4694_v11  ;;  %v4641_v57 = vmul.f32 %v12326_v10, %v4640_v6  ;;  %v12388_v48 = vpop.eup %8038  ;;  %v4665_v35 = vand.u32 2147483648, %v12039_v28  ;;  %v4682_v15 = vor.u32 1.1754944e-38, %v4681_v1  ;;  %vm12403_vm9 = vmor %vm4659_vm1, %vm4660_vm15  ;;  %v15193_v6 = vld [vmem:[#allocation70_spill] sm:$0xff] }
 0xb09   : > { %8042 = vrcp.f32 %v12225_v23  ;;  %v4700_v61 = vmul.f32 %v15185_v13, %v4699_v46  ;;  %v4701_v39 = vmul.f32 %v15186_v43, %v4699_v46  ;;  %vm4680_vm5 = vcmp.eq.f32.partialorder %v4679_v4, 8.507059e+37 }
 0xb0a   : > { %v4663_v33 = vand.u32 2147483647, %v12039_v28  ;;  %v4608_v24 = vsub.f32 1.0, %v4607_v3  ;;  %v4683_v26 = vsel %vm4680_vm5, %v4682_v15, %v4678_v41  ;;  %v4591_v54 = vmul.f32 %v12388_v48, %v12149_v0  ;;  %v15198_v41 = vld [vmem:[#allocation47_spill] sm:$0xff] }
 0xb0b   : > { %v12398_v12 = vpop.eup %8040  ;;  %v4662_v28 = vsel %vm12403_vm9, %v12249_v38, %v4658_v25  ;;  %v4642_v62 = vadd.f32 %v12326_v10, %v4641_v57  ;;  %vm4644_vm10 = vweird.f32 %v12326_v10  ;;  %v4666_v37 = vor.u32 1.1754944e-38, %v4665_v35 }
 0xb0c   : > { %4824 = vmatpush.xpose.msrb.mxu0 %v4748_v47  ;;  %4844 = vmatpush.xpose.msrb.mxu1 %v4749_v8  ;;  %v4625_v47 = vmul.f32 %v12339_v34, %v4624_v9  ;;  %vm4643_vm11 = vweird.f32 %v12092_v14  ;;  %v4649_v60 = vand.u32 2147483648, %v12092_v14  ;;  %8044 = vrcp.f32 %v12393_v56 }
 0xb0d   : > { %v4684_v16 = vmul.f32 %v15189_v52, %v4683_v26  ;;  %v4685_v32 = vmul.f32 %v15190_v29, %v4683_v26  ;;  %vm4664_vm12 = vcmp.eq.f32.partialorder %v4663_v33, 8.507059e+37  ;;  %v4647_v19 = vand.u32 2147483647, %v12092_v14  ;;  %vm12425_vm14 = vmor %vm4643_vm11, %vm4644_vm10  ;;  %v15201_v26 = vld [vmem:[#allocation46_spill] sm:$0xff] }
 0xb0e   : > { %v4609_v38 = vmul.f32 %v12363_v5, %v4608_v24  ;;  %v4667_v36 = vsel %vm4664_vm12, %v4666_v37, %v4662_v28  ;;  %v4592_v2 = vsub.f32 1.0, %v4591_v54  ;;  %v4646_v14 = vsel %vm12425_vm14, %v12326_v10, %v4642_v62  ;;  %v15202_v54 = vld [vmem:[#allocation87_spill] sm:$0xff] }
 0xb0f   : > { %v12420_v55 = vpop.eup %8042  ;;  %v4626_v59 = vadd.f32 %v12339_v34, %v4625_v47  ;;  %vm4628_vm0 = vweird.f32 %v12339_v34  ;;  %vm4627_vm2 = vweird.f32 %v12068_v21  ;;  %v4633_v17 = vand.u32 2147483648, %v12068_v21 }
 0xb10   : > { %4825 = vmatpush.xpose.msrb.mxu0 %v4732_v18  ;;  %4845 = vmatpush.xpose.msrb.mxu1 %v4733_v22  ;;  %v4575_v18 = vmul.f32 %v12398_v12, %v12341_v42  ;;  %v4650_v49 = vor.u32 1.1754944e-38, %v4649_v60  ;;  %v4668_v11 = vmul.f32 %v15193_v6, %v4667_v36  ;;  %v4669_v1 = vmul.f32 %v15194_v30, %v4667_v36  ;;  %vm12446_vm6 = vmor %vm4627_vm2, %vm4628_vm0  ;;  %v15206_v36 = vld [vmem:[#allocation84_spill] sm:$0xff]  ;;  %v15207_v30 = vld [vmem:[#allocation79_spill] sm:$0xff] }
 0xb11   : > { %vm4648_vm3 = vcmp.eq.f32.partialorder %v4647_v19, 8.507059e+37  ;;  %v4631_v63 = vand.u32 2147483647, %v12068_v21  ;;  %v4559_v10 = vmul.f32 %v12420_v55, %v12225_v23  ;;  %8046 = vrcp.f32 %v12429_v27 }
 0xb12   : > { %v12441_v51 = vpop.eup %8044  ;;  %v4651_v20 = vsel %vm4648_vm3, %v4650_v49, %v4646_v14  ;;  %v4593_v4 = vmul.f32 %v12388_v48, %v4592_v2  ;;  %v4630_v21 = vsel %vm12446_vm6, %v12339_v34, %v4626_v59  ;;  %v4610_v3 = vadd.f32 %v12363_v5, %v4609_v38  ;;  %v15205_v38 = vld [vmem:[#allocation77_spill] sm:$0xff] }
 0xb13   : > { %vm4612_vm13 = vweird.f32 %v12363_v5  ;;  %vm4611_vm4 = vweird.f32 %v12071_v7  ;;  %v4617_v9 = vand.u32 2147483648, %v12071_v7  ;;  %v4634_v46 = vor.u32 1.1754944e-38, %v4633_v17 }
 0xb14   : > { %4826 = vmatpush.xpose.msrb.mxu0 %v4716_v40  ;;  %4846 = vmatpush.xpose.msrb.mxu1 %v4717_v31  ;;  %v4576_v40 = vsub.f32 1.0, %v4575_v18  ;;  %v4652_v57 = vmul.f32 %v15197_v44, %v4651_v20  ;;  %v4653_v25 = vmul.f32 %v15198_v41, %v4651_v20  ;;  %vm4632_vm15 = vcmp.eq.f32.partialorder %v4631_v63, 8.507059e+37  ;;  %vm12463_vm1 = vmor %vm4611_vm4, %vm4612_vm13 }
 0xb15   : > { %v4615_v35 = vand.u32 2147483647, %v12071_v7  ;;  %v4560_v15 = vsub.f32 1.0, %v4559_v10  ;;  %v4543_v34 = vmul.f32 %v12441_v51, %v12393_v56  ;;  %v4635_v13 = vsel %vm4632_vm15, %v4634_v46, %v4630_v21 }
 0xb16   : > { %v4577_v43 = vmul.f32 %v12398_v12, %v4576_v40  ;;  %v4594_v33 = vadd.f32 %v12388_v48, %v4593_v4  ;;  %vm4596_vm5 = vweird.f32 %v12388_v48  ;;  %v4618_v24 = vor.u32 1.1754944e-38, %v4617_v9 }
 0xb17   : > { %v12473_v7 = vpop.eup %8046  ;;  %vm4595_vm9 = vweird.f32 %v12149_v0  ;;  %v4601_v47 = vand.u32 2147483648, %v12149_v0  ;;  %v4636_v8 = vmul.f32 %v15201_v26, %v4635_v13  ;;  %v4637_v28 = vmul.f32 %v15202_v54, %v4635_v13  ;;  %v15212_v13 = vld [vmem:[#allocation88_spill] sm:$0xff]  ;;  %v666_v54 = vpop.permute.xlu1 %665 }
 0xb18   : > { %4827 = vmatpush.xpose.msrb.mxu0 %v4700_v61  ;;  %4847 = vmatpush.xpose.msrb.mxu1 %v4701_v39  ;;  %v4614_v39 = vsel %vm12463_vm1, %v12363_v5, %v4610_v3  ;;  %vm4616_vm10 = vcmp.eq.f32.partialorder %v4615_v35, 8.507059e+37  ;;  %v4599_v62 = vand.u32 2147483647, %v12149_v0  ;;  %v4561_v5 = vmul.f32 %v12420_v55, %v4560_v15  ;;  %vm12481_vm11 = vmor %vm4595_vm9, %vm4596_vm5  ;;  %v15209_v3 = vld [vmem:[#allocation89_spill] sm:$0xff]  ;;  %v15211_v15 = vld [vmem:[#allocation48_spill] sm:$0xff] }
 0xb19   : > { %v4544_v37 = vsub.f32 1.0, %v4543_v34  ;;  %v4619_v60 = vsel %vm4616_vm10, %v4618_v24, %v4614_v39  ;;  %v4598_v29 = vsel %vm12481_vm11, %v12388_v48, %v4594_v33  ;;  %vm4580_vm12 = vweird.f32 %v12398_v12  ;;  %v15213_v33 = vld [vmem:[#allocation49_spill] sm:$0xff] }
 0xb1a   : > { %vm4579_vm14 = vweird.f32 %v12341_v42  ;;  %v4585_v0 = vand.u32 2147483648, %v12341_v42  ;;  %v4602_v19 = vor.u32 1.1754944e-38, %v4601_v47  ;;  %v4620_v18 = vmul.f32 %v15205_v38, %v4619_v60  ;;  %v15214_v47 = vld [vmem:[#allocation31_spill] sm:$0xff] }
 0xb1b   : > { %v4621_v22 = vmul.f32 %v15206_v36, %v4619_v60  ;;  %vm4600_vm0 = vcmp.eq.f32.partialorder %v4599_v62, 8.507059e+37  ;;  %v4583_v2 = vand.u32 2147483647, %v12341_v42  ;;  %v4545_v14 = vmul.f32 %v12441_v51, %v4544_v37  ;;  %vm4581_vm2 = vmor %vm4579_vm14, %vm4580_vm12  ;;  %v15215_v62 = vld [vmem:[#allocation55_spill] sm:$0xff]  ;;  %v15216_v37 = vld [vmem:[#allocation56_spill] sm:$0xff] }
 0xb1c   : > { %4828 = vmatpush.xpose.msrb.mxu0 %v4684_v16  ;;  %4848 = vmatpush.xpose.msrb.mxu1 %v4685_v32  ;;  %v4527_v16 = vmul.f32 %v12473_v7, %v12429_v27  ;;  %v4578_v32 = vadd.f32 %v12398_v12, %v4577_v43  ;;  %v4603_v59 = vsel %vm4600_vm0, %v4602_v19, %v4598_v29  ;;  %vm4564_vm3 = vweird.f32 %v12420_v55 }
 0xb1d   : > { %v4562_v49 = vadd.f32 %v12420_v55, %v4561_v5  ;;  %vm4563_vm6 = vweird.f32 %v12225_v23  ;;  %v4569_v6 = vand.u32 2147483648, %v12225_v23  ;;  %v4604_v42 = vmul.f32 %v15207_v30, %v4603_v59 }
 0xb1e   : > { %v4528_v48 = vsub.f32 1.0, %v4527_v16  ;;  %v4582_v17 = vsel %vm4581_vm2, %v12398_v12, %v4578_v32  ;;  %vm4584_vm13 = vcmp.eq.f32.partialorder %v4583_v2, 8.507059e+37  ;;  %v4567_v10 = vand.u32 2147483647, %v12225_v23  ;;  %vm4565_vm4 = vmor %vm4563_vm6, %vm4564_vm3  ;;  %v15210_v23 = vld [vmem:[#allocation82_spill] sm:$0xff] }
 0xb1f   : > { %v4566_v20 = vsel %vm4565_vm4, %v12420_v55, %v4562_v49  ;;  %v4546_v31 = vadd.f32 %v12441_v51, %v4545_v14  ;;  %vm4548_vm15 = vweird.f32 %v12441_v51  ;;  %v4570_v4 = vor.u32 1.1754944e-38, %v4569_v6  ;;  %v4869_v52 = vpop.permute.xlu1 %4868 }
 0xb20   : > { %4829 = vmatpush.xpose.msrb.mxu0 %v4668_v11  ;;  %4849 = vmatpush.xpose.msrb.mxu1 %v4669_v1  ;;  %v4586_v11 = vor.u32 1.1754944e-38, %v4585_v0  ;;  %v15208_v1 = vld [vmem:[#allocation83_spill] sm:$0xff]  ;;  %v4529_v12 = vmul.f32 %v12473_v7, %v4528_v48  ;;  %vm4547_vm1 = vweird.f32 %v12393_v56  ;;  %v4553_v21 = vand.u32 2147483648, %v12393_v56 }
 0xb21   : > { %v4605_v63 = vmul.f32 %v15208_v1, %v4603_v59  ;;  %vm4568_vm5 = vcmp.eq.f32.partialorder %v4567_v10, 8.507059e+37  ;;  %v4551_v44 = vand.u32 2147483647, %v12393_v56  ;;  %vm4549_vm9 = vmor %vm4547_vm1, %vm4548_vm15  ;;  %vm4532_vm10 = vweird.f32 %v12473_v7 }
 0xb22   : > { %v4587_v40 = vsel %vm4584_vm13, %v4586_v11, %v4582_v17  ;;  %v4550_v55 = vsel %vm4549_vm9, %v12441_v51, %v4546_v31  ;;  %v4530_v41 = vadd.f32 %v12473_v7, %v4529_v12  ;;  %vm4531_vm11 = vweird.f32 %v12429_v27 }
 0xb23   : > { %v4588_v9 = vmul.f32 %v15209_v3, %v4587_v40  ;;  %v4589_v46 = vmul.f32 %v15210_v23, %v4587_v40  ;;  %v4537_v35 = vand.u32 2147483648, %v12429_v27  ;;  %vm4552_vm12 = vcmp.eq.f32.partialorder %v4551_v44, 8.507059e+37  ;;  %vm4533_vm14 = vmor %vm4531_vm11, %vm4532_vm10 }
 0xb24   : > { %4830 = vmatpush.xpose.msrb.mxu0 %v4652_v57  ;;  %4850 = vmatpush.xpose.msrb.mxu1 %v4653_v25  ;;  %v4571_v57 = vsel %vm4568_vm5, %v4570_v4, %v4566_v20  ;;  %v4554_v25 = vor.u32 1.1754944e-38, %v4553_v21  ;;  %v4535_v56 = vand.u32 2147483647, %v12429_v27  ;;  %v4534_v51 = vsel %vm4533_vm14, %v12473_v7, %v4530_v41  ;;  %v4863_v7 = vpop.permute.xlu0 %4862 }
 0xb25   : > { %v4572_v34 = vmul.f32 %v15211_v15, %v4571_v57  ;;  %v4573_v61 = vmul.f32 %v15212_v13, %v4571_v57  ;;  %v4538_v39 = vor.u32 1.1754944e-38, %v4537_v35  ;;  %v764_v5 = vadd.f32 %v15215_v62, %v666_v54 }
 0xb26   : > { %v4555_v43 = vsel %vm4552_vm12, %v4554_v25, %v4550_v55  ;;  %vm4536_vm0 = vcmp.eq.f32.partialorder %v4535_v56, 8.507059e+37  ;;  %v817_v60 = vadd.f32 %v15216_v37, %v666_v54 }
 0xb27   : > { %v4556_v24 = vmul.f32 %v15213_v33, %v4555_v43  ;;  %v4557_v26 = vmul.f32 %v15214_v47, %v4555_v43  ;;  %v4875_v16 = vpop.permute.xlu1 %4874 }
 0xb28   : > { %4831 = vmatpush.xpose.msrb.mxu0 %v4636_v8  ;;  %4851 = vmatpush.xpose.msrb.mxu1 %v4637_v28  ;;  %v4539_v8 = vsel %vm4536_vm0, %v4538_v39, %v4534_v51 }
 0xb29   : > { %v4540_v28 = vmul.f32 %v11937_v45, %v4539_v8  ;;  %v4541_v27 = vmul.f32 %v11945_v50, %v4539_v8  ;;  %v4865_v45 = vpop.permute.xlu2 %4864 }
 0xb2c   : > { %4832 = vmatpush.xpose.msrb.mxu0 %v4620_v18  ;;  %4852 = vmatpush.xpose.msrb.mxu1 %v4621_v22  ;;  %v4867_v50 = vpop.permute.xlu0 %4866 }
 0xb2f   : > { %v4881_v0 = vpop.permute.xlu1 %4880 }
 0xb30   : > { %4833 = vmatpush.xpose.msrb.mxu0 %v4604_v42  ;;  %4853 = vmatpush.xpose.msrb.mxu1 %v4605_v63 }
 0xb34   : > { %4834 = vmatpush.xpose.msrb.mxu0 %v4588_v9  ;;  %4854 = vmatpush.xpose.msrb.mxu1 %v4589_v46 }
 0xb37   : > { %v4887_v18 = vpop.permute.xlu1 %4886 }
 0xb38   : > { %4835 = vmatpush.xpose.msrb.mxu0 %v4572_v34  ;;  %4855 = vmatpush.xpose.msrb.mxu1 %v4573_v61 }
 0xb3c   : > { %4836 = vmatpush.xpose.msrb.mxu0 %v4556_v24  ;;  %4856 = vmatpush.xpose.msrb.mxu1 %v4557_v26 }
 0xb3f   : > { %v4893_v17 = vpop.permute.xlu1 %4892 }
 0xb40   : > { %4837 = vmatpush.xpose.msrb.mxu0 %v4540_v28  ;;  %4857 = vmatpush.xpose.msrb.mxu1 %v4541_v27 }
 0xb43   : > { %4838 = vmatmul.f32.vlgmr.msrb.gmra.mxu0 %v12294_v53  ;;  %4858 = vmatmul.f32.vlgmr.msrb.gmra.mxu1 %v12297_v58  ;;  %v4871_v53 = vpop.permute.xlu2 %4870  ;;  %v4873_v58 = vpop.permute.xlu0 %4872 }
 0xb44   : > { %5005 = vmatpush.msra.mxu0 %v764_v5  ;;  %5118 = vmatpush.msra.mxu1 %v817_v60 }
 0xb47   : > { %v4899_v40 = vpop.permute.xlu1 %4898 }
 0xb4b   : > { %7313 = vmatmul.msk.f32.vlgmr.msra.gmra.mxu0 %vm903_vm8, %v4863_v7  ;;  %7345 = vmatmul.msk.f32.vlgmr.msra.gmra.mxu1 %vm903_vm8, %v4863_v7  ;;  %v4877_v29 = vpop.permute.xlu2 %4876  ;;  %v4879_v32 = vpop.permute.xlu0 %4878 }
 0xb4f   : > { %v4905_v57 = vpop.permute.xlu1 %4904 }
 0xb53   : > { %7314 = vmatmul.msk.f32.gmra.mxu0 %vm903_vm8, %v4865_v45  ;;  %7346 = vmatmul.msk.f32.gmra.mxu1 %vm903_vm8, %v4865_v45  ;;  %v4883_v19 = vpop.permute.xlu2 %4882  ;;  %v4885_v38 = vpop.permute.xlu0 %4884 }
 0xb57   : > { %v4911_v39 = vpop.permute.xlu1 %4910 }
 0xb5b   : > { %7315 = vmatmul.msk.f32.gmra.mxu0 %vm903_vm8, %v4867_v50  ;;  %7347 = vmatmul.msk.f32.gmra.mxu1 %vm903_vm8, %v4867_v50  ;;  %v4889_v36 = vpop.permute.xlu2 %4888  ;;  %v4891_v14 = vpop.permute.xlu0 %4890 }
 0xb5f   : > { %v4917_v60 = vpop.permute.xlu1 %4916 }
 0xb63   : > { %7316 = vmatmul.msk.f32.gmra.mxu0 %vm903_vm8, %v4869_v52  ;;  %7348 = vmatmul.msk.f32.gmra.mxu1 %vm903_vm8, %v4869_v52  ;;  %v4895_v11 = vpop.permute.xlu2 %4894  ;;  %v4897_v1 = vpop.permute.xlu0 %4896 }
 0xb6b   : > { %7317 = vmatmul.msk.f32.gmra.mxu0 %vm903_vm8, %v4871_v53  ;;  %7349 = vmatmul.msk.f32.gmra.mxu1 %vm903_vm8, %v4871_v53  ;;  %v4901_v31 = vpop.permute.xlu2 %4900  ;;  %v4903_v9 = vpop.permute.xlu0 %4902 }
 0xb73   : > { %7318 = vmatmul.msk.f32.gmra.mxu0 %vm903_vm8, %v4873_v58  ;;  %7350 = vmatmul.msk.f32.gmra.mxu1 %vm903_vm8, %v4873_v58  ;;  %v4907_v35 = vpop.permute.xlu2 %4906  ;;  %v4909_v61 = vpop.permute.xlu0 %4908 }
 0xb7b   : > { %7319 = vmatmul.msk.f32.gmra.mxu0 %vm903_vm8, %v4875_v16  ;;  %7351 = vmatmul.msk.f32.gmra.mxu1 %vm903_vm8, %v4875_v16  ;;  %v4913_v26 = vpop.permute.xlu2 %4912  ;;  %v4915_v27 = vpop.permute.xlu0 %4914 }
 0xb80   : > { %v12560_v22 = vpop.f32.mrf.mxu0  ;;  %v12562_v2 = vpop.f32.mrf.mxu1 }
 0xb81   : > { %15217 = vst [vmem:[#allocation80_spill] sm:$0xff] %v12560_v22 }
 0xb82   : > { %15218 = vst [vmem:[#allocation11_spill] sm:$0xff] %v12562_v2 }
 0xb83   : > { %7320 = vmatmul.msk.f32.gmra.mxu0 %vm903_vm8, %v4877_v29  ;;  %7352 = vmatmul.msk.f32.gmra.mxu1 %vm903_vm8, %v4877_v29  ;;  %v4919_v52 = vpop.permute.xlu2 %4918  ;;  %v4921_v29 = vpop.permute.xlu0 %4920 }
 0xb8b   : > { %7321 = vmatmul.msk.f32.gmra.mxu0 %vm903_vm8, %v4879_v32  ;;  %7353 = vmatmul.msk.f32.gmra.mxu1 %vm903_vm8, %v4879_v32 }
 0xb93   : > { %7322 = vmatmul.msk.f32.gmra.mxu0 %vm903_vm8, %v4881_v0  ;;  %7354 = vmatmul.msk.f32.gmra.mxu1 %vm903_vm8, %v4881_v0 }
 0xb9b   : > { %7323 = vmatmul.msk.f32.gmra.mxu0 %vm903_vm8, %v4883_v19  ;;  %7355 = vmatmul.msk.f32.gmra.mxu1 %vm903_vm8, %v4883_v19 }
 0xba3   : > { %7324 = vmatmul.msk.f32.gmra.mxu0 %vm903_vm8, %v4885_v38  ;;  %7356 = vmatmul.msk.f32.gmra.mxu1 %vm903_vm8, %v4885_v38  ;;  %v4923_v38 = vpop.permute.xlu1 %4922 }
 0xbab   : > { %7325 = vmatmul.msk.f32.gmra.mxu0 %vm903_vm8, %v4887_v18  ;;  %7357 = vmatmul.msk.f32.gmra.mxu1 %vm903_vm8, %v4887_v18 }
 0xbb3   : > { %7326 = vmatmul.msk.f32.gmra.mxu0 %vm903_vm8, %v4889_v36  ;;  %7358 = vmatmul.msk.f32.gmra.mxu1 %vm903_vm8, %v4889_v36 }
 0xbbb   : > { %7327 = vmatmul.msk.f32.gmra.mxu0 %vm903_vm8, %v4891_v14  ;;  %7359 = vmatmul.msk.f32.gmra.mxu1 %vm903_vm8, %v4891_v14 }
 0xbc0   : > { %v12566_v59 = vpop.f32.mrf.mxu0  ;;  %v12568_v48 = vpop.f32.mrf.mxu1 }
 0xbc1   : > { %15219 = vst [vmem:[#allocation13_spill] sm:$0xff] %v12566_v59 }
 0xbc2   : > { %15220 = vst [vmem:[#allocation14_spill] sm:$0xff] %v12568_v48 }
 0xbc3   : > { %7328 = vmatmul.msk.f32.gmra.mxu0 %vm903_vm8, %v4893_v17  ;;  %7360 = vmatmul.msk.f32.gmra.mxu1 %vm903_vm8, %v4893_v17  ;;  %v4925_v17 = vpop.permute.xlu2 %4924 }
 0xbc8   : > { %v12572_v49 = vpop.f32.mrf.mxu0  ;;  %v12574_v6 = vpop.f32.mrf.mxu1 }
 0xbcb   : > { %7329 = vmatmul.msk.f32.gmra.mxu0 %vm903_vm8, %v4895_v11  ;;  %7361 = vmatmul.msk.f32.gmra.mxu1 %vm903_vm8, %v4895_v11 }
 0xbd0   : > { %v12578_v30 = vpop.f32.mrf.mxu0  ;;  %v12580_v42 = vpop.f32.mrf.mxu1 }
 0xbd3   : > { %7330 = vmatmul.msk.f32.gmra.mxu0 %vm903_vm8, %v4897_v1  ;;  %7362 = vmatmul.msk.f32.gmra.mxu1 %vm903_vm8, %v4897_v1 }
 0xbd8   : > { %v12584_v63 = vpop.f32.mrf.mxu0  ;;  %v12586_v10 = vpop.f32.mrf.mxu1 }
 0xbdb   : > { %7331 = vmatmul.msk.f32.gmra.mxu0 %vm903_vm8, %v4899_v40  ;;  %7363 = vmatmul.msk.f32.gmra.mxu1 %vm903_vm8, %v4899_v40 }
 0xbe0   : > { %v12590_v12 = vpop.f32.mrf.mxu0  ;;  %v12592_v20 = vpop.f32.mrf.mxu1 }
 0xbe1   : > { %15221 = vst [vmem:[#allocation16_spill] sm:$0xff] %v12592_v20 }
 0xbe3   : > { %7332 = vmatmul.msk.f32.gmra.mxu0 %vm903_vm8, %v4901_v31  ;;  %7364 = vmatmul.msk.f32.gmra.mxu1 %vm903_vm8, %v4901_v31 }
 0xbe8   : > { %v12596_v4 = vpop.f32.mrf.mxu0  ;;  %v12598_v21 = vpop.f32.mrf.mxu1 }
 0xbe9   : > { %v5228_v3 = vmax.f32 %v12596_v4, %v12598_v21 }
 0xbeb   : > { %5229 = vmax.xlane.f32.xlu2 %v5228_v3  ;;  %7333 = vmatmul.msk.f32.gmra.mxu0 %vm903_vm8, %v4903_v9 }
 0xbec   : > { %7365 = vmatmul.msk.f32.gmra.mxu1 %vm903_vm8, %v4903_v9 }
 0xbf0   : > { %v12604_v23 = vpop.f32.mrf.mxu0  ;;  %v12606_v46 = vpop.f32.mrf.mxu1 }
 0xbf1   : > { %15222 = vst [vmem:[#allocation50_spill] sm:$0xff] %v12604_v23  ;;  %v5231_v44 = vmax.f32 %v12604_v23, %v12606_v46 }
 0xbf2   : > { %15223 = vst [vmem:[#allocation17_spill] sm:$0xff] %v12606_v46 }
 0xbf3   : > { %5232 = vmax.xlane.f32.xlu0 %v5231_v44  ;;  %7334 = vmatmul.msk.f32.gmra.mxu0 %vm903_vm8, %v4905_v57 }
 0xbf4   : > { %7366 = vmatmul.msk.f32.gmra.mxu1 %vm903_vm8, %v4905_v57 }
 0xbf8   : > { %v12612_v55 = vpop.f32.mrf.mxu0  ;;  %v12614_v41 = vpop.f32.mrf.mxu1 }
 0xbf9   : > { %15224 = vst [vmem:[#allocation69_spill] sm:$0xff] %v12612_v55  ;;  %v5234_v25 = vmax.f32 %v12612_v55, %v12614_v41 }
 0xbfa   : > { %15225 = vst [vmem:[#allocation76_spill] sm:$0xff] %v12614_v41 }
 0xbfb   : > { %5235 = vmax.xlane.f32.xlu1 %v5234_v25  ;;  %7335 = vmatmul.msk.f32.gmra.mxu0 %vm903_vm8, %v4907_v35 }
 0xbfc   : > { %7367 = vmatmul.msk.f32.gmra.mxu1 %vm903_vm8, %v4907_v35 }
 0xc00   : > { %v12620_v15 = vpop.f32.mrf.mxu0  ;;  %v12622_v34 = vpop.f32.mrf.mxu1 }
 0xc01   : > { %v5237_v13 = vmax.f32 %v12620_v15, %v12622_v34 }
 0xc03   : > { %5238 = vmax.xlane.f32.xlu2 %v5237_v13  ;;  %7336 = vmatmul.msk.f32.gmra.mxu0 %vm903_vm8, %v4909_v61 }
 0xc04   : > { %7368 = vmatmul.msk.f32.gmra.mxu1 %vm903_vm8, %v4909_v61 }
 0xc08   : > { %v12628_v56 = vpop.f32.mrf.mxu0  ;;  %v12630_v43 = vpop.f32.mrf.mxu1 }
 0xc09   : > { %v5240_v51 = vmax.f32 %v12628_v56, %v12630_v43 }
 0xc0b   : > { %5241 = vmax.xlane.f32.xlu0 %v5240_v51  ;;  %7337 = vmatmul.msk.f32.gmra.mxu0 %vm903_vm8, %v4911_v39 }
 0xc0c   : > { %7369 = vmatmul.msk.f32.gmra.mxu1 %vm903_vm8, %v4911_v39 }
 0xc10   : > { %v12636_v33 = vpop.f32.mrf.mxu0  ;;  %v12638_v24 = vpop.f32.mrf.mxu1 }
 0xc11   : > { %15226 = vst [vmem:[#allocation51_spill] sm:$0xff] %v12636_v33  ;;  %v5243_v47 = vmax.f32 %v12636_v33, %v12638_v24  ;;  %v5225_v33 = vmax.f32 %v12590_v12, %v12592_v20 }
 0xc12   : > { %15227 = vst [vmem:[#allocation19_spill] sm:$0xff] %v12638_v24 }
 0xc13   : > { %5244 = vmax.xlane.f32.xlu1 %v5243_v47  ;;  %7338 = vmatmul.msk.f32.gmra.mxu0 %vm903_vm8, %v4913_v26 }
 0xc14   : > { %7370 = vmatmul.msk.f32.gmra.mxu1 %vm903_vm8, %v4913_v26 }
 0xc18   : > { %v12644_v8 = vpop.f32.mrf.mxu0  ;;  %v12646_v54 = vpop.f32.mrf.mxu1 }
 0xc19   : > { %v5246_v28 = vmax.f32 %v12644_v8, %v12646_v54 }
 0xc1b   : > { %5247 = vmax.xlane.f32.xlu2 %v5246_v28  ;;  %7339 = vmatmul.msk.f32.gmra.mxu0 %vm903_vm8, %v4915_v27 }
 0xc1c   : > { %7371 = vmatmul.msk.f32.gmra.mxu1 %vm903_vm8, %v4915_v27 }
 0xc20   : > { %v12652_v62 = vpop.f32.mrf.mxu0  ;;  %v12654_v5 = vpop.f32.mrf.mxu1 }
 0xc21   : > { %v5249_v37 = vmax.f32 %v12652_v62, %v12654_v5 }
 0xc23   : > { %5250 = vmax.xlane.f32.xlu0 %v5249_v37  ;;  %7340 = vmatmul.msk.f32.gmra.mxu0 %vm903_vm8, %v4917_v60 }
 0xc24   : > { %7372 = vmatmul.msk.f32.gmra.mxu1 %vm903_vm8, %v4917_v60 }
 0xc28   : > { %v12660_v7 = vpop.f32.mrf.mxu0  ;;  %v12662_v45 = vpop.f32.mrf.mxu1 }
 0xc29   : > { %v5252_v50 = vmax.f32 %v12660_v7, %v12662_v45 }
 0xc2b   : > { %5253 = vmax.xlane.f32.xlu1 %v5252_v50  ;;  %7341 = vmatmul.msk.f32.gmra.mxu0 %vm903_vm8, %v4919_v52 }
 0xc2c   : > { %7373 = vmatmul.msk.f32.gmra.mxu1 %vm903_vm8, %v4919_v52 }
 0xc30   : > { %v12668_v53 = vpop.f32.mrf.mxu0  ;;  %v12670_v58 = vpop.f32.mrf.mxu1 }
 0xc31   : > { %v5255_v16 = vmax.f32 %v12668_v53, %v12670_v58 }
 0xc33   : > { %5256 = vmax.xlane.f32.xlu2 %v5255_v16  ;;  %7342 = vmatmul.msk.f32.gmra.mxu0 %vm903_vm8, %v4921_v29 }
 0xc34   : > { %7374 = vmatmul.msk.f32.gmra.mxu1 %vm903_vm8, %v4921_v29 }
 0xc38   : > { %v12676_v32 = vpop.f32.mrf.mxu0  ;;  %v12678_v0 = vpop.f32.mrf.mxu1 }
 0xc39   : > { %v5258_v19 = vmax.f32 %v12676_v32, %v12678_v0 }
 0xc3b   : > { %5259 = vmax.xlane.f32.xlu1 %v5258_v19  ;;  %7343 = vmatmul.msk.f32.gmra.mxu0 %vm903_vm8, %v4923_v38 }
 0xc3c   : > { %7375 = vmatmul.msk.f32.gmra.mxu1 %vm903_vm8, %v4923_v38 }
 0xc40   : > { %v12684_v18 = vpop.f32.mrf.mxu0  ;;  %v12686_v36 = vpop.f32.mrf.mxu1 }
 0xc41   : > { %v5261_v14 = vmax.f32 %v12684_v18, %v12686_v36 }
 0xc43   : > { %5262 = vmax.xlane.f32.xlu0 %v5261_v14  ;;  %7344 = vmatmul.msk.f32.gmra.mxu0 %vm903_vm8, %v4925_v17 }
 0xc44   : > { %7376 = vmatmul.msk.f32.gmra.mxu1 %vm903_vm8, %v4925_v17 }
 0xc48   : > { %v12692_v11 = vpop.f32.mrf.mxu0  ;;  %v12694_v1 = vpop.f32.mrf.mxu1 }
 0xc50   : > { %v12696_v40 = vpop.f32.mrf.mxu0  ;;  %v12698_v31 = vpop.f32.mrf.mxu1 }
 0xc58   : > { %v12700_v3 = vpop.f32.mrf.mxu0  ;;  %v12702_v9 = vpop.f32.mrf.mxu1 }
 0xc5e   : > { %v12752_v48 = vpop.xlane.xlu2 %5229 }
 0xc60   : > { %v12704_v44 = vpop.f32.mrf.mxu0  ;;  %v12706_v57 = vpop.f32.mrf.mxu1 }
 0xc68   : > { %v12708_v25 = vpop.f32.mrf.mxu0 }
 0xc69   : > { %v12710_v35 = vpop.f32.mrf.mxu1 }
 0xc6a   : > { %15228 = vst [vmem:[#allocation60_spill] sm:$0xff] %v12710_v35  ;;  %v5276_v20 = vmax.f32 %v12708_v25, %v12710_v35  ;;  %v5273_v35 = vmax.f32 %v12704_v44, %v12706_v57 }
 0xc6e   : > { %v12744_v14 = vpop.xlane.xlu1 %5235 }
 0xc6f   : > { %15235 = vst [vmem:[#allocation22_spill] sm:$0xff] %v12744_v14 }
 0xc70   : > { %v12712_v13 = vpop.f32.mrf.mxu0 }
 0xc71   : > { %v12714_v61 = vpop.f32.mrf.mxu1 }
 0xc76   : > { %v12762_v22 = vpop.xlane.xlu2 %5238 }
 0xc78   : > { %v12716_v51 = vpop.f32.mrf.mxu0 }
 0xc79   : > { %v12718_v39 = vpop.f32.mrf.mxu1 }
 0xc80   : > { %v12720_v47 = vpop.f32.mrf.mxu0 }
 0xc81   : > { %15229 = vst [vmem:[#allocation20_spill] sm:$0xff] %v12720_v47  ;;  %v12722_v26 = vpop.f32.mrf.mxu1 }
 0xc82   : > { %15230 = vst [vmem:[#allocation10_spill] sm:$0xff] %v12722_v26  ;;  %v5285_v28 = vmax.f32 %v12720_v47, %v12722_v26 }
 0xc84   : > { %5286 = vmax.xlane.f32.xlu1 %v5285_v28 }
 0xc88   : > { %v12726_v27 = vpop.f32.mrf.mxu0 }
 0xc89   : > { %v12728_v37 = vpop.f32.mrf.mxu1 }
 0xc8a   : > { %v5288_v60 = vmax.f32 %v12726_v27, %v12728_v37 }
 0xc8c   : > { %5289 = vmax.xlane.f32.xlu2 %v5288_v60 }
 0xc8e   : > { %v12770_v55 = vpop.xlane.xlu2 %5247 }
 0xc90   : > { %v12732_v50 = vpop.f32.mrf.mxu0 }
 0xc91   : > { %15231 = vst [vmem:[#allocation23_spill] sm:$0xff] %v12732_v50  ;;  %v12734_v52 = vpop.f32.mrf.mxu1 }
 0xc92   : > { %15232 = vst [vmem:[#allocation24_spill] sm:$0xff] %v12734_v52  ;;  %v5291_v16 = vmax.f32 %v12732_v50, %v12734_v52 }
 0xc94   : > { %5292 = vmax.xlane.f32.xlu0 %v5291_v16  ;;  %v12754_v16 = vpop.xlane.xlu1 %5244 }
 0xc95   : > { %15236 = vst [vmem:[#allocation15_spill] sm:$0xff] %v12754_v16 }
 0xc98   : > { %v12738_v29 = vpop.f32.mrf.mxu0 }
 0xc99   : > { %15233 = vst [vmem:[#allocation12_spill] sm:$0xff] %v12738_v29  ;;  %v12740_v19 = vpop.f32.mrf.mxu1 }
 0xc9a   : > { %15234 = vst [vmem:[#allocation28_spill] sm:$0xff] %v12740_v19  ;;  %v5294_v38 = vmax.f32 %v12738_v29, %v12740_v19 }
 0xc9c   : > { %5295 = vmax.xlane.f32.xlu1 %v5294_v38 }
 0xc9e   : > { %v5254_v26 = vpop.xlane.xlu1 %5253 }
 0xca0   : > { %v12746_v17 = vpop.f32.mrf.mxu0 }
 0xca1   : > { %v12748_v28 = vpop.f32.mrf.mxu1 }
 0xca2   : > { %v5297_v60 = vmax.f32 %v12746_v17, %v12748_v28 }
 0xca4   : > { %5298 = vmax.xlane.f32.xlu2 %v5297_v60 }
 0xca6   : > { %v5257_v23 = vpop.xlane.xlu2 %5256 }
 0xca8   : > { %v12756_v59 = vpop.f32.mrf.mxu0 }
 0xca9   : > { %v12758_v2 = vpop.f32.mrf.mxu1 }
 0xcaa   : > { %v5300_v38 = vmax.f32 %v12756_v59, %v12758_v2 }
 0xcac   : > { %5301 = vmax.xlane.f32.xlu0 %v5300_v38 }
 0xcae   : > { %v5260_v14 = vpop.xlane.xlu1 %5259 }
 0xcaf   : > { %v5340_v19 = vsub.f32 %v12676_v32, %v5260_v14  ;;  %v5341_v38 = vsub.f32 %v12678_v0, %v5260_v14  ;;  %v5338_v32 = vsub.f32 %v12668_v53, %v5257_v23  ;;  %v5339_v0 = vsub.f32 %v12670_v58, %v5257_v23 }
 0xcb0   : > { %v12764_v47 = vpop.f32.mrf.mxu0 }
 0xcb1   : > { %v12766_v41 = vpop.f32.mrf.mxu1  ;;  %v5432_v46 = vmul.f32 1.442695, %v5340_v19  ;;  %v5434_v52 = vmul.f32 1.442695, %v5341_v38  ;;  %v5430_v53 = vmul.f32 1.442695, %v5339_v0  ;;  %v5337_v38 = vsub.f32 %v12662_v45, %v5254_v26 }
 0xcb2   : > { %v5303_v60 = vmax.f32 %v12764_v47, %v12766_v41 }
 0xcb3   : > { %8048 = vpow2.f32 %v5432_v46 }
 0xcb4   : > { %5304 = vmax.xlane.f32.xlu1 %v5303_v60  ;;  %v12782_v60 = vpop.xlane.xlu0 %5232  ;;  %8050 = vpow2.f32 %v5434_v52  ;;  %v5336_v52 = vsub.f32 %v12660_v7, %v5254_v26 }
 0xcb6   : > { %v5424_v0 = vmul.f32 1.442695, %v5336_v52  ;;  %v5222_v52 = vmax.f32 %v12584_v63, %v12586_v10 }
 0xcb8   : > { %v12773_v29 = vpop.f32.mrf.mxu0 }
 0xcb9   : > { %v12776_v24 = vpop.f32.mrf.mxu1  ;;  %v12798_v23 = vpop.eup %8048 }
 0xcba   : > { %v5306_v16 = vmax.f32 %v12773_v29, %v12776_v24  ;;  %v12800_v58 = vpop.eup %8050 }
 0xcbc   : > { %5226 = vmax.xlane.f32.xlu1 %v5225_v33  ;;  %5307 = vmax.xlane.f32.xlu2 %v5306_v16  ;;  %v5279_v33 = vmax.f32 %v12712_v13, %v12714_v61  ;;  %v5428_v16 = vmul.f32 1.442695, %v5338_v32  ;;  %v12796_v46 = vpop.xlane.xlu0 %5241  ;;  %v5282_v32 = vmax.f32 %v12716_v51, %v12718_v39 }
 0xcbe   : > { %8052 = vpow2.f32 %v5428_v16 }
 0xcbf   : > { %8054 = vpow2.f32 %v5430_v53  ;;  %v5270_v53 = vmax.f32 %v12700_v3, %v12702_v9 }
 0xcc0   : > { %v12785_v50 = vpop.f32.mrf.mxu0  ;;  %8056 = vpow2.f32 %v5424_v0 }
 0xcc1   : > { %v12788_v14 = vpop.f32.mrf.mxu1 }
 0xcc2   : > { %v5309_v19 = vmax.f32 %v12785_v50, %v12788_v14 }
 0xcc4   : > { %5277 = vmax.xlane.f32.xlu1 %v5276_v20  ;;  %5280 = vmax.xlane.f32.xlu2 %v5279_v33  ;;  %v5546_v20 = vadd.f32 %v12800_v58, %v12798_v23  ;;  %v5251_v33 = vpop.xlane.xlu0 %5250  ;;  %v12810_v7 = vpop.eup %8052 }
 0xcc5   : > { %5310 = vmax.xlane.f32.xlu0 %v5309_v19  ;;  %v5426_v19 = vmul.f32 1.442695, %v5337_v38  ;;  %v12812_v16 = vpop.eup %8054  ;;  %v5334_v45 = vsub.f32 %v12652_v62, %v5251_v33  ;;  %v5335_v26 = vsub.f32 %v12654_v5, %v5251_v33  ;;  %v5332_v5 = vsub.f32 %v12644_v8, %v12770_v55 }
 0xcc6   : > { %15237 = vst [vmem:[#allocation27_spill] sm:$0xff] %v12812_v16  ;;  %v12822_v62 = vpop.eup %8056  ;;  %v5333_v33 = vsub.f32 %v12646_v54, %v12770_v55  ;;  %v5219_v8 = vmax.f32 %v12578_v30, %v12580_v42 }
 0xcc7   : > { %8058 = vpow2.f32 %v5426_v19  ;;  %v5420_v38 = vmul.f32 1.442695, %v5334_v45 }
 0xcc9   : > { %8060 = vpow2.f32 %v5420_v38 }
 0xccc   : > { %5274 = vmax.xlane.f32.xlu1 %v5273_v35  ;;  %5547 = vadd.xlane.f32.xlu2 %v5546_v20  ;;  %v5543_v35 = vadd.f32 %v12812_v16, %v12810_v7  ;;  %v5422_v20 = vmul.f32 1.442695, %v5335_v26  ;;  %v5267_v26 = vmax.f32 %v12696_v40, %v12698_v31 }
 0xccd   : > { %5283 = vmax.xlane.f32.xlu0 %v5282_v32  ;;  %v5263_v32 = vpop.xlane.xlu0 %5262  ;;  %v12826_v0 = vpop.eup %8058 }
 0xcce   : > { %v5342_v19 = vsub.f32 %v12684_v18, %v5263_v32  ;;  %8062 = vpow2.f32 %v5422_v20  ;;  %v5343_v45 = vsub.f32 %v12686_v36, %v5263_v32  ;;  %v5264_v36 = vmax.f32 %v12692_v11, %v12694_v1 }
 0xccf   : > { %v12838_v54 = vpop.eup %8060  ;;  %v5216_v20 = vmax.f32 %v12572_v49, %v12574_v6 }
 0xcd0   : > { %v5436_v16 = vmul.f32 1.442695, %v5342_v19  ;;  %v5438_v55 = vmul.f32 1.442695, %v5343_v45 }
 0xcd4   : > { %5271 = vmax.xlane.f32.xlu1 %v5270_v53  ;;  %5544 = vadd.xlane.f32.xlu2 %v5543_v35  ;;  %v5416_v53 = vmul.f32 1.442695, %v5332_v5  ;;  %v5540_v35 = vadd.f32 %v12826_v0, %v12822_v62  ;;  %v12840_v18 = vpop.eup %8062 }
 0xcd5   : > { %5223 = vmax.xlane.f32.xlu0 %v5222_v52  ;;  %v5418_v52 = vmul.f32 1.442695, %v5333_v33  ;;  %15238 = vst [vmem:[#allocation29_spill] sm:$0xff] %v12840_v18  ;;  %v5537_v38 = vadd.f32 %v12840_v18, %v12838_v54 }
 0xcd6   : > { %8064 = vpow2.f32 %v5416_v53 }
 0xcd7   : > { %8066 = vpow2.f32 %v5418_v52 }
 0xcd8   : > { %8068 = vpow2.f32 %v5436_v16 }
 0xcd9   : > { %8070 = vpow2.f32 %v5438_v55 }
 0xcdc   : > { %5268 = vmax.xlane.f32.xlu1 %v5267_v26  ;;  %5541 = vadd.xlane.f32.xlu2 %v5540_v35  ;;  %v12848_v32 = vpop.eup %8064 }
 0xcdd   : > { %5220 = vmax.xlane.f32.xlu0 %v5219_v8  ;;  %15239 = vst [vmem:[#allocation18_spill] sm:$0xff] %v12848_v32  ;;  %v12850_v5 = vpop.eup %8066 }
 0xcde   : > { %15240 = vst [vmem:[#allocation33_spill] sm:$0xff] %v12850_v5  ;;  %v12852_v33 = vpop.eup %8068  ;;  %v5534_v19 = vadd.f32 %v12850_v5, %v12848_v32  ;;  %v5327_v5 = vsub.f32 %v12622_v34, %v12762_v22 }
 0xcdf   : > { %v12854_v16 = vpop.eup %8070 }
 0xce0   : > { %v5549_v45 = vadd.f32 %v12854_v16, %v12852_v33 }
 0xce4   : > { %5265 = vmax.xlane.f32.xlu1 %v5264_v36  ;;  %5538 = vadd.xlane.f32.xlu2 %v5537_v38  ;;  %v5326_v36 = vsub.f32 %v12620_v15, %v12762_v22  ;;  %v5329_v15 = vsub.f32 %v12630_v43, %v12796_v46 }
 0xce5   : > { %5217 = vmax.xlane.f32.xlu0 %v5216_v20 }
 0xcec   : > { %5535 = vadd.xlane.f32.xlu1 %v5534_v19  ;;  %5550 = vadd.xlane.f32.xlu2 %v5549_v45  ;;  %v5404_v19 = vmul.f32 1.442695, %v5326_v36  ;;  %v5406_v45 = vmul.f32 1.442695, %v5327_v5 }
 0xcf7   : > { %v12860_v53 = vpop.xlane.xlu1 %5286 }
 0xcff   : > { %v5290_v26 = vpop.xlane.xlu2 %5289 }
 0xd00   : > { %v5360_v22 = vsub.f32 %v12726_v27, %v5290_v26  ;;  %v5361_v36 = vsub.f32 %v12728_v37, %v5290_v26  ;;  %v5320_v27 = vsub.f32 %v12596_v4, %v12752_v48  ;;  %v15246_v4 = vld [vmem:[#allocation24_spill] sm:$0xff] }
 0xd02   : > { %v5472_v43 = vmul.f32 1.442695, %v5360_v22 }
 0xd07   : > { %v5293_v35 = vpop.xlane.xlu0 %5292 }
 0xd0f   : > { %v12868_v32 = vpop.xlane.xlu1 %5295 }
 0xd17   : > { %v5299_v8 = vpop.xlane.xlu2 %5298 }
 0xd18   : > { %v5366_v52 = vsub.f32 %v12746_v17, %v5299_v8  ;;  %v5367_v55 = vsub.f32 %v12748_v28, %v5299_v8  ;;  %v5328_v17 = vsub.f32 %v12628_v56, %v12796_v46  ;;  %v5474_v46 = vmul.f32 1.442695, %v5361_v36 }
 0xd1a   : > { %v5484_v38 = vmul.f32 1.442695, %v5366_v52  ;;  %v5486_v20 = vmul.f32 1.442695, %v5367_v55  ;;  %v5408_v56 = vmul.f32 1.442695, %v5328_v17 }
 0xd1b   : > { %v15244_v17 = vld [vmem:[#allocation23_spill] sm:$0xff] }
 0xd1c   : > { %8072 = vpow2.f32 %v5484_v38 }
 0xd1d   : > { %8074 = vpow2.f32 %v5486_v20 }
 0xd1e   : > { %8076 = vpow2.f32 %v5404_v19  ;;  %v5321_v19 = vsub.f32 %v12598_v21, %v12752_v48 }
 0xd1f   : > { %v5302_v18 = vpop.xlane.xlu0 %5301  ;;  %8078 = vpow2.f32 %v5406_v45 }
 0xd20   : > { %v5368_v28 = vsub.f32 %v12756_v59, %v5302_v18  ;;  %v5369_v8 = vsub.f32 %v12758_v2, %v5302_v18  ;;  %v5410_v59 = vmul.f32 1.442695, %v5329_v15  ;;  %v5394_v21 = vmul.f32 1.442695, %v5321_v19 }
 0xd22   : > { %v12876_v52 = vpop.eup %8072  ;;  %v5488_v34 = vmul.f32 1.442695, %v5368_v28  ;;  %v5490_v5 = vmul.f32 1.442695, %v5369_v8  ;;  %v5362_v28 = vsub.f32 %v15244_v17, %v5293_v35  ;;  %v15251_v17 = vld [vmem:[#allocation17_spill] sm:$0xff] }
 0xd23   : > { %15241 = vst [vmem:[#allocation34_spill] sm:$0xff] %v12876_v52  ;;  %v12879_v55 = vpop.eup %8074 }
 0xd24   : > { %15242 = vst [vmem:[#allocation21_spill] sm:$0xff] %v12879_v55  ;;  %8080 = vpow2.f32 %v5488_v34  ;;  %v5585_v2 = vadd.f32 %v12879_v55, %v12876_v52  ;;  %v12884_v38 = vpop.eup %8076  ;;  %v5392_v34 = vmul.f32 1.442695, %v5320_v27  ;;  %v5476_v36 = vmul.f32 1.442695, %v5362_v28 }
 0xd25   : > { %8082 = vpow2.f32 %v5490_v5  ;;  %v12890_v26 = vpop.eup %8078  ;;  %v5323_v28 = vsub.f32 %v15251_v17, %v12782_v60 }
 0xd26   : > { %5586 = vadd.xlane.f32.xlu1 %v5585_v2  ;;  %8084 = vpow2.f32 %v5408_v56 }
 0xd27   : > { %v5305_v18 = vpop.xlane.xlu1 %5304  ;;  %8086 = vpow2.f32 %v5410_v59 }
 0xd28   : > { %v5370_v20 = vsub.f32 %v12764_v47, %v5305_v18  ;;  %v5371_v37 = vsub.f32 %v12766_v41, %v5305_v18  ;;  %8088 = vpow2.f32 %v5472_v43  ;;  %v5363_v47 = vsub.f32 %v15246_v4, %v5293_v35 }
 0xd29   : > { %8090 = vpow2.f32 %v5474_v46  ;;  %v5525_v41 = vadd.f32 %v12890_v26, %v12884_v38 }
 0xd2a   : > { %v12894_v45 = vpop.eup %8080  ;;  %v5492_v8 = vmul.f32 1.442695, %v5370_v20  ;;  %v5494_v15 = vmul.f32 1.442695, %v5371_v37  ;;  %v5478_v2 = vmul.f32 1.442695, %v5363_v47 }
 0xd2b   : > { %15243 = vst [vmem:[#allocation36_spill] sm:$0xff] %v12894_v45  ;;  %v12897_v22 = vpop.eup %8082  ;;  %v15249_v20 = vld [vmem:[#allocation50_spill] sm:$0xff] }
 0xd2c   : > { %15245 = vst [vmem:[#allocation37_spill] sm:$0xff] %v12897_v22  ;;  %8092 = vpow2.f32 %v5492_v8  ;;  %v5588_v48 = vadd.f32 %v12897_v22, %v12894_v45  ;;  %v12904_v5 = vpop.eup %8084  ;;  %v5322_v37 = vsub.f32 %v15249_v20, %v12782_v60  ;;  %v5398_v60 = vmul.f32 1.442695, %v5323_v28 }
 0xd2d   : > { %8094 = vpow2.f32 %v5494_v15  ;;  %v12906_v56 = vpop.eup %8086 }
 0xd2e   : > { %5526 = vadd.xlane.f32.xlu1 %v5525_v41  ;;  %5589 = vadd.xlane.f32.xlu2 %v5588_v48  ;;  %v12910_v43 = vpop.eup %8088  ;;  %8096 = vpow2.f32 %v5392_v34  ;;  %v5396_v34 = vmul.f32 1.442695, %v5322_v37 }
 0xd2f   : > { %v5308_v59 = vpop.xlane.xlu2 %5307  ;;  %v12908_v35 = vpop.xlane.xlu1 %5226  ;;  %15247 = vst [vmem:[#allocation26_spill] sm:$0xff] %v12910_v43  ;;  %8098 = vpow2.f32 %v5394_v21 }
 0xd30   : > { %v5372_v46 = vsub.f32 %v12773_v29, %v5308_v59  ;;  %v5373_v18 = vsub.f32 %v12776_v24, %v5308_v59  ;;  %v12914_v27 = vpop.eup %8090  ;;  %8100 = vpow2.f32 %v5476_v36  ;;  %v5528_v29 = vadd.f32 %v12906_v56, %v12904_v5 }
 0xd31   : > { %15248 = vst [vmem:[#allocation39_spill] sm:$0xff] %v12914_v27  ;;  %8102 = vpow2.f32 %v5478_v2  ;;  %v5576_v24 = vadd.f32 %v12914_v27, %v12910_v43 }
 0xd32   : > { %v12918_v19 = vpop.eup %8092  ;;  %v5496_v8 = vmul.f32 1.442695, %v5372_v46  ;;  %v5498_v15 = vmul.f32 1.442695, %v5373_v18 }
 0xd33   : > { %15250 = vst [vmem:[#allocation40_spill] sm:$0xff] %v12918_v19  ;;  %v12922_v4 = vpop.eup %8094 }
 0xd34   : > { %15252 = vst [vmem:[#allocation25_spill] sm:$0xff] %v12922_v4  ;;  %8104 = vpow2.f32 %v5496_v8  ;;  %v5591_v47 = vadd.f32 %v12922_v4, %v12918_v19  ;;  %v12930_v41 = vpop.eup %8096 }
 0xd35   : > { %8106 = vpow2.f32 %v5498_v15  ;;  %v12932_v48 = vpop.eup %8098 }
 0xd36   : > { %5577 = vadd.xlane.f32.xlu1 %v5576_v24  ;;  %5529 = vadd.xlane.f32.xlu2 %v5528_v29  ;;  %v12936_v2 = vpop.eup %8100  ;;  %8108 = vpow2.f32 %v5396_v34  ;;  %v15257_v29 = vld [vmem:[#allocation15_spill] sm:$0xff] }
 0xd37   : > { %5592 = vadd.xlane.f32.xlu0 %v5591_v47  ;;  %v5281_v21 = vpop.xlane.xlu2 %5280  ;;  %v12934_v36 = vpop.xlane.xlu1 %5277  ;;  %15253 = vst [vmem:[#allocation42_spill] sm:$0xff] %v12936_v2  ;;  %8110 = vpow2.f32 %v5398_v60  ;;  %v15258_v47 = vld [vmem:[#allocation51_spill] sm:$0xff] }
 0xd38   : > { %v5354_v59 = vsub.f32 %v12712_v13, %v5281_v21  ;;  %v5355_v46 = vsub.f32 %v12714_v61, %v5281_v21  ;;  %v5311_v18 = vpop.xlane.xlu0 %5310  ;;  %v12940_v20 = vpop.eup %8102  ;;  %v5330_v13 = vsub.f32 %v15258_v47, %v15257_v29  ;;  %v5516_v21 = vadd.f32 %v12932_v48, %v12930_v41  ;;  %v15259_v34 = vld [vmem:[#allocation19_spill] sm:$0xff] }
 0xd39   : > { %15254 = vst [vmem:[#allocation43_spill] sm:$0xff] %v12940_v20  ;;  %v5374_v37 = vsub.f32 %v12785_v50, %v5311_v18  ;;  %v5375_v17 = vsub.f32 %v12788_v14, %v5311_v18  ;;  %v5331_v50 = vsub.f32 %v15259_v34, %v15257_v29  ;;  %v5579_v14 = vadd.f32 %v12940_v20, %v12936_v2  ;;  %v15266_v20 = vld [vmem:[#allocation69_spill] sm:$0xff] }
 0xd3a   : > { %v12944_v28 = vpop.eup %8104  ;;  %v5460_v8 = vmul.f32 1.442695, %v5354_v59  ;;  %v5462_v15 = vmul.f32 1.442695, %v5355_v46  ;;  %v5412_v46 = vmul.f32 1.442695, %v5330_v13 }
 0xd3b   : > { %15255 = vst [vmem:[#allocation32_spill] sm:$0xff] %v12944_v28  ;;  %v12946_v24 = vpop.eup %8106  ;;  %v5500_v27 = vmul.f32 1.442695, %v5374_v37  ;;  %v5502_v61 = vmul.f32 1.442695, %v5375_v17  ;;  %v15262_v13 = vld [vmem:[#allocation12_spill] sm:$0xff] }
 0xd3c   : > { %15256 = vst [vmem:[#allocation35_spill] sm:$0xff] %v12946_v24  ;;  %8112 = vpow2.f32 %v5460_v8  ;;  %v5594_v60 = vadd.f32 %v12946_v24, %v12944_v28  ;;  %v12958_v59 = vpop.eup %8108  ;;  %v5414_v8 = vmul.f32 1.442695, %v5331_v50  ;;  %v15263_v50 = vld [vmem:[#allocation28_spill] sm:$0xff] }
 0xd3d   : > { %8114 = vpow2.f32 %v5462_v15  ;;  %v12962_v17 = vpop.eup %8110  ;;  %v5365_v43 = vsub.f32 %v15263_v50, %v12868_v32  ;;  %v15267_v50 = vld [vmem:[#allocation76_spill] sm:$0xff] }
 0xd3e   : > { %8116 = vpow2.f32 %v5500_v27  ;;  %5517 = vadd.xlane.f32.xlu1 %v5516_v21  ;;  %5580 = vadd.xlane.f32.xlu2 %v5579_v14 }
 0xd3f   : > { %8118 = vpow2.f32 %v5502_v61  ;;  %5595 = vadd.xlane.f32.xlu0 %v5594_v60  ;;  %v12960_v18 = vpop.xlane.xlu2 %5547  ;;  %v5275_v37 = vpop.xlane.xlu1 %5274  ;;  %v5364_v61 = vsub.f32 %v15262_v13, %v12868_v32 }
 0xd40   : > { %v5284_v29 = vpop.xlane.xlu0 %5283  ;;  %8120 = vpow2.f32 %v5412_v46  ;;  %v15265_v46 = vld [vmem:[#allocation22_spill] sm:$0xff]  ;;  %vm5829_vm8 = vweird.f32 %v12960_v18  ;;  %v5833_v19 = vand.u32 2147483647, %v12960_v18 }
 0xd41   : > { %v5356_v47 = vsub.f32 %v12716_v51, %v5284_v29  ;;  %v5357_v34 = vsub.f32 %v12718_v39, %v5284_v29  ;;  %8122 = vpow2.f32 %v5414_v8  ;;  %v5519_v39 = vadd.f32 %v12962_v17, %v12958_v59 }
 0xd42   : > { %v12966_v15 = vpop.eup %8112  ;;  %v5324_v13 = vsub.f32 %v15266_v20, %v15265_v46  ;;  %v15268_v20 = vld [vmem:[#allocation20_spill] sm:$0xff]  ;;  %vm5834_vm9 = vcmp.eq.f32.partialorder %v5833_v19, 8.507059e+37 }
 0xd43   : > { %15260 = vst [vmem:[#allocation38_spill] sm:$0xff] %v12966_v15  ;;  %v12968_v27 = vpop.eup %8114  ;;  %v5464_v21 = vmul.f32 1.442695, %v5356_v47  ;;  %v5466_v14 = vmul.f32 1.442695, %v5357_v34 }
 0xd44   : > { %15261 = vst [vmem:[#allocation41_spill] sm:$0xff] %v12968_v27  ;;  %v12972_v60 = vpop.eup %8116  ;;  %v5567_v51 = vadd.f32 %v12968_v27, %v12966_v15  ;;  %v5480_v47 = vmul.f32 1.442695, %v5364_v61  ;;  %v5325_v27 = vsub.f32 %v15267_v50, %v15265_v46  ;;  %v5482_v15 = vmul.f32 1.442695, %v5365_v43 }
 0xd45   : > { %v12980_v29 = vpop.eup %8118  ;;  %8124 = vpow2.f32 %v5464_v21  ;;  %v5400_v61 = vmul.f32 1.442695, %v5324_v13  ;;  %v5350_v46 = vsub.f32 %v12704_v44, %v5275_v37 }
 0xd46   : > { %15264 = vst [vmem:[#allocation86_spill] sm:$0xff] %v12980_v29  ;;  %8126 = vpow2.f32 %v5466_v14  ;;  %5568 = vadd.xlane.f32.xlu1 %v5567_v51  ;;  %5520 = vadd.xlane.f32.xlu2 %v5519_v39  ;;  %v5597_v8 = vadd.f32 %v12980_v29, %v12972_v60  ;;  %v12990_v21 = vpop.eup %8120  ;;  %v5358_v14 = vsub.f32 %v15268_v20, %v12860_v53  ;;  %v5402_v22 = vmul.f32 1.442695, %v5325_v27 }
 0xd47   : > { %v12986_v32 = vpop.xlane.xlu2 %5544  ;;  %v5272_v34 = vpop.xlane.xlu1 %5271  ;;  %8128 = vpow2.f32 %v5480_v47  ;;  %v5351_v20 = vsub.f32 %v12706_v57, %v5275_v37 }
 0xd48   : > { %5598 = vadd.xlane.f32.xlu0 %v5597_v8  ;;  %v5224_v2 = vpop.xlane.xlu0 %5223  ;;  %v12996_v55 = vpop.eup %8122  ;;  %8130 = vpow2.f32 %v5482_v15  ;;  %v5468_v45 = vmul.f32 1.442695, %v5358_v14  ;;  %v5348_v15 = vsub.f32 %v12700_v3, %v5272_v34  ;;  %v5349_v47 = vsub.f32 %v12702_v9, %v5272_v34 }
 0xd49   : > { %v5316_v51 = vsub.f32 %v12584_v63, %v5224_v2  ;;  %v5317_v39 = vsub.f32 %v12586_v10, %v5224_v2  ;;  %v5531_v10 = vadd.f32 %v12996_v55, %v12990_v21  ;;  %v5452_v2 = vmul.f32 1.442695, %v5350_v46 }
 0xd4a   : > { %v5454_v27 = vmul.f32 1.442695, %v5351_v20  ;;  %vm5813_vm5 = vweird.f32 %v12986_v32 }
 0xd4b   : > { %v12998_v52 = vpop.eup %8124  ;;  %v5384_v43 = vmul.f32 1.442695, %v5316_v51  ;;  %v5386_v8 = vmul.f32 1.442695, %v5317_v39 }
 0xd4c   : > { %15269 = vst [vmem:[#allocation66_spill] sm:$0xff] %v12998_v52  ;;  %v13001_v50 = vpop.eup %8126 }
 0xd4d   : > { %15270 = vst [vmem:[#allocation52_spill] sm:$0xff] %v13001_v50  ;;  %8132 = vpow2.f32 %v5384_v43  ;;  %v5570_v63 = vadd.f32 %v13001_v50, %v12998_v52  ;;  %v13011_v37 = vpop.eup %8128 }
 0xd4e   : > { %8134 = vpow2.f32 %v5386_v8  ;;  %15271 = vst [vmem:[#allocation54_spill] sm:$0xff] %v13011_v37  ;;  %v13016_v39 = vpop.eup %8130  ;;  %v5450_v8 = vmul.f32 1.442695, %v5349_v47 }
 0xd4f   : > { %8136 = vpow2.f32 %v5400_v61  ;;  %5571 = vadd.xlane.f32.xlu2 %v5570_v63  ;;  %v13008_v44 = vpop.xlane.xlu2 %5541  ;;  %v5269_v13 = vpop.xlane.xlu1 %5268  ;;  %15272 = vst [vmem:[#allocation85_spill] sm:$0xff] %v13016_v39 }
 0xd50   : > { %8138 = vpow2.f32 %v5402_v22  ;;  %5532 = vadd.xlane.f32.xlu0 %v5531_v10  ;;  %v5221_v57 = vpop.xlane.xlu0 %5220  ;;  %v5346_v46 = vsub.f32 %v12696_v40, %v5269_v13  ;;  %v5347_v9 = vsub.f32 %v12698_v31, %v5269_v13  ;;  %v5582_v40 = vadd.f32 %v13016_v39, %v13011_v37 }
 0xd51   : > { %8140 = vpow2.f32 %v5468_v45  ;;  %v5314_v14 = vsub.f32 %v12578_v30, %v5221_v57  ;;  %v5315_v51 = vsub.f32 %v12580_v42, %v5221_v57  ;;  %v5448_v45 = vmul.f32 1.442695, %v5348_v15  ;;  %v15273_v42 = vld [vmem:[#allocation10_spill] sm:$0xff] }
 0xd52   : > { %8142 = vrcp.f32 %v12960_v18  ;;  %v5359_v34 = vsub.f32 %v15273_v42, %v12860_v53  ;;  %v5444_v31 = vmul.f32 1.442695, %v5346_v46  ;;  %v5446_v13 = vmul.f32 1.442695, %v5347_v9 }
 0xd53   : > { %v13019_v61 = vpop.eup %8132  ;;  %8144 = vpow2.f32 %v5452_v2  ;;  %v5380_v22 = vmul.f32 1.442695, %v5314_v14  ;;  %v5382_v3 = vmul.f32 1.442695, %v5315_v51  ;;  %v5318_v57 = vsub.f32 %v12590_v12, %v12908_v35 }
 0xd54   : > { %v13022_v43 = vpop.eup %8134  ;;  %8146 = vpow2.f32 %v5454_v27  ;;  %v5470_v15 = vmul.f32 1.442695, %v5359_v34  ;;  %vm5797_vm12 = vweird.f32 %v13008_v44  ;;  %v5803_v19 = vand.u32 2147483648, %v13008_v44 }
 0xd55   : > { %v13025_v30 = vpop.eup %8136  ;;  %8148 = vpow2.f32 %v5380_v22  ;;  %v5510_v20 = vadd.f32 %v13022_v43, %v13019_v61  ;;  %v15277_v22 = vld [vmem:[#allocation16_spill] sm:$0xff]  ;;  %v5388_v12 = vmul.f32 1.442695, %v5318_v57 }
 0xd56   : > { %v13031_v63 = vpop.eup %8138  ;;  %8150 = vpow2.f32 %v5382_v3  ;;  %v5319_v3 = vsub.f32 %v15277_v22, %v12908_v35  ;;  %v15281_v22 = vld [vmem:[#allocation60_spill] sm:$0xff] }
 0xd57   : > { %v13035_v10 = vpop.eup %8140  ;;  %8152 = vrcp.f32 %v12986_v32  ;;  %5511 = vadd.xlane.f32.xlu2 %v5510_v20  ;;  %v13038_v2 = vpop.xlane.xlu2 %5538  ;;  %v5522_v35 = vadd.f32 %v13031_v63, %v13025_v30 }
 0xd58   : > { %15274 = vst [vmem:[#allocation75_spill] sm:$0xff] %v13035_v10  ;;  %v13040_v53 = vpop.eup %8142  ;;  %8154 = vpow2.f32 %v5448_v45  ;;  %5583 = vadd.xlane.f32.xlu0 %v5582_v40  ;;  %v13046_v47 = vpop.xlane.xlu1 %5265  ;;  %v5390_v40 = vmul.f32 1.442695, %v5319_v3 }
 0xd59   : > { %v13042_v27 = vpop.eup %8144  ;;  %8156 = vpow2.f32 %v5450_v8  ;;  %v5825_v8 = vmul.f32 %v13040_v53, %v12960_v18  ;;  %vm5830_vm2 = vweird.f32 %v13040_v53 }
 0xd5a   : > { %15275 = vst [vmem:[#allocation53_spill] sm:$0xff] %v13042_v27  ;;  %v13048_v14 = vpop.eup %8146  ;;  %8158 = vrcp.f32 %v13008_v44  ;;  %vm13128_vm13 = vmor %vm5829_vm8, %vm5830_vm2  ;;  %vm5781_vm2 = vweird.f32 %v13038_v2 }
 0xd5b   : > { %15276 = vst [vmem:[#allocation45_spill] sm:$0xff] %v13048_v14  ;;  %v13051_v51 = vpop.eup %8148  ;;  %8160 = vpow2.f32 %v5444_v31  ;;  %v5561_v42 = vadd.f32 %v13048_v14, %v13042_v27  ;;  %v5353_v14 = vsub.f32 %v15281_v22, %v12934_v36  ;;  %v5826_v3 = vsub.f32 1.0, %v5825_v8 }
 0xd5c   : > { %v13055_v46 = vpop.eup %8150  ;;  %8162 = vpow2.f32 %v5446_v13 }
 0xd5d   : > { %v13057_v45 = vpop.eup %8152  ;;  %8164 = vpow2.f32 %v5470_v15  ;;  %v5507_v9 = vadd.f32 %v13055_v46, %v13051_v51  ;;  %v5352_v15 = vsub.f32 %v12708_v25, %v12934_v36  ;;  %v5458_v50 = vmul.f32 1.442695, %v5353_v14 }
 0xd5e   : > { %v13063_v34 = vpop.eup %8154  ;;  %v5835_v36 = vand.u32 2147483648, %v12960_v18  ;;  %v5827_v39 = vmul.f32 %v13040_v53, %v5826_v3  ;;  %vm5814_vm15 = vweird.f32 %v13057_v45 }
 0xd5f   : > { %15278 = vst [vmem:[#allocation64_spill] sm:$0xff] %v13063_v34  ;;  %v13069_v20 = vpop.eup %8156  ;;  %5508 = vadd.xlane.f32.xlu1 %v5507_v9  ;;  %5562 = vadd.xlane.f32.xlu2 %v5561_v42  ;;  %v13071_v31 = vpop.xlane.xlu2 %5550  ;;  %v5809_v9 = vmul.f32 %v13057_v45, %v12986_v32  ;;  %vm13147_vm10 = vmor %vm5813_vm5, %vm5814_vm15 }
 0xd60   : > { %15279 = vst [vmem:[#allocation67_spill] sm:$0xff] %v13069_v20  ;;  %v13073_v13 = vpop.eup %8158  ;;  %5523 = vadd.xlane.f32.xlu0 %v5522_v35  ;;  %8166 = vrcp.f32 %v13071_v31  ;;  %v13089_v25 = vpop.xlane.xlu1 %5535  ;;  %v5456_v35 = vmul.f32 1.442695, %v5352_v15  ;;  %v5558_v8 = vadd.f32 %v13069_v20, %v13063_v34  ;;  %vm5845_vm6 = vweird.f32 %v13071_v31 }
 0xd61   : > { %v13078_v57 = vpop.eup %8160  ;;  %8168 = vpow2.f32 %v5388_v12  ;;  %v5793_v12 = vmul.f32 %v13073_v13, %v13008_v44  ;;  %v5810_v37 = vsub.f32 1.0, %v5809_v9  ;;  %v5836_v9 = vor.u32 1.1754944e-38, %v5835_v36 }
 0xd62   : > { %15280 = vst [vmem:[#allocation68_spill] sm:$0xff] %v13078_v57  ;;  %v13082_v27 = vpop.eup %8162  ;;  %8170 = vrcp.f32 %v13038_v2  ;;  %vm5798_vm11 = vweird.f32 %v13073_v13 }
 0xd63   : > { %15282 = vst [vmem:[#allocation57_spill] sm:$0xff] %v13082_v27  ;;  %v13087_v42 = vpop.eup %8164  ;;  %8172 = vpow2.f32 %v5390_v40  ;;  %v5555_v22 = vadd.f32 %v13082_v27, %v13078_v57  ;;  %v5218_v40 = vpop.xlane.xlu0 %5217  ;;  %v5794_v27 = vsub.f32 1.0, %v5793_v12  ;;  %vm13169_vm0 = vmor %vm5797_vm12, %vm5798_vm11 }
 0xd64   : > { %15283 = vst [vmem:[#allocation58_spill] sm:$0xff] %v13087_v42  ;;  %8174 = vrcp.f32 %v13089_v25  ;;  %v5573_v15 = vadd.f32 %v13087_v42, %v13035_v10  ;;  %v5312_v57 = vsub.f32 %v12572_v49, %v5218_v40  ;;  %v5811_v42 = vmul.f32 %v13057_v45, %v5810_v37 }
 0xd65   : > { %8176 = vpow2.f32 %v5456_v35  ;;  %v5851_v10 = vand.u32 2147483648, %v13071_v31  ;;  %v5819_v49 = vand.u32 2147483648, %v12986_v32  ;;  %v5795_v36 = vmul.f32 %v13073_v13, %v5794_v27 }
 0xd66   : > { %v8167_v52 = vpop.eup %8166  ;;  %8178 = vpow2.f32 %v5458_v50  ;;  %v5313_v37 = vsub.f32 %v12574_v6, %v5218_v40 }
 0xd67   : > { %v13102_v4 = vpop.eup %8168  ;;  %v5841_v14 = vmul.f32 %v8167_v52, %v13071_v31  ;;  %5559 = vadd.xlane.f32.xlu1 %v5558_v8  ;;  %5556 = vadd.xlane.f32.xlu2 %v5555_v22  ;;  %v5828_v8 = vadd.f32 %v13040_v53, %v5827_v39  ;;  %vm5846_vm3 = vweird.f32 %v8167_v52  ;;  %v5849_v22 = vand.u32 2147483647, %v13071_v31 }
 0xd68   : > { %v13105_v20 = vpop.eup %8170  ;;  %5574 = vadd.xlane.f32.xlu0 %v5573_v15  ;;  %v5376_v15 = vmul.f32 1.442695, %v5312_v57  ;;  %vm5847_vm4 = vmor %vm5845_vm6, %vm5846_vm3  ;;  %v5852_v27 = vor.u32 1.1754944e-38, %v5851_v10  ;;  %v5812_v57 = vadd.f32 %v13057_v45, %v5811_v42  ;;  %v5820_v28 = vor.u32 1.1754944e-38, %v5819_v49 }
 0xd69   : > { %v13108_v3 = vpop.eup %8172  ;;  %v5842_v34 = vsub.f32 1.0, %v5841_v14  ;;  %v5777_v35 = vmul.f32 %v13105_v20, %v13038_v2  ;;  %v5832_v6 = vsel %vm13128_vm13, %v13040_v53, %v5828_v8  ;;  %vm5850_vm1 = vcmp.eq.f32.partialorder %v5849_v22, 8.507059e+37 }
 0xd6a   : > { %v13118_v50 = vpop.eup %8174  ;;  %v5513_v39 = vadd.f32 %v13108_v3, %v13102_v4  ;;  %v5378_v10 = vmul.f32 1.442695, %v5313_v37  ;;  %8180 = vpow2.f32 %v5376_v15  ;;  %v5837_v22 = vsel %vm5834_vm9, %v5836_v9, %v5832_v6  ;;  %v6303_v15 = vld [vmem:[%s14347_s8 + $0x8] sm:$0xff] }
 0xd6b   : > { %v5843_v12 = vmul.f32 %v8167_v52, %v5842_v34  ;;  %v13133_v24 = vpop.eup %8176  ;;  %v5778_v40 = vsub.f32 1.0, %v5777_v35  ;;  %v5817_v35 = vand.u32 2147483647, %v12986_v32  ;;  %v5816_v49 = vsel %vm13147_vm10, %v13057_v45, %v5812_v57 }
 0xd6c   : > { %v13140_v31 = vpop.eup %8178  ;;  %8182 = vpow2.f32 %v5378_v10  ;;  %v5839_v32 = vmul.f32 %v12800_v58, %v5837_v22  ;;  %v5801_v45 = vand.u32 2147483647, %v13008_v44  ;;  %vm5782_vm8 = vweird.f32 %v13105_v20 }
 0xd6d   : > { %v5844_v14 = vadd.f32 %v8167_v52, %v5843_v12  ;;  %v5761_v12 = vmul.f32 %v13118_v50, %v13089_v25  ;;  %vm5818_vm14 = vcmp.eq.f32.partialorder %v5817_v35, 8.507059e+37  ;;  %v5804_v44 = vor.u32 1.1754944e-38, %v5803_v19  ;;  %vm13188_vm6 = vmor %vm5781_vm2, %vm5782_vm8  ;;  %v15294_v19 = vld [vmem:[#allocation29_spill] sm:$0xff] }
 0xd6e   : > { %vm5802_vm3 = vcmp.eq.f32.partialorder %v5801_v45, 8.507059e+37  ;;  %vm5766_vm13 = vweird.f32 %v13118_v50  ;;  %v5769_v8 = vand.u32 2147483647, %v13089_v25  ;;  %v15296_v45 = vld [vmem:[#allocation33_spill] sm:$0xff] }
 0xd6f   : > { %v5848_v18 = vsel %vm5847_vm4, %v8167_v52, %v5844_v14  ;;  %v5344_v52 = vsub.f32 %v12692_v11, %v13046_v47  ;;  %v5762_v37 = vsub.f32 1.0, %v5761_v12  ;;  %v5345_v11 = vsub.f32 %v12694_v1, %v13046_v47  ;;  %v6905_v12 = vld [vmem:[%s14351_s12 + $0x18] sm:$0xff] }
 0xd70   : > { %5514 = vadd.xlane.f32.xlu0 %v5513_v39  ;;  %v5853_v29 = vsel %vm5850_vm1, %v5852_v27, %v5848_v18  ;;  %v5821_v39 = vsel %vm5818_vm14, %v5820_v28, %v5816_v49  ;;  %v13179_v58 = vpop.eup %8180  ;;  %v5787_v28 = vand.u32 2147483648, %v13038_v2  ;;  %v15290_v27 = vld [vmem:[#allocation27_spill] sm:$0xff]  ;;  %vm5765_vm4 = vweird.f32 %v13089_v25 }
 0xd71   : > { %v5854_v53 = vmul.f32 %v12852_v33, %v5853_v29  ;;  %v5855_v42 = vmul.f32 %v12854_v16, %v5853_v29  ;;  %v5779_v33 = vmul.f32 %v13105_v20, %v5778_v40  ;;  %v5796_v16 = vadd.f32 %v13073_v13, %v5795_v36  ;;  %vm5767_vm1 = vmor %vm5765_vm4, %vm5766_vm13 }
 0xd72   : > { %v5838_v29 = vmul.f32 %v12798_v23, %v5837_v22  ;;  %v5440_v9 = vmul.f32 1.442695, %v5344_v52  ;;  %v5564_v36 = vadd.f32 %v13140_v31, %v13133_v24  ;;  %v5763_v14 = vmul.f32 %v13118_v50, %v5762_v37  ;;  %v13186_v57 = vpop.eup %8182 }
 0xd73   : > { %6112 = vmatpush.xpose.msra.mxu2 %v5854_v53  ;;  %6132 = vmatpush.xpose.msra.mxu3 %v5855_v42  ;;  %v5800_v1 = vsel %vm13169_vm0, %v13073_v13, %v5796_v16  ;;  %v5780_v23 = vadd.f32 %v13105_v20, %v5779_v33  ;;  %v5442_v47 = vmul.f32 1.442695, %v5345_v11  ;;  %v5822_v34 = vmul.f32 %v12810_v7, %v5821_v39  ;;  %v6196_v53 = vld [vmem:[%s14345_s6] sm:$0xff]  ;;  %v627_v42 = vld [vmem:[%s14343_s4 + $0x58] sm:$0xff] }
 0xd74   : > { %v5823_v6 = vmul.f32 %v15290_v27, %v5821_v39  ;;  %v5785_v13 = vand.u32 2147483647, %v13038_v2  ;;  %v5805_v40 = vsel %vm5802_vm3, %v5804_v44, %v5800_v1  ;;  %8184 = vpow2.f32 %v5440_v9  ;;  %v6300_v39 = vld [vmem:[%s14346_s7 + $0x10] sm:$0xff]  ;;  %v6197_v1 = vld [vmem:[%s14345_s6 + $0x8] sm:$0xff]  ;;  %v6302_v44 = vld [vmem:[%s14347_s8] sm:$0xff] }
 0xd75   : > { %v5784_v18 = vsel %vm13188_vm6, %v13105_v20, %v5780_v23  ;;  %v5764_v7 = vadd.f32 %v13118_v50, %v5763_v14  ;;  %v5788_v10 = vor.u32 1.1754944e-38, %v5787_v28  ;;  %8186 = vpow2.f32 %v5442_v47  ;;  %v6304_v14 = vld [vmem:[%s14347_s8 + $0x10] sm:$0xff]  ;;  %v6199_v28 = vld [vmem:[%s14345_s6 + $0x18] sm:$0xff]  ;;  %v6453_v27 = vld [vmem:[%s14349_s10 + $0x8] sm:$0xff] }
 0xd76   : > { %v5771_v2 = vand.u32 2147483648, %v13089_v25  ;;  %v5806_v20 = vmul.f32 %v12822_v62, %v5805_v40  ;;  %vm5786_vm15 = vcmp.eq.f32.partialorder %v5785_v13, 8.507059e+37  ;;  %v5504_v35 = vadd.f32 %v13186_v57, %v13179_v58  ;;  %v6454_v23 = vld [vmem:[%s14349_s10 + $0x10] sm:$0xff] }
 0xd77   : > { %6113 = vmatpush.xpose.msra.mxu2 %v5838_v29  ;;  %6133 = vmatpush.xpose.msra.mxu3 %v5839_v32  ;;  %v5789_v52 = vsel %vm5786_vm15, %v5788_v10, %v5784_v18  ;;  %v5807_v22 = vmul.f32 %v12826_v0, %v5805_v40  ;;  %v5768_v49 = vsel %vm5767_vm1, %v13118_v50, %v5764_v7  ;;  %vm5770_vm5 = vcmp.eq.f32.partialorder %v5769_v8, 8.507059e+37  ;;  %v6301_v0 = vld [vmem:[%s14346_s7 + $0x18] sm:$0xff]  ;;  %v6198_v50 = vld [vmem:[%s14345_s6 + $0x10] sm:$0xff]  ;;  %v15295_v29 = vld [vmem:[#allocation18_spill] sm:$0xff] }
 0xd78   : > { %5565 = vadd.xlane.f32.xlu0 %v5564_v36  ;;  %v5772_v33 = vor.u32 1.1754944e-38, %v5771_v2  ;;  %v5790_v62 = vmul.f32 %v12838_v54, %v5789_v52  ;;  %v5791_v11 = vmul.f32 %v15294_v19, %v5789_v52  ;;  %v6299_v36 = vld [vmem:[%s14346_s7 + $0x8] sm:$0xff]  ;;  %v6298_v10 = vld [vmem:[%s14346_s7] sm:$0xff] }
 0xd79   : > { %v6903_v18 = vld [vmem:[%s14351_s12 + $0x8] sm:$0xff]  ;;  %v6452_v52 = vld [vmem:[%s14349_s10] sm:$0xff] }
 0xd7a   : > { %v13211_v37 = vpop.eup %8184  ;;  %v5773_v16 = vsel %vm5770_vm5, %v5772_v33, %v5768_v49 }
 0xd7b   : > { %6114 = vmatpush.xpose.msra.mxu2 %v5822_v34  ;;  %6134 = vmatpush.xpose.msra.mxu3 %v5823_v6  ;;  %v13214_v25 = vpop.eup %8186  ;;  %v5774_v32 = vmul.f32 %v15295_v29, %v5773_v16  ;;  %v5775_v9 = vmul.f32 %v15296_v45, %v5773_v16  ;;  %v6902_v34 = vld [vmem:[%s14351_s12] sm:$0xff]  ;;  %v6305_v6 = vld [vmem:[%s14347_s8 + $0x18] sm:$0xff] }
 0xd7c   : > { %15293 = vst [vmem:[#allocation65_spill] sm:$0xff] %v13214_v25  ;;  %v5552_v54 = vadd.f32 %v13214_v25, %v13211_v37 }
 0xd7f   : > { %6202 = vperm.xlu2 %7465, %v6196_v53   ;;  %6115 = vmatpush.xpose.msra.mxu2 %v5806_v20  ;;  %v6455_v20 = vld [vmem:[%s14349_s10 + $0x18] sm:$0xff] }
 0xd80   : > { %5505 = vadd.xlane.f32.xlu0 %v5504_v35  ;;  %685 = vperm.xlu1 %7464, %v627_v42  }
 0xd81   : > { %6135 = vmatpush.xpose.msra.mxu3 %v5807_v22 }
 0xd83   : > { %6116 = vmatpush.xpose.msra.mxu2 %v5790_v62 }
 0xd85   : > { %6136 = vmatpush.xpose.msra.mxu3 %v5791_v11 }
 0xd87   : > { %6409 = vperm.xlu2 %7465, %v6301_v0   ;;  %6117 = vmatpush.xpose.msra.mxu2 %v5774_v32  ;;  %v6904_v0 = vld [vmem:[%s14351_s12 + $0x10] sm:$0xff] }
 0xd88   : > { %5553 = vadd.xlane.f32.xlu0 %v5552_v54  ;;  %6212 = vperm.xlu1 %7464, %v6198_v50  }
 0xd89   : > { %6137 = vmatpush.xpose.msra.mxu3 %v5775_v9 }
 0xd8f   : > { %6399 = vperm.xlu2 %7465, %v6299_v36  }
 0xd90   : > { %6404 = vperm.xlu1 %7464, %v6300_v39  }
 0xd97   : > { %6427 = vperm.xlu2 %7465, %v6303_v15  }
 0xd98   : > { %6432 = vperm.xlu1 %7464, %v6304_v14  }
 0xd99   : > { %v13264_v40 = vpop.xlane.xlu1 %5586 }
 0xd9c   : > { %6207 = vperm.xlu0 %7463, %v6197_v1  }
 0xd9f   : > { %6468 = vperm.xlu2 %7465, %v6454_v23  }
 0xda0   : > { %6422 = vperm.xlu1 %7464, %v6302_v44  }
 0xda1   : > { %v13251_v47 = vpop.xlane.xlu2 %5589  ;;  %v13279_v53 = vpop.xlane.xlu1 %5526 }
 0xda2   : > { %vm5717_vm3 = vweird.f32 %v13279_v53 }
 0xda4   : > { %6217 = vperm.xlu0 %7463, %v6199_v28  }
 0xda7   : > { %6908 = vperm.xlu2 %7465, %v6902_v34  }
 0xda8   : > { %6463 = vperm.xlu1 %7464, %v6453_v27  }
 0xda9   : > { %v13272_v7 = vpop.xlane.xlu2 %5529  ;;  %v13289_v35 = vpop.xlane.xlu1 %5577 }
 0xdaa   : > { %v13262_v13 = vpop.xlane.xlu0 %5592  ;;  %8188 = vrcp.f32 %v13272_v7  ;;  %vm5733_vm11 = vweird.f32 %v13272_v7 }
 0xdab   : > { %8190 = vrcp.f32 %v13279_v53 }
 0xdac   : > { %6437 = vperm.xlu0 %7463, %v6305_v6   ;;  %v5739_v6 = vand.u32 2147483648, %v13272_v7 }
 0xdaf   : > { %6923 = vperm.xlu2 %7465, %v6905_v12  }
 0xdb0   : > { %6913 = vperm.xlu1 %7464, %v6903_v18   ;;  %v8189_v49 = vpop.eup %8188 }
 0xdb1   : > { %v13281_v42 = vpop.xlane.xlu2 %5580  ;;  %v13297_v62 = vpop.eup %8190  ;;  %v5729_v16 = vmul.f32 %v8189_v49, %v13272_v7  ;;  %vm5734_vm9 = vweird.f32 %v8189_v49 }
 0xdb2   : > { %v13277_v2 = vpop.xlane.xlu0 %5595  ;;  %v5713_v19 = vmul.f32 %v13297_v62, %v13279_v53  ;;  %v13302_v11 = vpop.xlane.xlu1 %5517  ;;  %vm13327_vm14 = vmor %vm5733_vm11, %vm5734_vm9  ;;  %vm5718_vm8 = vweird.f32 %v13297_v62 }
 0xdb3   : > { %v5730_v29 = vsub.f32 1.0, %v5729_v16  ;;  %v5723_v16 = vand.u32 2147483648, %v13279_v53  ;;  %vm13346_vm13 = vmor %vm5717_vm3, %vm5718_vm8 }
 0xdb4   : > { %6394 = vperm.xlu0 %7463, %v6298_v10   ;;  %v5714_v9 = vsub.f32 1.0, %v5713_v19 }
 0xdb5   : > { %v5731_v39 = vmul.f32 %v8189_v49, %v5730_v29 }
 0xdb6   : > { %v5715_v1 = vmul.f32 %v13297_v62, %v5714_v9 }
 0xdb7   : > { %v5732_v34 = vadd.f32 %v8189_v49, %v5731_v39  ;;  %v5721_v39 = vand.u32 2147483647, %v13279_v53 }
 0xdb9   : > { %v13295_v22 = vpop.xlane.xlu2 %5520  ;;  %v5736_v9 = vsel %vm13327_vm14, %v8189_v49, %v5732_v34  ;;  %vm5722_vm4 = vcmp.eq.f32.partialorder %v5721_v39, 8.507059e+37 }
 0xdba   : > { %v13320_v12 = vpop.xlane.xlu1 %5568  ;;  %vm5685_vm9 = vweird.f32 %v13295_v22 }
 0xdbb   : > { %v13286_v8 = vpop.xlane.xlu0 %5598 }
 0xdbc   : > { %6473 = vperm.xlu0 %7463, %v6455_v20  }
 0xdc2   : > { %v13310_v45 = vpop.xlane.xlu2 %5571 }
 0xdc3   : > { %v5533_v33 = vpop.xlane.xlu0 %5532 }
 0xdc4   : > { %8192 = vrcp.f32 %v5533_v33  ;;  %6458 = vperm.xlu0 %7463, %v6452_v52   ;;  %v5755_v23 = vand.u32 2147483648, %v5533_v33  ;;  %v5753_v28 = vand.u32 2147483647, %v5533_v33  ;;  %vm5749_vm12 = vweird.f32 %v5533_v33 }
 0xdc5   : > { %8194 = vrcp.f32 %v13295_v22  ;;  %v5737_v52 = vand.u32 2147483647, %v13272_v7  ;;  %v5740_v7 = vor.u32 1.1754944e-38, %v5739_v6 }
 0xdc6   : > { %8196 = vrcp.f32 %v13302_v11  ;;  %v5756_v19 = vor.u32 1.1754944e-38, %v5755_v23  ;;  %vm5754_vm2 = vcmp.eq.f32.partialorder %v5753_v28, 8.507059e+37  ;;  %v5724_v28 = vor.u32 1.1754944e-38, %v5723_v16 }
 0xdc7   : > { %vm5738_vm6 = vcmp.eq.f32.partialorder %v5737_v52, 8.507059e+37 }
 0xdca   : > { %v8193_v50 = vpop.eup %8192  ;;  %v13338_v29 = vpop.xlane.xlu2 %5511 }
 0xdcb   : > { %v5745_v32 = vmul.f32 %v8193_v50, %v5533_v33  ;;  %v13308_v54 = vpop.xlane.xlu0 %5583  ;;  %v13313_v14 = vpop.eup %8194  ;;  %vm5750_vm10 = vweird.f32 %v8193_v50 }
 0xdcc   : > { %6918 = vperm.xlu0 %7463, %v6904_v0   ;;  %v13316_v27 = vpop.eup %8196  ;;  %v5681_v10 = vmul.f32 %v13313_v14, %v13295_v22  ;;  %vm5751_vm0 = vmor %vm5749_vm12, %vm5750_vm10  ;;  %v5716_v0 = vadd.f32 %v13297_v62, %v5715_v1  ;;  %vm5686_vm1 = vweird.f32 %v13313_v14 }
 0xdcd   : > { %v5746_v36 = vsub.f32 1.0, %v5745_v32  ;;  %v5665_v33 = vmul.f32 %v13316_v27, %v13302_v11  ;;  %vm13387_vm11 = vmor %vm5685_vm9, %vm5686_vm1  ;;  %vm5670_vm12 = vweird.f32 %v13316_v27 }
 0xdce   : > { %v5720_v49 = vsel %vm13346_vm13, %v13297_v62, %v5716_v0 }
 0xdcf   : > { %v5747_v15 = vmul.f32 %v8193_v50, %v5746_v36  ;;  %v5666_v53 = vsub.f32 1.0, %v5665_v33  ;;  %v5725_v25 = vsel %vm5722_vm4, %v5724_v28, %v5720_v49  ;;  %v5675_v49 = vand.u32 2147483648, %v13302_v11 }
 0xdd0   : > { %v5726_v33 = vmul.f32 %v12884_v38, %v5725_v25  ;;  %vm5637_vm4 = vweird.f32 %v13338_v29 }
 0xdd1   : > { %v5748_v44 = vadd.f32 %v8193_v50, %v5747_v15  ;;  %v5682_v15 = vsub.f32 1.0, %v5681_v10  ;;  %v5667_v52 = vmul.f32 %v13316_v27, %v5666_v53  ;;  %v5673_v53 = vand.u32 2147483647, %v13302_v11 }
 0xdd3   : > { %v13322_v18 = vpop.xlane.xlu0 %5523  ;;  %v5752_v32 = vsel %vm5751_vm0, %v8193_v50, %v5748_v44  ;;  %v5741_v50 = vsel %vm5738_vm6, %v5740_v7, %v5736_v9  ;;  %v5683_v6 = vmul.f32 %v13313_v14, %v5682_v15  ;;  %v5691_v9 = vand.u32 2147483648, %v13295_v22 }
 0xdd4   : > { %8198 = vrcp.f32 %v13322_v18  ;;  %v5757_v36 = vsel %vm5754_vm2, %v5756_v19, %v5752_v32  ;;  %v5742_v10 = vmul.f32 %v12904_v5, %v5741_v50  ;;  %v5743_v20 = vmul.f32 %v12906_v56, %v5741_v50 }
 0xdd5   : > { %v5758_v1 = vmul.f32 %v12990_v21, %v5757_v36  ;;  %v5759_v23 = vmul.f32 %v12996_v55, %v5757_v36  ;;  %8200 = vrcp.f32 %v13338_v29  ;;  %v13355_v55 = vpop.xlane.xlu1 %5508  ;;  %v5707_v0 = vand.u32 2147483648, %v13322_v18 }
 0xdd6   : > { %8202 = vrcp.f32 %v13355_v55  ;;  %v5727_v5 = vmul.f32 %v12890_v26, %v5725_v25  ;;  %v5705_v56 = vand.u32 2147483647, %v13322_v18  ;;  %v5684_v32 = vadd.f32 %v13313_v14, %v5683_v6 }
 0xdd7   : > { %6118 = vmatpush.xpose.msra.mxu2 %v5758_v1  ;;  %6138 = vmatpush.xpose.msra.mxu3 %v5759_v23  ;;  %vm5701_vm5 = vweird.f32 %v13322_v18  ;;  %8204 = vrcp.f32 %v13286_v8  ;;  %v5689_v36 = vand.u32 2147483647, %v13295_v22  ;;  %v5708_v39 = vor.u32 1.1754944e-38, %v5707_v0 }
 0xdd8   : > { %v5668_v23 = vadd.f32 %v13316_v27, %v5667_v52  ;;  %vm5706_vm14 = vcmp.eq.f32.partialorder %v5705_v56, 8.507059e+37  ;;  %v5688_v22 = vsel %vm13387_vm11, %v13313_v14, %v5684_v32  ;;  %vm5669_vm0 = vweird.f32 %v13302_v11 }
 0xdd9   : > { %vm5690_vm8 = vcmp.eq.f32.partialorder %v5689_v36, 8.507059e+37  ;;  %vm5671_vm2 = vmor %vm5669_vm0, %vm5670_vm12  ;;  %v5676_v11 = vor.u32 1.1754944e-38, %v5675_v49  ;;  %vm5674_vm3 = vcmp.eq.f32.partialorder %v5673_v53, 8.507059e+37  ;;  %vm5621_vm11 = vweird.f32 %v13355_v55 }
 0xdda   : > { %v8199_v44 = vpop.eup %8198  ;;  %v5672_v14 = vsel %vm5671_vm2, %v13316_v27, %v5668_v23  ;;  %vm6069_vm2 = vweird.f32 %v13262_v13 }
 0xddb   : > { %v5697_v21 = vmul.f32 %v8199_v44, %v13322_v18  ;;  %v13357_v34 = vpop.xlane.xlu0 %5574  ;;  %6119 = vmatpush.xpose.msra.mxu2 %v5742_v10  ;;  %6139 = vmatpush.xpose.msra.mxu3 %v5743_v20  ;;  %v13364_v16 = vpop.eup %8200  ;;  %vm5702_vm15 = vweird.f32 %v8199_v44 }
 0xddc   : > { %v5633_v38 = vmul.f32 %v13364_v16, %v13338_v29  ;;  %vm13378_vm10 = vmor %vm5701_vm5, %vm5702_vm15  ;;  %v13393_v50 = vpop.eup %8202  ;;  %vm5638_vm6 = vweird.f32 %v13364_v16 }
 0xddd   : > { %v5698_v62 = vsub.f32 1.0, %v5697_v21  ;;  %v5617_v20 = vmul.f32 %v13393_v50, %v13355_v55  ;;  %vm13441_vm1 = vmor %vm5637_vm4, %vm5638_vm6 }
 0xdde   : > { %v5634_v10 = vsub.f32 1.0, %v5633_v38 }
 0xddf   : > { %v5699_v19 = vmul.f32 %v8199_v44, %v5698_v62  ;;  %6120 = vmatpush.xpose.msra.mxu2 %v5726_v33  ;;  %6140 = vmatpush.xpose.msra.mxu3 %v5727_v5  ;;  %v13408_v62 = vpop.eup %8204  ;;  %v5618_v33 = vsub.f32 1.0, %v5617_v20 }
 0xde0   : > { %v5635_v0 = vmul.f32 %v13364_v16, %v5634_v10 }
 0xde1   : > { %v5700_v7 = vadd.f32 %v8199_v44, %v5699_v19  ;;  %v5677_v19 = vsel %vm5674_vm3, %v5676_v11, %v5672_v14  ;;  %vm6101_vm3 = vweird.f32 %v13286_v8 }
 0xde2   : > { %v5679_v26 = vmul.f32 %v12932_v48, %v5677_v19  ;;  %v5636_v1 = vadd.f32 %v13364_v16, %v5635_v0 }
 0xde3   : > { %v13383_v15 = vpop.xlane.xlu0 %5514  ;;  %v5704_v18 = vsel %vm13378_vm10, %v8199_v44, %v5700_v7  ;;  %v5692_v44 = vor.u32 1.1754944e-38, %v5691_v9  ;;  %v5678_v9 = vmul.f32 %v12930_v41, %v5677_v19  ;;  %vm5622_vm10 = vweird.f32 %v13393_v50 }
 0xde4   : > { %8206 = vrcp.f32 %v13383_v15  ;;  %v5709_v28 = vsel %vm5706_vm14, %v5708_v39, %v5704_v18  ;;  %v5659_v38 = vand.u32 2147483648, %v13383_v15  ;;  %v5657_v36 = vand.u32 2147483647, %v13383_v15  ;;  %vm13462_vm14 = vmor %vm5621_vm11, %vm5622_vm10 }
 0xde5   : > { %8208 = vrcp.f32 %v13264_v40  ;;  %v5710_v21 = vmul.f32 %v13025_v30, %v5709_v28  ;;  %v5711_v6 = vmul.f32 %v13031_v63, %v5709_v28  ;;  %v5693_v25 = vsel %vm5690_vm8, %v5692_v44, %v5688_v22 }
 0xde6   : > { %8210 = vrcp.f32 %v13277_v2  ;;  %v5694_v63 = vmul.f32 %v12958_v59, %v5693_v25  ;;  %v5695_v52 = vmul.f32 %v12962_v17, %v5693_v25  ;;  %v6097_v59 = vmul.f32 %v13408_v62, %v13286_v8 }
 0xde7   : > { %6121 = vmatpush.xpose.msra.mxu2 %v5710_v21  ;;  %6141 = vmatpush.xpose.msra.mxu3 %v5711_v6  ;;  %8212 = vrcp.f32 %v13251_v47  ;;  %v5643_v17 = vand.u32 2147483648, %v13338_v29  ;;  %v5619_v39 = vmul.f32 %v13393_v50, %v5618_v33  ;;  %vm5653_vm15 = vweird.f32 %v13383_v15 }
 0xde8   : > { %8214 = vrcp.f32 %v13262_v13  ;;  %v5641_v44 = vand.u32 2147483647, %v13338_v29  ;;  %v6098_v53 = vsub.f32 1.0, %v6097_v59  ;;  %v5660_v6 = vor.u32 1.1754944e-38, %v5659_v38 }
 0xde9   : > { %v5644_v21 = vor.u32 1.1754944e-38, %v5643_v17  ;;  %vm5658_vm9 = vcmp.eq.f32.partialorder %v5657_v36, 8.507059e+37  ;;  %v5620_v25 = vadd.f32 %v13393_v50, %v5619_v39  ;;  %v5627_v29 = vand.u32 2147483648, %v13355_v55 }
 0xdea   : > { %v8207_v30 = vpop.eup %8206  ;;  %vm5642_vm12 = vcmp.eq.f32.partialorder %v5641_v44, 8.507059e+37  ;;  %vm6102_vm8 = vweird.f32 %v13408_v62  ;;  %v6105_v22 = vand.u32 2147483647, %v13286_v8 }
 0xdeb   : > { %v5649_v27 = vmul.f32 %v8207_v30, %v13383_v15  ;;  %v13416_v5 = vpop.xlane.xlu0 %5565  ;;  %v13418_v56 = vpop.eup %8208  ;;  %6122 = vmatpush.xpose.msra.mxu2 %v5694_v63  ;;  %6142 = vmatpush.xpose.msra.mxu3 %v5695_v52  ;;  %vm5654_vm13 = vweird.f32 %v8207_v30  ;;  %v5640_v15 = vsel %vm13441_vm1, %v13364_v16, %v5636_v1  ;;  %vm13497_vm6 = vmor %vm6101_vm3, %vm6102_vm8  ;;  %vm6085_vm1 = vweird.f32 %v13277_v2 }
 0xdec   : > { %v13425_v7 = vpop.eup %8210  ;;  %v6033_v23 = vmul.f32 %v13418_v56, %v13264_v40  ;;  %vm5655_vm5 = vmor %vm5653_vm15, %vm5654_vm13  ;;  %v5645_v16 = vsel %vm5642_vm12, %v5644_v21, %v5640_v15  ;;  %v13487_v1 = vpop.xlane.xlu1 %5559 }
 0xded   : > { %v5650_v32 = vsub.f32 1.0, %v5649_v27  ;;  %v13436_v41 = vpop.eup %8212  ;;  %v6081_v48 = vmul.f32 %v13425_v7, %v13277_v2  ;;  %v5628_v27 = vor.u32 1.1754944e-38, %v5627_v29  ;;  %v5646_v59 = vmul.f32 %v13019_v61, %v5645_v16 }
 0xdee   : > { %v13446_v28 = vpop.eup %8214  ;;  %v6034_v52 = vsub.f32 1.0, %v6033_v23  ;;  %v6049_v0 = vmul.f32 %v13436_v41, %v13251_v47  ;;  %v5647_v17 = vmul.f32 %v13022_v43, %v5645_v16  ;;  %vm6086_vm4 = vweird.f32 %v13425_v7 }
 0xdef   : > { %v5651_v18 = vmul.f32 %v8207_v30, %v5650_v32  ;;  %6123 = vmatpush.xpose.msra.mxu2 %v5678_v9  ;;  %6143 = vmatpush.xpose.msra.mxu3 %v5679_v26  ;;  %v6082_v33 = vsub.f32 1.0, %v6081_v48  ;;  %v6075_v26 = vand.u32 2147483648, %v13262_v13  ;;  %v6091_v29 = vand.u32 2147483648, %v13277_v2  ;;  %vm13517_vm11 = vmor %vm6085_vm1, %vm6086_vm4 }
 0xdf0   : > { %v13477_v9 = vmul.f32 %v13418_v56, %v6034_v52  ;;  %vm6070_vm12 = vweird.f32 %v13446_v28  ;;  %vm6054_vm8 = vweird.f32 %v13436_v41  ;;  %vm6037_vm4 = vweird.f32 %v13264_v40 }
 0xdf1   : > { %v5652_v49 = vadd.f32 %v8207_v30, %v5651_v18  ;;  %v6083_v43 = vmul.f32 %v13425_v7, %v6082_v33  ;;  %v6107_v18 = vand.u32 2147483648, %v13286_v8  ;;  %v6092_v33 = vor.u32 1.1754944e-38, %v6091_v29 }
 0xdf3   : > { %v13449_v10 = vpop.xlane.xlu0 %5505  ;;  %v5656_v20 = vsel %vm5655_vm5, %v8207_v30, %v5652_v49  ;;  %v5625_v30 = vand.u32 2147483647, %v13355_v55  ;;  %v6099_v55 = vmul.f32 %v13408_v62, %v6098_v53  ;;  %v6084_v15 = vadd.f32 %v13425_v7, %v6083_v43  ;;  %v15317_v43 = vld [vmem:[#allocation30_spill] sm:$0xff] }
 0xdf4   : > { %8216 = vrcp.f32 %v13449_v10  ;;  %v5661_v14 = vsel %vm5658_vm9, %v5660_v6, %v5656_v20  ;;  %v5611_v44 = vand.u32 2147483648, %v13449_v10  ;;  %vm5605_vm15 = vweird.f32 %v13449_v10 }
 0xdf5   : > { %v5662_v11 = vmul.f32 %v13102_v4, %v5661_v14  ;;  %v5663_v63 = vmul.f32 %v13108_v3, %v5661_v14  ;;  %v5624_v4 = vsel %vm13462_vm14, %v13393_v50, %v5620_v25  ;;  %v6065_v3 = vmul.f32 %v13446_v28, %v13262_v13 }
 0xdf6   : > { %vm5626_vm0 = vcmp.eq.f32.partialorder %v5625_v30, 8.507059e+37  ;;  %8218 = vrcp.f32 %v13281_v42  ;;  %v6050_v50 = vsub.f32 1.0, %v6049_v0  ;;  %v6100_v39 = vadd.f32 %v13408_v62, %v6099_v55  ;;  %v686_v55 = vpop.permute.xlu1 %685 }
 0xdf7   : > { %6124 = vmatpush.xpose.msra.mxu2 %v5662_v11  ;;  %6144 = vmatpush.xpose.msra.mxu3 %v5663_v63  ;;  %v5629_v38 = vsel %vm5626_vm0, %v5628_v27, %v5624_v4  ;;  %8220 = vrcp.f32 %v13308_v54  ;;  %v6066_v61 = vsub.f32 1.0, %v6065_v3  ;;  %v6108_v14 = vor.u32 1.1754944e-38, %v6107_v18  ;;  %vm13542_vm0 = vmor %vm6069_vm2, %vm6070_vm12 }
 0xdf8   : > { %v5630_v48 = vmul.f32 %v13051_v51, %v5629_v38  ;;  %v5631_v49 = vmul.f32 %v13055_v46, %v5629_v38  ;;  %8222 = vrcp.f32 %v13289_v35  ;;  %v6051_v53 = vmul.f32 %v13436_v41, %v6050_v50 }
 0xdf9   : > { %v5609_v51 = vand.u32 2147483647, %v13449_v10  ;;  %v6067_v20 = vmul.f32 %v13446_v28, %v6066_v61  ;;  %v6104_v8 = vsel %vm13497_vm6, %v13408_v62, %v6100_v39  ;;  %vm6106_vm5 = vcmp.eq.f32.partialorder %v6105_v22, 8.507059e+37  ;;  %v15318_v22 = vld [vmem:[#allocation32_spill] sm:$0xff] }
 0xdfa   : > { %v8217_v32 = vpop.eup %8216  ;;  %v5612_v63 = vor.u32 1.1754944e-38, %v5611_v44  ;;  %v6089_v62 = vand.u32 2147483647, %v13277_v2  ;;  %v6109_v52 = vsel %vm6106_vm5, %v6108_v14, %v6104_v8  ;;  %v6088_v4 = vsel %vm13517_vm11, %v13425_v7, %v6084_v15 }
 0xdfb   : > { %v5601_v36 = vmul.f32 %v8217_v32, %v13449_v10  ;;  %6125 = vmatpush.xpose.msra.mxu2 %v5646_v59  ;;  %6145 = vmatpush.xpose.msra.mxu3 %v5647_v17  ;;  %vm5606_vm13 = vweird.f32 %v8217_v32  ;;  %vm5610_vm10 = vcmp.eq.f32.partialorder %v5609_v51, 8.507059e+37  ;;  %v6068_v2 = vadd.f32 %v13446_v28, %v6067_v20 }
 0xdfc   : > { %v13502_v46 = vpop.eup %8218  ;;  %vm5607_vm9 = vmor %vm5605_vm15, %vm5606_vm13  ;;  %v6110_v17 = vmul.f32 %v12972_v60, %v6109_v52  ;;  %vm6090_vm14 = vcmp.eq.f32.partialorder %v6089_v62, 8.507059e+37  ;;  %v6073_v50 = vand.u32 2147483647, %v13262_v13  ;;  %8224 = vrcp.f32 %v13357_v34  ;;  %v15323_v62 = vld [vmem:[#allocation25_spill] sm:$0xff] }
 0xdfd   : > { %v5602_v23 = vsub.f32 1.0, %v5601_v36  ;;  %v13510_v25 = vpop.eup %8220  ;;  %v6001_v3 = vmul.f32 %v13502_v46, %v13281_v42  ;;  %v6093_v7 = vsel %vm6090_vm14, %v6092_v33, %v6088_v4  ;;  %v6052_v60 = vadd.f32 %v13436_v41, %v6051_v53  ;;  %v15316_v36 = vld [vmem:[#allocation63_spill] sm:$0xff] }
 0xdfe   : > { %v13522_v19 = vpop.eup %8222  ;;  %v6017_v10 = vmul.f32 %v13510_v25, %v13308_v54  ;;  %v13549_v61 = vadd.f32 %v15316_v36, %v686_v55  ;;  %v13552_v39 = vadd.f32 %v15317_v43, %v686_v55  ;;  %v6072_v18 = vsel %vm13542_vm0, %v13446_v28, %v6068_v2  ;;  %v15319_v53 = vld [vmem:[#allocation35_spill] sm:$0xff]  ;;  %v15326_v55 = vld [vmem:[#allocation36_spill] sm:$0xff] }
 0xdff   : > { %v5603_v6 = vmul.f32 %v8217_v32, %v5602_v23  ;;  %6126 = vmatpush.xpose.msra.mxu2 %v5630_v48  ;;  %6146 = vmatpush.xpose.msra.mxu3 %v5631_v49  ;;  %vm6053_vm2 = vweird.f32 %v13251_v47  ;;  %v6059_v23 = vand.u32 2147483648, %v13251_v47  ;;  %v6076_v48 = vor.u32 1.1754944e-38, %v6075_v26 }
 0xe00   : > { %v6057_v49 = vand.u32 2147483647, %v13251_v47  ;;  %8226 = vrcp.f32 %v13310_v45  ;;  %v6094_v44 = vmul.f32 %v15318_v22, %v6093_v7  ;;  %v6095_v21 = vmul.f32 %v15319_v53, %v6093_v7  ;;  %vm13571_vm6 = vmor %vm6053_vm2, %vm6054_vm8 }
 0xe01   : > { %v5604_v11 = vadd.f32 %v8217_v32, %v5603_v6  ;;  %vm6074_vm3 = vcmp.eq.f32.partialorder %v6073_v50, 8.507059e+37  ;;  %v5985_v28 = vmul.f32 %v13522_v19, %v13289_v35  ;;  %v6002_v6 = vsub.f32 1.0, %v6001_v3 }
 0xe02   : > { %v6077_v51 = vsel %vm6074_vm3, %v6076_v48, %v6072_v18  ;;  %v6056_v26 = vsel %vm13571_vm6, %v13436_v41, %v6052_v60  ;;  %v6036_v20 = vadd.f32 %v13418_v56, %v13477_v9  ;;  %vm6038_vm13 = vweird.f32 %v13418_v56  ;;  %v13582_v8 = vpop.eup %8224  ;;  %v15330_v18 = vld [vmem:[#allocation34_spill] sm:$0xff]  ;;  %v15331_v48 = vld [vmem:[#allocation21_spill] sm:$0xff] }
 0xe03   : > { %v5608_v30 = vsel %vm5607_vm9, %v8217_v32, %v5604_v11  ;;  %v15313_v32 = vld [vmem:[#allocation86_spill] sm:$0xff]  ;;  %v6043_v15 = vand.u32 2147483648, %v13264_v40  ;;  %v6060_v29 = vor.u32 1.1754944e-38, %v6059_v23  ;;  %v6041_v14 = vand.u32 2147483647, %v13264_v40  ;;  %v15322_v11 = vld [vmem:[#allocation40_spill] sm:$0xff]  ;;  %vm13591_vm1 = vmor %vm6037_vm4, %vm6038_vm13 }
 0xe04   : > { %v5613_v0 = vsel %vm5610_vm10, %v5612_v63, %v5608_v30  ;;  %v6111_v38 = vmul.f32 %v15313_v32, %v6109_v52  ;;  %8228 = vrcp.f32 %v13320_v12  ;;  %v6078_v63 = vmul.f32 %v15322_v11, %v6077_v51 }
 0xe05   : > { %v5614_v27 = vmul.f32 %v13179_v58, %v5613_v0  ;;  %v5615_v59 = vmul.f32 %v13186_v57, %v5613_v0  ;;  %v6018_v57 = vsub.f32 1.0, %v6017_v10  ;;  %v6079_v41 = vmul.f32 %v15323_v62, %v6077_v51  ;;  %v13597_v0 = vpop.xlane.xlu2 %5562 }
 0xe06   : > { %vm6058_vm15 = vcmp.eq.f32.partialorder %v6057_v49, 8.507059e+37  ;;  %v5986_v30 = vsub.f32 1.0, %v5985_v28  ;;  %v6003_v9 = vmul.f32 %v13502_v46, %v6002_v6  ;;  %v13595_v10 = vpop.eup %8226  ;;  %v5969_v40 = vmul.f32 %v13582_v8, %v13357_v34 }
 0xe07   : > { %6127 = vmatpush.xpose.msra.mxu2 %v5614_v27  ;;  %6147 = vmatpush.xpose.msra.mxu3 %v5615_v59  ;;  %v6019_v13 = vmul.f32 %v13510_v25, %v6018_v57  ;;  %v6061_v52 = vsel %vm6058_vm15, %v6060_v29, %v6056_v26  ;;  %v6040_v4 = vsel %vm13591_vm1, %v13418_v56, %v6036_v20  ;;  %vm6022_vm5 = vweird.f32 %v13510_v25  ;;  %v15327_v59 = vld [vmem:[#allocation37_spill] sm:$0xff]  ;;  %v15334_v20 = vld [vmem:[#allocation54_spill] sm:$0xff] }
 0xe08   : > { %v6044_v3 = vor.u32 1.1754944e-38, %v6043_v15  ;;  %v6027_v33 = vand.u32 2147483648, %v13308_v54  ;;  %vm6042_vm9 = vcmp.eq.f32.partialorder %v6041_v14, 8.507059e+37  ;;  %vm6021_vm10 = vweird.f32 %v13308_v54  ;;  %v15335_v29 = vld [vmem:[#allocation85_spill] sm:$0xff] }
 0xe09   : > { %v6020_v2 = vadd.f32 %v13510_v25, %v6019_v13  ;;  %v6062_v27 = vmul.f32 %v15326_v55, %v6061_v52  ;;  %v6025_v32 = vand.u32 2147483647, %v13308_v54  ;;  %v5953_v56 = vmul.f32 %v13595_v10, %v13310_v45  ;;  %vm13615_vm11 = vmor %vm6021_vm10, %vm6022_vm5 }
 0xe0a   : > { %6128 = vmatmul.f32.vlgmr.msra.gmra.mxu2 %v13549_v61  ;;  %6148 = vmatmul.f32.vlgmr.msra.gmra.mxu3 %v13552_v39  ;;  %8230 = vrcp.f32 %v13416_v5  ;;  %v6045_v50 = vsel %vm6042_vm9, %v6044_v3, %v6040_v4  ;;  %v13619_v58 = vpop.eup %8228  ;;  %v5970_v60 = vsub.f32 1.0, %v5969_v40  ;;  %v6004_v57 = vadd.f32 %v13502_v46, %v6003_v9  ;;  %v15338_v4 = vld [vmem:[#allocation42_spill] sm:$0xff]  ;;  %v15339_v3 = vld [vmem:[#allocation43_spill] sm:$0xff] }
 0xe0b   : > { %6152 = vmatpush.xpose.msrb.mxu2 %v6110_v17  ;;  %6172 = vmatpush.xpose.msrb.mxu3 %v6111_v38  ;;  %v6063_v17 = vmul.f32 %v15327_v59, %v6061_v52  ;;  %v5987_v38 = vmul.f32 %v13522_v19, %v5986_v30  ;;  %v6024_v54 = vsel %vm13615_vm11, %v13510_v25, %v6020_v2  ;;  %vm6006_vm12 = vweird.f32 %v13502_v46  ;;  %v15350_v30 = vld [vmem:[#allocation66_spill] sm:$0xff] }
 0xe0c   : > { %vm6005_vm14 = vweird.f32 %v13281_v42  ;;  %v6011_v36 = vand.u32 2147483648, %v13281_v42  ;;  %v6028_v43 = vor.u32 1.1754944e-38, %v6027_v33  ;;  %8232 = vrcp.f32 %v13597_v0 }
 0xe0d   : > { %v6046_v23 = vmul.f32 %v15330_v18, %v6045_v50  ;;  %v6047_v49 = vmul.f32 %v15331_v48, %v6045_v50  ;;  %vm6026_vm0 = vcmp.eq.f32.partialorder %v6025_v32, 8.507059e+37  ;;  %v6009_v22 = vand.u32 2147483647, %v13281_v42  ;;  %vm13634_vm8 = vmor %vm6005_vm14, %vm6006_vm12  ;;  %v13649_v26 = vpop.xlane.xlu2 %5556  ;;  %v15355_v32 = vld [vmem:[#allocation41_spill] sm:$0xff] }
 0xe0e   : > { %v5937_v25 = vmul.f32 %v13619_v58, %v13320_v12  ;;  %v6029_v53 = vsel %vm6026_vm0, %v6028_v43, %v6024_v54  ;;  %v5971_v28 = vmul.f32 %v13582_v8, %v5970_v60  ;;  %v6008_v6 = vsel %vm13634_vm8, %v13502_v46, %v6004_v57  ;;  %v15342_v54 = vld [vmem:[#allocation26_spill] sm:$0xff] }
 0xe0f   : > { %6153 = vmatpush.xpose.msrb.mxu2 %v6094_v44  ;;  %6173 = vmatpush.xpose.msrb.mxu3 %v6095_v21  ;;  %v5954_v44 = vsub.f32 1.0, %v5953_v56  ;;  %v5988_v51 = vadd.f32 %v13522_v19, %v5987_v38  ;;  %vm5990_vm2 = vweird.f32 %v13522_v19  ;;  %vm5989_vm3 = vweird.f32 %v13289_v35  ;;  %v13685_v56 = vpop.xlane.xlu0 %5553 }
 0xe10   : > { %v13644_v42 = vpop.eup %8230  ;;  %v5995_v47 = vand.u32 2147483648, %v13289_v35  ;;  %v6012_v13 = vor.u32 1.1754944e-38, %v6011_v36  ;;  %8234 = vrcp.f32 %v13487_v1  ;;  %v6030_v15 = vmul.f32 %v15334_v20, %v6029_v53  ;;  %vm13659_vm13 = vmor %vm5989_vm3, %vm5990_vm2  ;;  %v15343_v36 = vld [vmem:[#allocation39_spill] sm:$0xff] }
 0xe11   : > { %v6031_v14 = vmul.f32 %v15335_v29, %v6029_v53  ;;  %vm6010_vm6 = vcmp.eq.f32.partialorder %v6009_v22, 8.507059e+37  ;;  %v5993_v46 = vand.u32 2147483647, %v13289_v35  ;;  %v5955_v62 = vmul.f32 %v13595_v10, %v5954_v44  ;;  %v15356_v22 = vld [vmem:[#allocation53_spill] sm:$0xff]  ;;  %v15360_v29 = vld [vmem:[#allocation68_spill] sm:$0xff] }
 0xe12   : > { %v13654_v11 = vpop.eup %8232  ;;  %v5921_v9 = vmul.f32 %v13644_v42, %v13416_v5  ;;  %v5992_v35 = vsel %vm13659_vm13, %v13522_v19, %v5988_v51  ;;  %v5972_v52 = vadd.f32 %v13582_v8, %v5971_v28  ;;  %vm5974_vm4 = vweird.f32 %v13582_v8  ;;  %v15346_v28 = vld [vmem:[#allocation75_spill] sm:$0xff]  ;;  %v15347_v51 = vld [vmem:[#allocation58_spill] sm:$0xff] }
 0xe13   : > { %6154 = vmatpush.xpose.msrb.mxu2 %v6078_v63  ;;  %6174 = vmatpush.xpose.msrb.mxu3 %v6079_v41  ;;  %v5938_v63 = vsub.f32 1.0, %v5937_v25  ;;  %v6013_v41 = vsel %vm6010_vm6, %v6012_v13, %v6008_v6  ;;  %v5996_v16 = vor.u32 1.1754944e-38, %v5995_v47  ;;  %vm5973_vm15 = vweird.f32 %v13357_v34 }
 0xe14   : > { %v5979_v40 = vand.u32 2147483648, %v13357_v34  ;;  %8236 = vrcp.f32 %v13649_v26  ;;  %v6014_v2 = vmul.f32 %v15338_v4, %v6013_v41  ;;  %v6015_v33 = vmul.f32 %v15339_v3, %v6013_v41  ;;  %vm13681_vm5 = vmor %vm5973_vm15, %vm5974_vm4 }
 0xe15   : > { %vm5994_vm1 = vcmp.eq.f32.partialorder %v5993_v46, 8.507059e+37  ;;  %v5977_v55 = vand.u32 2147483647, %v13357_v34  ;;  %v5939_v19 = vmul.f32 %v13619_v58, %v5938_v63  ;;  %v5905_v59 = vmul.f32 %v13654_v11, %v13597_v0 }
 0xe16   : > { %v5922_v38 = vsub.f32 1.0, %v5921_v9  ;;  %v5976_v34 = vsel %vm13681_vm5, %v13582_v8, %v5972_v52  ;;  %v5956_v50 = vadd.f32 %v13595_v10, %v5955_v62  ;;  %vm5958_vm9 = vweird.f32 %v13595_v10 }
 0xe17   : > { %6155 = vmatpush.xpose.msrb.mxu2 %v6062_v27  ;;  %6175 = vmatpush.xpose.msrb.mxu3 %v6063_v17  ;;  %v13676_v27 = vpop.eup %8234  ;;  %v5997_v17 = vsel %vm5994_vm1, %v5996_v16, %v5992_v35  ;;  %vm5957_vm10 = vweird.f32 %v13310_v45  ;;  %v5963_v7 = vand.u32 2147483648, %v13310_v45  ;;  %v5980_v60 = vor.u32 1.1754944e-38, %v5979_v40  ;;  %v15351_v35 = vld [vmem:[#allocation52_spill] sm:$0xff] }
 0xe18   : > { %v5998_v57 = vmul.f32 %v15342_v54, %v5997_v17  ;;  %v5999_v43 = vmul.f32 %v15343_v36, %v5997_v17  ;;  %vm5978_vm11 = vcmp.eq.f32.partialorder %v5977_v55, 8.507059e+37  ;;  %v5961_v18 = vand.u32 2147483647, %v13310_v45  ;;  %vm13702_vm12 = vmor %vm5957_vm10, %vm5958_vm9 }
 0xe19   : > { %v5906_v48 = vsub.f32 1.0, %v5905_v59  ;;  %v5889_v8 = vmul.f32 %v13676_v27, %v13487_v1  ;;  %8238 = vrcp.f32 %v13685_v56  ;;  %v5923_v25 = vmul.f32 %v13644_v42, %v5922_v38  ;;  %v15354_v59 = vld [vmem:[#allocation38_spill] sm:$0xff] }
 0xe1a   : > { %v5960_v45 = vsel %vm13702_vm12, %v13595_v10, %v5956_v50  ;;  %v5940_v44 = vadd.f32 %v13619_v58, %v5939_v19  ;;  %vm5942_vm14 = vweird.f32 %v13619_v58  ;;  %vm5941_vm0 = vweird.f32 %v13320_v12 }
 0xe1b   : > { %6156 = vmatpush.xpose.msrb.mxu2 %v6046_v23  ;;  %6176 = vmatpush.xpose.msrb.mxu3 %v6047_v49  ;;  %v13697_v23 = vpop.eup %8236  ;;  %v5981_v49 = vsel %vm5978_vm11, %v5980_v60, %v5976_v34  ;;  %v5947_v53 = vand.u32 2147483648, %v13320_v12  ;;  %v5964_v21 = vor.u32 1.1754944e-38, %v5963_v7  ;;  %vm5962_vm8 = vcmp.eq.f32.partialorder %v5961_v18, 8.507059e+37  ;;  %vm13719_vm2 = vmor %vm5941_vm0, %vm5942_vm14 }
 0xe1c   : > { %v5982_v6 = vmul.f32 %v15346_v28, %v5981_v49  ;;  %v5983_v47 = vmul.f32 %v15347_v51, %v5981_v49  ;;  %v5945_v13 = vand.u32 2147483647, %v13320_v12  ;;  %v5873_v20 = vmul.f32 %v13697_v23, %v13649_v26  ;;  %v15358_v51 = vld [vmem:[#allocation64_spill] sm:$0xff] }
 0xe1d   : > { %v5890_v10 = vsub.f32 1.0, %v5889_v8  ;;  %v5944_v46 = vsel %vm13719_vm2, %v13619_v58, %v5940_v44  ;;  %v5924_v63 = vadd.f32 %v13644_v42, %v5923_v25  ;;  %vm5926_vm3 = vweird.f32 %v13644_v42 }
 0xe1e   : > { %v5948_v62 = vor.u32 1.1754944e-38, %v5947_v53  ;;  %vm5925_vm6 = vweird.f32 %v13416_v5  ;;  %v5931_v41 = vand.u32 2147483648, %v13416_v5  ;;  %vm5946_vm13 = vcmp.eq.f32.partialorder %v5945_v13, 8.507059e+37  ;;  %v15359_v13 = vld [vmem:[#allocation67_spill] sm:$0xff] }
 0xe1f   : > { %6157 = vmatpush.xpose.msrb.mxu2 %v6030_v15  ;;  %6177 = vmatpush.xpose.msrb.mxu3 %v6031_v14  ;;  %v5965_v15 = vsel %vm5962_vm8, %v5964_v21, %v5960_v45  ;;  %v5907_v14 = vmul.f32 %v13654_v11, %v5906_v48  ;;  %v13729_v12 = vpop.eup %8238  ;;  %v5929_v16 = vand.u32 2147483647, %v13416_v5  ;;  %v5874_v40 = vsub.f32 1.0, %v5873_v20  ;;  %vm13737_vm4 = vmor %vm5925_vm6, %vm5926_vm3 }
 0xe20   : > { %v5966_v9 = vmul.f32 %v15350_v30, %v5965_v15  ;;  %v5967_v52 = vmul.f32 %v15351_v35, %v5965_v15  ;;  %v5891_v58 = vmul.f32 %v13676_v27, %v5890_v10  ;;  %v5949_v4 = vsel %vm5946_vm13, %v5948_v62, %v5944_v46  ;;  %v15361_v46 = vld [vmem:[#allocation57_spill] sm:$0xff] }
 0xe21   : > { %v5857_v3 = vmul.f32 %v13729_v12, %v13685_v56  ;;  %v5908_v55 = vadd.f32 %v13654_v11, %v5907_v14  ;;  %vm5910_vm15 = vweird.f32 %v13654_v11  ;;  %vm5909_vm1 = vweird.f32 %v13597_v0  ;;  %v15362_v30 = vld [vmem:[#allocation65_spill] sm:$0xff] }
 0xe22   : > { %v5915_v5 = vand.u32 2147483648, %v13597_v0  ;;  %v5932_v19 = vor.u32 1.1754944e-38, %v5931_v41  ;;  %v5950_v17 = vmul.f32 %v15354_v59, %v5949_v4  ;;  %v5951_v38 = vmul.f32 %v15355_v32, %v5949_v4  ;;  %vm5911_vm9 = vmor %vm5909_vm1, %vm5910_vm15  ;;  %v15366_v4 = vld [vmem:[#allocation73_spill] sm:$0xff] }
 0xe23   : > { %6158 = vmatpush.xpose.msrb.mxu2 %v6014_v2  ;;  %6178 = vmatpush.xpose.msrb.mxu3 %v6015_v33  ;;  %v5928_v33 = vsel %vm13737_vm4, %v13644_v42, %v5924_v63  ;;  %vm5930_vm5 = vcmp.eq.f32.partialorder %v5929_v16, 8.507059e+37  ;;  %v5913_v34 = vand.u32 2147483647, %v13597_v0  ;;  %v5875_v50 = vmul.f32 %v13697_v23, %v5874_v40  ;;  %v15364_v16 = vld [vmem:[#allocation11_spill] sm:$0xff]  ;;  %v15369_v32 = vld [vmem:[#allocation13_spill] sm:$0xff] }
 0xe24   : > { %v5933_v7 = vsel %vm5930_vm5, %v5932_v19, %v5928_v33  ;;  %v5858_v42 = vsub.f32 1.0, %v5857_v3  ;;  %v5912_v60 = vsel %vm5911_vm9, %v13654_v11, %v5908_v55  ;;  %v5892_v54 = vadd.f32 %v13676_v27, %v5891_v58  ;;  %v15365_v58 = vld [vmem:[#allocation72_spill] sm:$0xff]  ;;  %v15368_v3 = vld [vmem:[#allocation61_spill] sm:$0xff]  ;;  %v6194_v55 = vld [vmem:[%s14344_s5 + $0x10] sm:$0xff] }
 0xe25   : > { %vm5894_vm10 = vweird.f32 %v13676_v27  ;;  %vm5893_vm11 = vweird.f32 %v13487_v1  ;;  %v5899_v36 = vand.u32 2147483648, %v13487_v1  ;;  %v5934_v0 = vmul.f32 %v13133_v24, %v5933_v7 }
 0xe26   : > { %vm5914_vm12 = vcmp.eq.f32.partialorder %v5913_v34, 8.507059e+37  ;;  %v5897_v18 = vand.u32 2147483647, %v13487_v1  ;;  %vm5895_vm14 = vmor %vm5893_vm11, %vm5894_vm10  ;;  %v5859_v11 = vmul.f32 %v13729_v12, %v5858_v42  ;;  %v5876_v49 = vadd.f32 %v13697_v23, %v5875_v50  ;;  %v15357_v1 = vld [vmem:[#allocation45_spill] sm:$0xff]  ;;  %v15371_v50 = vld [vmem:[#allocation44_spill] sm:$0xff] }
 0xe27   : > { %6159 = vmatpush.xpose.msrb.mxu2 %v5998_v57  ;;  %6179 = vmatpush.xpose.msrb.mxu3 %v5999_v43  ;;  %v5916_v57 = vor.u32 1.1754944e-38, %v5915_v5  ;;  %v5935_v43 = vmul.f32 %v13140_v31, %v5933_v7  ;;  %v5896_v8 = vsel %vm5895_vm14, %v13676_v27, %v5892_v54  ;;  %vm5878_vm0 = vweird.f32 %v13697_v23  ;;  %v6195_v5 = vld [vmem:[%s14344_s5 + $0x18] sm:$0xff]  ;;  %v15372_v7 = vld [vmem:[#allocation59_spill] sm:$0xff] }
 0xe28   : > { %vm5877_vm8 = vweird.f32 %v13649_v26  ;;  %v5883_v24 = vand.u32 2147483648, %v13649_v26  ;;  %v5900_v31 = vor.u32 1.1754944e-38, %v5899_v36  ;;  %vm5898_vm2 = vcmp.eq.f32.partialorder %v5897_v18, 8.507059e+37  ;;  %v6208_v36 = vpop.permute.xlu0 %6207  ;;  %v6203_v18 = vpop.permute.xlu2 %6202 }
 0xe29   : > { %v5917_v48 = vsel %vm5914_vm12, %v5916_v57, %v5912_v60  ;;  %v5881_v44 = vand.u32 2147483647, %v13649_v26  ;;  %vm5879_vm3 = vmor %vm5877_vm8, %vm5878_vm0  ;;  %v5860_v21 = vadd.f32 %v13729_v12, %v5859_v11  ;;  %vm5862_vm6 = vweird.f32 %v13729_v12  ;;  %v15373_v60 = vld [vmem:[#allocation78_spill] sm:$0xff] }
 0xe2a   : > { %v5918_v25 = vmul.f32 %v15356_v22, %v5917_v48  ;;  %v5919_v45 = vmul.f32 %v15357_v1, %v5917_v48  ;;  %v5901_v53 = vsel %vm5898_vm2, %v5900_v31, %v5896_v8  ;;  %v5880_v27 = vsel %vm5879_vm3, %v13697_v23, %v5876_v49  ;;  %v6213_v48 = vpop.permute.xlu1 %6212  ;;  %v8260_v49 = vld [vmem:[%s8486_s21 + $0x10] sm:$0xff]  ;;  %v8261_v31 = vld [vmem:[%s8486_s21] sm:$0xff] }
 0xe2b   : > { %6160 = vmatpush.xpose.msrb.mxu2 %v5982_v6  ;;  %6180 = vmatpush.xpose.msrb.mxu3 %v5983_v47  ;;  %v5884_v28 = vor.u32 1.1754944e-38, %v5883_v24  ;;  %vm5861_vm13 = vweird.f32 %v13685_v56  ;;  %v5867_v6 = vand.u32 2147483648, %v13685_v56  ;;  %v5902_v47 = vmul.f32 %v15358_v51, %v5901_v53 }
 0xe2c   : > { %v5903_v20 = vmul.f32 %v15359_v13, %v5901_v53  ;;  %vm5882_vm4 = vcmp.eq.f32.partialorder %v5881_v44, 8.507059e+37  ;;  %v5865_v26 = vand.u32 2147483647, %v13685_v56  ;;  %vm5863_vm15 = vmor %vm5861_vm13, %vm5862_vm6  ;;  %v3490_v2 = vadd.f32 %v15366_v4, %v15365_v58 }
 0xe2d   : > { %v5885_v10 = vsel %vm5882_vm4, %v5884_v28, %v5880_v27  ;;  %v5864_v23 = vsel %vm5863_vm15, %v13729_v12, %v5860_v21  ;;  %v5868_v15 = vor.u32 1.1754944e-38, %v5867_v6  ;;  %v2200_v42 = vadd.f32 %v15372_v7, %v15371_v50  ;;  %v8263_v28 = vld [vmem:[%s8486_s21 + $0x30] sm:$0xff]  ;;  %v8266_v50 = vld [vmem:[%s8486_s21 + $0x28] sm:$0xff] }
 0xe2e   : > { %v5886_v14 = vmul.f32 %v15360_v29, %v5885_v10  ;;  %v5887_v63 = vmul.f32 %v15361_v46, %v5885_v10  ;;  %vm5866_vm1 = vcmp.eq.f32.partialorder %v5865_v26, 8.507059e+37 }
 0xe2f   : > { %6161 = vmatpush.xpose.msrb.mxu2 %v5966_v9  ;;  %6181 = vmatpush.xpose.msrb.mxu3 %v5967_v52  ;;  %v5869_v62 = vsel %vm5866_vm1, %v5868_v15, %v5864_v23  ;;  %v15363_v52 = vld [vmem:[#allocation80_spill] sm:$0xff]  ;;  %v15374_v15 = vld [vmem:[#allocation9_spill] sm:$0xff] }
 0xe30   : > { %v5870_v41 = vmul.f32 %v13211_v37, %v5869_v62  ;;  %v5871_v9 = vmul.f32 %v15362_v30, %v5869_v62  ;;  %v4820_v40 = vadd.f32 %v15364_v16, %v15363_v52  ;;  %v15367_v37 = vld [vmem:[#allocation62_spill] sm:$0xff] }
 0xe31   : > { %v2160_v33 = vadd.f32 %v15368_v3, %v15367_v37 }
 0xe33   : > { %6162 = vmatpush.xpose.msrb.mxu2 %v5950_v17  ;;  %6182 = vmatpush.xpose.msrb.mxu3 %v5951_v38  ;;  %v15370_v38 = vld [vmem:[#allocation14_spill] sm:$0xff] }
 0xe34   : > { %v4860_v34 = vadd.f32 %v15370_v38, %v15369_v32  ;;  %v8265_v38 = vld [vmem:[%s8486_s21 + $0x8] sm:$0xff] }
 0xe37   : > { %6163 = vmatpush.xpose.msrb.mxu2 %v5934_v0  ;;  %6183 = vmatpush.xpose.msrb.mxu3 %v5935_v43 }
 0xe3b   : > { %6164 = vmatpush.xpose.msrb.mxu2 %v5918_v25  ;;  %6184 = vmatpush.xpose.msrb.mxu3 %v5919_v45  ;;  %v8262_v25 = vld [vmem:[%s8486_s21 + $0x20] sm:$0xff]  ;;  %v6218_v45 = vpop.permute.xlu0 %6217 }
 0xe3f   : > { %6165 = vmatpush.xpose.msrb.mxu2 %v5902_v47  ;;  %6185 = vmatpush.xpose.msrb.mxu3 %v5903_v20 }
 0xe43   : > { %6166 = vmatpush.xpose.msrb.mxu2 %v5886_v14  ;;  %6186 = vmatpush.xpose.msrb.mxu3 %v5887_v63 }
 0xe47   : > { %6167 = vmatpush.xpose.msrb.mxu2 %v5870_v41  ;;  %6187 = vmatpush.xpose.msrb.mxu3 %v5871_v9 }
 0xe4a   : > { %6168 = vmatmul.f32.vlgmr.msrb.gmra.mxu2 %v13549_v61  ;;  %6188 = vmatmul.f32.vlgmr.msrb.gmra.mxu3 %v13552_v39  ;;  %v6192_v61 = vld [vmem:[%s14344_s5] sm:$0xff]  ;;  %v6193_v39 = vld [vmem:[%s14344_s5 + $0x8] sm:$0xff] }
 0xe8d   : > { %v6129_v56 = vpop.f32.mrf.mxu2  ;;  %v6149_v12 = vpop.f32.mrf.mxu3 }
 0xe8e   : > { %v6150_v35 = vadd.f32 %v6149_v12, %v6129_v56 }
 0xe90   : > { %6244 = vmatpush.msra.mxu2 %v6150_v35 }
 0xe92   : > { %6245 = vmatpush.msra.mxu2 %v4820_v40 }
 0xe94   : > { %6246 = vmatpush.msra.mxu2 %v3490_v2 }
 0xe96   : > { %6247 = vmatpush.msra.mxu2 %v2160_v33 }
 0xe97   : > { %7377 = vmatmul.msk.f32.vlgmr.msra.gmra.mxu2 %vm688_vm7, %v6192_v61 }
 0xe9f   : > { %7378 = vmatmul.msk.f32.gmra.mxu2 %vm688_vm7, %v6193_v39 }
 0xea7   : > { %7379 = vmatmul.msk.f32.gmra.mxu2 %vm688_vm7, %v6194_v55 }
 0xeaf   : > { %7380 = vmatmul.msk.f32.gmra.mxu2 %vm688_vm7, %v6195_v5 }
 0xecd   : > { %v6169_v19 = vpop.f32.mrf.mxu2  ;;  %v6189_v59 = vpop.f32.mrf.mxu3 }
 0xece   : > { %v6190_v17 = vadd.f32 %v6189_v59, %v6169_v19 }
 0xed0   : > { %6273 = vmatpush.msra.mxu3 %v6190_v17  ;;  %v8264_v17 = vld [vmem:[%s8486_s21 + $0x18] sm:$0xff] }
 0xed2   : > { %6274 = vmatpush.msra.mxu3 %v4860_v34 }
 0xed4   : > { %6275 = vmatpush.msra.mxu3 %v15373_v60 }
 0xed6   : > { %6276 = vmatpush.msra.mxu3 %v2200_v42 }
 0xed7   : > { %7381 = vmatmul.msk.f32.vlgmr.msra.gmra.mxu3 %vm688_vm7, %v6192_v61 }
 0xedf   : > { %7382 = vmatmul.msk.f32.gmra.mxu3 %vm688_vm7, %v6193_v39 }
 0xee7   : > { %7383 = vmatmul.msk.f32.gmra.mxu3 %vm688_vm7, %v6194_v55 }
 0xeef   : > { %7384 = vmatmul.msk.f32.gmra.mxu3 %vm688_vm7, %v6195_v5 }
 0xf1a   : > { %v6249_v54 = vpop.f32.mrf.mxu2 }
 0xf1b   : > { %v6250_v11 = vadd.f32 %v6249_v54, %v6203_v18 }
 0xf1d   : > { %v13821_v22 = vadd.f32 %v8261_v31, %v6250_v11 }
 0xf22   : > { %v6252_v57 = vpop.f32.mrf.mxu2 }
 0xf23   : > { %v6253_v43 = vadd.f32 %v6252_v57, %v6208_v36 }
 0xf25   : > { %v13818_v24 = vadd.f32 %v8260_v49, %v6253_v43 }
 0xf27   : > { %v6306_v53 = vadd.f32 %v13818_v24, %v13821_v22 }
 0xf2a   : > { %v6255_v0 = vpop.f32.mrf.mxu2 }
 0xf2b   : > { %v6256_v8 = vadd.f32 %v6255_v0, %v6213_v48  ;;  %v8267_v0 = vld [vmem:[%s8486_s21 + $0x38] sm:$0xff]  ;;  %s7027_s21 = sshll.u32 %s7024_s15, 4  ;;  %s7028_s21 = int_to_ptr.hbm [resolvable:$true] %s7027_s21 }
 0xf2c   : > { %s8282_s29 = sshra.s32 %s7028_s21, 4  ;;  %s8283_s29 = int_to_ptr.hbm [resolvable:$true] %s8282_s29 }
 0xf2d   : > { %v13824_v1 = vadd.f32 %v8262_v25, %v6256_v8  ;;  %s8284_s17 = scalar_lea.hbm %s8283_s29, 64  ;;  %p8289_p0 = scmp.lt.s32.totalorder %s8283_s29, %s14352_s13 }
 0xf2e   : > { %p8285_p11 = scmp.ne.s32.totalorder %s8283_s29, %s8284_s17  ;;  %p8290_p1 = scmp.lt.s32.totalorder %s8288_s23, %s8284_s17 }
 0xf2f   : > { %v6307_v21 = vadd.f32 %v6306_v53, %v13824_v1 }
 0xf30   : > { %p8286_p12 = pnand %p8285_p11, %p8447_p5  ;;  %p8291_p2 = por %p8290_p1, %p8289_p0 }
 0xf32   : > { %v6258_v44 = vpop.f32.mrf.mxu2  ;;  %p8287_p13 = pneg %p8286_p12 }
 0xf33   : > { %v6259_v27 = vadd.f32 %v6258_v44, %v6218_v45 }
 0xf34   : > { %p8292_p3 = pnand %p8291_p2, %p8287_p13 }
 0xf35   : > { %v13830_v6 = vadd.f32 %v8263_v28, %v6259_v27 }
 0xf37   : > { %v6308_v51 = vadd.f32 %v6307_v21, %v13830_v6  ;;  %v13871_v21 = vpop.permute.xlu2 %6409 }
 0xf39   : > { %v6309_v47 = vrot.slane %v6308_v51, 4 }
 0xf3b   : > { %v6310_v13 = vadd.f32 %v6309_v47, %v6308_v51  ;;  %v13874_v51 = vpop.permute.xlu1 %6404 }
 0xf3d   : > { %v6311_v20 = vrot.slane %v6310_v13, 2 }
 0xf3f   : > { %v6312_v26 = vadd.f32 %v6311_v20, %v6310_v13 }
 0xf41   : > { %v6313_v10 = vrot.slane %v6312_v26, 1 }
 0xf43   : > { %v6314_v23 = vadd.f32 %v6313_v10, %v6312_v26 }
 0xf45   : > { %v6324_v29 = vmul.f32 %v6314_v23, %v15374_v15 }
 0xf47   : > { %v13835_v14 = vsub.f32 %v13821_v22, %v6324_v29  ;;  %v13838_v46 = vsub.f32 %v13818_v24, %v6324_v29  ;;  %v13841_v63 = vsub.f32 %v13824_v1, %v6324_v29  ;;  %v13844_v62 = vsub.f32 %v13830_v6, %v6324_v29 }
 0xf49   : > { %v6334_v41 = vmul.f32 %v13835_v14, %v13835_v14  ;;  %v6336_v30 = vmul.f32 %v13838_v46, %v13838_v46  ;;  %v6338_v9 = vmul.f32 %v13841_v63, %v13841_v63  ;;  %v6340_v12 = vmul.f32 %v13844_v62, %v13844_v62 }
 0xf4b   : > { %v6342_v56 = vadd.f32 %v6336_v30, %v6334_v41 }
 0xf4d   : > { %v6343_v35 = vadd.f32 %v6342_v56, %v6338_v9  ;;  %v6438_v9 = vpop.permute.xlu0 %6437 }
 0xf4f   : > { %v6344_v52 = vadd.f32 %v6343_v35, %v6340_v12 }
 0xf51   : > { %v6345_v16 = vrot.slane %v6344_v52, 4 }
 0xf53   : > { %v6346_v40 = vadd.f32 %v6345_v16, %v6344_v52  ;;  %v6400_v52 = vpop.permute.xlu2 %6399 }
 0xf55   : > { %v6347_v58 = vrot.slane %v6346_v40, 2 }
 0xf57   : > { %v6348_v2 = vadd.f32 %v6347_v58, %v6346_v40  ;;  %v6433_v58 = vpop.permute.xlu1 %6432 }
 0xf59   : > { %v6349_v37 = vrot.slane %v6348_v2, 1 }
 0xf5a   : > { %v6278_v4 = vpop.f32.mrf.mxu3 }
 0xf5b   : > { %v6350_v33 = vadd.f32 %v6349_v37, %v6348_v2  ;;  %v6279_v19 = vadd.f32 %v6278_v4, %v6203_v18 }
 0xf5d   : > { %v6360_v61 = vmul.f32 %v6350_v33, %v15374_v15  ;;  %v13859_v34 = vadd.f32 %v8265_v38, %v6279_v19 }
 0xf5f   : > { %v6362_v55 = vadd.f32 1e-05, %v6360_v61 }
 0xf61   : > { %8240 = vrsqrt.f32 %v6362_v55  ;;  %vm6370_vm9 = vweird.f32 %v6362_v55 }
 0xf62   : > { %v6281_v3 = vpop.f32.mrf.mxu3 }
 0xf63   : > { %v6282_v5 = vadd.f32 %v6281_v3, %v6208_v36 }
 0xf65   : > { %v13856_v32 = vadd.f32 %v8264_v17, %v6282_v5 }
 0xf67   : > { %v6315_v60 = vadd.f32 %v13856_v32, %v13859_v34  ;;  %v8241_v57 = vpop.eup %8240 }
 0xf68   : > { %vm6371_vm5 = vweird.f32 %v8241_v57 }
 0xf69   : > { %vm6372_vm10 = vmor %vm6370_vm9, %vm6371_vm5 }
 0xf6a   : > { %v6284_v39 = vpop.f32.mrf.mxu3 }
 0xf6b   : > { %v6285_v59 = vadd.f32 %v6284_v39, %v6213_v48  ;;  %v6365_v48 = vmul.f32 %v8241_v57, %v6362_v55 }
 0xf6d   : > { %v13862_v7 = vadd.f32 %v8266_v50, %v6285_v59  ;;  %v6366_v49 = vmul.f32 %v8241_v57, %v6365_v48  ;;  %v6395_v59 = vpop.permute.xlu0 %6394  ;;  %v6428_v50 = vpop.permute.xlu2 %6427 }
 0xf6f   : > { %v6316_v36 = vadd.f32 %v6315_v60, %v13862_v7  ;;  %v6367_v44 = vmul.f32 0.5, %v6366_v49 }
 0xf72   : > { %v6287_v42 = vpop.f32.mrf.mxu3 }
 0xf73   : > { %v6288_v54 = vadd.f32 %v6287_v42, %v6218_v45  ;;  %v6368_v45 = vsub.f32 1.5, %v6367_v44 }
 0xf75   : > { %v13868_v43 = vadd.f32 %v8267_v0, %v6288_v54  ;;  %v6369_v26 = vmul.f32 %v8241_v57, %v6368_v45  ;;  %v6423_v54 = vpop.permute.xlu1 %6422  ;;  %v6449_v0 = vld [vmem:[%s14348_s9 + $0x8] sm:$0xff] }
 0xf77   : > { %v6317_v18 = vadd.f32 %v6316_v36, %v13868_v43  ;;  %v6373_v56 = vsel %vm6372_vm10, %v8241_v57, %v6369_v26 }
 0xf78   : > { %v6390_v16 = vmul.f32 %v6373_v56, %v13844_v62  ;;  %v6388_v3 = vmul.f32 %v6373_v56, %v13841_v63  ;;  %v6386_v33 = vmul.f32 %v6373_v56, %v13838_v46  ;;  %v6384_v61 = vmul.f32 %v6373_v56, %v13835_v14  ;;  %v6448_v14 = vld [vmem:[%s14348_s9] sm:$0xff] }
 0xf79   : > { %v6318_v11 = vrot.slane %v6317_v18, 4 }
 0xf7a   : > { %v6418_v37 = vmul.f32 %v13871_v21, %v6390_v16  ;;  %v6416_v5 = vmul.f32 %v13874_v51, %v6388_v3  ;;  %v6414_v19 = vmul.f32 %v6400_v52, %v6386_v33  ;;  %v6412_v38 = vmul.f32 %v6395_v59, %v6384_v61 }
 0xf7b   : > { %v6319_v8 = vadd.f32 %v6318_v11, %v6317_v18 }
 0xf7c   : > { %v6446_v55 = vadd.f32 %v6438_v9, %v6418_v37  ;;  %v6444_v62 = vadd.f32 %v6433_v58, %v6416_v5  ;;  %v6442_v60 = vadd.f32 %v6428_v50, %v6414_v19  ;;  %v6440_v46 = vadd.f32 %v6423_v54, %v6412_v38 }
 0xf7d   : > { %v6320_v31 = vrot.slane %v6319_v8, 2  ;;  %v13939_v16 = vpop.permute.xlu1 %6463 }
 0xf7e   : > { %6500 = vmatpush.msrb.mxu2 %v6446_v55 }
 0xf7f   : > { %v6321_v25 = vadd.f32 %v6320_v31, %v6319_v8  ;;  %v6450_v8 = vld [vmem:[%s14348_s9 + $0x10] sm:$0xff] }
 0xf80   : > { %6501 = vmatpush.msrb.mxu2 %v6444_v62 }
 0xf81   : > { %v6322_v53 = vrot.slane %v6321_v25, 1 }
 0xf82   : > { %6502 = vmatpush.msrb.mxu2 %v6442_v60 }
 0xf83   : > { %v6323_v27 = vadd.f32 %v6322_v53, %v6321_v25  ;;  %v6451_v53 = vld [vmem:[%s14348_s9 + $0x18] sm:$0xff] }
 0xf84   : > { %6503 = vmatpush.msrb.mxu2 %v6440_v46 }
 0xf85   : > { %v6325_v28 = vmul.f32 %v6323_v27, %v15374_v15  ;;  %7385 = vmatmul.msk.f32.vlgmr.msrb.gmra.mxu2 %vm688_vm7, %v6448_v14 }
 0xf87   : > { %v13877_v47 = vsub.f32 %v13859_v34, %v6325_v28  ;;  %v13880_v13 = vsub.f32 %v13856_v32, %v6325_v28  ;;  %v13883_v20 = vsub.f32 %v13862_v7, %v6325_v28  ;;  %v6333_v10 = vsub.f32 %v13868_v43, %v6325_v28 }
 0xf89   : > { %v6335_v23 = vmul.f32 %v13877_v47, %v13877_v47  ;;  %v6337_v29 = vmul.f32 %v13880_v13, %v13880_v13  ;;  %v6339_v41 = vmul.f32 %v13883_v20, %v13883_v20  ;;  %v6341_v12 = vmul.f32 %v6333_v10, %v6333_v10 }
 0xf8b   : > { %v6351_v30 = vadd.f32 %v6337_v29, %v6335_v23 }
 0xf8d   : > { %v6352_v35 = vadd.f32 %v6351_v30, %v6339_v41  ;;  %7386 = vmatmul.msk.f32.gmra.mxu2 %vm688_vm7, %v6449_v0 }
 0xf8f   : > { %v6353_v40 = vadd.f32 %v6352_v35, %v6341_v12 }
 0xf91   : > { %v6354_v4 = vrot.slane %v6353_v40, 4 }
 0xf93   : > { %v6355_v2 = vadd.f32 %v6354_v4, %v6353_v40 }
 0xf95   : > { %v6356_v39 = vrot.slane %v6355_v2, 2  ;;  %7387 = vmatmul.msk.f32.gmra.mxu2 %vm688_vm7, %v6450_v8 }
 0xf97   : > { %v6357_v17 = vadd.f32 %v6356_v39, %v6355_v2 }
 0xf99   : > { %v6358_v42 = vrot.slane %v6357_v17, 1 }
 0xf9b   : > { %v6359_v63 = vadd.f32 %v6358_v42, %v6357_v17 }
 0xf9d   : > { %v6361_v57 = vmul.f32 %v6359_v63, %v15374_v15  ;;  %7388 = vmatmul.msk.f32.gmra.mxu2 %vm688_vm7, %v6451_v53 }
 0xf9f   : > { %v6363_v36 = vadd.f32 1e-05, %v6361_v57 }
 0xfa1   : > { %8242 = vrsqrt.f32 %v6363_v36  ;;  %vm6380_vm12 = vweird.f32 %v6363_v36 }
 0xfa7   : > { %v8243_v18 = vpop.eup %8242 }
 0xfa8   : > { %v6375_v48 = vmul.f32 %v8243_v18, %v6363_v36  ;;  %vm6381_vm11 = vweird.f32 %v8243_v18 }
 0xfa9   : > { %vm6382_vm14 = vmor %vm6380_vm12, %vm6381_vm11 }
 0xfaa   : > { %v6376_v11 = vmul.f32 %v8243_v18, %v6375_v48 }
 0xfac   : > { %v6377_v49 = vmul.f32 0.5, %v6376_v11 }
 0xfae   : > { %v6378_v15 = vsub.f32 1.5, %v6377_v49 }
 0xfb0   : > { %v6379_v31 = vmul.f32 %v8243_v18, %v6378_v15 }
 0xfb2   : > { %v6383_v25 = vsel %vm6382_vm14, %v8243_v18, %v6379_v31 }
 0xfb3   : > { %v6391_v44 = vmul.f32 %v6383_v25, %v6333_v10  ;;  %v6389_v27 = vmul.f32 %v6383_v25, %v13883_v20  ;;  %v6387_v45 = vmul.f32 %v6383_v25, %v13880_v13  ;;  %v6385_v23 = vmul.f32 %v6383_v25, %v13877_v47 }
 0xfb5   : > { %v6419_v28 = vmul.f32 %v13871_v21, %v6391_v44  ;;  %v6417_v26 = vmul.f32 %v13874_v51, %v6389_v27  ;;  %v6415_v41 = vmul.f32 %v6400_v52, %v6387_v45  ;;  %v6413_v30 = vmul.f32 %v6395_v59, %v6385_v23  ;;  %v13924_v21 = vpop.permute.xlu0 %6473  ;;  %v13955_v59 = vpop.permute.xlu2 %6468 }
 0xfb7   : > { %v6447_v29 = vadd.f32 %v6438_v9, %v6419_v28  ;;  %v6445_v10 = vadd.f32 %v6433_v58, %v6417_v26  ;;  %v6443_v56 = vadd.f32 %v6428_v50, %v6415_v41  ;;  %v6441_v12 = vadd.f32 %v6423_v54, %v6413_v30 }
 0xfb9   : > { %6529 = vmatpush.msrb.mxu3 %v6447_v29 }
 0xfbb   : > { %6530 = vmatpush.msrb.mxu3 %v6445_v10 }
 0xfbd   : > { %6531 = vmatpush.msrb.mxu3 %v6443_v56  ;;  %v13926_v51 = vpop.permute.xlu0 %6458 }
 0xfbf   : > { %6532 = vmatpush.msrb.mxu3 %v6441_v12 }
 0xfc0   : > { %7389 = vmatmul.msk.f32.vlgmr.msrb.gmra.mxu3 %vm688_vm7, %v6448_v14 }
 0xfc8   : > { %7390 = vmatmul.msk.f32.gmra.mxu3 %vm688_vm7, %v6449_v0 }
 0xfd0   : > { %7391 = vmatmul.msk.f32.gmra.mxu3 %vm688_vm7, %v6450_v8 }
 0xfd8   : > { %7392 = vmatmul.msk.f32.gmra.mxu3 %vm688_vm7, %v6451_v53 }
0x1008   : > { %v6505_v47 = vpop.f32.mrf.mxu2 }
0x1009   : > { %v13929_v13 = vadd.f32 %v6505_v47, %v13926_v51 }
0x100b   : > { %v13932_v20 = vmul.f32 0.70710677, %v13929_v13 }
0x100d   : > { %v6562_v9 = vmul.f32 %v13932_v20, %v13932_v20 }
0x100f   : > { %v13936_v35 = vmin.f32 %v6562_v9, 16.0 }
0x1010   : > { %v6508_v40 = vpop.f32.mrf.mxu2 }
0x1011   : > { %v6575_v52 = vmul.f32 3.8918573e-05, %v13936_v35  ;;  %v13942_v4 = vadd.f32 %v6508_v40, %v13939_v16  ;;  %v6564_v54 = vmul.f32 2.1237322e-06, %v13936_v35 }
0x1013   : > { %v6576_v58 = vadd.f32 0.001143296, %v6575_v52  ;;  %v13945_v2 = vmul.f32 0.70710677, %v13942_v4  ;;  %v6565_v36 = vadd.f32 0.00028619796, %v6564_v54 }
0x1015   : > { %v6577_v37 = vmul.f32 %v6576_v58, %v13936_v35  ;;  %v6642_v3 = vmul.f32 %v13945_v2, %v13945_v2  ;;  %v6566_v25 = vmul.f32 %v6565_v36, %v13936_v35 }
0x1017   : > { %v13950_v33 = vmin.f32 %v6642_v3, 16.0  ;;  %v6578_v61 = vadd.f32 0.014752088, %v6577_v37  ;;  %v6567_v41 = vadd.f32 0.0036580483, %v6566_v25 }
0x1018   : > { %v6511_v17 = vpop.f32.mrf.mxu2 }
0x1019   : > { %v6655_v39 = vmul.f32 3.8918573e-05, %v13950_v33  ;;  %v6579_v5 = vmul.f32 %v6578_v61, %v13936_v35  ;;  %v13958_v38 = vadd.f32 %v6511_v17, %v13955_v59  ;;  %v6644_v11 = vmul.f32 2.1237322e-06, %v13950_v33 }
0x101a   : > { %v6568_v37 = vmul.f32 %v6567_v41, %v13936_v35 }
0x101b   : > { %v6656_v55 = vadd.f32 0.001143296, %v6655_v39  ;;  %v6580_v50 = vadd.f32 0.112945676, %v6579_v5  ;;  %v13962_v60 = vmul.f32 0.70710677, %v13958_v38 }
0x101c   : > { %v6645_v28 = vadd.f32 0.00028619796, %v6644_v11 }
0x101d   : > { %v6657_v19 = vmul.f32 %v6656_v55, %v13950_v33  ;;  %v6581_v63 = vmul.f32 %v6580_v50, %v13936_v35  ;;  %v6722_v14 = vmul.f32 %v13962_v60, %v13962_v60 }
0x101e   : > { %v6646_v56 = vmul.f32 %v6645_v28, %v13950_v33 }
0x101f   : > { %v6658_v62 = vadd.f32 0.014752088, %v6657_v19  ;;  %v13968_v57 = vmin.f32 %v6722_v14, 16.0  ;;  %v6582_v0 = vadd.f32 0.4994258, %v6581_v63 }
0x1020   : > { %v6514_v8 = vpop.f32.mrf.mxu2  ;;  %v6647_v61 = vadd.f32 0.0036580483, %v6646_v56 }
0x1021   : > { %v6659_v42 = vmul.f32 %v6658_v62, %v13950_v33  ;;  %v6735_v48 = vmul.f32 3.8918573e-05, %v13968_v57  ;;  %v6724_v49 = vmul.f32 2.1237322e-06, %v13968_v57  ;;  %v13975_v31 = vadd.f32 %v6514_v8, %v13924_v21 }
0x1022   : > { %v6583_v44 = vmul.f32 %v6582_v0, %v13936_v35  ;;  %v6648_v54 = vmul.f32 %v6647_v61, %v13950_v33 }
0x1023   : > { %v6660_v46 = vadd.f32 0.112945676, %v6659_v42  ;;  %v6736_v15 = vadd.f32 0.001143296, %v6735_v48  ;;  %v13981_v45 = vmul.f32 0.70710677, %v13975_v31 }
0x1024   : > { %v6725_v26 = vadd.f32 0.00028619796, %v6724_v49  ;;  %v13985_v10 = vadd.f32 1.0, %v6583_v44  ;;  %v6569_v42 = vadd.f32 0.05243302, %v6568_v37 }
0x1025   : > { %v6661_v18 = vmul.f32 %v6660_v46, %v13950_v33  ;;  %v6737_v27 = vmul.f32 %v6736_v15, %v13968_v57  ;;  %v6802_v29 = vmul.f32 %v13981_v45, %v13981_v45  ;;  %v6649_v8 = vadd.f32 0.05243302, %v6648_v54 }
0x1026   : > { %v6726_v9 = vmul.f32 %v6725_v26, %v13968_v57  ;;  %8244 = vrcp.f32 %v13985_v10  ;;  %v6570_v11 = vmul.f32 %v6569_v42, %v13936_v35  ;;  %vm6590_vm0 = vweird.f32 %v13985_v10 }
0x1027   : > { %v6662_v53 = vadd.f32 0.4994258, %v6661_v18  ;;  %v6738_v23 = vadd.f32 0.014752088, %v6737_v27  ;;  %v13990_v47 = vmin.f32 %v6802_v29, 16.0  ;;  %v6650_v29 = vmul.f32 %v6649_v8, %v13950_v33 }
0x1028   : > { %v6727_v19 = vadd.f32 0.0036580483, %v6726_v9 }
0x1029   : > { %v6663_v30 = vmul.f32 %v6662_v53, %v13950_v33  ;;  %v6739_v12 = vmul.f32 %v6738_v23, %v13968_v57  ;;  %v6804_v40 = vmul.f32 2.1237322e-06, %v13990_v47  ;;  %v6815_v58 = vmul.f32 3.8918573e-05, %v13990_v47 }
0x102a   : > { %v6728_v36 = vmul.f32 %v6727_v19, %v13968_v57  ;;  %v6571_v23 = vadd.f32 0.18741608, %v6570_v11  ;;  %v6651_v61 = vadd.f32 0.18741608, %v6650_v29  ;;  %v6596_v11 = vand.u32 2147483648, %v13985_v10 }
0x102b   : > { %v6740_v52 = vadd.f32 0.112945676, %v6739_v12  ;;  %v13997_v3 = vadd.f32 1.0, %v6663_v30  ;;  %v6805_v55 = vadd.f32 0.00028619796, %v6804_v40 }
0x102c   : > { %v6816_v5 = vadd.f32 0.001143296, %v6815_v58  ;;  %v14005_v14 = vpop.eup %8244  ;;  %v6729_v25 = vadd.f32 0.05243302, %v6728_v36  ;;  %v6572_v37 = vmul.f32 %v6571_v23, %v13936_v35  ;;  %v6594_v35 = vand.u32 2147483647, %v13985_v10 }
0x102d   : > { %v6741_v39 = vmul.f32 %v6740_v52, %v13968_v57  ;;  %v6806_v62 = vmul.f32 %v6805_v55, %v13990_v47  ;;  %8246 = vrcp.f32 %v13997_v3  ;;  %v6586_v15 = vmul.f32 %v14005_v14, %v13985_v10 }
0x102e   : > { %v6817_v50 = vmul.f32 %v6816_v5, %v13990_v47  ;;  %v6730_v56 = vmul.f32 %v6729_v25, %v13968_v57  ;;  %vm6591_vm8 = vweird.f32 %v14005_v14  ;;  %v6674_v25 = vand.u32 2147483647, %v13997_v3 }
0x102f   : > { %v6742_v17 = vadd.f32 0.4994258, %v6741_v39  ;;  %v6807_v18 = vadd.f32 0.0036580483, %v6806_v62  ;;  %v6587_v30 = vsub.f32 1.0, %v6586_v15  ;;  %vm14055_vm3 = vmor %vm6590_vm0, %vm6591_vm8  ;;  %vm14066_vm4 = vcmp.eq.f32.partialorder %v6594_v35, 8.507059e+37 }
0x1030   : > { %v6818_v46 = vadd.f32 0.014752088, %v6817_v50  ;;  %v6731_v19 = vadd.f32 0.18741608, %v6730_v56  ;;  %vm6670_vm1 = vweird.f32 %v13997_v3  ;;  %vm14084_vm9 = vcmp.eq.f32.partialorder %v6674_v25, 8.507059e+37 }
0x1031   : > { %v6743_v63 = vmul.f32 %v6742_v17, %v13968_v57  ;;  %v6808_v53 = vmul.f32 %v6807_v18, %v13990_v47  ;;  %v6588_v5 = vmul.f32 %v14005_v14, %v6587_v30  ;;  %v6652_v18 = vmul.f32 %v6651_v61, %v13950_v33 }
0x1032   : > { %v6819_v48 = vmul.f32 %v6818_v46, %v13990_v47  ;;  %v6597_v35 = vor.u32 1.1754944e-38, %v6596_v11  ;;  %v6552_v56 = vmul.f32 0.5, %v13975_v31 }
0x1033   : > { %v14008_v0 = vadd.f32 1.0, %v6743_v63  ;;  %v14013_v49 = vpop.eup %8246  ;;  %v6809_v52 = vadd.f32 0.05243302, %v6808_v53  ;;  %v6573_v63 = vadd.f32 1.1283791, %v6572_v37  ;;  %v6589_v36 = vadd.f32 %v14005_v14, %v6588_v5 }
0x1034   : > { %v6820_v44 = vadd.f32 0.112945676, %v6819_v48  ;;  %v6666_v41 = vmul.f32 %v14013_v49, %v13997_v3  ;;  %v6732_v48 = vmul.f32 %v6731_v19, %v13968_v57  ;;  %vm6671_vm6 = vweird.f32 %v14013_v49 }
0x1035   : > { %8248 = vrcp.f32 %v14008_v0  ;;  %v6810_v50 = vmul.f32 %v6809_v52, %v13990_v47  ;;  %v6756_v53 = vand.u32 2147483648, %v14008_v0  ;;  %vm6750_vm13 = vweird.f32 %v14008_v0  ;;  %vm14080_vm5 = vmor %vm6670_vm1, %vm6671_vm6 }
0x1036   : > { %v6821_v28 = vmul.f32 %v6820_v44, %v13990_v47  ;;  %v6667_v39 = vsub.f32 1.0, %v6666_v41  ;;  %v6676_v44 = vand.u32 2147483648, %v13997_v3  ;;  %v6754_v57 = vand.u32 2147483647, %v14008_v0 }
0x1037   : > { %v6811_v15 = vadd.f32 0.18741608, %v6810_v50  ;;  %v6593_v29 = vsel %vm14055_vm3, %v14005_v14, %v6589_v36  ;;  %v6653_v10 = vadd.f32 1.1283791, %v6652_v18  ;;  %v6733_v30 = vadd.f32 1.1283791, %v6732_v48 }
0x1038   : > { %v6822_v12 = vadd.f32 0.4994258, %v6821_v28  ;;  %v6668_v46 = vmul.f32 %v14013_v49, %v6667_v39  ;;  %v6757_v37 = vor.u32 1.1754944e-38, %v6756_v53  ;;  %vm6755_vm10 = vcmp.eq.f32.partialorder %v6754_v57, 8.507059e+37 }
0x1039   : > { %v6654_v36 = vmul.f32 %v6653_v10, %v13945_v2 }
0x103a   : > { %v6669_v33 = vadd.f32 %v14013_v49, %v6668_v46 }
0x103b   : > { %v8249_v9 = vpop.eup %8248 }
0x103c   : > { %v6746_v58 = vmul.f32 %v8249_v9, %v14008_v0  ;;  %vm6751_vm2 = vweird.f32 %v8249_v9 }
0x103d   : > { %vm14071_vm15 = vmor %vm6750_vm13, %vm6751_vm2 }
0x103e   : > { %v6747_v17 = vsub.f32 1.0, %v6746_v58 }
0x1040   : > { %v6748_v42 = vmul.f32 %v8249_v9, %v6747_v17 }
0x1042   : > { %v6749_v8 = vadd.f32 %v8249_v9, %v6748_v42 }
0x1043   : > { %v6534_v27 = vpop.f32.mrf.mxu3 }
0x1044   : > { %v14020_v26 = vadd.f32 %v6534_v27, %v13926_v51  ;;  %v6823_v51 = vmul.f32 %v6822_v12, %v13990_v47  ;;  %v6753_v0 = vsel %vm14071_vm15, %v8249_v9, %v6749_v8  ;;  %v6812_v12 = vmul.f32 %v6811_v15, %v13990_v47 }
0x1045   : > { %v6673_v47 = vsel %vm14080_vm5, %v14013_v49, %v6669_v33  ;;  %v6677_v9 = vor.u32 1.1754944e-38, %v6676_v44  ;;  %v6758_v5 = vsel %vm6755_vm10, %v6757_v37, %v6753_v0  ;;  %v6574_v8 = vmul.f32 %v6573_v63, %v13932_v20 }
0x1046   : > { %v14027_v40 = vmul.f32 0.70710677, %v14020_v26  ;;  %v14035_v62 = vadd.f32 1.0, %v6823_v51  ;;  %v6813_v50 = vadd.f32 1.1283791, %v6812_v12  ;;  %v6598_v15 = vsel %vm14066_vm4, %v6597_v35, %v6593_v29 }
0x1047   : > { %v6678_v49 = vsel %vm14084_vm9, %v6677_v9, %v6673_v47  ;;  %v6599_v57 = vmul.f32 %v6598_v15, %v6574_v8  ;;  %v6550_v12 = vmul.f32 0.5, %v13958_v38  ;;  %v6546_v38 = vmul.f32 0.5, %v13929_v13 }
0x1048   : > { %v6602_v55 = vmul.f32 %v14027_v40, %v14027_v40  ;;  %8250 = vrcp.f32 %v14035_v62  ;;  %v6836_v19 = vand.u32 2147483648, %v14035_v62  ;;  %vm6830_vm12 = vweird.f32 %v14035_v62 }
0x1049   : > { %v6679_v44 = vmul.f32 %v6678_v49, %v6654_v36  ;;  %v6814_v53 = vmul.f32 %v6813_v50, %v13981_v45 }
0x104a   : > { %v14039_v54 = vmin.f32 %v6602_v55, 16.0  ;;  %v6734_v55 = vmul.f32 %v6733_v30, %v13962_v60  ;;  %v6837_v11 = vor.u32 1.1754944e-38, %v6836_v19 }
0x104b   : > { %v6537_v52 = vpop.f32.mrf.mxu3  ;;  %v7395_v41 = vclamps-f32 %v6679_v44, 1.0 }
0x104c   : > { %v6615_v27 = vmul.f32 3.8918573e-05, %v14039_v54  ;;  %v14089_v3 = vadd.f32 %v6537_v52, %v13939_v16  ;;  %v6834_v16 = vand.u32 2147483647, %v14035_v62  ;;  %v6759_v18 = vmul.f32 %v6758_v5, %v6734_v55 }
0x104d   : > { %v6884_v37 = vadd.f32 1.0, %v7395_v41  ;;  %v6604_v5 = vmul.f32 2.1237322e-06, %v14039_v54 }
0x104e   : > { %v8251_v23 = vpop.eup %8250  ;;  %v6616_v61 = vadd.f32 0.001143296, %v6615_v27  ;;  %v14097_v17 = vmul.f32 0.70710677, %v14089_v3  ;;  %vm6835_vm0 = vcmp.eq.f32.partialorder %v6834_v16, 8.507059e+37  ;;  %v7397_v10 = vclamps-f32 %v6759_v18, 1.0 }
0x104f   : > { %v6826_v14 = vmul.f32 %v8251_v23, %v14035_v62  ;;  %vm6831_vm11 = vweird.f32 %v8251_v23  ;;  %v14134_v16 = vld [vmem:[%s14350_s11] sm:$0xff] }
0x1050   : > { %v6617_v46 = vmul.f32 %v6616_v61, %v14039_v54  ;;  %v6682_v60 = vmul.f32 %v14097_v17, %v14097_v17  ;;  %vm6832_vm14 = vmor %vm6830_vm12, %vm6831_vm11  ;;  %v6886_v45 = vadd.f32 1.0, %v7397_v10  ;;  %v6548_v61 = vmul.f32 0.5, %v13942_v4 }
0x1051   : > { %v6827_v39 = vsub.f32 1.0, %v6826_v14 }
0x1052   : > { %v14110_v25 = vmin.f32 %v6682_v60, 16.0  ;;  %v6618_v2 = vadd.f32 0.014752088, %v6617_v46  ;;  %v6894_v31 = vmul.f32 %v6886_v45, %v6550_v12  ;;  %v6892_v50 = vmul.f32 %v6884_v37, %v6548_v61 }
0x1053   : > { %v6828_v42 = vmul.f32 %v8251_v23, %v6827_v39  ;;  %v6540_v14 = vpop.f32.mrf.mxu3  ;;  %v6605_v46 = vadd.f32 0.00028619796, %v6604_v5 }
0x1054   : > { %v6695_v33 = vmul.f32 3.8918573e-05, %v14110_v25  ;;  %v6619_v29 = vmul.f32 %v6618_v2, %v14039_v54  ;;  %v14119_v51 = vadd.f32 %v6540_v14, %v13955_v59  ;;  %v6684_v8 = vmul.f32 2.1237322e-06, %v14110_v25 }
0x1055   : > { %v6829_v48 = vadd.f32 %v8251_v23, %v6828_v42 }
0x1056   : > { %v6696_v20 = vadd.f32 0.001143296, %v6695_v33  ;;  %v6620_v47 = vadd.f32 0.112945676, %v6619_v29  ;;  %v14124_v39 = vmul.f32 0.70710677, %v14119_v51 }
0x1057   : > { %v6833_v27 = vsel %vm6832_vm14, %v8251_v23, %v6829_v48  ;;  %v7393_v23 = vclamps-f32 %v6599_v57, 1.0  ;;  %v6685_v33 = vadd.f32 0.00028619796, %v6684_v8  ;;  %v14158_v57 = vld [vmem:[%s14350_s11 + $0x8] sm:$0xff] }
0x1058   : > { %v6838_v28 = vsel %vm6835_vm0, %v6837_v11, %v6833_v27  ;;  %v6697_v30 = vmul.f32 %v6696_v20, %v14110_v25  ;;  %v6762_v59 = vmul.f32 %v14124_v39, %v14124_v39  ;;  %v6621_v4 = vmul.f32 %v6620_v47, %v14039_v54 }
0x1059   : > { %v6839_v62 = vmul.f32 %v6838_v28, %v6814_v53  ;;  %v6882_v55 = vadd.f32 1.0, %v7393_v23  ;;  %v6606_v53 = vmul.f32 %v6605_v46, %v14039_v54 }
0x105a   : > { %v6698_v58 = vadd.f32 0.014752088, %v6697_v30  ;;  %v14137_v13 = vmin.f32 %v6762_v59, 16.0  ;;  %v6622_v36 = vadd.f32 0.4994258, %v6621_v4  ;;  %v6686_v30 = vmul.f32 %v6685_v33, %v14110_v25 }
0x105b   : > { %v7399_v63 = vclamps-f32 %v6839_v62, 1.0  ;;  %v6890_v42 = vmul.f32 %v6882_v55, %v6546_v38  ;;  %v6543_v49 = vpop.f32.mrf.mxu3  ;;  %v14182_v55 = vld [vmem:[%s14350_s11 + $0x10] sm:$0xff] }
0x105c   : > { %v6699_v9 = vmul.f32 %v6698_v58, %v14110_v25  ;;  %v14140_v60 = vadd.f32 %v6543_v49, %v13924_v21  ;;  %v6764_v18 = vmul.f32 2.1237322e-06, %v14137_v13  ;;  %v6775_v48 = vmul.f32 3.8918573e-05, %v14137_v13 }
0x105d   : > { %v6888_v0 = vadd.f32 1.0, %v7399_v63  ;;  %v6623_v21 = vmul.f32 %v6622_v36, %v14039_v54  ;;  %v6607_v63 = vadd.f32 0.0036580483, %v6606_v53  ;;  %v6687_v61 = vadd.f32 0.0036580483, %v6686_v30  ;;  %v14203_v53 = vld [vmem:[%s14350_s11 + $0x18] sm:$0xff] }
0x105e   : > { %v6700_v19 = vadd.f32 0.112945676, %v6699_v9  ;;  %v6776_v11 = vadd.f32 0.001143296, %v6775_v48  ;;  %v14148_v44 = vmul.f32 0.70710677, %v14140_v60 }
0x105f   : > { %v6896_v52 = vmul.f32 %v6888_v0, %v6552_v56  ;;  %v6765_v27 = vadd.f32 0.00028619796, %v6764_v18  ;;  %v14163_v41 = vadd.f32 1.0, %v6623_v21  ;;  %v6608_v58 = vmul.f32 %v6607_v63, %v14039_v54 }
0x1060   : > { %v6701_v35 = vmul.f32 %v6700_v19, %v14110_v25  ;;  %v6777_v28 = vmul.f32 %v6776_v11, %v14137_v13  ;;  %v6842_v2 = vmul.f32 %v14148_v44, %v14148_v44 }
0x1061   : > { %6950 = vmatpush.msra.mxu2 %v6896_v52  ;;  %v6766_v29 = vmul.f32 %v6765_v27, %v14137_v13  ;;  %8252 = vrcp.f32 %v14163_v41  ;;  %v6609_v19 = vadd.f32 0.05243302, %v6608_v58  ;;  %vm6630_vm13 = vweird.f32 %v14163_v41 }
0x1062   : > { %v6702_v15 = vadd.f32 0.4994258, %v6701_v35  ;;  %v6778_v10 = vadd.f32 0.014752088, %v6777_v28  ;;  %v14161_v20 = vmin.f32 %v6842_v2, 16.0 }
0x1063   : > { %6951 = vmatpush.msra.mxu2 %v6894_v31  ;;  %v6767_v37 = vadd.f32 0.0036580483, %v6766_v29  ;;  %v6610_v48 = vmul.f32 %v6609_v19, %v14039_v54 }
0x1064   : > { %v6703_v62 = vmul.f32 %v6702_v15, %v14110_v25  ;;  %v6779_v56 = vmul.f32 %v6778_v10, %v14137_v13  ;;  %v6844_v0 = vmul.f32 2.1237322e-06, %v14161_v20  ;;  %v6855_v45 = vmul.f32 3.8918573e-05, %v14161_v20 }
0x1065   : > { %6952 = vmatpush.msra.mxu2 %v6892_v50  ;;  %v6768_v59 = vmul.f32 %v6767_v37, %v14137_v13  ;;  %v6688_v50 = vmul.f32 %v6687_v61, %v14110_v25  ;;  %v6611_v2 = vadd.f32 0.18741608, %v6610_v48 }
0x1066   : > { %v14172_v23 = vadd.f32 1.0, %v6703_v62  ;;  %v6780_v12 = vadd.f32 0.112945676, %v6779_v56  ;;  %v6845_v14 = vadd.f32 0.00028619796, %v6844_v0 }
0x1067   : > { %6953 = vmatpush.msra.mxu2 %v6890_v42  ;;  %v6856_v52 = vadd.f32 0.001143296, %v6855_v45  ;;  %v14191_v49 = vpop.eup %8252  ;;  %v6769_v8 = vadd.f32 0.05243302, %v6768_v59  ;;  %v6689_v15 = vadd.f32 0.05243302, %v6688_v50  ;;  %v6612_v45 = vmul.f32 %v6611_v2, %v14039_v54 }
0x1068   : > { %7401 = vmatmul.msk.f32.vlgmr.msra.gmra.mxu2 %vm688_vm7, %v14134_v16  ;;  %v6781_v47 = vmul.f32 %v6780_v12, %v14137_v13  ;;  %v6846_v9 = vmul.f32 %v6845_v14, %v14161_v20  ;;  %8254 = vrcp.f32 %v14172_v23  ;;  %v6626_v21 = vmul.f32 %v14191_v49, %v14163_v41 }
0x1069   : > { %v6857_v31 = vmul.f32 %v6856_v52, %v14161_v20  ;;  %v6770_v33 = vmul.f32 %v6769_v8, %v14137_v13  ;;  %v6690_v10 = vmul.f32 %v6689_v15, %v14110_v25  ;;  %vm6631_vm8 = vweird.f32 %v14191_v49 }
0x106a   : > { %v6782_v38 = vadd.f32 0.4994258, %v6781_v47  ;;  %v6847_v42 = vadd.f32 0.0036580483, %v6846_v9  ;;  %v6627_v29 = vsub.f32 1.0, %v6626_v21  ;;  %v6716_v48 = vand.u32 2147483648, %v14172_v23  ;;  %vm14243_vm15 = vmor %vm6630_vm13, %vm6631_vm8 }
0x106b   : > { %v6858_v5 = vadd.f32 0.014752088, %v6857_v31  ;;  %v6771_v12 = vadd.f32 0.18741608, %v6770_v33  ;;  %v6691_v58 = vadd.f32 0.18741608, %v6690_v10  ;;  %vm6710_vm1 = vweird.f32 %v14172_v23 }
0x106c   : > { %v6783_v4 = vmul.f32 %v6782_v38, %v14137_v13  ;;  %v6848_v11 = vmul.f32 %v6847_v42, %v14161_v20  ;;  %v6628_v61 = vmul.f32 %v14191_v49, %v6627_v29  ;;  %v6613_v31 = vadd.f32 1.1283791, %v6612_v45 }
0x106d   : > { %v6859_v35 = vmul.f32 %v6858_v5, %v14161_v20  ;;  %v6772_v38 = vmul.f32 %v6771_v12, %v14137_v13  ;;  %v6692_v54 = vmul.f32 %v6691_v58, %v14110_v25  ;;  %v6714_v50 = vand.u32 2147483647, %v14172_v23 }
0x106e   : > { %v14193_v46 = vadd.f32 1.0, %v6783_v4  ;;  %v14195_v18 = vpop.eup %8254  ;;  %v6849_v63 = vadd.f32 0.05243302, %v6848_v11  ;;  %v6629_v59 = vadd.f32 %v14191_v49, %v6628_v61  ;;  %v6634_v25 = vand.u32 2147483647, %v14163_v41  ;;  %v6919_v11 = vpop.permute.xlu0 %6918 }
0x106f   : > { %v6860_v36 = vadd.f32 0.112945676, %v6859_v35  ;;  %v6706_v28 = vmul.f32 %v14195_v18, %v14172_v23  ;;  %vm6711_vm3 = vweird.f32 %v14195_v18  ;;  %v6773_v8 = vadd.f32 1.1283791, %v6772_v38 }
0x1070   : > { %7402 = vmatmul.msk.f32.gmra.mxu2 %vm688_vm7, %v14158_v57  ;;  %8256 = vrcp.f32 %v14193_v46  ;;  %v6850_v37 = vmul.f32 %v6849_v63, %v14161_v20  ;;  %v6796_v42 = vand.u32 2147483648, %v14193_v46  ;;  %vm6790_vm6 = vweird.f32 %v14193_v46  ;;  %vm14258_vm5 = vmor %vm6710_vm1, %vm6711_vm3 }
0x1071   : > { %v6861_v27 = vmul.f32 %v6860_v36, %v14161_v20  ;;  %v6707_v0 = vsub.f32 1.0, %v6706_v28  ;;  %v6794_v13 = vand.u32 2147483647, %v14193_v46  ;;  %v6633_v28 = vsel %vm14243_vm15, %v14191_v49, %v6629_v59 }
0x1072   : > { %v6851_v19 = vadd.f32 0.18741608, %v6850_v37  ;;  %v6636_v2 = vand.u32 2147483648, %v14163_v41  ;;  %v6693_v33 = vadd.f32 1.1283791, %v6692_v54  ;;  %v6797_v23 = vor.u32 1.1754944e-38, %v6796_v42 }
0x1073   : > { %v6862_v62 = vadd.f32 0.4994258, %v6861_v27  ;;  %v6708_v9 = vmul.f32 %v14195_v18, %v6707_v0  ;;  %vm6715_vm9 = vcmp.eq.f32.partialorder %v6714_v50, 8.507059e+37  ;;  %vm6795_vm10 = vcmp.eq.f32.partialorder %v6794_v13, 8.507059e+37 }
0x1074   : > { %v6852_v21 = vmul.f32 %v6851_v19, %v14161_v20  ;;  %v6717_v63 = vor.u32 1.1754944e-38, %v6716_v48  ;;  %v6774_v49 = vmul.f32 %v6773_v8, %v14124_v39  ;;  %vm6635_vm12 = vcmp.eq.f32.partialorder %v6634_v25, 8.507059e+37 }
0x1075   : > { %v6863_v30 = vmul.f32 %v6862_v62, %v14161_v20  ;;  %v6709_v35 = vadd.f32 %v14195_v18, %v6708_v9  ;;  %v6637_v45 = vor.u32 1.1754944e-38, %v6636_v2  ;;  %v6614_v37 = vmul.f32 %v6613_v31, %v14027_v40 }
0x1076   : > { %v8257_v56 = vpop.eup %8256  ;;  %v6551_v40 = vmul.f32 0.5, %v14119_v51  ;;  %v6547_v48 = vmul.f32 0.5, %v14020_v26  ;;  %v6909_v26 = vpop.permute.xlu2 %6908 }
0x1077   : > { %v6786_v14 = vmul.f32 %v8257_v56, %v14193_v46  ;;  %v14217_v52 = vadd.f32 1.0, %v6863_v30  ;;  %vm6791_vm2 = vweird.f32 %v8257_v56  ;;  %v6713_v20 = vsel %vm14258_vm5, %v14195_v18, %v6709_v35 }
0x1078   : > { %7403 = vmatmul.msk.f32.gmra.mxu2 %vm688_vm7, %v14182_v55  ;;  %vm14237_vm4 = vmor %vm6790_vm6, %vm6791_vm2  ;;  %v6853_v30 = vadd.f32 1.1283791, %v6852_v21  ;;  %v6718_v12 = vsel %vm6715_vm9, %v6717_v63, %v6713_v20  ;;  %v6638_v39 = vsel %vm6635_vm12, %v6637_v45, %v6633_v28 }
0x1079   : > { %v6787_v47 = vsub.f32 1.0, %v6786_v14  ;;  %8258 = vrcp.f32 %v14217_v52  ;;  %v6876_v41 = vand.u32 2147483648, %v14217_v52  ;;  %v6874_v0 = vand.u32 2147483647, %v14217_v52 }
0x107a   : > { %v6694_v14 = vmul.f32 %v6693_v33, %v14097_v17  ;;  %vm6870_vm14 = vweird.f32 %v14217_v52  ;;  %v6854_v9 = vmul.f32 %v6853_v30, %v14148_v44  ;;  %v6639_v54 = vmul.f32 %v6638_v39, %v6614_v37 }
0x107b   : > { %v6788_v5 = vmul.f32 %v8257_v56, %v6787_v47  ;;  %v6877_v61 = vor.u32 1.1754944e-38, %v6876_v41  ;;  %vm6875_vm8 = vcmp.eq.f32.partialorder %v6874_v0, 8.507059e+37  ;;  %v6549_v44 = vmul.f32 0.5, %v14089_v3 }
0x107c   : > { %v6719_v47 = vmul.f32 %v6718_v12, %v6694_v14  ;;  %v7394_v35 = vclamps-f32 %v6639_v54, 1.0 }
0x107d   : > { %v6789_v4 = vadd.f32 %v8257_v56, %v6788_v5 }
0x107e   : > { %v7396_v17 = vclamps-f32 %v6719_v47, 1.0  ;;  %v6883_v25 = vadd.f32 1.0, %v7394_v35 }
0x107f   : > { %v8259_v36 = vpop.eup %8258  ;;  %v6793_v46 = vsel %vm14237_vm4, %v8257_v56, %v6789_v4  ;;  %v6553_v4 = vmul.f32 0.5, %v14140_v60 }
0x1080   : > { %7404 = vmatmul.msk.f32.gmra.mxu2 %vm688_vm7, %v14203_v53  ;;  %v6866_v27 = vmul.f32 %v8259_v36, %v14217_v52  ;;  %v6798_v29 = vsel %vm6795_vm10, %v6797_v23, %v6793_v46  ;;  %vm6871_vm11 = vweird.f32 %v8259_v36  ;;  %v6885_v13 = vadd.f32 1.0, %v7396_v17 }
0x1081   : > { %v6799_v18 = vmul.f32 %v6798_v29, %v6774_v49  ;;  %vm6872_vm0 = vmor %vm6870_vm14, %vm6871_vm11  ;;  %v6891_v60 = vmul.f32 %v6883_v25, %v6547_v48 }
0x1082   : > { %v6867_v10 = vsub.f32 1.0, %v6866_v27  ;;  %v6893_v8 = vmul.f32 %v6885_v13, %v6549_v44  ;;  %v6924_v27 = vpop.permute.xlu2 %6923 }
0x1083   : > { %v7398_v59 = vclamps-f32 %v6799_v18, 1.0 }
0x1084   : > { %v6868_v56 = vmul.f32 %v8259_v36, %v6867_v10 }
0x1085   : > { %v6887_v52 = vadd.f32 1.0, %v7398_v59 }
0x1086   : > { %v6869_v58 = vadd.f32 %v8259_v36, %v6868_v56 }
0x1088   : > { %v6873_v38 = vsel %vm6872_vm0, %v8259_v36, %v6869_v58  ;;  %v6895_v36 = vmul.f32 %v6887_v52, %v6551_v40 }
0x1089   : > { %v6878_v5 = vsel %vm6875_vm8, %v6877_v61, %v6873_v38 }
0x108a   : > { %v6879_v19 = vmul.f32 %v6878_v5, %v6854_v9 }
0x108c   : > { %v7400_v50 = vclamps-f32 %v6879_v19, 1.0 }
0x108e   : > { %v6889_v42 = vadd.f32 1.0, %v7400_v50 }
0x1090   : > { %v6897_v31 = vmul.f32 %v6889_v42, %v6553_v4 }
0x1092   : > { %6979 = vmatpush.msra.mxu3 %v6897_v31 }
0x1094   : > { %6980 = vmatpush.msra.mxu3 %v6895_v36 }
0x1096   : > { %6981 = vmatpush.msra.mxu3 %v6893_v8 }
0x1098   : > { %6982 = vmatpush.msra.mxu3 %v6891_v60 }
0x1099   : > { %7405 = vmatmul.msk.f32.vlgmr.msra.gmra.mxu3 %vm688_vm7, %v14134_v16  ;;  %v6914_v16 = vpop.permute.xlu1 %6913 }
0x10a1   : > { %7406 = vmatmul.msk.f32.gmra.mxu3 %vm688_vm7, %v14158_v57 }
0x10a9   : > { %7407 = vmatmul.msk.f32.gmra.mxu3 %vm688_vm7, %v14182_v55 }
0x10b1   : > { %7408 = vmatmul.msk.f32.gmra.mxu3 %vm688_vm7, %v14203_v53 }
0x10eb   : > { %v6955_v3 = vpop.f32.mrf.mxu2 }
0x10ec   : > { %v6956_v51 = vadd.f32 %v6955_v3, %v6909_v26 }
0x10ee   : > { %v6996_v15 = vadd.f32 %v6956_v51, %v13821_v22 }
0x10f0   : > { %7004 = vst [vmem:[%s14288_s22] sm:$0xff] %v6996_v15 }
0x10f3   : > { %v6958_v57 = vpop.f32.mrf.mxu2 }
0x10f4   : > { %v6959_v55 = vadd.f32 %v6958_v57, %v6914_v16 }
0x10f6   : > { %v6998_v53 = vadd.f32 %v6959_v55, %v13818_v24 }
0x10f8   : > { %7006 = vst [vmem:[%s14288_s22 + $0x10] sm:$0xff] %v6998_v53 }
0x10fb   : > { %v6961_v46 = vpop.f32.mrf.mxu2 }
0x10fc   : > { %v6962_v21 = vadd.f32 %v6961_v46, %v6919_v11 }
0x10fe   : > { %v7000_v22 = vadd.f32 %v6962_v21, %v13824_v1 }
0x1100   : > { %7008 = vst [vmem:[%s14288_s22 + $0x20] sm:$0xff] %v7000_v22 }
0x1103   : > { %v6964_v28 = vpop.f32.mrf.mxu2 }
0x1104   : > { %v6965_v2 = vadd.f32 %v6964_v28, %v6924_v27 }
0x1106   : > { %v7002_v33 = vadd.f32 %v6965_v2, %v13830_v6 }
0x1108   : > { %7010 = vst [vmem:[%s14288_s22 + $0x30] sm:$0xff] %v7002_v33 }
0x111c   : > { %v6984_v62 = vpop.f32.mrf.mxu3 }
0x111d   : > { %v6985_v23 = vadd.f32 %v6984_v62, %v6909_v26 }
0x111f   : > { %v6997_v24 = vadd.f32 %v6985_v23, %v13859_v34 }
0x1121   : > { %7005 = vst [vmem:[%s14288_s22 + $0x8] sm:$0xff] %v6997_v24 }
0x1124   : > { %v6987_v20 = vpop.f32.mrf.mxu3 }
0x1125   : > { %v6988_v10 = vadd.f32 %v6987_v20, %v6914_v16 }
0x1127   : > { %v6999_v1 = vadd.f32 %v6988_v10, %v13856_v32 }
0x1129   : > { %7007 = vst [vmem:[%s14288_s22 + $0x18] sm:$0xff] %v6999_v1 }
0x112c   : > { %v6990_v63 = vpop.f32.mrf.mxu3 }
0x112d   : > { %v6991_v49 = vadd.f32 %v6990_v63, %v6919_v11 }
0x112f   : > { %v7001_v29 = vadd.f32 %v6991_v49, %v13862_v7 }
0x1131   : > { %7009 = vst [vmem:[%s14288_s22 + $0x28] sm:$0xff] %v7001_v29 }
0x1134   : > { %v6993_v6 = vpop.f32.mrf.mxu3 }
0x1135   : > { %v6994_v34 = vadd.f32 %v6993_v6, %v6924_v27 }
0x1137   : > { %v7003_v32 = vadd.f32 %v6994_v34, %v13868_v43 }
0x1139   : > { %7011 = vst [vmem:[%s14288_s22 + $0x38] sm:$0xff] %v7003_v32 }
0x113a   : > { %8295 = shalt.err (!%p8292_p3)
}
0x113b   : > { %s8337_s14 = smov 256   ;;  %s8338_s22 = smov 16  }
0x113c   : > { %7416 = dma.vmem_to_hbm [thread:$0]  (%p8447_p5), %s7026_s16, 1024, %s7028_s21, %s7013_s20, %s8337_s14, %s8337_s14, %s8338_s22  }
0x113d PF: > { %p7422_p4 = scmp.ge.s32.totalorder %s8330_s28, 2  ;;  %s7042_s27 = sand.u32 1, %s8318_s25  }
0x113e   : > { %s7043_s19 = scalar_lea.sflag [#allocation3], %s7042_s27 }
0x113f   : > { %p7419_p7 = pnand %p7422_p4, %p8451_p6 }
0x1141   : > { %p7420_p8 = pneg %p7419_p7 }
0x1143   : > { %8313 = dma.done.wait (%p7420_p8), %s7043_s19, 1024  }
0x1144   : > { %8315 = vsyncadd (%p7420_p8), %s7043_s19, 4294966272  ;;  %s15392_s28 = sld [smem:[#allocation6_spill]]  ;;  %s15395_s25 = smov %s8322_s26 }
0x1145   : > { %s15393_s29 = sld [smem:[#allocation5_spill]] }
0x1146   : > { %s15394_s27 = sld [smem:[#allocation7_spill]] }
0x114a   : > { %p23_p9 = scmp.ge.s32.totalorder %s15392_s28, 4  }
0x114b   : > { %s15396_s26 = smov %s15393_s29 }
0x114c   :  { %25 = sbr.rel (!%p23_p9) target bundleno = 3 (0x3), region = 107 }
0x1151   :  { %7049 = vsyncpa [#allocation3], 1 }
0x1152   :  { %7051 = vsyncpa [#allocation3 + $0x1], 1 }

</bundles_post_ra>
